<compile_context>
chip_gen: v7x
topology: tpu7x:2x2x1
jax: 0.10.0
libtpu: 0.0.40
codegen_flags: <defaults>
</compile_context>

<pallas_src>
import jax
import jax.numpy as jnp
from jax import lax
from jax.experimental import pallas as pl
from jax.experimental.pallas import tpu as pltpu

# ----------------------------- config ---------------------------------------
PATCH = 14
IMG = 28                        # 2x2 patches
C_IN = 3
EMBED = 64
HEADS = 4
HEAD_DIM = EMBED // HEADS
MLP_HIDDEN = 4 * EMBED
DEPTH = 4
LAYER = 2                       # Encoder(model_path, layer=LAYER)
NUM_REG = 4                     # vit_base(14, 4, ...)
EPS = 1e-6                      # DINOv2 LayerNorm eps

NP = (IMG // PATCH) ** 2        # number of patches (4)
T_TOK = 1 + NUM_REG + NP        # tokens per image (9)
NB = DEPTH - LAYER + 1          # blocks actually executed (output of block DEPTH-LAYER)
CPP = C_IN * PATCH * PATCH      # flattened patch size (588)


# ----------------------------- in-kernel helpers ----------------------------
def _layernorm(x, g, b):
    mu = jnp.mean(x, axis=-1, keepdims=True)
    var = jnp.mean((x - mu) ** 2, axis=-1, keepdims=True)
    return (x - mu) * lax.rsqrt(var + EPS) * g + b


def _gelu_tanh(x):
    # tanh-approximate GELU -> tanh on the EUP slot (exact-erf reference is
    # within ~3e-4 abs; the 5e-3 check tolerates it easily).
    c = 0.7978845608028654  # sqrt(2/pi)
    return 0.5 * x * (1.0 + jnp.tanh(c * (x + 0.044715 * x * x * x)))


def _softmax_rows(s):
    s = s - jnp.max(s, axis=-1, keepdims=True)
    e = jnp.exp(s)
    # reciprocal on EUP instead of a VALU divide
    return e * pl.reciprocal(jnp.sum(e, axis=-1, keepdims=True), approx=True)


# ----------------------------- fused kernel ----------------------------------
def _fused_encoder_kernel(x_ref, patch_w, patch_b, pos_patch, sel_put, template,
                          sel_get, ln1_g, ln1_b, wq, bq, wk, bk, wv, bv, wo, bo,
                          ls1, ln2_g, ln2_b, w1, b1, w2, b2, ls2,
                          norm_g, norm_b, o_ref):
    # ---- patch embed: Conv2d(k=s=P) == (Np, C*P*P) @ (C*P*P, D) + b ---------
    patches = jnp.dot(x_ref[0], patch_w[...], preferred_element_type=jnp.float32)
    patches = patches + patch_b[...] + pos_patch[...]                 # (Np, D)

    # ---- token assembly: [cls+pos0, regs, patches+pos] via constant matmul --
    # template holds [cls+pos0; regs; 0], sel_put scatters patches into rows
    # 1+NUM_REG.. (avoids sublane concat/offset stores entirely).
    x = template[...] + jnp.dot(sel_put[...], patches,
                                preferred_element_type=jnp.float32)   # (T, D)

    # ---- transformer blocks (static unroll; everything stays in VMEM/vregs) --
    for li in range(NB):
        # attention branch (pre-LN, LayerScale)
        xn = _layernorm(x, ln1_g[li], ln1_b[li])
        attn = jnp.zeros((T_TOK, EMBED), jnp.float32)
        for h in range(HEADS):
            i = li * HEADS + h
            qh = jnp.dot(xn, wq[i], preferred_element_type=jnp.float32) + bq[i]
            kh = jnp.dot(xn, wk[i], preferred_element_type=jnp.float32) + bk[i]
            vh = jnp.dot(xn, wv[i], preferred_element_type=jnp.float32) + bv[i]
            # q . k^T without materializing a transpose
            s = lax.dot_general(qh, kh, (((1,), (1,)), ((), ())),
                                preferred_element_type=jnp.float32)   # (T, T)
            p = _softmax_rows(s)
            oh = jnp.dot(p, vh, preferred_element_type=jnp.float32)   # (T, hd)
            # output projection as accumulation over heads (no concat)
            attn = attn + jnp.dot(oh, wo[i], preferred_element_type=jnp.float32)
        x = x + ls1[li] * (attn + bo[li])

        # MLP branch
        xn = _layernorm(x, ln2_g[li], ln2_b[li])
        h1 = jnp.dot(xn, w1[li], preferred_element_type=jnp.float32) + b1[li]
        h1 = _gelu_tanh(h1)
        h2 = jnp.dot(h1, w2[li], preferred_element_type=jnp.float32) + b2[li]
        x = x + ls2[li] * h2

    # ---- final LayerNorm + strip cls/register tokens (constant gather matmul)
    xn = _layernorm(x, norm_g[...], norm_b[...])
    o_ref[0] = jnp.dot(sel_get[...], xn, preferred_element_type=jnp.float32)


# ----------------------------- weight preparation ----------------------------
def _prepare_weights(params):
    blocks = params['blocks'][:NB]
    scale = HEAD_DIM ** -0.5

    def stack(name):
        return jnp.stack([b[name] for b in blocks], axis=0)

    # split packed qkv into per-head matrices; fold 1/sqrt(hd) into q weights.
    wq_l, bq_l, wk_l, bk_l, wv_l, bv_l, wo_l = [], [], [], [], [], [], []
    for bp in blocks:
        wqkv, bqkv = bp['wqkv'], bp['bqkv']
        for base, wl, bl, sc in ((0, wq_l, bq_l, scale),
                                 (EMBED, wk_l, bk_l, 1.0),
                                 (2 * EMBED, wv_l, bv_l, 1.0)):
            for h in range(HEADS):
                sl = slice(base + h * HEAD_DIM, base + (h + 1) * HEAD_DIM)
                wl.append(wqkv[:, sl] * sc)
                bl.append(bqkv[:, sl] * sc)
        for h in range(HEADS):
            wo_l.append(bp['wo'][h * HEAD_DIM:(h + 1) * HEAD_DIM, :])

    # constant token-assembly helpers
    template = jnp.concatenate(
        [params['cls_token'][0] + params['pos_embed'][0, :1],   # cls + pos[0]
         params['reg_tokens'][0],                               # register tokens
         jnp.zeros((NP, EMBED), jnp.float32)], axis=0)          # (T, D)
    pos_patch = params['pos_embed'][0, 1:]                      # (Np, D)
    sel_put = jnp.concatenate(
        [jnp.zeros((1 + NUM_REG, NP), jnp.float32), jnp.eye(NP, dtype=jnp.float32)],
        axis=0)                                                 # (T, Np)
    sel_get = jnp.concatenate(
        [jnp.zeros((NP, 1 + NUM_REG), jnp.float32), jnp.eye(NP, dtype=jnp.float32)],
        axis=1)                                                 # (Np, T)

    return [params['patch_w'], params['patch_b'], pos_patch, sel_put, template,
            sel_get,
            stack('ln1_g'), stack('ln1_b'),
            jnp.stack(wq_l), jnp.stack(bq_l), jnp.stack(wk_l), jnp.stack(bk_l),
            jnp.stack(wv_l), jnp.stack(bv_l), jnp.stack(wo_l),
            stack('bo'), stack('ls1'), stack('ln2_g'), stack('ln2_b'),
            stack('w1'), stack('b1'), stack('w2'), stack('b2'), stack('ls2'),
            params['norm_g'], params['norm_b']]


# ----------------------------- wrapper ----------------------------------------
def encoder_forward(img, params):
    B = img.shape[0]
    Hp = Wp = IMG // PATCH

    # NCHW image -> patch matrix (B, Np, C*P*P), identical ordering to
    # Conv2d(stride=P).flatten(2).transpose(1, 2).
    x = img.reshape(B, C_IN, Hp, PATCH, Wp, PATCH)
    x = x.transpose(0, 2, 4, 1, 3, 5).reshape(B, NP, CPP)

    weights = _prepare_weights(params)

    def _const_spec(w):
        nd = w.ndim
        return pl.BlockSpec(w.shape, lambda b, _nd=nd: (0,) * _nd)

    in_specs = [pl.BlockSpec((1, NP, CPP), lambda b: (b, 0, 0))]
    in_specs += [_const_spec(w) for w in weights]

    # NOTE: all weights (<1 MB f32) + activations fit VMEM on every TPU
    # generation; at real ViT-B scale cast matmul inputs to bf16 and trim
    # weight double-buffering (constant index_map -> single fetch).
    return pl.pallas_call(
        _fused_encoder_kernel,
        grid=(B,),
        in_specs=in_specs,
        out_specs=pl.BlockSpec((1, NP, EMBED), lambda b: (b, 0, 0)),
        out_shape=jax.ShapeDtypeStruct((B, NP, EMBED), jnp.float32),
        compiler_params=pltpu.CompilerParams(dimension_semantics=("parallel",)),
    )(x, *weights)


# ----------------------------- pure-JAX reference ----------------------------
def _reference_forward(img, params):
    B = img.shape[0]
    Hp = Wp = IMG // PATCH
    x = img.reshape(B, C_IN, Hp, PATCH, Wp, PATCH)
    x = x.transpose(0, 2, 4, 1, 3, 5).reshape(B * NP, CPP)
    patches = (x @ params['patch_w'] + params['patch_b']).reshape(B, NP, EMBED)
    cls = jnp.broadcast_to(params['cls_token'], (B, 1, EMBED))
    t = jnp.concatenate([cls, patches], axis=1) + params['pos_embed']
    regs = jnp.broadcast_to(params['reg_tokens'], (B, NUM_REG, EMBED))
    t = jnp.concatenate([t[:, :1], regs, t[:, 1:]], axis=1)

    def ln(v, g, b):
        mu = jnp.mean(v, -1, keepdims=True)
        var = jnp.mean((v - mu) ** 2, -1, keepdims=True)
        return (v - mu) * lax.rsqrt(var + EPS) * g + b

    for li in range(NB):
        bp = params['blocks'][li]
        xn = ln(t, bp['ln1_g'], bp['ln1_b'])
        qkv = xn @ bp['wqkv'] + bp['bqkv']
        q, k, v = jnp.split(qkv, 3, axis=-1)
        q = q.reshape(B, -1, HEADS, HEAD_DIM).transpose(0, 2, 1, 3) * (HEAD_DIM ** -0.5)
        k = k.reshape(B, -1, HEADS, HEAD_DIM).transpose(0, 2, 1, 3)
        v = v.reshape(B, -1, HEADS, HEAD_DIM).transpose(0, 2, 1, 3)
        att = jax.nn.softmax(jnp.einsum('bhqd,bhkd->bhqk', q, k), axis=-1)
        o = jnp.einsum('bhqk,bhkd->bhqd', att, v).transpose(0, 2, 1, 3).reshape(B, -1, EMBED)
        t = t + bp['ls1'] * (o @ bp['wo'] + bp['bo'])
        xn = ln(t, bp['ln2_g'], bp['ln2_b'])
        h = jax.nn.gelu(xn @ bp['w1'] + bp['b1'], approximate=False)
        t = t + bp['ls2'] * (h @ bp['w2'] + bp['b2'])
    t = ln(t, params['norm_g'], params['norm_b'])
    return t[:, 1 + NUM_REG:, :]


# ----------------------------- params ----------------------------------------
def init_params(key):
    keys = jax.random.split(key, 8 + DEPTH)

    def nrm(k, shape, scale=0.02):
        return scale * jax.random.normal(k, shape, jnp.float32)

    params = {
        'patch_w': nrm(keys[0], (CPP, EMBED)),
        'patch_b': nrm(keys[1], (1, EMBED)),
        'cls_token': nrm(keys[2], (1, 1, EMBED)),
        'reg_tokens': nrm(keys[3], (1, NUM_REG, EMBED)),
        'pos_embed': nrm(keys[4], (1, 1 + NP, EMBED)),
        'norm_g': 1.0 + nrm(keys[5], (1, EMBED)),
        'norm_b': nrm(keys[6], (1, EMBED)),
        'blocks': [],
    }
    for li in range(DEPTH):
        bk = jax.random.split(keys[8 + li], 12)
        params['blocks'].append({
            'ln1_g': 1.0 + nrm(bk[0], (1, EMBED)),
            'ln1_b': nrm(bk[1], (1, EMBED)),
            'wqkv': nrm(bk[2], (EMBED, 3 * EMBED)),
            'bqkv': nrm(bk[3], (1, 3 * EMBED)),
            'wo': nrm(bk[4], (EMBED, EMBED)),
            'bo': nrm(bk[5], (1, EMBED)),
            'ls1': jnp.ones((1, EMBED), jnp.float32),      # LayerScale init_values=1
            'ln2_g': 1.0 + nrm(bk[6], (1, EMBED)),
            'ln2_b': nrm(bk[7], (1, EMBED)),
            'w1': nrm(bk[8], (EMBED, MLP_HIDDEN)),
            'b1': nrm(bk[9], (1, MLP_HIDDEN)),
            'w2': nrm(bk[10], (MLP_HIDDEN, EMBED)),
            'b2': nrm(bk[11], (1, EMBED)),
            'ls2': jnp.ones((1, EMBED), jnp.float32),
        })
    return params


# ----------------------------- main -------------------------------------------
if __name__ == "__main__":
    key = jax.random.PRNGKey(0)
    k_img, k_par = jax.random.split(key)
    img = jax.random.normal(k_img, (2, C_IN, IMG, IMG), jnp.float32)   # NCHW like torch
    params = init_params(k_par)

    rep = jax.jit(encoder_forward)(img, params)
    rep = jax.block_until_ready(rep)

    ref = _reference_forward(img, params)
    assert rep.shape == (2, NP, EMBED), rep.shape
    assert jnp.allclose(rep, ref, atol=5e-3, rtol=5e-3), float(jnp.abs(rep - ref).max())

    print("KERNEL_OK")
</pallas_src>

<mosaic_0001>
module attributes {stable_mosaic.version = 11 : i64} {
  func.func @_fused_encoder_kernel(%arg0: i32, %arg1: memref<1x4x588xf32, #tpu.memory_space<vmem>>, %arg2: memref<588x64xf32, #tpu.memory_space<vmem>>, %arg3: memref<1x64xf32, #tpu.memory_space<vmem>>, %arg4: memref<4x64xf32, #tpu.memory_space<vmem>>, %arg5: memref<9x4xf32, #tpu.memory_space<vmem>>, %arg6: memref<9x64xf32, #tpu.memory_space<vmem>>, %arg7: memref<4x9xf32, #tpu.memory_space<vmem>>, %arg8: memref<3x1x64xf32, #tpu.memory_space<vmem>>, %arg9: memref<3x1x64xf32, #tpu.memory_space<vmem>>, %arg10: memref<12x64x16xf32, #tpu.memory_space<vmem>>, %arg11: memref<12x1x16xf32, #tpu.memory_space<vmem>>, %arg12: memref<12x64x16xf32, #tpu.memory_space<vmem>>, %arg13: memref<12x1x16xf32, #tpu.memory_space<vmem>>, %arg14: memref<12x64x16xf32, #tpu.memory_space<vmem>>, %arg15: memref<12x1x16xf32, #tpu.memory_space<vmem>>, %arg16: memref<12x16x64xf32, #tpu.memory_space<vmem>>, %arg17: memref<3x1x64xf32, #tpu.memory_space<vmem>>, %arg18: memref<3x1x64xf32, #tpu.memory_space<vmem>>, %arg19: memref<3x1x64xf32, #tpu.memory_space<vmem>>, %arg20: memref<3x1x64xf32, #tpu.memory_space<vmem>>, %arg21: memref<3x64x256xf32, #tpu.memory_space<vmem>>, %arg22: memref<3x1x256xf32, #tpu.memory_space<vmem>>, %arg23: memref<3x256x64xf32, #tpu.memory_space<vmem>>, %arg24: memref<3x1x64xf32, #tpu.memory_space<vmem>>, %arg25: memref<3x1x64xf32, #tpu.memory_space<vmem>>, %arg26: memref<1x64xf32, #tpu.memory_space<vmem>>, %arg27: memref<1x64xf32, #tpu.memory_space<vmem>>, %arg28: memref<1x4x64xf32, #tpu.memory_space<vmem>>) attributes {dimension_semantics = [#tpu.dimension_semantics<parallel>], iteration_bounds = array<i64: 2>, scalar_prefetch = 0 : i64, scratch_operands = 0 : i64, tpu.core_type = #tpu.core_type<tc>, window_params = [{transform_indices = @transform_0, window_bounds = array<i64: 1, 4, 588>}, {pipeline_mode = #tpu.pipeline_mode<synchronous>, transform_indices = @transform_1, window_bounds = array<i64: 588, 64>}, {pipeline_mode = #tpu.pipeline_mode<synchronous>, transform_indices = @transform_2, window_bounds = array<i64: 1, 64>}, {pipeline_mode = #tpu.pipeline_mode<synchronous>, transform_indices = @transform_3, window_bounds = array<i64: 4, 64>}, {pipeline_mode = #tpu.pipeline_mode<synchronous>, transform_indices = @transform_4, window_bounds = array<i64: 9, 4>}, {pipeline_mode = #tpu.pipeline_mode<synchronous>, transform_indices = @transform_5, window_bounds = array<i64: 9, 64>}, {pipeline_mode = #tpu.pipeline_mode<synchronous>, transform_indices = @transform_6, window_bounds = array<i64: 4, 9>}, {pipeline_mode = #tpu.pipeline_mode<synchronous>, transform_indices = @transform_7, window_bounds = array<i64: 3, 1, 64>}, {pipeline_mode = #tpu.pipeline_mode<synchronous>, transform_indices = @transform_8, window_bounds = array<i64: 3, 1, 64>}, {pipeline_mode = #tpu.pipeline_mode<synchronous>, transform_indices = @transform_9, window_bounds = array<i64: 12, 64, 16>}, {pipeline_mode = #tpu.pipeline_mode<synchronous>, transform_indices = @transform_10, window_bounds = array<i64: 12, 1, 16>}, {pipeline_mode = #tpu.pipeline_mode<synchronous>, transform_indices = @transform_11, window_bounds = array<i64: 12, 64, 16>}, {pipeline_mode = #tpu.pipeline_mode<synchronous>, transform_indices = @transform_12, window_bounds = array<i64: 12, 1, 16>}, {pipeline_mode = #tpu.pipeline_mode<synchronous>, transform_indices = @transform_13, window_bounds = array<i64: 12, 64, 16>}, {pipeline_mode = #tpu.pipeline_mode<synchronous>, transform_indices = @transform_14, window_bounds = array<i64: 12, 1, 16>}, {pipeline_mode = #tpu.pipeline_mode<synchronous>, transform_indices = @transform_15, window_bounds = array<i64: 12, 16, 64>}, {pipeline_mode = #tpu.pipeline_mode<synchronous>, transform_indices = @transform_16, window_bounds = array<i64: 3, 1, 64>}, {pipeline_mode = #tpu.pipeline_mode<synchronous>, transform_indices = @transform_17, window_bounds = array<i64: 3, 1, 64>}, {pipeline_mode = #tpu.pipeline_mode<synchronous>, transform_indices = @transform_18, window_bounds = array<i64: 3, 1, 64>}, {pipeline_mode = #tpu.pipeline_mode<synchronous>, transform_indices = @transform_19, window_bounds = array<i64: 3, 1, 64>}, {pipeline_mode = #tpu.pipeline_mode<synchronous>, transform_indices = @transform_20, window_bounds = array<i64: 3, 64, 256>}, {pipeline_mode = #tpu.pipeline_mode<synchronous>, transform_indices = @transform_21, window_bounds = array<i64: 3, 1, 256>}, {pipeline_mode = #tpu.pipeline_mode<synchronous>, transform_indices = @transform_22, window_bounds = array<i64: 3, 256, 64>}, {pipeline_mode = #tpu.pipeline_mode<synchronous>, transform_indices = @transform_23, window_bounds = array<i64: 3, 1, 64>}, {pipeline_mode = #tpu.pipeline_mode<synchronous>, transform_indices = @transform_24, window_bounds = array<i64: 3, 1, 64>}, {pipeline_mode = #tpu.pipeline_mode<synchronous>, transform_indices = @transform_25, window_bounds = array<i64: 1, 64>}, {pipeline_mode = #tpu.pipeline_mode<synchronous>, transform_indices = @transform_26, window_bounds = array<i64: 1, 64>}, {transform_indices = @transform_27, window_bounds = array<i64: 1, 4, 64>}]} {
    %c0 = arith.constant 0 : index
    %c0_0 = arith.constant 0 : index
    %c0_1 = arith.constant 0 : index
    %0 = vector.load %arg1[%c0, %c0_0, %c0_1] : memref<1x4x588xf32, #tpu.memory_space<vmem>>, vector<1x4x588xf32>
    %1 = vector.shape_cast %0 : vector<1x4x588xf32> to vector<4x588xf32>
    %c0_2 = arith.constant 0 : index
    %c0_3 = arith.constant 0 : index
    %2 = vector.load %arg2[%c0_2, %c0_3] : memref<588x64xf32, #tpu.memory_space<vmem>>, vector<588x64xf32>
    %cst = arith.constant dense<0.000000e+00> : vector<4x64xf32>
    %3 = tpu.matmul %1, %2, %cst {dimension_numbers = #tpu.dot_dimension_numbers<[1], [0], [0], [1], [0, 0, 1, 1], [], []>} : vector<4x588xf32>, vector<588x64xf32>, vector<4x64xf32> -> vector<4x64xf32>
    %c0_4 = arith.constant 0 : index
    %c0_5 = arith.constant 0 : index
    %4 = vector.load %arg3[%c0_4, %c0_5] : memref<1x64xf32, #tpu.memory_space<vmem>>, vector<1x64xf32>
    %5 = vector.broadcast %4 : vector<1x64xf32> to vector<4x64xf32>
    %6 = arith.addf %3, %5 : vector<4x64xf32>
    %c0_6 = arith.constant 0 : index
    %c0_7 = arith.constant 0 : index
    %7 = vector.load %arg4[%c0_6, %c0_7] : memref<4x64xf32, #tpu.memory_space<vmem>>, vector<4x64xf32>
    %8 = arith.addf %6, %7 : vector<4x64xf32>
    %c0_8 = arith.constant 0 : index
    %c0_9 = arith.constant 0 : index
    %9 = vector.load %arg6[%c0_8, %c0_9] : memref<9x64xf32, #tpu.memory_space<vmem>>, vector<9x64xf32>
    %c0_10 = arith.constant 0 : index
    %c0_11 = arith.constant 0 : index
    %10 = vector.load %arg5[%c0_10, %c0_11] : memref<9x4xf32, #tpu.memory_space<vmem>>, vector<9x4xf32>
    %cst_12 = arith.constant dense<0.000000e+00> : vector<9x64xf32>
    %11 = tpu.matmul %10, %8, %cst_12 {dimension_numbers = #tpu.dot_dimension_numbers<[1], [0], [0], [1], [0, 0, 1, 1], [], []>} : vector<9x4xf32>, vector<4x64xf32>, vector<9x64xf32> -> vector<9x64xf32>
    %12 = arith.addf %9, %11 : vector<9x64xf32>
    %c0_13 = arith.constant 0 : index
    %c0_14 = arith.constant 0 : index
    %c0_15 = arith.constant 0 : index
    %13 = vector.load %arg8[%c0_13, %c0_14, %c0_15] : memref<3x1x64xf32, #tpu.memory_space<vmem>>, vector<1x1x64xf32>
    %14 = vector.shape_cast %13 : vector<1x1x64xf32> to vector<1x64xf32>
    %c0_16 = arith.constant 0 : index
    %c0_17 = arith.constant 0 : index
    %c0_18 = arith.constant 0 : index
    %15 = vector.load %arg9[%c0_16, %c0_17, %c0_18] : memref<3x1x64xf32, #tpu.memory_space<vmem>>, vector<1x1x64xf32>
    %16 = vector.shape_cast %15 : vector<1x1x64xf32> to vector<1x64xf32>
    %cst_19 = arith.constant dense<0.000000e+00> : vector<9xf32>
    %17 = vector.multi_reduction <add>, %12, %cst_19 [1] : vector<9x64xf32> to vector<9xf32>
    %18 = vector.shape_cast %17 : vector<9xf32> to vector<9x1xf32>
    %cst_20 = arith.constant 6.400000e+01 : f32
    %19 = vector.broadcast %cst_20 : f32 to vector<9x1xf32>
    %20 = arith.divf %18, %19 : vector<9x1xf32>
    %21 = vector.broadcast %20 : vector<9x1xf32> to vector<9x64xf32>
    %22 = arith.subf %12, %21 : vector<9x64xf32>
    %23 = arith.mulf %22, %22 : vector<9x64xf32>
    %cst_21 = arith.constant dense<0.000000e+00> : vector<9xf32>
    %24 = vector.multi_reduction <add>, %23, %cst_21 [1] : vector<9x64xf32> to vector<9xf32>
    %25 = vector.shape_cast %24 : vector<9xf32> to vector<9x1xf32>
    %cst_22 = arith.constant 6.400000e+01 : f32
    %26 = vector.broadcast %cst_22 : f32 to vector<9x1xf32>
    %27 = arith.divf %25, %26 : vector<9x1xf32>
    %28 = vector.broadcast %20 : vector<9x1xf32> to vector<9x64xf32>
    %29 = arith.subf %12, %28 : vector<9x64xf32>
    %cst_23 = arith.constant 9.99999997E-7 : f32
    %30 = vector.broadcast %cst_23 : f32 to vector<9x1xf32>
    %31 = arith.addf %27, %30 : vector<9x1xf32>
    %32 = math.rsqrt %31 : vector<9x1xf32>
    %33 = vector.broadcast %32 : vector<9x1xf32> to vector<9x64xf32>
    %34 = arith.mulf %29, %33 : vector<9x64xf32>
    %35 = vector.broadcast %14 : vector<1x64xf32> to vector<9x64xf32>
    %36 = arith.mulf %34, %35 : vector<9x64xf32>
    %37 = vector.broadcast %16 : vector<1x64xf32> to vector<9x64xf32>
    %38 = arith.addf %36, %37 : vector<9x64xf32>
    %cst_24 = arith.constant 0.000000e+00 : f32
    %39 = vector.broadcast %cst_24 : f32 to vector<9x64xf32>
    %c0_25 = arith.constant 0 : index
    %c0_26 = arith.constant 0 : index
    %c0_27 = arith.constant 0 : index
    %40 = vector.load %arg10[%c0_25, %c0_26, %c0_27] : memref<12x64x16xf32, #tpu.memory_space<vmem>>, vector<1x64x16xf32>
    %41 = vector.shape_cast %40 : vector<1x64x16xf32> to vector<64x16xf32>
    %cst_28 = arith.constant dense<0.000000e+00> : vector<9x16xf32>
    %42 = tpu.matmul %38, %41, %cst_28 {dimension_numbers = #tpu.dot_dimension_numbers<[1], [0], [0], [1], [0, 0, 1, 1], [], []>} : vector<9x64xf32>, vector<64x16xf32>, vector<9x16xf32> -> vector<9x16xf32>
    %c0_29 = arith.constant 0 : index
    %c0_30 = arith.constant 0 : index
    %c0_31 = arith.constant 0 : index
    %43 = vector.load %arg11[%c0_29, %c0_30, %c0_31] : memref<12x1x16xf32, #tpu.memory_space<vmem>>, vector<1x1x16xf32>
    %44 = vector.shape_cast %43 : vector<1x1x16xf32> to vector<1x16xf32>
    %45 = vector.broadcast %44 : vector<1x16xf32> to vector<9x16xf32>
    %46 = arith.addf %42, %45 : vector<9x16xf32>
    %c0_32 = arith.constant 0 : index
    %c0_33 = arith.constant 0 : index
    %c0_34 = arith.constant 0 : index
    %47 = vector.load %arg12[%c0_32, %c0_33, %c0_34] : memref<12x64x16xf32, #tpu.memory_space<vmem>>, vector<1x64x16xf32>
    %48 = vector.shape_cast %47 : vector<1x64x16xf32> to vector<64x16xf32>
    %cst_35 = arith.constant dense<0.000000e+00> : vector<9x16xf32>
    %49 = tpu.matmul %38, %48, %cst_35 {dimension_numbers = #tpu.dot_dimension_numbers<[1], [0], [0], [1], [0, 0, 1, 1], [], []>} : vector<9x64xf32>, vector<64x16xf32>, vector<9x16xf32> -> vector<9x16xf32>
    %c0_36 = arith.constant 0 : index
    %c0_37 = arith.constant 0 : index
    %c0_38 = arith.constant 0 : index
    %50 = vector.load %arg13[%c0_36, %c0_37, %c0_38] : memref<12x1x16xf32, #tpu.memory_space<vmem>>, vector<1x1x16xf32>
    %51 = vector.shape_cast %50 : vector<1x1x16xf32> to vector<1x16xf32>
    %52 = vector.broadcast %51 : vector<1x16xf32> to vector<9x16xf32>
    %53 = arith.addf %49, %52 : vector<9x16xf32>
    %c0_39 = arith.constant 0 : index
    %c0_40 = arith.constant 0 : index
    %c0_41 = arith.constant 0 : index
    %54 = vector.load %arg14[%c0_39, %c0_40, %c0_41] : memref<12x64x16xf32, #tpu.memory_space<vmem>>, vector<1x64x16xf32>
    %55 = vector.shape_cast %54 : vector<1x64x16xf32> to vector<64x16xf32>
    %cst_42 = arith.constant dense<0.000000e+00> : vector<9x16xf32>
    %56 = tpu.matmul %38, %55, %cst_42 {dimension_numbers = #tpu.dot_dimension_numbers<[1], [0], [0], [1], [0, 0, 1, 1], [], []>} : vector<9x64xf32>, vector<64x16xf32>, vector<9x16xf32> -> vector<9x16xf32>
    %c0_43 = arith.constant 0 : index
    %c0_44 = arith.constant 0 : index
    %c0_45 = arith.constant 0 : index
    %57 = vector.load %arg15[%c0_43, %c0_44, %c0_45] : memref<12x1x16xf32, #tpu.memory_space<vmem>>, vector<1x1x16xf32>
    %58 = vector.shape_cast %57 : vector<1x1x16xf32> to vector<1x16xf32>
    %59 = vector.broadcast %58 : vector<1x16xf32> to vector<9x16xf32>
    %60 = arith.addf %56, %59 : vector<9x16xf32>
    %cst_46 = arith.constant dense<0.000000e+00> : vector<9x9xf32>
    %61 = tpu.matmul %46, %53, %cst_46 {dimension_numbers = #tpu.dot_dimension_numbers<[1], [1], [0], [0], [0, 0, 1, 0], [], []>} : vector<9x16xf32>, vector<9x16xf32>, vector<9x9xf32> -> vector<9x9xf32>
    %cst_47 = arith.constant dense<0xFF800000> : vector<9xf32>
    %62 = vector.multi_reduction <maximumf>, %61, %cst_47 [1] : vector<9x9xf32> to vector<9xf32>
    %63 = vector.shape_cast %62 : vector<9xf32> to vector<9x1xf32>
    %64 = vector.broadcast %63 : vector<9x1xf32> to vector<9x9xf32>
    %65 = arith.subf %61, %64 : vector<9x9xf32>
    %66 = math.exp %65 : vector<9x9xf32>
    %cst_48 = arith.constant dense<0.000000e+00> : vector<9xf32>
    %67 = vector.multi_reduction <add>, %66, %cst_48 [1] : vector<9x9xf32> to vector<9xf32>
    %68 = vector.shape_cast %67 : vector<9xf32> to vector<9x1xf32>
    %69 = tpu.reciprocal %68 {approx = true} : vector<9x1xf32> -> vector<9x1xf32>
    %70 = vector.broadcast %69 : vector<9x1xf32> to vector<9x9xf32>
    %71 = arith.mulf %66, %70 : vector<9x9xf32>
    %cst_49 = arith.constant dense<0.000000e+00> : vector<9x16xf32>
    %72 = tpu.matmul %71, %60, %cst_49 {dimension_numbers = #tpu.dot_dimension_numbers<[1], [0], [0], [1], [0, 0, 1, 1], [], []>} : vector<9x9xf32>, vector<9x16xf32>, vector<9x16xf32> -> vector<9x16xf32>
    %c0_50 = arith.constant 0 : index
    %c0_51 = arith.constant 0 : index
    %c0_52 = arith.constant 0 : index
    %73 = vector.load %arg16[%c0_50, %c0_51, %c0_52] : memref<12x16x64xf32, #tpu.memory_space<vmem>>, vector<1x16x64xf32>
    %74 = vector.shape_cast %73 : vector<1x16x64xf32> to vector<16x64xf32>
    %cst_53 = arith.constant dense<0.000000e+00> : vector<9x64xf32>
    %75 = tpu.matmul %72, %74, %cst_53 {dimension_numbers = #tpu.dot_dimension_numbers<[1], [0], [0], [1], [0, 0, 1, 1], [], []>} : vector<9x16xf32>, vector<16x64xf32>, vector<9x64xf32> -> vector<9x64xf32>
    %76 = arith.addf %39, %75 : vector<9x64xf32>
    %c1 = arith.constant 1 : index
    %c0_54 = arith.constant 0 : index
    %c0_55 = arith.constant 0 : index
    %77 = vector.load %arg10[%c1, %c0_54, %c0_55] : memref<12x64x16xf32, #tpu.memory_space<vmem>>, vector<1x64x16xf32>
    %78 = vector.shape_cast %77 : vector<1x64x16xf32> to vector<64x16xf32>
    %cst_56 = arith.constant dense<0.000000e+00> : vector<9x16xf32>
    %79 = tpu.matmul %38, %78, %cst_56 {dimension_numbers = #tpu.dot_dimension_numbers<[1], [0], [0], [1], [0, 0, 1, 1], [], []>} : vector<9x64xf32>, vector<64x16xf32>, vector<9x16xf32> -> vector<9x16xf32>
    %c1_57 = arith.constant 1 : index
    %c0_58 = arith.constant 0 : index
    %c0_59 = arith.constant 0 : index
    %80 = vector.load %arg11[%c1_57, %c0_58, %c0_59] : memref<12x1x16xf32, #tpu.memory_space<vmem>>, vector<1x1x16xf32>
    %81 = vector.shape_cast %80 : vector<1x1x16xf32> to vector<1x16xf32>
    %82 = vector.broadcast %81 : vector<1x16xf32> to vector<9x16xf32>
    %83 = arith.addf %79, %82 : vector<9x16xf32>
    %c1_60 = arith.constant 1 : index
    %c0_61 = arith.constant 0 : index
    %c0_62 = arith.constant 0 : index
    %84 = vector.load %arg12[%c1_60, %c0_61, %c0_62] : memref<12x64x16xf32, #tpu.memory_space<vmem>>, vector<1x64x16xf32>
    %85 = vector.shape_cast %84 : vector<1x64x16xf32> to vector<64x16xf32>
    %cst_63 = arith.constant dense<0.000000e+00> : vector<9x16xf32>
    %86 = tpu.matmul %38, %85, %cst_63 {dimension_numbers = #tpu.dot_dimension_numbers<[1], [0], [0], [1], [0, 0, 1, 1], [], []>} : vector<9x64xf32>, vector<64x16xf32>, vector<9x16xf32> -> vector<9x16xf32>
    %c1_64 = arith.constant 1 : index
    %c0_65 = arith.constant 0 : index
    %c0_66 = arith.constant 0 : index
    %87 = vector.load %arg13[%c1_64, %c0_65, %c0_66] : memref<12x1x16xf32, #tpu.memory_space<vmem>>, vector<1x1x16xf32>
    %88 = vector.shape_cast %87 : vector<1x1x16xf32> to vector<1x16xf32>
    %89 = vector.broadcast %88 : vector<1x16xf32> to vector<9x16xf32>
    %90 = arith.addf %86, %89 : vector<9x16xf32>
    %c1_67 = arith.constant 1 : index
    %c0_68 = arith.constant 0 : index
    %c0_69 = arith.constant 0 : index
    %91 = vector.load %arg14[%c1_67, %c0_68, %c0_69] : memref<12x64x16xf32, #tpu.memory_space<vmem>>, vector<1x64x16xf32>
    %92 = vector.shape_cast %91 : vector<1x64x16xf32> to vector<64x16xf32>
    %cst_70 = arith.constant dense<0.000000e+00> : vector<9x16xf32>
    %93 = tpu.matmul %38, %92, %cst_70 {dimension_numbers = #tpu.dot_dimension_numbers<[1], [0], [0], [1], [0, 0, 1, 1], [], []>} : vector<9x64xf32>, vector<64x16xf32>, vector<9x16xf32> -> vector<9x16xf32>
    %c1_71 = arith.constant 1 : index
    %c0_72 = arith.constant 0 : index
    %c0_73 = arith.constant 0 : index
    %94 = vector.load %arg15[%c1_71, %c0_72, %c0_73] : memref<12x1x16xf32, #tpu.memory_space<vmem>>, vector<1x1x16xf32>
    %95 = vector.shape_cast %94 : vector<1x1x16xf32> to vector<1x16xf32>
    %96 = vector.broadcast %95 : vector<1x16xf32> to vector<9x16xf32>
    %97 = arith.addf %93, %96 : vector<9x16xf32>
    %cst_74 = arith.constant dense<0.000000e+00> : vector<9x9xf32>
    %98 = tpu.matmul %83, %90, %cst_74 {dimension_numbers = #tpu.dot_dimension_numbers<[1], [1], [0], [0], [0, 0, 1, 0], [], []>} : vector<9x16xf32>, vector<9x16xf32>, vector<9x9xf32> -> vector<9x9xf32>
    %cst_75 = arith.constant dense<0xFF800000> : vector<9xf32>
    %99 = vector.multi_reduction <maximumf>, %98, %cst_75 [1] : vector<9x9xf32> to vector<9xf32>
    %100 = vector.shape_cast %99 : vector<9xf32> to vector<9x1xf32>
    %101 = vector.broadcast %100 : vector<9x1xf32> to vector<9x9xf32>
    %102 = arith.subf %98, %101 : vector<9x9xf32>
    %103 = math.exp %102 : vector<9x9xf32>
    %cst_76 = arith.constant dense<0.000000e+00> : vector<9xf32>
    %104 = vector.multi_reduction <add>, %103, %cst_76 [1] : vector<9x9xf32> to vector<9xf32>
    %105 = vector.shape_cast %104 : vector<9xf32> to vector<9x1xf32>
    %106 = tpu.reciprocal %105 {approx = true} : vector<9x1xf32> -> vector<9x1xf32>
    %107 = vector.broadcast %106 : vector<9x1xf32> to vector<9x9xf32>
    %108 = arith.mulf %103, %107 : vector<9x9xf32>
    %cst_77 = arith.constant dense<0.000000e+00> : vector<9x16xf32>
    %109 = tpu.matmul %108, %97, %cst_77 {dimension_numbers = #tpu.dot_dimension_numbers<[1], [0], [0], [1], [0, 0, 1, 1], [], []>} : vector<9x9xf32>, vector<9x16xf32>, vector<9x16xf32> -> vector<9x16xf32>
    %c1_78 = arith.constant 1 : index
    %c0_79 = arith.constant 0 : index
    %c0_80 = arith.constant 0 : index
    %110 = vector.load %arg16[%c1_78, %c0_79, %c0_80] : memref<12x16x64xf32, #tpu.memory_space<vmem>>, vector<1x16x64xf32>
    %111 = vector.shape_cast %110 : vector<1x16x64xf32> to vector<16x64xf32>
    %cst_81 = arith.constant dense<0.000000e+00> : vector<9x64xf32>
    %112 = tpu.matmul %109, %111, %cst_81 {dimension_numbers = #tpu.dot_dimension_numbers<[1], [0], [0], [1], [0, 0, 1, 1], [], []>} : vector<9x16xf32>, vector<16x64xf32>, vector<9x64xf32> -> vector<9x64xf32>
    %113 = arith.addf %76, %112 : vector<9x64xf32>
    %c2 = arith.constant 2 : index
    %c0_82 = arith.constant 0 : index
    %c0_83 = arith.constant 0 : index
    %114 = vector.load %arg10[%c2, %c0_82, %c0_83] : memref<12x64x16xf32, #tpu.memory_space<vmem>>, vector<1x64x16xf32>
    %115 = vector.shape_cast %114 : vector<1x64x16xf32> to vector<64x16xf32>
    %cst_84 = arith.constant dense<0.000000e+00> : vector<9x16xf32>
    %116 = tpu.matmul %38, %115, %cst_84 {dimension_numbers = #tpu.dot_dimension_numbers<[1], [0], [0], [1], [0, 0, 1, 1], [], []>} : vector<9x64xf32>, vector<64x16xf32>, vector<9x16xf32> -> vector<9x16xf32>
    %c2_85 = arith.constant 2 : index
    %c0_86 = arith.constant 0 : index
    %c0_87 = arith.constant 0 : index
    %117 = vector.load %arg11[%c2_85, %c0_86, %c0_87] : memref<12x1x16xf32, #tpu.memory_space<vmem>>, vector<1x1x16xf32>
    %118 = vector.shape_cast %117 : vector<1x1x16xf32> to vector<1x16xf32>
    %119 = vector.broadcast %118 : vector<1x16xf32> to vector<9x16xf32>
    %120 = arith.addf %116, %119 : vector<9x16xf32>
    %c2_88 = arith.constant 2 : index
    %c0_89 = arith.constant 0 : index
    %c0_90 = arith.constant 0 : index
    %121 = vector.load %arg12[%c2_88, %c0_89, %c0_90] : memref<12x64x16xf32, #tpu.memory_space<vmem>>, vector<1x64x16xf32>
    %122 = vector.shape_cast %121 : vector<1x64x16xf32> to vector<64x16xf32>
    %cst_91 = arith.constant dense<0.000000e+00> : vector<9x16xf32>
    %123 = tpu.matmul %38, %122, %cst_91 {dimension_numbers = #tpu.dot_dimension_numbers<[1], [0], [0], [1], [0, 0, 1, 1], [], []>} : vector<9x64xf32>, vector<64x16xf32>, vector<9x16xf32> -> vector<9x16xf32>
    %c2_92 = arith.constant 2 : index
    %c0_93 = arith.constant 0 : index
    %c0_94 = arith.constant 0 : index
    %124 = vector.load %arg13[%c2_92, %c0_93, %c0_94] : memref<12x1x16xf32, #tpu.memory_space<vmem>>, vector<1x1x16xf32>
    %125 = vector.shape_cast %124 : vector<1x1x16xf32> to vector<1x16xf32>
    %126 = vector.broadcast %125 : vector<1x16xf32> to vector<9x16xf32>
    %127 = arith.addf %123, %126 : vector<9x16xf32>
    %c2_95 = arith.constant 2 : index
    %c0_96 = arith.constant 0 : index
    %c0_97 = arith.constant 0 : index
    %128 = vector.load %arg14[%c2_95, %c0_96, %c0_97] : memref<12x64x16xf32, #tpu.memory_space<vmem>>, vector<1x64x16xf32>
    %129 = vector.shape_cast %128 : vector<1x64x16xf32> to vector<64x16xf32>
    %cst_98 = arith.constant dense<0.000000e+00> : vector<9x16xf32>
    %130 = tpu.matmul %38, %129, %cst_98 {dimension_numbers = #tpu.dot_dimension_numbers<[1], [0], [0], [1], [0, 0, 1, 1], [], []>} : vector<9x64xf32>, vector<64x16xf32>, vector<9x16xf32> -> vector<9x16xf32>
    %c2_99 = arith.constant 2 : index
    %c0_100 = arith.constant 0 : index
    %c0_101 = arith.constant 0 : index
    %131 = vector.load %arg15[%c2_99, %c0_100, %c0_101] : memref<12x1x16xf32, #tpu.memory_space<vmem>>, vector<1x1x16xf32>
    %132 = vector.shape_cast %131 : vector<1x1x16xf32> to vector<1x16xf32>
    %133 = vector.broadcast %132 : vector<1x16xf32> to vector<9x16xf32>
    %134 = arith.addf %130, %133 : vector<9x16xf32>
    %cst_102 = arith.constant dense<0.000000e+00> : vector<9x9xf32>
    %135 = tpu.matmul %120, %127, %cst_102 {dimension_numbers = #tpu.dot_dimension_numbers<[1], [1], [0], [0], [0, 0, 1, 0], [], []>} : vector<9x16xf32>, vector<9x16xf32>, vector<9x9xf32> -> vector<9x9xf32>
    %cst_103 = arith.constant dense<0xFF800000> : vector<9xf32>
    %136 = vector.multi_reduction <maximumf>, %135, %cst_103 [1] : vector<9x9xf32> to vector<9xf32>
    %137 = vector.shape_cast %136 : vector<9xf32> to vector<9x1xf32>
    %138 = vector.broadcast %137 : vector<9x1xf32> to vector<9x9xf32>
    %139 = arith.subf %135, %138 : vector<9x9xf32>
    %140 = math.exp %139 : vector<9x9xf32>
    %cst_104 = arith.constant dense<0.000000e+00> : vector<9xf32>
    %141 = vector.multi_reduction <add>, %140, %cst_104 [1] : vector<9x9xf32> to vector<9xf32>
    %142 = vector.shape_cast %141 : vector<9xf32> to vector<9x1xf32>
    %143 = tpu.reciprocal %142 {approx = true} : vector<9x1xf32> -> vector<9x1xf32>
    %144 = vector.broadcast %143 : vector<9x1xf32> to vector<9x9xf32>
    %145 = arith.mulf %140, %144 : vector<9x9xf32>
    %cst_105 = arith.constant dense<0.000000e+00> : vector<9x16xf32>
    %146 = tpu.matmul %145, %134, %cst_105 {dimension_numbers = #tpu.dot_dimension_numbers<[1], [0], [0], [1], [0, 0, 1, 1], [], []>} : vector<9x9xf32>, vector<9x16xf32>, vector<9x16xf32> -> vector<9x16xf32>
    %c2_106 = arith.constant 2 : index
    %c0_107 = arith.constant 0 : index
    %c0_108 = arith.constant 0 : index
    %147 = vector.load %arg16[%c2_106, %c0_107, %c0_108] : memref<12x16x64xf32, #tpu.memory_space<vmem>>, vector<1x16x64xf32>
    %148 = vector.shape_cast %147 : vector<1x16x64xf32> to vector<16x64xf32>
    %cst_109 = arith.constant dense<0.000000e+00> : vector<9x64xf32>
    %149 = tpu.matmul %146, %148, %cst_109 {dimension_numbers = #tpu.dot_dimension_numbers<[1], [0], [0], [1], [0, 0, 1, 1], [], []>} : vector<9x16xf32>, vector<16x64xf32>, vector<9x64xf32> -> vector<9x64xf32>
    %150 = arith.addf %113, %149 : vector<9x64xf32>
    %c3 = arith.constant 3 : index
    %c0_110 = arith.constant 0 : index
    %c0_111 = arith.constant 0 : index
    %151 = vector.load %arg10[%c3, %c0_110, %c0_111] : memref<12x64x16xf32, #tpu.memory_space<vmem>>, vector<1x64x16xf32>
    %152 = vector.shape_cast %151 : vector<1x64x16xf32> to vector<64x16xf32>
    %cst_112 = arith.constant dense<0.000000e+00> : vector<9x16xf32>
    %153 = tpu.matmul %38, %152, %cst_112 {dimension_numbers = #tpu.dot_dimension_numbers<[1], [0], [0], [1], [0, 0, 1, 1], [], []>} : vector<9x64xf32>, vector<64x16xf32>, vector<9x16xf32> -> vector<9x16xf32>
    %c3_113 = arith.constant 3 : index
    %c0_114 = arith.constant 0 : index
    %c0_115 = arith.constant 0 : index
    %154 = vector.load %arg11[%c3_113, %c0_114, %c0_115] : memref<12x1x16xf32, #tpu.memory_space<vmem>>, vector<1x1x16xf32>
    %155 = vector.shape_cast %154 : vector<1x1x16xf32> to vector<1x16xf32>
    %156 = vector.broadcast %155 : vector<1x16xf32> to vector<9x16xf32>
    %157 = arith.addf %153, %156 : vector<9x16xf32>
    %c3_116 = arith.constant 3 : index
    %c0_117 = arith.constant 0 : index
    %c0_118 = arith.constant 0 : index
    %158 = vector.load %arg12[%c3_116, %c0_117, %c0_118] : memref<12x64x16xf32, #tpu.memory_space<vmem>>, vector<1x64x16xf32>
    %159 = vector.shape_cast %158 : vector<1x64x16xf32> to vector<64x16xf32>
    %cst_119 = arith.constant dense<0.000000e+00> : vector<9x16xf32>
    %160 = tpu.matmul %38, %159, %cst_119 {dimension_numbers = #tpu.dot_dimension_numbers<[1], [0], [0], [1], [0, 0, 1, 1], [], []>} : vector<9x64xf32>, vector<64x16xf32>, vector<9x16xf32> -> vector<9x16xf32>
    %c3_120 = arith.constant 3 : index
    %c0_121 = arith.constant 0 : index
    %c0_122 = arith.constant 0 : index
    %161 = vector.load %arg13[%c3_120, %c0_121, %c0_122] : memref<12x1x16xf32, #tpu.memory_space<vmem>>, vector<1x1x16xf32>
    %162 = vector.shape_cast %161 : vector<1x1x16xf32> to vector<1x16xf32>
    %163 = vector.broadcast %162 : vector<1x16xf32> to vector<9x16xf32>
    %164 = arith.addf %160, %163 : vector<9x16xf32>
    %c3_123 = arith.constant 3 : index
    %c0_124 = arith.constant 0 : index
    %c0_125 = arith.constant 0 : index
    %165 = vector.load %arg14[%c3_123, %c0_124, %c0_125] : memref<12x64x16xf32, #tpu.memory_space<vmem>>, vector<1x64x16xf32>
    %166 = vector.shape_cast %165 : vector<1x64x16xf32> to vector<64x16xf32>
    %cst_126 = arith.constant dense<0.000000e+00> : vector<9x16xf32>
    %167 = tpu.matmul %38, %166, %cst_126 {dimension_numbers = #tpu.dot_dimension_numbers<[1], [0], [0], [1], [0, 0, 1, 1], [], []>} : vector<9x64xf32>, vector<64x16xf32>, vector<9x16xf32> -> vector<9x16xf32>
    %c3_127 = arith.constant 3 : index
    %c0_128 = arith.constant 0 : index
    %c0_129 = arith.constant 0 : index
    %168 = vector.load %arg15[%c3_127, %c0_128, %c0_129] : memref<12x1x16xf32, #tpu.memory_space<vmem>>, vector<1x1x16xf32>
    %169 = vector.shape_cast %168 : vector<1x1x16xf32> to vector<1x16xf32>
    %170 = vector.broadcast %169 : vector<1x16xf32> to vector<9x16xf32>
    %171 = arith.addf %167, %170 : vector<9x16xf32>
    %cst_130 = arith.constant dense<0.000000e+00> : vector<9x9xf32>
    %172 = tpu.matmul %157, %164, %cst_130 {dimension_numbers = #tpu.dot_dimension_numbers<[1], [1], [0], [0], [0, 0, 1, 0], [], []>} : vector<9x16xf32>, vector<9x16xf32>, vector<9x9xf32> -> vector<9x9xf32>
    %cst_131 = arith.constant dense<0xFF800000> : vector<9xf32>
    %173 = vector.multi_reduction <maximumf>, %172, %cst_131 [1] : vector<9x9xf32> to vector<9xf32>
    %174 = vector.shape_cast %173 : vector<9xf32> to vector<9x1xf32>
    %175 = vector.broadcast %174 : vector<9x1xf32> to vector<9x9xf32>
    %176 = arith.subf %172, %175 : vector<9x9xf32>
    %177 = math.exp %176 : vector<9x9xf32>
    %cst_132 = arith.constant dense<0.000000e+00> : vector<9xf32>
    %178 = vector.multi_reduction <add>, %177, %cst_132 [1] : vector<9x9xf32> to vector<9xf32>
    %179 = vector.shape_cast %178 : vector<9xf32> to vector<9x1xf32>
    %180 = tpu.reciprocal %179 {approx = true} : vector<9x1xf32> -> vector<9x1xf32>
    %181 = vector.broadcast %180 : vector<9x1xf32> to vector<9x9xf32>
    %182 = arith.mulf %177, %181 : vector<9x9xf32>
    %cst_133 = arith.constant dense<0.000000e+00> : vector<9x16xf32>
    %183 = tpu.matmul %182, %171, %cst_133 {dimension_numbers = #tpu.dot_dimension_numbers<[1], [0], [0], [1], [0, 0, 1, 1], [], []>} : vector<9x9xf32>, vector<9x16xf32>, vector<9x16xf32> -> vector<9x16xf32>
    %c3_134 = arith.constant 3 : index
    %c0_135 = arith.constant 0 : index
    %c0_136 = arith.constant 0 : index
    %184 = vector.load %arg16[%c3_134, %c0_135, %c0_136] : memref<12x16x64xf32, #tpu.memory_space<vmem>>, vector<1x16x64xf32>
    %185 = vector.shape_cast %184 : vector<1x16x64xf32> to vector<16x64xf32>
    %cst_137 = arith.constant dense<0.000000e+00> : vector<9x64xf32>
    %186 = tpu.matmul %183, %185, %cst_137 {dimension_numbers = #tpu.dot_dimension_numbers<[1], [0], [0], [1], [0, 0, 1, 1], [], []>} : vector<9x16xf32>, vector<16x64xf32>, vector<9x64xf32> -> vector<9x64xf32>
    %187 = arith.addf %150, %186 : vector<9x64xf32>
    %c0_138 = arith.constant 0 : index
    %c0_139 = arith.constant 0 : index
    %c0_140 = arith.constant 0 : index
    %188 = vector.load %arg18[%c0_138, %c0_139, %c0_140] : memref<3x1x64xf32, #tpu.memory_space<vmem>>, vector<1x1x64xf32>
    %189 = vector.shape_cast %188 : vector<1x1x64xf32> to vector<1x64xf32>
    %c0_141 = arith.constant 0 : index
    %c0_142 = arith.constant 0 : index
    %c0_143 = arith.constant 0 : index
    %190 = vector.load %arg17[%c0_141, %c0_142, %c0_143] : memref<3x1x64xf32, #tpu.memory_space<vmem>>, vector<1x1x64xf32>
    %191 = vector.shape_cast %190 : vector<1x1x64xf32> to vector<1x64xf32>
    %192 = vector.broadcast %191 : vector<1x64xf32> to vector<9x64xf32>
    %193 = arith.addf %187, %192 : vector<9x64xf32>
    %194 = vector.broadcast %189 : vector<1x64xf32> to vector<9x64xf32>
    %195 = arith.mulf %194, %193 : vector<9x64xf32>
    %196 = arith.addf %12, %195 : vector<9x64xf32>
    %c0_144 = arith.constant 0 : index
    %c0_145 = arith.constant 0 : index
    %c0_146 = arith.constant 0 : index
    %197 = vector.load %arg19[%c0_144, %c0_145, %c0_146] : memref<3x1x64xf32, #tpu.memory_space<vmem>>, vector<1x1x64xf32>
    %198 = vector.shape_cast %197 : vector<1x1x64xf32> to vector<1x64xf32>
    %c0_147 = arith.constant 0 : index
    %c0_148 = arith.constant 0 : index
    %c0_149 = arith.constant 0 : index
    %199 = vector.load %arg20[%c0_147, %c0_148, %c0_149] : memref<3x1x64xf32, #tpu.memory_space<vmem>>, vector<1x1x64xf32>
    %200 = vector.shape_cast %199 : vector<1x1x64xf32> to vector<1x64xf32>
    %cst_150 = arith.constant dense<0.000000e+00> : vector<9xf32>
    %201 = vector.multi_reduction <add>, %196, %cst_150 [1] : vector<9x64xf32> to vector<9xf32>
    %202 = vector.shape_cast %201 : vector<9xf32> to vector<9x1xf32>
    %cst_151 = arith.constant 6.400000e+01 : f32
    %203 = vector.broadcast %cst_151 : f32 to vector<9x1xf32>
    %204 = arith.divf %202, %203 : vector<9x1xf32>
    %205 = vector.broadcast %204 : vector<9x1xf32> to vector<9x64xf32>
    %206 = arith.subf %196, %205 : vector<9x64xf32>
    %207 = arith.mulf %206, %206 : vector<9x64xf32>
    %cst_152 = arith.constant dense<0.000000e+00> : vector<9xf32>
    %208 = vector.multi_reduction <add>, %207, %cst_152 [1] : vector<9x64xf32> to vector<9xf32>
    %209 = vector.shape_cast %208 : vector<9xf32> to vector<9x1xf32>
    %cst_153 = arith.constant 6.400000e+01 : f32
    %210 = vector.broadcast %cst_153 : f32 to vector<9x1xf32>
    %211 = arith.divf %209, %210 : vector<9x1xf32>
    %212 = vector.broadcast %204 : vector<9x1xf32> to vector<9x64xf32>
    %213 = arith.subf %196, %212 : vector<9x64xf32>
    %cst_154 = arith.constant 9.99999997E-7 : f32
    %214 = vector.broadcast %cst_154 : f32 to vector<9x1xf32>
    %215 = arith.addf %211, %214 : vector<9x1xf32>
    %216 = math.rsqrt %215 : vector<9x1xf32>
    %217 = vector.broadcast %216 : vector<9x1xf32> to vector<9x64xf32>
    %218 = arith.mulf %213, %217 : vector<9x64xf32>
    %219 = vector.broadcast %198 : vector<1x64xf32> to vector<9x64xf32>
    %220 = arith.mulf %218, %219 : vector<9x64xf32>
    %221 = vector.broadcast %200 : vector<1x64xf32> to vector<9x64xf32>
    %222 = arith.addf %220, %221 : vector<9x64xf32>
    %c0_155 = arith.constant 0 : index
    %c0_156 = arith.constant 0 : index
    %c0_157 = arith.constant 0 : index
    %223 = vector.load %arg21[%c0_155, %c0_156, %c0_157] : memref<3x64x256xf32, #tpu.memory_space<vmem>>, vector<1x64x256xf32>
    %224 = vector.shape_cast %223 : vector<1x64x256xf32> to vector<64x256xf32>
    %cst_158 = arith.constant dense<0.000000e+00> : vector<9x256xf32>
    %225 = tpu.matmul %222, %224, %cst_158 {dimension_numbers = #tpu.dot_dimension_numbers<[1], [0], [0], [1], [0, 0, 1, 1], [], []>} : vector<9x64xf32>, vector<64x256xf32>, vector<9x256xf32> -> vector<9x256xf32>
    %c0_159 = arith.constant 0 : index
    %c0_160 = arith.constant 0 : index
    %c0_161 = arith.constant 0 : index
    %226 = vector.load %arg22[%c0_159, %c0_160, %c0_161] : memref<3x1x256xf32, #tpu.memory_space<vmem>>, vector<1x1x256xf32>
    %227 = vector.shape_cast %226 : vector<1x1x256xf32> to vector<1x256xf32>
    %228 = vector.broadcast %227 : vector<1x256xf32> to vector<9x256xf32>
    %229 = arith.addf %225, %228 : vector<9x256xf32>
    %cst_162 = arith.constant 5.000000e-01 : f32
    %230 = vector.broadcast %cst_162 : f32 to vector<9x256xf32>
    %231 = arith.mulf %230, %229 : vector<9x256xf32>
    %cst_163 = arith.constant 4.471500e-02 : f32
    %232 = vector.broadcast %cst_163 : f32 to vector<9x256xf32>
    %233 = arith.mulf %232, %229 : vector<9x256xf32>
    %234 = arith.mulf %233, %229 : vector<9x256xf32>
    %235 = arith.mulf %234, %229 : vector<9x256xf32>
    %236 = arith.addf %229, %235 : vector<9x256xf32>
    %cst_164 = arith.constant 0.797884583 : f32
    %237 = vector.broadcast %cst_164 : f32 to vector<9x256xf32>
    %238 = arith.mulf %237, %236 : vector<9x256xf32>
    %239 = math.tanh %238 : vector<9x256xf32>
    %cst_165 = arith.constant 1.000000e+00 : f32
    %240 = vector.broadcast %cst_165 : f32 to vector<9x256xf32>
    %241 = arith.addf %240, %239 : vector<9x256xf32>
    %242 = arith.mulf %231, %241 : vector<9x256xf32>
    %c0_166 = arith.constant 0 : index
    %c0_167 = arith.constant 0 : index
    %c0_168 = arith.constant 0 : index
    %243 = vector.load %arg23[%c0_166, %c0_167, %c0_168] : memref<3x256x64xf32, #tpu.memory_space<vmem>>, vector<1x256x64xf32>
    %244 = vector.shape_cast %243 : vector<1x256x64xf32> to vector<256x64xf32>
    %cst_169 = arith.constant dense<0.000000e+00> : vector<9x64xf32>
    %245 = tpu.matmul %242, %244, %cst_169 {dimension_numbers = #tpu.dot_dimension_numbers<[1], [0], [0], [1], [0, 0, 1, 1], [], []>} : vector<9x256xf32>, vector<256x64xf32>, vector<9x64xf32> -> vector<9x64xf32>
    %c0_170 = arith.constant 0 : index
    %c0_171 = arith.constant 0 : index
    %c0_172 = arith.constant 0 : index
    %246 = vector.load %arg24[%c0_170, %c0_171, %c0_172] : memref<3x1x64xf32, #tpu.memory_space<vmem>>, vector<1x1x64xf32>
    %247 = vector.shape_cast %246 : vector<1x1x64xf32> to vector<1x64xf32>
    %248 = vector.broadcast %247 : vector<1x64xf32> to vector<9x64xf32>
    %249 = arith.addf %245, %248 : vector<9x64xf32>
    %c0_173 = arith.constant 0 : index
    %c0_174 = arith.constant 0 : index
    %c0_175 = arith.constant 0 : index
    %250 = vector.load %arg25[%c0_173, %c0_174, %c0_175] : memref<3x1x64xf32, #tpu.memory_space<vmem>>, vector<1x1x64xf32>
    %251 = vector.shape_cast %250 : vector<1x1x64xf32> to vector<1x64xf32>
    %252 = vector.broadcast %251 : vector<1x64xf32> to vector<9x64xf32>
    %253 = arith.mulf %252, %249 : vector<9x64xf32>
    %254 = arith.addf %196, %253 : vector<9x64xf32>
    %c1_176 = arith.constant 1 : index
    %c0_177 = arith.constant 0 : index
    %c0_178 = arith.constant 0 : index
    %255 = vector.load %arg8[%c1_176, %c0_177, %c0_178] : memref<3x1x64xf32, #tpu.memory_space<vmem>>, vector<1x1x64xf32>
    %256 = vector.shape_cast %255 : vector<1x1x64xf32> to vector<1x64xf32>
    %c1_179 = arith.constant 1 : index
    %c0_180 = arith.constant 0 : index
    %c0_181 = arith.constant 0 : index
    %257 = vector.load %arg9[%c1_179, %c0_180, %c0_181] : memref<3x1x64xf32, #tpu.memory_space<vmem>>, vector<1x1x64xf32>
    %258 = vector.shape_cast %257 : vector<1x1x64xf32> to vector<1x64xf32>
    %cst_182 = arith.constant dense<0.000000e+00> : vector<9xf32>
    %259 = vector.multi_reduction <add>, %254, %cst_182 [1] : vector<9x64xf32> to vector<9xf32>
    %260 = vector.shape_cast %259 : vector<9xf32> to vector<9x1xf32>
    %cst_183 = arith.constant 6.400000e+01 : f32
    %261 = vector.broadcast %cst_183 : f32 to vector<9x1xf32>
    %262 = arith.divf %260, %261 : vector<9x1xf32>
    %263 = vector.broadcast %262 : vector<9x1xf32> to vector<9x64xf32>
    %264 = arith.subf %254, %263 : vector<9x64xf32>
    %265 = arith.mulf %264, %264 : vector<9x64xf32>
    %cst_184 = arith.constant dense<0.000000e+00> : vector<9xf32>
    %266 = vector.multi_reduction <add>, %265, %cst_184 [1] : vector<9x64xf32> to vector<9xf32>
    %267 = vector.shape_cast %266 : vector<9xf32> to vector<9x1xf32>
    %cst_185 = arith.constant 6.400000e+01 : f32
    %268 = vector.broadcast %cst_185 : f32 to vector<9x1xf32>
    %269 = arith.divf %267, %268 : vector<9x1xf32>
    %270 = vector.broadcast %262 : vector<9x1xf32> to vector<9x64xf32>
    %271 = arith.subf %254, %270 : vector<9x64xf32>
    %cst_186 = arith.constant 9.99999997E-7 : f32
    %272 = vector.broadcast %cst_186 : f32 to vector<9x1xf32>
    %273 = arith.addf %269, %272 : vector<9x1xf32>
    %274 = math.rsqrt %273 : vector<9x1xf32>
    %275 = vector.broadcast %274 : vector<9x1xf32> to vector<9x64xf32>
    %276 = arith.mulf %271, %275 : vector<9x64xf32>
    %277 = vector.broadcast %256 : vector<1x64xf32> to vector<9x64xf32>
    %278 = arith.mulf %276, %277 : vector<9x64xf32>
    %279 = vector.broadcast %258 : vector<1x64xf32> to vector<9x64xf32>
    %280 = arith.addf %278, %279 : vector<9x64xf32>
    %cst_187 = arith.constant 0.000000e+00 : f32
    %281 = vector.broadcast %cst_187 : f32 to vector<9x64xf32>
    %c4 = arith.constant 4 : index
    %c0_188 = arith.constant 0 : index
    %c0_189 = arith.constant 0 : index
    %282 = vector.load %arg10[%c4, %c0_188, %c0_189] : memref<12x64x16xf32, #tpu.memory_space<vmem>>, vector<1x64x16xf32>
    %283 = vector.shape_cast %282 : vector<1x64x16xf32> to vector<64x16xf32>
    %cst_190 = arith.constant dense<0.000000e+00> : vector<9x16xf32>
    %284 = tpu.matmul %280, %283, %cst_190 {dimension_numbers = #tpu.dot_dimension_numbers<[1], [0], [0], [1], [0, 0, 1, 1], [], []>} : vector<9x64xf32>, vector<64x16xf32>, vector<9x16xf32> -> vector<9x16xf32>
    %c4_191 = arith.constant 4 : index
    %c0_192 = arith.constant 0 : index
    %c0_193 = arith.constant 0 : index
    %285 = vector.load %arg11[%c4_191, %c0_192, %c0_193] : memref<12x1x16xf32, #tpu.memory_space<vmem>>, vector<1x1x16xf32>
    %286 = vector.shape_cast %285 : vector<1x1x16xf32> to vector<1x16xf32>
    %287 = vector.broadcast %286 : vector<1x16xf32> to vector<9x16xf32>
    %288 = arith.addf %284, %287 : vector<9x16xf32>
    %c4_194 = arith.constant 4 : index
    %c0_195 = arith.constant 0 : index
    %c0_196 = arith.constant 0 : index
    %289 = vector.load %arg12[%c4_194, %c0_195, %c0_196] : memref<12x64x16xf32, #tpu.memory_space<vmem>>, vector<1x64x16xf32>
    %290 = vector.shape_cast %289 : vector<1x64x16xf32> to vector<64x16xf32>
    %cst_197 = arith.constant dense<0.000000e+00> : vector<9x16xf32>
    %291 = tpu.matmul %280, %290, %cst_197 {dimension_numbers = #tpu.dot_dimension_numbers<[1], [0], [0], [1], [0, 0, 1, 1], [], []>} : vector<9x64xf32>, vector<64x16xf32>, vector<9x16xf32> -> vector<9x16xf32>
    %c4_198 = arith.constant 4 : index
    %c0_199 = arith.constant 0 : index
    %c0_200 = arith.constant 0 : index
    %292 = vector.load %arg13[%c4_198, %c0_199, %c0_200] : memref<12x1x16xf32, #tpu.memory_space<vmem>>, vector<1x1x16xf32>
    %293 = vector.shape_cast %292 : vector<1x1x16xf32> to vector<1x16xf32>
    %294 = vector.broadcast %293 : vector<1x16xf32> to vector<9x16xf32>
    %295 = arith.addf %291, %294 : vector<9x16xf32>
    %c4_201 = arith.constant 4 : index
    %c0_202 = arith.constant 0 : index
    %c0_203 = arith.constant 0 : index
    %296 = vector.load %arg14[%c4_201, %c0_202, %c0_203] : memref<12x64x16xf32, #tpu.memory_space<vmem>>, vector<1x64x16xf32>
    %297 = vector.shape_cast %296 : vector<1x64x16xf32> to vector<64x16xf32>
    %cst_204 = arith.constant dense<0.000000e+00> : vector<9x16xf32>
    %298 = tpu.matmul %280, %297, %cst_204 {dimension_numbers = #tpu.dot_dimension_numbers<[1], [0], [0], [1], [0, 0, 1, 1], [], []>} : vector<9x64xf32>, vector<64x16xf32>, vector<9x16xf32> -> vector<9x16xf32>
    %c4_205 = arith.constant 4 : index
    %c0_206 = arith.constant 0 : index
    %c0_207 = arith.constant 0 : index
    %299 = vector.load %arg15[%c4_205, %c0_206, %c0_207] : memref<12x1x16xf32, #tpu.memory_space<vmem>>, vector<1x1x16xf32>
    %300 = vector.shape_cast %299 : vector<1x1x16xf32> to vector<1x16xf32>
    %301 = vector.broadcast %300 : vector<1x16xf32> to vector<9x16xf32>
    %302 = arith.addf %298, %301 : vector<9x16xf32>
    %cst_208 = arith.constant dense<0.000000e+00> : vector<9x9xf32>
    %303 = tpu.matmul %288, %295, %cst_208 {dimension_numbers = #tpu.dot_dimension_numbers<[1], [1], [0], [0], [0, 0, 1, 0], [], []>} : vector<9x16xf32>, vector<9x16xf32>, vector<9x9xf32> -> vector<9x9xf32>
    %cst_209 = arith.constant dense<0xFF800000> : vector<9xf32>
    %304 = vector.multi_reduction <maximumf>, %303, %cst_209 [1] : vector<9x9xf32> to vector<9xf32>
    %305 = vector.shape_cast %304 : vector<9xf32> to vector<9x1xf32>
    %306 = vector.broadcast %305 : vector<9x1xf32> to vector<9x9xf32>
    %307 = arith.subf %303, %306 : vector<9x9xf32>
    %308 = math.exp %307 : vector<9x9xf32>
    %cst_210 = arith.constant dense<0.000000e+00> : vector<9xf32>
    %309 = vector.multi_reduction <add>, %308, %cst_210 [1] : vector<9x9xf32> to vector<9xf32>
    %310 = vector.shape_cast %309 : vector<9xf32> to vector<9x1xf32>
    %311 = tpu.reciprocal %310 {approx = true} : vector<9x1xf32> -> vector<9x1xf32>
    %312 = vector.broadcast %311 : vector<9x1xf32> to vector<9x9xf32>
    %313 = arith.mulf %308, %312 : vector<9x9xf32>
    %cst_211 = arith.constant dense<0.000000e+00> : vector<9x16xf32>
    %314 = tpu.matmul %313, %302, %cst_211 {dimension_numbers = #tpu.dot_dimension_numbers<[1], [0], [0], [1], [0, 0, 1, 1], [], []>} : vector<9x9xf32>, vector<9x16xf32>, vector<9x16xf32> -> vector<9x16xf32>
    %c4_212 = arith.constant 4 : index
    %c0_213 = arith.constant 0 : index
    %c0_214 = arith.constant 0 : index
    %315 = vector.load %arg16[%c4_212, %c0_213, %c0_214] : memref<12x16x64xf32, #tpu.memory_space<vmem>>, vector<1x16x64xf32>
    %316 = vector.shape_cast %315 : vector<1x16x64xf32> to vector<16x64xf32>
    %cst_215 = arith.constant dense<0.000000e+00> : vector<9x64xf32>
    %317 = tpu.matmul %314, %316, %cst_215 {dimension_numbers = #tpu.dot_dimension_numbers<[1], [0], [0], [1], [0, 0, 1, 1], [], []>} : vector<9x16xf32>, vector<16x64xf32>, vector<9x64xf32> -> vector<9x64xf32>
    %318 = arith.addf %281, %317 : vector<9x64xf32>
    %c5 = arith.constant 5 : index
    %c0_216 = arith.constant 0 : index
    %c0_217 = arith.constant 0 : index
    %319 = vector.load %arg10[%c5, %c0_216, %c0_217] : memref<12x64x16xf32, #tpu.memory_space<vmem>>, vector<1x64x16xf32>
    %320 = vector.shape_cast %319 : vector<1x64x16xf32> to vector<64x16xf32>
    %cst_218 = arith.constant dense<0.000000e+00> : vector<9x16xf32>
    %321 = tpu.matmul %280, %320, %cst_218 {dimension_numbers = #tpu.dot_dimension_numbers<[1], [0], [0], [1], [0, 0, 1, 1], [], []>} : vector<9x64xf32>, vector<64x16xf32>, vector<9x16xf32> -> vector<9x16xf32>
    %c5_219 = arith.constant 5 : index
    %c0_220 = arith.constant 0 : index
    %c0_221 = arith.constant 0 : index
    %322 = vector.load %arg11[%c5_219, %c0_220, %c0_221] : memref<12x1x16xf32, #tpu.memory_space<vmem>>, vector<1x1x16xf32>
    %323 = vector.shape_cast %322 : vector<1x1x16xf32> to vector<1x16xf32>
    %324 = vector.broadcast %323 : vector<1x16xf32> to vector<9x16xf32>
    %325 = arith.addf %321, %324 : vector<9x16xf32>
    %c5_222 = arith.constant 5 : index
    %c0_223 = arith.constant 0 : index
    %c0_224 = arith.constant 0 : index
    %326 = vector.load %arg12[%c5_222, %c0_223, %c0_224] : memref<12x64x16xf32, #tpu.memory_space<vmem>>, vector<1x64x16xf32>
    %327 = vector.shape_cast %326 : vector<1x64x16xf32> to vector<64x16xf32>
    %cst_225 = arith.constant dense<0.000000e+00> : vector<9x16xf32>
    %328 = tpu.matmul %280, %327, %cst_225 {dimension_numbers = #tpu.dot_dimension_numbers<[1], [0], [0], [1], [0, 0, 1, 1], [], []>} : vector<9x64xf32>, vector<64x16xf32>, vector<9x16xf32> -> vector<9x16xf32>
    %c5_226 = arith.constant 5 : index
    %c0_227 = arith.constant 0 : index
    %c0_228 = arith.constant 0 : index
    %329 = vector.load %arg13[%c5_226, %c0_227, %c0_228] : memref<12x1x16xf32, #tpu.memory_space<vmem>>, vector<1x1x16xf32>
    %330 = vector.shape_cast %329 : vector<1x1x16xf32> to vector<1x16xf32>
    %331 = vector.broadcast %330 : vector<1x16xf32> to vector<9x16xf32>
    %332 = arith.addf %328, %331 : vector<9x16xf32>
    %c5_229 = arith.constant 5 : index
    %c0_230 = arith.constant 0 : index
    %c0_231 = arith.constant 0 : index
    %333 = vector.load %arg14[%c5_229, %c0_230, %c0_231] : memref<12x64x16xf32, #tpu.memory_space<vmem>>, vector<1x64x16xf32>
    %334 = vector.shape_cast %333 : vector<1x64x16xf32> to vector<64x16xf32>
    %cst_232 = arith.constant dense<0.000000e+00> : vector<9x16xf32>
    %335 = tpu.matmul %280, %334, %cst_232 {dimension_numbers = #tpu.dot_dimension_numbers<[1], [0], [0], [1], [0, 0, 1, 1], [], []>} : vector<9x64xf32>, vector<64x16xf32>, vector<9x16xf32> -> vector<9x16xf32>
    %c5_233 = arith.constant 5 : index
    %c0_234 = arith.constant 0 : index
    %c0_235 = arith.constant 0 : index
    %336 = vector.load %arg15[%c5_233, %c0_234, %c0_235] : memref<12x1x16xf32, #tpu.memory_space<vmem>>, vector<1x1x16xf32>
    %337 = vector.shape_cast %336 : vector<1x1x16xf32> to vector<1x16xf32>
    %338 = vector.broadcast %337 : vector<1x16xf32> to vector<9x16xf32>
    %339 = arith.addf %335, %338 : vector<9x16xf32>
    %cst_236 = arith.constant dense<0.000000e+00> : vector<9x9xf32>
    %340 = tpu.matmul %325, %332, %cst_236 {dimension_numbers = #tpu.dot_dimension_numbers<[1], [1], [0], [0], [0, 0, 1, 0], [], []>} : vector<9x16xf32>, vector<9x16xf32>, vector<9x9xf32> -> vector<9x9xf32>
    %cst_237 = arith.constant dense<0xFF800000> : vector<9xf32>
    %341 = vector.multi_reduction <maximumf>, %340, %cst_237 [1] : vector<9x9xf32> to vector<9xf32>
    %342 = vector.shape_cast %341 : vector<9xf32> to vector<9x1xf32>
    %343 = vector.broadcast %342 : vector<9x1xf32> to vector<9x9xf32>
    %344 = arith.subf %340, %343 : vector<9x9xf32>
    %345 = math.exp %344 : vector<9x9xf32>
    %cst_238 = arith.constant dense<0.000000e+00> : vector<9xf32>
    %346 = vector.multi_reduction <add>, %345, %cst_238 [1] : vector<9x9xf32> to vector<9xf32>
    %347 = vector.shape_cast %346 : vector<9xf32> to vector<9x1xf32>
    %348 = tpu.reciprocal %347 {approx = true} : vector<9x1xf32> -> vector<9x1xf32>
    %349 = vector.broadcast %348 : vector<9x1xf32> to vector<9x9xf32>
    %350 = arith.mulf %345, %349 : vector<9x9xf32>
    %cst_239 = arith.constant dense<0.000000e+00> : vector<9x16xf32>
    %351 = tpu.matmul %350, %339, %cst_239 {dimension_numbers = #tpu.dot_dimension_numbers<[1], [0], [0], [1], [0, 0, 1, 1], [], []>} : vector<9x9xf32>, vector<9x16xf32>, vector<9x16xf32> -> vector<9x16xf32>
    %c5_240 = arith.constant 5 : index
    %c0_241 = arith.constant 0 : index
    %c0_242 = arith.constant 0 : index
    %352 = vector.load %arg16[%c5_240, %c0_241, %c0_242] : memref<12x16x64xf32, #tpu.memory_space<vmem>>, vector<1x16x64xf32>
    %353 = vector.shape_cast %352 : vector<1x16x64xf32> to vector<16x64xf32>
    %cst_243 = arith.constant dense<0.000000e+00> : vector<9x64xf32>
    %354 = tpu.matmul %351, %353, %cst_243 {dimension_numbers = #tpu.dot_dimension_numbers<[1], [0], [0], [1], [0, 0, 1, 1], [], []>} : vector<9x16xf32>, vector<16x64xf32>, vector<9x64xf32> -> vector<9x64xf32>
    %355 = arith.addf %318, %354 : vector<9x64xf32>
    %c6 = arith.constant 6 : index
    %c0_244 = arith.constant 0 : index
    %c0_245 = arith.constant 0 : index
    %356 = vector.load %arg10[%c6, %c0_244, %c0_245] : memref<12x64x16xf32, #tpu.memory_space<vmem>>, vector<1x64x16xf32>
    %357 = vector.shape_cast %356 : vector<1x64x16xf32> to vector<64x16xf32>
    %cst_246 = arith.constant dense<0.000000e+00> : vector<9x16xf32>
    %358 = tpu.matmul %280, %357, %cst_246 {dimension_numbers = #tpu.dot_dimension_numbers<[1], [0], [0], [1], [0, 0, 1, 1], [], []>} : vector<9x64xf32>, vector<64x16xf32>, vector<9x16xf32> -> vector<9x16xf32>
    %c6_247 = arith.constant 6 : index
    %c0_248 = arith.constant 0 : index
    %c0_249 = arith.constant 0 : index
    %359 = vector.load %arg11[%c6_247, %c0_248, %c0_249] : memref<12x1x16xf32, #tpu.memory_space<vmem>>, vector<1x1x16xf32>
    %360 = vector.shape_cast %359 : vector<1x1x16xf32> to vector<1x16xf32>
    %361 = vector.broadcast %360 : vector<1x16xf32> to vector<9x16xf32>
    %362 = arith.addf %358, %361 : vector<9x16xf32>
    %c6_250 = arith.constant 6 : index
    %c0_251 = arith.constant 0 : index
    %c0_252 = arith.constant 0 : index
    %363 = vector.load %arg12[%c6_250, %c0_251, %c0_252] : memref<12x64x16xf32, #tpu.memory_space<vmem>>, vector<1x64x16xf32>
    %364 = vector.shape_cast %363 : vector<1x64x16xf32> to vector<64x16xf32>
    %cst_253 = arith.constant dense<0.000000e+00> : vector<9x16xf32>
    %365 = tpu.matmul %280, %364, %cst_253 {dimension_numbers = #tpu.dot_dimension_numbers<[1], [0], [0], [1], [0, 0, 1, 1], [], []>} : vector<9x64xf32>, vector<64x16xf32>, vector<9x16xf32> -> vector<9x16xf32>
    %c6_254 = arith.constant 6 : index
    %c0_255 = arith.constant 0 : index
    %c0_256 = arith.constant 0 : index
    %366 = vector.load %arg13[%c6_254, %c0_255, %c0_256] : memref<12x1x16xf32, #tpu.memory_space<vmem>>, vector<1x1x16xf32>
    %367 = vector.shape_cast %366 : vector<1x1x16xf32> to vector<1x16xf32>
    %368 = vector.broadcast %367 : vector<1x16xf32> to vector<9x16xf32>
    %369 = arith.addf %365, %368 : vector<9x16xf32>
    %c6_257 = arith.constant 6 : index
    %c0_258 = arith.constant 0 : index
    %c0_259 = arith.constant 0 : index
    %370 = vector.load %arg14[%c6_257, %c0_258, %c0_259] : memref<12x64x16xf32, #tpu.memory_space<vmem>>, vector<1x64x16xf32>
    %371 = vector.shape_cast %370 : vector<1x64x16xf32> to vector<64x16xf32>
    %cst_260 = arith.constant dense<0.000000e+00> : vector<9x16xf32>
    %372 = tpu.matmul %280, %371, %cst_260 {dimension_numbers = #tpu.dot_dimension_numbers<[1], [0], [0], [1], [0, 0, 1, 1], [], []>} : vector<9x64xf32>, vector<64x16xf32>, vector<9x16xf32> -> vector<9x16xf32>
    %c6_261 = arith.constant 6 : index
    %c0_262 = arith.constant 0 : index
    %c0_263 = arith.constant 0 : index
    %373 = vector.load %arg15[%c6_261, %c0_262, %c0_263] : memref<12x1x16xf32, #tpu.memory_space<vmem>>, vector<1x1x16xf32>
    %374 = vector.shape_cast %373 : vector<1x1x16xf32> to vector<1x16xf32>
    %375 = vector.broadcast %374 : vector<1x16xf32> to vector<9x16xf32>
    %376 = arith.addf %372, %375 : vector<9x16xf32>
    %cst_264 = arith.constant dense<0.000000e+00> : vector<9x9xf32>
    %377 = tpu.matmul %362, %369, %cst_264 {dimension_numbers = #tpu.dot_dimension_numbers<[1], [1], [0], [0], [0, 0, 1, 0], [], []>} : vector<9x16xf32>, vector<9x16xf32>, vector<9x9xf32> -> vector<9x9xf32>
    %cst_265 = arith.constant dense<0xFF800000> : vector<9xf32>
    %378 = vector.multi_reduction <maximumf>, %377, %cst_265 [1] : vector<9x9xf32> to vector<9xf32>
    %379 = vector.shape_cast %378 : vector<9xf32> to vector<9x1xf32>
    %380 = vector.broadcast %379 : vector<9x1xf32> to vector<9x9xf32>
    %381 = arith.subf %377, %380 : vector<9x9xf32>
    %382 = math.exp %381 : vector<9x9xf32>
    %cst_266 = arith.constant dense<0.000000e+00> : vector<9xf32>
    %383 = vector.multi_reduction <add>, %382, %cst_266 [1] : vector<9x9xf32> to vector<9xf32>
    %384 = vector.shape_cast %383 : vector<9xf32> to vector<9x1xf32>
    %385 = tpu.reciprocal %384 {approx = true} : vector<9x1xf32> -> vector<9x1xf32>
    %386 = vector.broadcast %385 : vector<9x1xf32> to vector<9x9xf32>
    %387 = arith.mulf %382, %386 : vector<9x9xf32>
    %cst_267 = arith.constant dense<0.000000e+00> : vector<9x16xf32>
    %388 = tpu.matmul %387, %376, %cst_267 {dimension_numbers = #tpu.dot_dimension_numbers<[1], [0], [0], [1], [0, 0, 1, 1], [], []>} : vector<9x9xf32>, vector<9x16xf32>, vector<9x16xf32> -> vector<9x16xf32>
    %c6_268 = arith.constant 6 : index
    %c0_269 = arith.constant 0 : index
    %c0_270 = arith.constant 0 : index
    %389 = vector.load %arg16[%c6_268, %c0_269, %c0_270] : memref<12x16x64xf32, #tpu.memory_space<vmem>>, vector<1x16x64xf32>
    %390 = vector.shape_cast %389 : vector<1x16x64xf32> to vector<16x64xf32>
    %cst_271 = arith.constant dense<0.000000e+00> : vector<9x64xf32>
    %391 = tpu.matmul %388, %390, %cst_271 {dimension_numbers = #tpu.dot_dimension_numbers<[1], [0], [0], [1], [0, 0, 1, 1], [], []>} : vector<9x16xf32>, vector<16x64xf32>, vector<9x64xf32> -> vector<9x64xf32>
    %392 = arith.addf %355, %391 : vector<9x64xf32>
    %c7 = arith.constant 7 : index
    %c0_272 = arith.constant 0 : index
    %c0_273 = arith.constant 0 : index
    %393 = vector.load %arg10[%c7, %c0_272, %c0_273] : memref<12x64x16xf32, #tpu.memory_space<vmem>>, vector<1x64x16xf32>
    %394 = vector.shape_cast %393 : vector<1x64x16xf32> to vector<64x16xf32>
    %cst_274 = arith.constant dense<0.000000e+00> : vector<9x16xf32>
    %395 = tpu.matmul %280, %394, %cst_274 {dimension_numbers = #tpu.dot_dimension_numbers<[1], [0], [0], [1], [0, 0, 1, 1], [], []>} : vector<9x64xf32>, vector<64x16xf32>, vector<9x16xf32> -> vector<9x16xf32>
    %c7_275 = arith.constant 7 : index
    %c0_276 = arith.constant 0 : index
    %c0_277 = arith.constant 0 : index
    %396 = vector.load %arg11[%c7_275, %c0_276, %c0_277] : memref<12x1x16xf32, #tpu.memory_space<vmem>>, vector<1x1x16xf32>
    %397 = vector.shape_cast %396 : vector<1x1x16xf32> to vector<1x16xf32>
    %398 = vector.broadcast %397 : vector<1x16xf32> to vector<9x16xf32>
    %399 = arith.addf %395, %398 : vector<9x16xf32>
    %c7_278 = arith.constant 7 : index
    %c0_279 = arith.constant 0 : index
    %c0_280 = arith.constant 0 : index
    %400 = vector.load %arg12[%c7_278, %c0_279, %c0_280] : memref<12x64x16xf32, #tpu.memory_space<vmem>>, vector<1x64x16xf32>
    %401 = vector.shape_cast %400 : vector<1x64x16xf32> to vector<64x16xf32>
    %cst_281 = arith.constant dense<0.000000e+00> : vector<9x16xf32>
    %402 = tpu.matmul %280, %401, %cst_281 {dimension_numbers = #tpu.dot_dimension_numbers<[1], [0], [0], [1], [0, 0, 1, 1], [], []>} : vector<9x64xf32>, vector<64x16xf32>, vector<9x16xf32> -> vector<9x16xf32>
    %c7_282 = arith.constant 7 : index
    %c0_283 = arith.constant 0 : index
    %c0_284 = arith.constant 0 : index
    %403 = vector.load %arg13[%c7_282, %c0_283, %c0_284] : memref<12x1x16xf32, #tpu.memory_space<vmem>>, vector<1x1x16xf32>
    %404 = vector.shape_cast %403 : vector<1x1x16xf32> to vector<1x16xf32>
    %405 = vector.broadcast %404 : vector<1x16xf32> to vector<9x16xf32>
    %406 = arith.addf %402, %405 : vector<9x16xf32>
    %c7_285 = arith.constant 7 : index
    %c0_286 = arith.constant 0 : index
    %c0_287 = arith.constant 0 : index
    %407 = vector.load %arg14[%c7_285, %c0_286, %c0_287] : memref<12x64x16xf32, #tpu.memory_space<vmem>>, vector<1x64x16xf32>
    %408 = vector.shape_cast %407 : vector<1x64x16xf32> to vector<64x16xf32>
    %cst_288 = arith.constant dense<0.000000e+00> : vector<9x16xf32>
    %409 = tpu.matmul %280, %408, %cst_288 {dimension_numbers = #tpu.dot_dimension_numbers<[1], [0], [0], [1], [0, 0, 1, 1], [], []>} : vector<9x64xf32>, vector<64x16xf32>, vector<9x16xf32> -> vector<9x16xf32>
    %c7_289 = arith.constant 7 : index
    %c0_290 = arith.constant 0 : index
    %c0_291 = arith.constant 0 : index
    %410 = vector.load %arg15[%c7_289, %c0_290, %c0_291] : memref<12x1x16xf32, #tpu.memory_space<vmem>>, vector<1x1x16xf32>
    %411 = vector.shape_cast %410 : vector<1x1x16xf32> to vector<1x16xf32>
    %412 = vector.broadcast %411 : vector<1x16xf32> to vector<9x16xf32>
    %413 = arith.addf %409, %412 : vector<9x16xf32>
    %cst_292 = arith.constant dense<0.000000e+00> : vector<9x9xf32>
    %414 = tpu.matmul %399, %406, %cst_292 {dimension_numbers = #tpu.dot_dimension_numbers<[1], [1], [0], [0], [0, 0, 1, 0], [], []>} : vector<9x16xf32>, vector<9x16xf32>, vector<9x9xf32> -> vector<9x9xf32>
    %cst_293 = arith.constant dense<0xFF800000> : vector<9xf32>
    %415 = vector.multi_reduction <maximumf>, %414, %cst_293 [1] : vector<9x9xf32> to vector<9xf32>
    %416 = vector.shape_cast %415 : vector<9xf32> to vector<9x1xf32>
    %417 = vector.broadcast %416 : vector<9x1xf32> to vector<9x9xf32>
    %418 = arith.subf %414, %417 : vector<9x9xf32>
    %419 = math.exp %418 : vector<9x9xf32>
    %cst_294 = arith.constant dense<0.000000e+00> : vector<9xf32>
    %420 = vector.multi_reduction <add>, %419, %cst_294 [1] : vector<9x9xf32> to vector<9xf32>
    %421 = vector.shape_cast %420 : vector<9xf32> to vector<9x1xf32>
    %422 = tpu.reciprocal %421 {approx = true} : vector<9x1xf32> -> vector<9x1xf32>
    %423 = vector.broadcast %422 : vector<9x1xf32> to vector<9x9xf32>
    %424 = arith.mulf %419, %423 : vector<9x9xf32>
    %cst_295 = arith.constant dense<0.000000e+00> : vector<9x16xf32>
    %425 = tpu.matmul %424, %413, %cst_295 {dimension_numbers = #tpu.dot_dimension_numbers<[1], [0], [0], [1], [0, 0, 1, 1], [], []>} : vector<9x9xf32>, vector<9x16xf32>, vector<9x16xf32> -> vector<9x16xf32>
    %c7_296 = arith.constant 7 : index
    %c0_297 = arith.constant 0 : index
    %c0_298 = arith.constant 0 : index
    %426 = vector.load %arg16[%c7_296, %c0_297, %c0_298] : memref<12x16x64xf32, #tpu.memory_space<vmem>>, vector<1x16x64xf32>
    %427 = vector.shape_cast %426 : vector<1x16x64xf32> to vector<16x64xf32>
    %cst_299 = arith.constant dense<0.000000e+00> : vector<9x64xf32>
    %428 = tpu.matmul %425, %427, %cst_299 {dimension_numbers = #tpu.dot_dimension_numbers<[1], [0], [0], [1], [0, 0, 1, 1], [], []>} : vector<9x16xf32>, vector<16x64xf32>, vector<9x64xf32> -> vector<9x64xf32>
    %429 = arith.addf %392, %428 : vector<9x64xf32>
    %c1_300 = arith.constant 1 : index
    %c0_301 = arith.constant 0 : index
    %c0_302 = arith.constant 0 : index
    %430 = vector.load %arg18[%c1_300, %c0_301, %c0_302] : memref<3x1x64xf32, #tpu.memory_space<vmem>>, vector<1x1x64xf32>
    %431 = vector.shape_cast %430 : vector<1x1x64xf32> to vector<1x64xf32>
    %c1_303 = arith.constant 1 : index
    %c0_304 = arith.constant 0 : index
    %c0_305 = arith.constant 0 : index
    %432 = vector.load %arg17[%c1_303, %c0_304, %c0_305] : memref<3x1x64xf32, #tpu.memory_space<vmem>>, vector<1x1x64xf32>
    %433 = vector.shape_cast %432 : vector<1x1x64xf32> to vector<1x64xf32>
    %434 = vector.broadcast %433 : vector<1x64xf32> to vector<9x64xf32>
    %435 = arith.addf %429, %434 : vector<9x64xf32>
    %436 = vector.broadcast %431 : vector<1x64xf32> to vector<9x64xf32>
    %437 = arith.mulf %436, %435 : vector<9x64xf32>
    %438 = arith.addf %254, %437 : vector<9x64xf32>
    %c1_306 = arith.constant 1 : index
    %c0_307 = arith.constant 0 : index
    %c0_308 = arith.constant 0 : index
    %439 = vector.load %arg19[%c1_306, %c0_307, %c0_308] : memref<3x1x64xf32, #tpu.memory_space<vmem>>, vector<1x1x64xf32>
    %440 = vector.shape_cast %439 : vector<1x1x64xf32> to vector<1x64xf32>
    %c1_309 = arith.constant 1 : index
    %c0_310 = arith.constant 0 : index
    %c0_311 = arith.constant 0 : index
    %441 = vector.load %arg20[%c1_309, %c0_310, %c0_311] : memref<3x1x64xf32, #tpu.memory_space<vmem>>, vector<1x1x64xf32>
    %442 = vector.shape_cast %441 : vector<1x1x64xf32> to vector<1x64xf32>
    %cst_312 = arith.constant dense<0.000000e+00> : vector<9xf32>
    %443 = vector.multi_reduction <add>, %438, %cst_312 [1] : vector<9x64xf32> to vector<9xf32>
    %444 = vector.shape_cast %443 : vector<9xf32> to vector<9x1xf32>
    %cst_313 = arith.constant 6.400000e+01 : f32
    %445 = vector.broadcast %cst_313 : f32 to vector<9x1xf32>
    %446 = arith.divf %444, %445 : vector<9x1xf32>
    %447 = vector.broadcast %446 : vector<9x1xf32> to vector<9x64xf32>
    %448 = arith.subf %438, %447 : vector<9x64xf32>
    %449 = arith.mulf %448, %448 : vector<9x64xf32>
    %cst_314 = arith.constant dense<0.000000e+00> : vector<9xf32>
    %450 = vector.multi_reduction <add>, %449, %cst_314 [1] : vector<9x64xf32> to vector<9xf32>
    %451 = vector.shape_cast %450 : vector<9xf32> to vector<9x1xf32>
    %cst_315 = arith.constant 6.400000e+01 : f32
    %452 = vector.broadcast %cst_315 : f32 to vector<9x1xf32>
    %453 = arith.divf %451, %452 : vector<9x1xf32>
    %454 = vector.broadcast %446 : vector<9x1xf32> to vector<9x64xf32>
    %455 = arith.subf %438, %454 : vector<9x64xf32>
    %cst_316 = arith.constant 9.99999997E-7 : f32
    %456 = vector.broadcast %cst_316 : f32 to vector<9x1xf32>
    %457 = arith.addf %453, %456 : vector<9x1xf32>
    %458 = math.rsqrt %457 : vector<9x1xf32>
    %459 = vector.broadcast %458 : vector<9x1xf32> to vector<9x64xf32>
    %460 = arith.mulf %455, %459 : vector<9x64xf32>
    %461 = vector.broadcast %440 : vector<1x64xf32> to vector<9x64xf32>
    %462 = arith.mulf %460, %461 : vector<9x64xf32>
    %463 = vector.broadcast %442 : vector<1x64xf32> to vector<9x64xf32>
    %464 = arith.addf %462, %463 : vector<9x64xf32>
    %c1_317 = arith.constant 1 : index
    %c0_318 = arith.constant 0 : index
    %c0_319 = arith.constant 0 : index
    %465 = vector.load %arg21[%c1_317, %c0_318, %c0_319] : memref<3x64x256xf32, #tpu.memory_space<vmem>>, vector<1x64x256xf32>
    %466 = vector.shape_cast %465 : vector<1x64x256xf32> to vector<64x256xf32>
    %cst_320 = arith.constant dense<0.000000e+00> : vector<9x256xf32>
    %467 = tpu.matmul %464, %466, %cst_320 {dimension_numbers = #tpu.dot_dimension_numbers<[1], [0], [0], [1], [0, 0, 1, 1], [], []>} : vector<9x64xf32>, vector<64x256xf32>, vector<9x256xf32> -> vector<9x256xf32>
    %c1_321 = arith.constant 1 : index
    %c0_322 = arith.constant 0 : index
    %c0_323 = arith.constant 0 : index
    %468 = vector.load %arg22[%c1_321, %c0_322, %c0_323] : memref<3x1x256xf32, #tpu.memory_space<vmem>>, vector<1x1x256xf32>
    %469 = vector.shape_cast %468 : vector<1x1x256xf32> to vector<1x256xf32>
    %470 = vector.broadcast %469 : vector<1x256xf32> to vector<9x256xf32>
    %471 = arith.addf %467, %470 : vector<9x256xf32>
    %cst_324 = arith.constant 5.000000e-01 : f32
    %472 = vector.broadcast %cst_324 : f32 to vector<9x256xf32>
    %473 = arith.mulf %472, %471 : vector<9x256xf32>
    %cst_325 = arith.constant 4.471500e-02 : f32
    %474 = vector.broadcast %cst_325 : f32 to vector<9x256xf32>
    %475 = arith.mulf %474, %471 : vector<9x256xf32>
    %476 = arith.mulf %475, %471 : vector<9x256xf32>
    %477 = arith.mulf %476, %471 : vector<9x256xf32>
    %478 = arith.addf %471, %477 : vector<9x256xf32>
    %cst_326 = arith.constant 0.797884583 : f32
    %479 = vector.broadcast %cst_326 : f32 to vector<9x256xf32>
    %480 = arith.mulf %479, %478 : vector<9x256xf32>
    %481 = math.tanh %480 : vector<9x256xf32>
    %cst_327 = arith.constant 1.000000e+00 : f32
    %482 = vector.broadcast %cst_327 : f32 to vector<9x256xf32>
    %483 = arith.addf %482, %481 : vector<9x256xf32>
    %484 = arith.mulf %473, %483 : vector<9x256xf32>
    %c1_328 = arith.constant 1 : index
    %c0_329 = arith.constant 0 : index
    %c0_330 = arith.constant 0 : index
    %485 = vector.load %arg23[%c1_328, %c0_329, %c0_330] : memref<3x256x64xf32, #tpu.memory_space<vmem>>, vector<1x256x64xf32>
    %486 = vector.shape_cast %485 : vector<1x256x64xf32> to vector<256x64xf32>
    %cst_331 = arith.constant dense<0.000000e+00> : vector<9x64xf32>
    %487 = tpu.matmul %484, %486, %cst_331 {dimension_numbers = #tpu.dot_dimension_numbers<[1], [0], [0], [1], [0, 0, 1, 1], [], []>} : vector<9x256xf32>, vector<256x64xf32>, vector<9x64xf32> -> vector<9x64xf32>
    %c1_332 = arith.constant 1 : index
    %c0_333 = arith.constant 0 : index
    %c0_334 = arith.constant 0 : index
    %488 = vector.load %arg24[%c1_332, %c0_333, %c0_334] : memref<3x1x64xf32, #tpu.memory_space<vmem>>, vector<1x1x64xf32>
    %489 = vector.shape_cast %488 : vector<1x1x64xf32> to vector<1x64xf32>
    %490 = vector.broadcast %489 : vector<1x64xf32> to vector<9x64xf32>
    %491 = arith.addf %487, %490 : vector<9x64xf32>
    %c1_335 = arith.constant 1 : index
    %c0_336 = arith.constant 0 : index
    %c0_337 = arith.constant 0 : index
    %492 = vector.load %arg25[%c1_335, %c0_336, %c0_337] : memref<3x1x64xf32, #tpu.memory_space<vmem>>, vector<1x1x64xf32>
    %493 = vector.shape_cast %492 : vector<1x1x64xf32> to vector<1x64xf32>
    %494 = vector.broadcast %493 : vector<1x64xf32> to vector<9x64xf32>
    %495 = arith.mulf %494, %491 : vector<9x64xf32>
    %496 = arith.addf %438, %495 : vector<9x64xf32>
    %c2_338 = arith.constant 2 : index
    %c0_339 = arith.constant 0 : index
    %c0_340 = arith.constant 0 : index
    %497 = vector.load %arg8[%c2_338, %c0_339, %c0_340] : memref<3x1x64xf32, #tpu.memory_space<vmem>>, vector<1x1x64xf32>
    %498 = vector.shape_cast %497 : vector<1x1x64xf32> to vector<1x64xf32>
    %c2_341 = arith.constant 2 : index
    %c0_342 = arith.constant 0 : index
    %c0_343 = arith.constant 0 : index
    %499 = vector.load %arg9[%c2_341, %c0_342, %c0_343] : memref<3x1x64xf32, #tpu.memory_space<vmem>>, vector<1x1x64xf32>
    %500 = vector.shape_cast %499 : vector<1x1x64xf32> to vector<1x64xf32>
    %cst_344 = arith.constant dense<0.000000e+00> : vector<9xf32>
    %501 = vector.multi_reduction <add>, %496, %cst_344 [1] : vector<9x64xf32> to vector<9xf32>
    %502 = vector.shape_cast %501 : vector<9xf32> to vector<9x1xf32>
    %cst_345 = arith.constant 6.400000e+01 : f32
    %503 = vector.broadcast %cst_345 : f32 to vector<9x1xf32>
    %504 = arith.divf %502, %503 : vector<9x1xf32>
    %505 = vector.broadcast %504 : vector<9x1xf32> to vector<9x64xf32>
    %506 = arith.subf %496, %505 : vector<9x64xf32>
    %507 = arith.mulf %506, %506 : vector<9x64xf32>
    %cst_346 = arith.constant dense<0.000000e+00> : vector<9xf32>
    %508 = vector.multi_reduction <add>, %507, %cst_346 [1] : vector<9x64xf32> to vector<9xf32>
    %509 = vector.shape_cast %508 : vector<9xf32> to vector<9x1xf32>
    %cst_347 = arith.constant 6.400000e+01 : f32
    %510 = vector.broadcast %cst_347 : f32 to vector<9x1xf32>
    %511 = arith.divf %509, %510 : vector<9x1xf32>
    %512 = vector.broadcast %504 : vector<9x1xf32> to vector<9x64xf32>
    %513 = arith.subf %496, %512 : vector<9x64xf32>
    %cst_348 = arith.constant 9.99999997E-7 : f32
    %514 = vector.broadcast %cst_348 : f32 to vector<9x1xf32>
    %515 = arith.addf %511, %514 : vector<9x1xf32>
    %516 = math.rsqrt %515 : vector<9x1xf32>
    %517 = vector.broadcast %516 : vector<9x1xf32> to vector<9x64xf32>
    %518 = arith.mulf %513, %517 : vector<9x64xf32>
    %519 = vector.broadcast %498 : vector<1x64xf32> to vector<9x64xf32>
    %520 = arith.mulf %518, %519 : vector<9x64xf32>
    %521 = vector.broadcast %500 : vector<1x64xf32> to vector<9x64xf32>
    %522 = arith.addf %520, %521 : vector<9x64xf32>
    %cst_349 = arith.constant 0.000000e+00 : f32
    %523 = vector.broadcast %cst_349 : f32 to vector<9x64xf32>
    %c8 = arith.constant 8 : index
    %c0_350 = arith.constant 0 : index
    %c0_351 = arith.constant 0 : index
    %524 = vector.load %arg10[%c8, %c0_350, %c0_351] : memref<12x64x16xf32, #tpu.memory_space<vmem>>, vector<1x64x16xf32>
    %525 = vector.shape_cast %524 : vector<1x64x16xf32> to vector<64x16xf32>
    %cst_352 = arith.constant dense<0.000000e+00> : vector<9x16xf32>
    %526 = tpu.matmul %522, %525, %cst_352 {dimension_numbers = #tpu.dot_dimension_numbers<[1], [0], [0], [1], [0, 0, 1, 1], [], []>} : vector<9x64xf32>, vector<64x16xf32>, vector<9x16xf32> -> vector<9x16xf32>
    %c8_353 = arith.constant 8 : index
    %c0_354 = arith.constant 0 : index
    %c0_355 = arith.constant 0 : index
    %527 = vector.load %arg11[%c8_353, %c0_354, %c0_355] : memref<12x1x16xf32, #tpu.memory_space<vmem>>, vector<1x1x16xf32>
    %528 = vector.shape_cast %527 : vector<1x1x16xf32> to vector<1x16xf32>
    %529 = vector.broadcast %528 : vector<1x16xf32> to vector<9x16xf32>
    %530 = arith.addf %526, %529 : vector<9x16xf32>
    %c8_356 = arith.constant 8 : index
    %c0_357 = arith.constant 0 : index
    %c0_358 = arith.constant 0 : index
    %531 = vector.load %arg12[%c8_356, %c0_357, %c0_358] : memref<12x64x16xf32, #tpu.memory_space<vmem>>, vector<1x64x16xf32>
    %532 = vector.shape_cast %531 : vector<1x64x16xf32> to vector<64x16xf32>
    %cst_359 = arith.constant dense<0.000000e+00> : vector<9x16xf32>
    %533 = tpu.matmul %522, %532, %cst_359 {dimension_numbers = #tpu.dot_dimension_numbers<[1], [0], [0], [1], [0, 0, 1, 1], [], []>} : vector<9x64xf32>, vector<64x16xf32>, vector<9x16xf32> -> vector<9x16xf32>
    %c8_360 = arith.constant 8 : index
    %c0_361 = arith.constant 0 : index
    %c0_362 = arith.constant 0 : index
    %534 = vector.load %arg13[%c8_360, %c0_361, %c0_362] : memref<12x1x16xf32, #tpu.memory_space<vmem>>, vector<1x1x16xf32>
    %535 = vector.shape_cast %534 : vector<1x1x16xf32> to vector<1x16xf32>
    %536 = vector.broadcast %535 : vector<1x16xf32> to vector<9x16xf32>
    %537 = arith.addf %533, %536 : vector<9x16xf32>
    %c8_363 = arith.constant 8 : index
    %c0_364 = arith.constant 0 : index
    %c0_365 = arith.constant 0 : index
    %538 = vector.load %arg14[%c8_363, %c0_364, %c0_365] : memref<12x64x16xf32, #tpu.memory_space<vmem>>, vector<1x64x16xf32>
    %539 = vector.shape_cast %538 : vector<1x64x16xf32> to vector<64x16xf32>
    %cst_366 = arith.constant dense<0.000000e+00> : vector<9x16xf32>
    %540 = tpu.matmul %522, %539, %cst_366 {dimension_numbers = #tpu.dot_dimension_numbers<[1], [0], [0], [1], [0, 0, 1, 1], [], []>} : vector<9x64xf32>, vector<64x16xf32>, vector<9x16xf32> -> vector<9x16xf32>
    %c8_367 = arith.constant 8 : index
    %c0_368 = arith.constant 0 : index
    %c0_369 = arith.constant 0 : index
    %541 = vector.load %arg15[%c8_367, %c0_368, %c0_369] : memref<12x1x16xf32, #tpu.memory_space<vmem>>, vector<1x1x16xf32>
    %542 = vector.shape_cast %541 : vector<1x1x16xf32> to vector<1x16xf32>
    %543 = vector.broadcast %542 : vector<1x16xf32> to vector<9x16xf32>
    %544 = arith.addf %540, %543 : vector<9x16xf32>
    %cst_370 = arith.constant dense<0.000000e+00> : vector<9x9xf32>
    %545 = tpu.matmul %530, %537, %cst_370 {dimension_numbers = #tpu.dot_dimension_numbers<[1], [1], [0], [0], [0, 0, 1, 0], [], []>} : vector<9x16xf32>, vector<9x16xf32>, vector<9x9xf32> -> vector<9x9xf32>
    %cst_371 = arith.constant dense<0xFF800000> : vector<9xf32>
    %546 = vector.multi_reduction <maximumf>, %545, %cst_371 [1] : vector<9x9xf32> to vector<9xf32>
    %547 = vector.shape_cast %546 : vector<9xf32> to vector<9x1xf32>
    %548 = vector.broadcast %547 : vector<9x1xf32> to vector<9x9xf32>
    %549 = arith.subf %545, %548 : vector<9x9xf32>
    %550 = math.exp %549 : vector<9x9xf32>
    %cst_372 = arith.constant dense<0.000000e+00> : vector<9xf32>
    %551 = vector.multi_reduction <add>, %550, %cst_372 [1] : vector<9x9xf32> to vector<9xf32>
    %552 = vector.shape_cast %551 : vector<9xf32> to vector<9x1xf32>
    %553 = tpu.reciprocal %552 {approx = true} : vector<9x1xf32> -> vector<9x1xf32>
    %554 = vector.broadcast %553 : vector<9x1xf32> to vector<9x9xf32>
    %555 = arith.mulf %550, %554 : vector<9x9xf32>
    %cst_373 = arith.constant dense<0.000000e+00> : vector<9x16xf32>
    %556 = tpu.matmul %555, %544, %cst_373 {dimension_numbers = #tpu.dot_dimension_numbers<[1], [0], [0], [1], [0, 0, 1, 1], [], []>} : vector<9x9xf32>, vector<9x16xf32>, vector<9x16xf32> -> vector<9x16xf32>
    %c8_374 = arith.constant 8 : index
    %c0_375 = arith.constant 0 : index
    %c0_376 = arith.constant 0 : index
    %557 = vector.load %arg16[%c8_374, %c0_375, %c0_376] : memref<12x16x64xf32, #tpu.memory_space<vmem>>, vector<1x16x64xf32>
    %558 = vector.shape_cast %557 : vector<1x16x64xf32> to vector<16x64xf32>
    %cst_377 = arith.constant dense<0.000000e+00> : vector<9x64xf32>
    %559 = tpu.matmul %556, %558, %cst_377 {dimension_numbers = #tpu.dot_dimension_numbers<[1], [0], [0], [1], [0, 0, 1, 1], [], []>} : vector<9x16xf32>, vector<16x64xf32>, vector<9x64xf32> -> vector<9x64xf32>
    %560 = arith.addf %523, %559 : vector<9x64xf32>
    %c9 = arith.constant 9 : index
    %c0_378 = arith.constant 0 : index
    %c0_379 = arith.constant 0 : index
    %561 = vector.load %arg10[%c9, %c0_378, %c0_379] : memref<12x64x16xf32, #tpu.memory_space<vmem>>, vector<1x64x16xf32>
    %562 = vector.shape_cast %561 : vector<1x64x16xf32> to vector<64x16xf32>
    %cst_380 = arith.constant dense<0.000000e+00> : vector<9x16xf32>
    %563 = tpu.matmul %522, %562, %cst_380 {dimension_numbers = #tpu.dot_dimension_numbers<[1], [0], [0], [1], [0, 0, 1, 1], [], []>} : vector<9x64xf32>, vector<64x16xf32>, vector<9x16xf32> -> vector<9x16xf32>
    %c9_381 = arith.constant 9 : index
    %c0_382 = arith.constant 0 : index
    %c0_383 = arith.constant 0 : index
    %564 = vector.load %arg11[%c9_381, %c0_382, %c0_383] : memref<12x1x16xf32, #tpu.memory_space<vmem>>, vector<1x1x16xf32>
    %565 = vector.shape_cast %564 : vector<1x1x16xf32> to vector<1x16xf32>
    %566 = vector.broadcast %565 : vector<1x16xf32> to vector<9x16xf32>
    %567 = arith.addf %563, %566 : vector<9x16xf32>
    %c9_384 = arith.constant 9 : index
    %c0_385 = arith.constant 0 : index
    %c0_386 = arith.constant 0 : index
    %568 = vector.load %arg12[%c9_384, %c0_385, %c0_386] : memref<12x64x16xf32, #tpu.memory_space<vmem>>, vector<1x64x16xf32>
    %569 = vector.shape_cast %568 : vector<1x64x16xf32> to vector<64x16xf32>
    %cst_387 = arith.constant dense<0.000000e+00> : vector<9x16xf32>
    %570 = tpu.matmul %522, %569, %cst_387 {dimension_numbers = #tpu.dot_dimension_numbers<[1], [0], [0], [1], [0, 0, 1, 1], [], []>} : vector<9x64xf32>, vector<64x16xf32>, vector<9x16xf32> -> vector<9x16xf32>
    %c9_388 = arith.constant 9 : index
    %c0_389 = arith.constant 0 : index
    %c0_390 = arith.constant 0 : index
    %571 = vector.load %arg13[%c9_388, %c0_389, %c0_390] : memref<12x1x16xf32, #tpu.memory_space<vmem>>, vector<1x1x16xf32>
    %572 = vector.shape_cast %571 : vector<1x1x16xf32> to vector<1x16xf32>
    %573 = vector.broadcast %572 : vector<1x16xf32> to vector<9x16xf32>
    %574 = arith.addf %570, %573 : vector<9x16xf32>
    %c9_391 = arith.constant 9 : index
    %c0_392 = arith.constant 0 : index
    %c0_393 = arith.constant 0 : index
    %575 = vector.load %arg14[%c9_391, %c0_392, %c0_393] : memref<12x64x16xf32, #tpu.memory_space<vmem>>, vector<1x64x16xf32>
    %576 = vector.shape_cast %575 : vector<1x64x16xf32> to vector<64x16xf32>
    %cst_394 = arith.constant dense<0.000000e+00> : vector<9x16xf32>
    %577 = tpu.matmul %522, %576, %cst_394 {dimension_numbers = #tpu.dot_dimension_numbers<[1], [0], [0], [1], [0, 0, 1, 1], [], []>} : vector<9x64xf32>, vector<64x16xf32>, vector<9x16xf32> -> vector<9x16xf32>
    %c9_395 = arith.constant 9 : index
    %c0_396 = arith.constant 0 : index
    %c0_397 = arith.constant 0 : index
    %578 = vector.load %arg15[%c9_395, %c0_396, %c0_397] : memref<12x1x16xf32, #tpu.memory_space<vmem>>, vector<1x1x16xf32>
    %579 = vector.shape_cast %578 : vector<1x1x16xf32> to vector<1x16xf32>
    %580 = vector.broadcast %579 : vector<1x16xf32> to vector<9x16xf32>
    %581 = arith.addf %577, %580 : vector<9x16xf32>
    %cst_398 = arith.constant dense<0.000000e+00> : vector<9x9xf32>
    %582 = tpu.matmul %567, %574, %cst_398 {dimension_numbers = #tpu.dot_dimension_numbers<[1], [1], [0], [0], [0, 0, 1, 0], [], []>} : vector<9x16xf32>, vector<9x16xf32>, vector<9x9xf32> -> vector<9x9xf32>
    %cst_399 = arith.constant dense<0xFF800000> : vector<9xf32>
    %583 = vector.multi_reduction <maximumf>, %582, %cst_399 [1] : vector<9x9xf32> to vector<9xf32>
    %584 = vector.shape_cast %583 : vector<9xf32> to vector<9x1xf32>
    %585 = vector.broadcast %584 : vector<9x1xf32> to vector<9x9xf32>
    %586 = arith.subf %582, %585 : vector<9x9xf32>
    %587 = math.exp %586 : vector<9x9xf32>
    %cst_400 = arith.constant dense<0.000000e+00> : vector<9xf32>
    %588 = vector.multi_reduction <add>, %587, %cst_400 [1] : vector<9x9xf32> to vector<9xf32>
    %589 = vector.shape_cast %588 : vector<9xf32> to vector<9x1xf32>
    %590 = tpu.reciprocal %589 {approx = true} : vector<9x1xf32> -> vector<9x1xf32>
    %591 = vector.broadcast %590 : vector<9x1xf32> to vector<9x9xf32>
    %592 = arith.mulf %587, %591 : vector<9x9xf32>
    %cst_401 = arith.constant dense<0.000000e+00> : vector<9x16xf32>
    %593 = tpu.matmul %592, %581, %cst_401 {dimension_numbers = #tpu.dot_dimension_numbers<[1], [0], [0], [1], [0, 0, 1, 1], [], []>} : vector<9x9xf32>, vector<9x16xf32>, vector<9x16xf32> -> vector<9x16xf32>
    %c9_402 = arith.constant 9 : index
    %c0_403 = arith.constant 0 : index
    %c0_404 = arith.constant 0 : index
    %594 = vector.load %arg16[%c9_402, %c0_403, %c0_404] : memref<12x16x64xf32, #tpu.memory_space<vmem>>, vector<1x16x64xf32>
    %595 = vector.shape_cast %594 : vector<1x16x64xf32> to vector<16x64xf32>
    %cst_405 = arith.constant dense<0.000000e+00> : vector<9x64xf32>
    %596 = tpu.matmul %593, %595, %cst_405 {dimension_numbers = #tpu.dot_dimension_numbers<[1], [0], [0], [1], [0, 0, 1, 1], [], []>} : vector<9x16xf32>, vector<16x64xf32>, vector<9x64xf32> -> vector<9x64xf32>
    %597 = arith.addf %560, %596 : vector<9x64xf32>
    %c10 = arith.constant 10 : index
    %c0_406 = arith.constant 0 : index
    %c0_407 = arith.constant 0 : index
    %598 = vector.load %arg10[%c10, %c0_406, %c0_407] : memref<12x64x16xf32, #tpu.memory_space<vmem>>, vector<1x64x16xf32>
    %599 = vector.shape_cast %598 : vector<1x64x16xf32> to vector<64x16xf32>
    %cst_408 = arith.constant dense<0.000000e+00> : vector<9x16xf32>
    %600 = tpu.matmul %522, %599, %cst_408 {dimension_numbers = #tpu.dot_dimension_numbers<[1], [0], [0], [1], [0, 0, 1, 1], [], []>} : vector<9x64xf32>, vector<64x16xf32>, vector<9x16xf32> -> vector<9x16xf32>
    %c10_409 = arith.constant 10 : index
    %c0_410 = arith.constant 0 : index
    %c0_411 = arith.constant 0 : index
    %601 = vector.load %arg11[%c10_409, %c0_410, %c0_411] : memref<12x1x16xf32, #tpu.memory_space<vmem>>, vector<1x1x16xf32>
    %602 = vector.shape_cast %601 : vector<1x1x16xf32> to vector<1x16xf32>
    %603 = vector.broadcast %602 : vector<1x16xf32> to vector<9x16xf32>
    %604 = arith.addf %600, %603 : vector<9x16xf32>
    %c10_412 = arith.constant 10 : index
    %c0_413 = arith.constant 0 : index
    %c0_414 = arith.constant 0 : index
    %605 = vector.load %arg12[%c10_412, %c0_413, %c0_414] : memref<12x64x16xf32, #tpu.memory_space<vmem>>, vector<1x64x16xf32>
    %606 = vector.shape_cast %605 : vector<1x64x16xf32> to vector<64x16xf32>
    %cst_415 = arith.constant dense<0.000000e+00> : vector<9x16xf32>
    %607 = tpu.matmul %522, %606, %cst_415 {dimension_numbers = #tpu.dot_dimension_numbers<[1], [0], [0], [1], [0, 0, 1, 1], [], []>} : vector<9x64xf32>, vector<64x16xf32>, vector<9x16xf32> -> vector<9x16xf32>
    %c10_416 = arith.constant 10 : index
    %c0_417 = arith.constant 0 : index
    %c0_418 = arith.constant 0 : index
    %608 = vector.load %arg13[%c10_416, %c0_417, %c0_418] : memref<12x1x16xf32, #tpu.memory_space<vmem>>, vector<1x1x16xf32>
    %609 = vector.shape_cast %608 : vector<1x1x16xf32> to vector<1x16xf32>
    %610 = vector.broadcast %609 : vector<1x16xf32> to vector<9x16xf32>
    %611 = arith.addf %607, %610 : vector<9x16xf32>
    %c10_419 = arith.constant 10 : index
    %c0_420 = arith.constant 0 : index
    %c0_421 = arith.constant 0 : index
    %612 = vector.load %arg14[%c10_419, %c0_420, %c0_421] : memref<12x64x16xf32, #tpu.memory_space<vmem>>, vector<1x64x16xf32>
    %613 = vector.shape_cast %612 : vector<1x64x16xf32> to vector<64x16xf32>
    %cst_422 = arith.constant dense<0.000000e+00> : vector<9x16xf32>
    %614 = tpu.matmul %522, %613, %cst_422 {dimension_numbers = #tpu.dot_dimension_numbers<[1], [0], [0], [1], [0, 0, 1, 1], [], []>} : vector<9x64xf32>, vector<64x16xf32>, vector<9x16xf32> -> vector<9x16xf32>
    %c10_423 = arith.constant 10 : index
    %c0_424 = arith.constant 0 : index
    %c0_425 = arith.constant 0 : index
    %615 = vector.load %arg15[%c10_423, %c0_424, %c0_425] : memref<12x1x16xf32, #tpu.memory_space<vmem>>, vector<1x1x16xf32>
    %616 = vector.shape_cast %615 : vector<1x1x16xf32> to vector<1x16xf32>
    %617 = vector.broadcast %616 : vector<1x16xf32> to vector<9x16xf32>
    %618 = arith.addf %614, %617 : vector<9x16xf32>
    %cst_426 = arith.constant dense<0.000000e+00> : vector<9x9xf32>
    %619 = tpu.matmul %604, %611, %cst_426 {dimension_numbers = #tpu.dot_dimension_numbers<[1], [1], [0], [0], [0, 0, 1, 0], [], []>} : vector<9x16xf32>, vector<9x16xf32>, vector<9x9xf32> -> vector<9x9xf32>
    %cst_427 = arith.constant dense<0xFF800000> : vector<9xf32>
    %620 = vector.multi_reduction <maximumf>, %619, %cst_427 [1] : vector<9x9xf32> to vector<9xf32>
    %621 = vector.shape_cast %620 : vector<9xf32> to vector<9x1xf32>
    %622 = vector.broadcast %621 : vector<9x1xf32> to vector<9x9xf32>
    %623 = arith.subf %619, %622 : vector<9x9xf32>
    %624 = math.exp %623 : vector<9x9xf32>
    %cst_428 = arith.constant dense<0.000000e+00> : vector<9xf32>
    %625 = vector.multi_reduction <add>, %624, %cst_428 [1] : vector<9x9xf32> to vector<9xf32>
    %626 = vector.shape_cast %625 : vector<9xf32> to vector<9x1xf32>
    %627 = tpu.reciprocal %626 {approx = true} : vector<9x1xf32> -> vector<9x1xf32>
    %628 = vector.broadcast %627 : vector<9x1xf32> to vector<9x9xf32>
    %629 = arith.mulf %624, %628 : vector<9x9xf32>
    %cst_429 = arith.constant dense<0.000000e+00> : vector<9x16xf32>
    %630 = tpu.matmul %629, %618, %cst_429 {dimension_numbers = #tpu.dot_dimension_numbers<[1], [0], [0], [1], [0, 0, 1, 1], [], []>} : vector<9x9xf32>, vector<9x16xf32>, vector<9x16xf32> -> vector<9x16xf32>
    %c10_430 = arith.constant 10 : index
    %c0_431 = arith.constant 0 : index
    %c0_432 = arith.constant 0 : index
    %631 = vector.load %arg16[%c10_430, %c0_431, %c0_432] : memref<12x16x64xf32, #tpu.memory_space<vmem>>, vector<1x16x64xf32>
    %632 = vector.shape_cast %631 : vector<1x16x64xf32> to vector<16x64xf32>
    %cst_433 = arith.constant dense<0.000000e+00> : vector<9x64xf32>
    %633 = tpu.matmul %630, %632, %cst_433 {dimension_numbers = #tpu.dot_dimension_numbers<[1], [0], [0], [1], [0, 0, 1, 1], [], []>} : vector<9x16xf32>, vector<16x64xf32>, vector<9x64xf32> -> vector<9x64xf32>
    %634 = arith.addf %597, %633 : vector<9x64xf32>
    %c11 = arith.constant 11 : index
    %c0_434 = arith.constant 0 : index
    %c0_435 = arith.constant 0 : index
    %635 = vector.load %arg10[%c11, %c0_434, %c0_435] : memref<12x64x16xf32, #tpu.memory_space<vmem>>, vector<1x64x16xf32>
    %636 = vector.shape_cast %635 : vector<1x64x16xf32> to vector<64x16xf32>
    %cst_436 = arith.constant dense<0.000000e+00> : vector<9x16xf32>
    %637 = tpu.matmul %522, %636, %cst_436 {dimension_numbers = #tpu.dot_dimension_numbers<[1], [0], [0], [1], [0, 0, 1, 1], [], []>} : vector<9x64xf32>, vector<64x16xf32>, vector<9x16xf32> -> vector<9x16xf32>
    %c11_437 = arith.constant 11 : index
    %c0_438 = arith.constant 0 : index
    %c0_439 = arith.constant 0 : index
    %638 = vector.load %arg11[%c11_437, %c0_438, %c0_439] : memref<12x1x16xf32, #tpu.memory_space<vmem>>, vector<1x1x16xf32>
    %639 = vector.shape_cast %638 : vector<1x1x16xf32> to vector<1x16xf32>
    %640 = vector.broadcast %639 : vector<1x16xf32> to vector<9x16xf32>
    %641 = arith.addf %637, %640 : vector<9x16xf32>
    %c11_440 = arith.constant 11 : index
    %c0_441 = arith.constant 0 : index
    %c0_442 = arith.constant 0 : index
    %642 = vector.load %arg12[%c11_440, %c0_441, %c0_442] : memref<12x64x16xf32, #tpu.memory_space<vmem>>, vector<1x64x16xf32>
    %643 = vector.shape_cast %642 : vector<1x64x16xf32> to vector<64x16xf32>
    %cst_443 = arith.constant dense<0.000000e+00> : vector<9x16xf32>
    %644 = tpu.matmul %522, %643, %cst_443 {dimension_numbers = #tpu.dot_dimension_numbers<[1], [0], [0], [1], [0, 0, 1, 1], [], []>} : vector<9x64xf32>, vector<64x16xf32>, vector<9x16xf32> -> vector<9x16xf32>
    %c11_444 = arith.constant 11 : index
    %c0_445 = arith.constant 0 : index
    %c0_446 = arith.constant 0 : index
    %645 = vector.load %arg13[%c11_444, %c0_445, %c0_446] : memref<12x1x16xf32, #tpu.memory_space<vmem>>, vector<1x1x16xf32>
    %646 = vector.shape_cast %645 : vector<1x1x16xf32> to vector<1x16xf32>
    %647 = vector.broadcast %646 : vector<1x16xf32> to vector<9x16xf32>
    %648 = arith.addf %644, %647 : vector<9x16xf32>
    %c11_447 = arith.constant 11 : index
    %c0_448 = arith.constant 0 : index
    %c0_449 = arith.constant 0 : index
    %649 = vector.load %arg14[%c11_447, %c0_448, %c0_449] : memref<12x64x16xf32, #tpu.memory_space<vmem>>, vector<1x64x16xf32>
    %650 = vector.shape_cast %649 : vector<1x64x16xf32> to vector<64x16xf32>
    %cst_450 = arith.constant dense<0.000000e+00> : vector<9x16xf32>
    %651 = tpu.matmul %522, %650, %cst_450 {dimension_numbers = #tpu.dot_dimension_numbers<[1], [0], [0], [1], [0, 0, 1, 1], [], []>} : vector<9x64xf32>, vector<64x16xf32>, vector<9x16xf32> -> vector<9x16xf32>
    %c11_451 = arith.constant 11 : index
    %c0_452 = arith.constant 0 : index
    %c0_453 = arith.constant 0 : index
    %652 = vector.load %arg15[%c11_451, %c0_452, %c0_453] : memref<12x1x16xf32, #tpu.memory_space<vmem>>, vector<1x1x16xf32>
    %653 = vector.shape_cast %652 : vector<1x1x16xf32> to vector<1x16xf32>
    %654 = vector.broadcast %653 : vector<1x16xf32> to vector<9x16xf32>
    %655 = arith.addf %651, %654 : vector<9x16xf32>
    %cst_454 = arith.constant dense<0.000000e+00> : vector<9x9xf32>
    %656 = tpu.matmul %641, %648, %cst_454 {dimension_numbers = #tpu.dot_dimension_numbers<[1], [1], [0], [0], [0, 0, 1, 0], [], []>} : vector<9x16xf32>, vector<9x16xf32>, vector<9x9xf32> -> vector<9x9xf32>
    %cst_455 = arith.constant dense<0xFF800000> : vector<9xf32>
    %657 = vector.multi_reduction <maximumf>, %656, %cst_455 [1] : vector<9x9xf32> to vector<9xf32>
    %658 = vector.shape_cast %657 : vector<9xf32> to vector<9x1xf32>
    %659 = vector.broadcast %658 : vector<9x1xf32> to vector<9x9xf32>
    %660 = arith.subf %656, %659 : vector<9x9xf32>
    %661 = math.exp %660 : vector<9x9xf32>
    %cst_456 = arith.constant dense<0.000000e+00> : vector<9xf32>
    %662 = vector.multi_reduction <add>, %661, %cst_456 [1] : vector<9x9xf32> to vector<9xf32>
    %663 = vector.shape_cast %662 : vector<9xf32> to vector<9x1xf32>
    %664 = tpu.reciprocal %663 {approx = true} : vector<9x1xf32> -> vector<9x1xf32>
    %665 = vector.broadcast %664 : vector<9x1xf32> to vector<9x9xf32>
    %666 = arith.mulf %661, %665 : vector<9x9xf32>
    %cst_457 = arith.constant dense<0.000000e+00> : vector<9x16xf32>
    %667 = tpu.matmul %666, %655, %cst_457 {dimension_numbers = #tpu.dot_dimension_numbers<[1], [0], [0], [1], [0, 0, 1, 1], [], []>} : vector<9x9xf32>, vector<9x16xf32>, vector<9x16xf32> -> vector<9x16xf32>
    %c11_458 = arith.constant 11 : index
    %c0_459 = arith.constant 0 : index
    %c0_460 = arith.constant 0 : index
    %668 = vector.load %arg16[%c11_458, %c0_459, %c0_460] : memref<12x16x64xf32, #tpu.memory_space<vmem>>, vector<1x16x64xf32>
    %669 = vector.shape_cast %668 : vector<1x16x64xf32> to vector<16x64xf32>
    %cst_461 = arith.constant dense<0.000000e+00> : vector<9x64xf32>
    %670 = tpu.matmul %667, %669, %cst_461 {dimension_numbers = #tpu.dot_dimension_numbers<[1], [0], [0], [1], [0, 0, 1, 1], [], []>} : vector<9x16xf32>, vector<16x64xf32>, vector<9x64xf32> -> vector<9x64xf32>
    %671 = arith.addf %634, %670 : vector<9x64xf32>
    %c2_462 = arith.constant 2 : index
    %c0_463 = arith.constant 0 : index
    %c0_464 = arith.constant 0 : index
    %672 = vector.load %arg18[%c2_462, %c0_463, %c0_464] : memref<3x1x64xf32, #tpu.memory_space<vmem>>, vector<1x1x64xf32>
    %673 = vector.shape_cast %672 : vector<1x1x64xf32> to vector<1x64xf32>
    %c2_465 = arith.constant 2 : index
    %c0_466 = arith.constant 0 : index
    %c0_467 = arith.constant 0 : index
    %674 = vector.load %arg17[%c2_465, %c0_466, %c0_467] : memref<3x1x64xf32, #tpu.memory_space<vmem>>, vector<1x1x64xf32>
    %675 = vector.shape_cast %674 : vector<1x1x64xf32> to vector<1x64xf32>
    %676 = vector.broadcast %675 : vector<1x64xf32> to vector<9x64xf32>
    %677 = arith.addf %671, %676 : vector<9x64xf32>
    %678 = vector.broadcast %673 : vector<1x64xf32> to vector<9x64xf32>
    %679 = arith.mulf %678, %677 : vector<9x64xf32>
    %680 = arith.addf %496, %679 : vector<9x64xf32>
    %c2_468 = arith.constant 2 : index
    %c0_469 = arith.constant 0 : index
    %c0_470 = arith.constant 0 : index
    %681 = vector.load %arg19[%c2_468, %c0_469, %c0_470] : memref<3x1x64xf32, #tpu.memory_space<vmem>>, vector<1x1x64xf32>
    %682 = vector.shape_cast %681 : vector<1x1x64xf32> to vector<1x64xf32>
    %c2_471 = arith.constant 2 : index
    %c0_472 = arith.constant 0 : index
    %c0_473 = arith.constant 0 : index
    %683 = vector.load %arg20[%c2_471, %c0_472, %c0_473] : memref<3x1x64xf32, #tpu.memory_space<vmem>>, vector<1x1x64xf32>
    %684 = vector.shape_cast %683 : vector<1x1x64xf32> to vector<1x64xf32>
    %cst_474 = arith.constant dense<0.000000e+00> : vector<9xf32>
    %685 = vector.multi_reduction <add>, %680, %cst_474 [1] : vector<9x64xf32> to vector<9xf32>
    %686 = vector.shape_cast %685 : vector<9xf32> to vector<9x1xf32>
    %cst_475 = arith.constant 6.400000e+01 : f32
    %687 = vector.broadcast %cst_475 : f32 to vector<9x1xf32>
    %688 = arith.divf %686, %687 : vector<9x1xf32>
    %689 = vector.broadcast %688 : vector<9x1xf32> to vector<9x64xf32>
    %690 = arith.subf %680, %689 : vector<9x64xf32>
    %691 = arith.mulf %690, %690 : vector<9x64xf32>
    %cst_476 = arith.constant dense<0.000000e+00> : vector<9xf32>
    %692 = vector.multi_reduction <add>, %691, %cst_476 [1] : vector<9x64xf32> to vector<9xf32>
    %693 = vector.shape_cast %692 : vector<9xf32> to vector<9x1xf32>
    %cst_477 = arith.constant 6.400000e+01 : f32
    %694 = vector.broadcast %cst_477 : f32 to vector<9x1xf32>
    %695 = arith.divf %693, %694 : vector<9x1xf32>
    %696 = vector.broadcast %688 : vector<9x1xf32> to vector<9x64xf32>
    %697 = arith.subf %680, %696 : vector<9x64xf32>
    %cst_478 = arith.constant 9.99999997E-7 : f32
    %698 = vector.broadcast %cst_478 : f32 to vector<9x1xf32>
    %699 = arith.addf %695, %698 : vector<9x1xf32>
    %700 = math.rsqrt %699 : vector<9x1xf32>
    %701 = vector.broadcast %700 : vector<9x1xf32> to vector<9x64xf32>
    %702 = arith.mulf %697, %701 : vector<9x64xf32>
    %703 = vector.broadcast %682 : vector<1x64xf32> to vector<9x64xf32>
    %704 = arith.mulf %702, %703 : vector<9x64xf32>
    %705 = vector.broadcast %684 : vector<1x64xf32> to vector<9x64xf32>
    %706 = arith.addf %704, %705 : vector<9x64xf32>
    %c2_479 = arith.constant 2 : index
    %c0_480 = arith.constant 0 : index
    %c0_481 = arith.constant 0 : index
    %707 = vector.load %arg21[%c2_479, %c0_480, %c0_481] : memref<3x64x256xf32, #tpu.memory_space<vmem>>, vector<1x64x256xf32>
    %708 = vector.shape_cast %707 : vector<1x64x256xf32> to vector<64x256xf32>
    %cst_482 = arith.constant dense<0.000000e+00> : vector<9x256xf32>
    %709 = tpu.matmul %706, %708, %cst_482 {dimension_numbers = #tpu.dot_dimension_numbers<[1], [0], [0], [1], [0, 0, 1, 1], [], []>} : vector<9x64xf32>, vector<64x256xf32>, vector<9x256xf32> -> vector<9x256xf32>
    %c2_483 = arith.constant 2 : index
    %c0_484 = arith.constant 0 : index
    %c0_485 = arith.constant 0 : index
    %710 = vector.load %arg22[%c2_483, %c0_484, %c0_485] : memref<3x1x256xf32, #tpu.memory_space<vmem>>, vector<1x1x256xf32>
    %711 = vector.shape_cast %710 : vector<1x1x256xf32> to vector<1x256xf32>
    %712 = vector.broadcast %711 : vector<1x256xf32> to vector<9x256xf32>
    %713 = arith.addf %709, %712 : vector<9x256xf32>
    %cst_486 = arith.constant 5.000000e-01 : f32
    %714 = vector.broadcast %cst_486 : f32 to vector<9x256xf32>
    %715 = arith.mulf %714, %713 : vector<9x256xf32>
    %cst_487 = arith.constant 4.471500e-02 : f32
    %716 = vector.broadcast %cst_487 : f32 to vector<9x256xf32>
    %717 = arith.mulf %716, %713 : vector<9x256xf32>
    %718 = arith.mulf %717, %713 : vector<9x256xf32>
    %719 = arith.mulf %718, %713 : vector<9x256xf32>
    %720 = arith.addf %713, %719 : vector<9x256xf32>
    %cst_488 = arith.constant 0.797884583 : f32
    %721 = vector.broadcast %cst_488 : f32 to vector<9x256xf32>
    %722 = arith.mulf %721, %720 : vector<9x256xf32>
    %723 = math.tanh %722 : vector<9x256xf32>
    %cst_489 = arith.constant 1.000000e+00 : f32
    %724 = vector.broadcast %cst_489 : f32 to vector<9x256xf32>
    %725 = arith.addf %724, %723 : vector<9x256xf32>
    %726 = arith.mulf %715, %725 : vector<9x256xf32>
    %c2_490 = arith.constant 2 : index
    %c0_491 = arith.constant 0 : index
    %c0_492 = arith.constant 0 : index
    %727 = vector.load %arg23[%c2_490, %c0_491, %c0_492] : memref<3x256x64xf32, #tpu.memory_space<vmem>>, vector<1x256x64xf32>
    %728 = vector.shape_cast %727 : vector<1x256x64xf32> to vector<256x64xf32>
    %cst_493 = arith.constant dense<0.000000e+00> : vector<9x64xf32>
    %729 = tpu.matmul %726, %728, %cst_493 {dimension_numbers = #tpu.dot_dimension_numbers<[1], [0], [0], [1], [0, 0, 1, 1], [], []>} : vector<9x256xf32>, vector<256x64xf32>, vector<9x64xf32> -> vector<9x64xf32>
    %c2_494 = arith.constant 2 : index
    %c0_495 = arith.constant 0 : index
    %c0_496 = arith.constant 0 : index
    %730 = vector.load %arg24[%c2_494, %c0_495, %c0_496] : memref<3x1x64xf32, #tpu.memory_space<vmem>>, vector<1x1x64xf32>
    %731 = vector.shape_cast %730 : vector<1x1x64xf32> to vector<1x64xf32>
    %732 = vector.broadcast %731 : vector<1x64xf32> to vector<9x64xf32>
    %733 = arith.addf %729, %732 : vector<9x64xf32>
    %c2_497 = arith.constant 2 : index
    %c0_498 = arith.constant 0 : index
    %c0_499 = arith.constant 0 : index
    %734 = vector.load %arg25[%c2_497, %c0_498, %c0_499] : memref<3x1x64xf32, #tpu.memory_space<vmem>>, vector<1x1x64xf32>
    %735 = vector.shape_cast %734 : vector<1x1x64xf32> to vector<1x64xf32>
    %736 = vector.broadcast %735 : vector<1x64xf32> to vector<9x64xf32>
    %737 = arith.mulf %736, %733 : vector<9x64xf32>
    %738 = arith.addf %680, %737 : vector<9x64xf32>
    %c0_500 = arith.constant 0 : index
    %c0_501 = arith.constant 0 : index
    %739 = vector.load %arg26[%c0_500, %c0_501] : memref<1x64xf32, #tpu.memory_space<vmem>>, vector<1x64xf32>
    %c0_502 = arith.constant 0 : index
    %c0_503 = arith.constant 0 : index
    %740 = vector.load %arg27[%c0_502, %c0_503] : memref<1x64xf32, #tpu.memory_space<vmem>>, vector<1x64xf32>
    %cst_504 = arith.constant dense<0.000000e+00> : vector<9xf32>
    %741 = vector.multi_reduction <add>, %738, %cst_504 [1] : vector<9x64xf32> to vector<9xf32>
    %742 = vector.shape_cast %741 : vector<9xf32> to vector<9x1xf32>
    %cst_505 = arith.constant 6.400000e+01 : f32
    %743 = vector.broadcast %cst_505 : f32 to vector<9x1xf32>
    %744 = arith.divf %742, %743 : vector<9x1xf32>
    %745 = vector.broadcast %744 : vector<9x1xf32> to vector<9x64xf32>
    %746 = arith.subf %738, %745 : vector<9x64xf32>
    %747 = arith.mulf %746, %746 : vector<9x64xf32>
    %cst_506 = arith.constant dense<0.000000e+00> : vector<9xf32>
    %748 = vector.multi_reduction <add>, %747, %cst_506 [1] : vector<9x64xf32> to vector<9xf32>
    %749 = vector.shape_cast %748 : vector<9xf32> to vector<9x1xf32>
    %cst_507 = arith.constant 6.400000e+01 : f32
    %750 = vector.broadcast %cst_507 : f32 to vector<9x1xf32>
    %751 = arith.divf %749, %750 : vector<9x1xf32>
    %752 = vector.broadcast %744 : vector<9x1xf32> to vector<9x64xf32>
    %753 = arith.subf %738, %752 : vector<9x64xf32>
    %cst_508 = arith.constant 9.99999997E-7 : f32
    %754 = vector.broadcast %cst_508 : f32 to vector<9x1xf32>
    %755 = arith.addf %751, %754 : vector<9x1xf32>
    %756 = math.rsqrt %755 : vector<9x1xf32>
    %757 = vector.broadcast %756 : vector<9x1xf32> to vector<9x64xf32>
    %758 = arith.mulf %753, %757 : vector<9x64xf32>
    %759 = vector.broadcast %739 : vector<1x64xf32> to vector<9x64xf32>
    %760 = arith.mulf %758, %759 : vector<9x64xf32>
    %761 = vector.broadcast %740 : vector<1x64xf32> to vector<9x64xf32>
    %762 = arith.addf %760, %761 : vector<9x64xf32>
    %c0_509 = arith.constant 0 : index
    %c0_510 = arith.constant 0 : index
    %763 = vector.load %arg7[%c0_509, %c0_510] : memref<4x9xf32, #tpu.memory_space<vmem>>, vector<4x9xf32>
    %cst_511 = arith.constant dense<0.000000e+00> : vector<4x64xf32>
    %764 = tpu.matmul %763, %762, %cst_511 {dimension_numbers = #tpu.dot_dimension_numbers<[1], [0], [0], [1], [0, 0, 1, 1], [], []>} : vector<4x9xf32>, vector<9x64xf32>, vector<4x64xf32> -> vector<4x64xf32>
    %c0_512 = arith.constant 0 : index
    %c0_513 = arith.constant 0 : index
    %c0_514 = arith.constant 0 : index
    %765 = vector.load %arg28[%c0_512, %c0_513, %c0_514] : memref<1x4x64xf32, #tpu.memory_space<vmem>>, vector<1x4x64xf32>
    %766 = vector.shape_cast %765 : vector<1x4x64xf32> to vector<4x64xf32>
    %767 = vector.shape_cast %764 : vector<4x64xf32> to vector<1x4x64xf32>
    tpu.vector_store %arg28[%c0_512, %c0_513, %c0_514], %767 {strides = array<i32>} : memref<1x4x64xf32, #tpu.memory_space<vmem>>, vector<1x4x64xf32>,
    return
  }
  func.func @transform_0(%arg0: i32) -> (i32, i32, i32) {
    %c0_i32 = arith.constant 0 : i32
    %c0_i32_0 = arith.constant 0 : i32
    %c0_i32_1 = arith.constant 0 : i32
    return %arg0, %c0_i32, %c0_i32_0 : i32, i32, i32
  }
  func.func @transform_1(%arg0: i32) -> (i32, i32) {
    %c0_i32 = arith.constant 0 : i32
    %c0_i32_0 = arith.constant 0 : i32
    %c0_i32_1 = arith.constant 0 : i32
    return %c0_i32, %c0_i32_0 : i32, i32
  }
  func.func @transform_2(%arg0: i32) -> (i32, i32) {
    %c0_i32 = arith.constant 0 : i32
    %c0_i32_0 = arith.constant 0 : i32
    %c0_i32_1 = arith.constant 0 : i32
    return %c0_i32, %c0_i32_0 : i32, i32
  }
  func.func @transform_3(%arg0: i32) -> (i32, i32) {
    %c0_i32 = arith.constant 0 : i32
    %c0_i32_0 = arith.constant 0 : i32
    %c0_i32_1 = arith.constant 0 : i32
    return %c0_i32, %c0_i32_0 : i32, i32
  }
  func.func @transform_4(%arg0: i32) -> (i32, i32) {
    %c0_i32 = arith.constant 0 : i32
    %c0_i32_0 = arith.constant 0 : i32
    %c0_i32_1 = arith.constant 0 : i32
    return %c0_i32, %c0_i32_0 : i32, i32
  }
  func.func @transform_5(%arg0: i32) -> (i32, i32) {
    %c0_i32 = arith.constant 0 : i32
    %c0_i32_0 = arith.constant 0 : i32
    %c0_i32_1 = arith.constant 0 : i32
    return %c0_i32, %c0_i32_0 : i32, i32
  }
  func.func @transform_6(%arg0: i32) -> (i32, i32) {
    %c0_i32 = arith.constant 0 : i32
    %c0_i32_0 = arith.constant 0 : i32
    %c0_i32_1 = arith.constant 0 : i32
    return %c0_i32, %c0_i32_0 : i32, i32
  }
  func.func @transform_7(%arg0: i32) -> (i32, i32, i32) {
    %c0_i32 = arith.constant 0 : i32
    %c0_i32_0 = arith.constant 0 : i32
    %c0_i32_1 = arith.constant 0 : i32
    %c0_i32_2 = arith.constant 0 : i32
    return %c0_i32, %c0_i32_0, %c0_i32_1 : i32, i32, i32
  }
  func.func @transform_8(%arg0: i32) -> (i32, i32, i32) {
    %c0_i32 = arith.constant 0 : i32
    %c0_i32_0 = arith.constant 0 : i32
    %c0_i32_1 = arith.constant 0 : i32
    %c0_i32_2 = arith.constant 0 : i32
    return %c0_i32, %c0_i32_0, %c0_i32_1 : i32, i32, i32
  }
  func.func @transform_9(%arg0: i32) -> (i32, i32, i32) {
    %c0_i32 = arith.constant 0 : i32
    %c0_i32_0 = arith.constant 0 : i32
    %c0_i32_1 = arith.constant 0 : i32
    %c0_i32_2 = arith.constant 0 : i32
    return %c0_i32, %c0_i32_0, %c0_i32_1 : i32, i32, i32
  }
  func.func @transform_10(%arg0: i32) -> (i32, i32, i32) {
    %c0_i32 = arith.constant 0 : i32
    %c0_i32_0 = arith.constant 0 : i32
    %c0_i32_1 = arith.constant 0 : i32
    %c0_i32_2 = arith.constant 0 : i32
    return %c0_i32, %c0_i32_0, %c0_i32_1 : i32, i32, i32
  }
  func.func @transform_11(%arg0: i32) -> (i32, i32, i32) {
    %c0_i32 = arith.constant 0 : i32
    %c0_i32_0 = arith.constant 0 : i32
    %c0_i32_1 = arith.constant 0 : i32
    %c0_i32_2 = arith.constant 0 : i32
    return %c0_i32, %c0_i32_0, %c0_i32_1 : i32, i32, i32
  }
  func.func @transform_12(%arg0: i32) -> (i32, i32, i32) {
    %c0_i32 = arith.constant 0 : i32
    %c0_i32_0 = arith.constant 0 : i32
    %c0_i32_1 = arith.constant 0 : i32
    %c0_i32_2 = arith.constant 0 : i32
    return %c0_i32, %c0_i32_0, %c0_i32_1 : i32, i32, i32
  }
  func.func @transform_13(%arg0: i32) -> (i32, i32, i32) {
    %c0_i32 = arith.constant 0 : i32
    %c0_i32_0 = arith.constant 0 : i32
    %c0_i32_1 = arith.constant 0 : i32
    %c0_i32_2 = arith.constant 0 : i32
    return %c0_i32, %c0_i32_0, %c0_i32_1 : i32, i32, i32
  }
  func.func @transform_14(%arg0: i32) -> (i32, i32, i32) {
    %c0_i32 = arith.constant 0 : i32
    %c0_i32_0 = arith.constant 0 : i32
    %c0_i32_1 = arith.constant 0 : i32
    %c0_i32_2 = arith.constant 0 : i32
    return %c0_i32, %c0_i32_0, %c0_i32_1 : i32, i32, i32
  }
  func.func @transform_15(%arg0: i32) -> (i32, i32, i32) {
    %c0_i32 = arith.constant 0 : i32
    %c0_i32_0 = arith.constant 0 : i32
    %c0_i32_1 = arith.constant 0 : i32
    %c0_i32_2 = arith.constant 0 : i32
    return %c0_i32, %c0_i32_0, %c0_i32_1 : i32, i32, i32
  }
  func.func @transform_16(%arg0: i32) -> (i32, i32, i32) {
    %c0_i32 = arith.constant 0 : i32
    %c0_i32_0 = arith.constant 0 : i32
    %c0_i32_1 = arith.constant 0 : i32
    %c0_i32_2 = arith.constant 0 : i32
    return %c0_i32, %c0_i32_0, %c0_i32_1 : i32, i32, i32
  }
  func.func @transform_17(%arg0: i32) -> (i32, i32, i32) {
    %c0_i32 = arith.constant 0 : i32
    %c0_i32_0 = arith.constant 0 : i32
    %c0_i32_1 = arith.constant 0 : i32
    %c0_i32_2 = arith.constant 0 : i32
    return %c0_i32, %c0_i32_0, %c0_i32_1 : i32, i32, i32
  }
  func.func @transform_18(%arg0: i32) -> (i32, i32, i32) {
    %c0_i32 = arith.constant 0 : i32
    %c0_i32_0 = arith.constant 0 : i32
    %c0_i32_1 = arith.constant 0 : i32
    %c0_i32_2 = arith.constant 0 : i32
    return %c0_i32, %c0_i32_0, %c0_i32_1 : i32, i32, i32
  }
  func.func @transform_19(%arg0: i32) -> (i32, i32, i32) {
    %c0_i32 = arith.constant 0 : i32
    %c0_i32_0 = arith.constant 0 : i32
    %c0_i32_1 = arith.constant 0 : i32
    %c0_i32_2 = arith.constant 0 : i32
    return %c0_i32, %c0_i32_0, %c0_i32_1 : i32, i32, i32
  }
  func.func @transform_20(%arg0: i32) -> (i32, i32, i32) {
    %c0_i32 = arith.constant 0 : i32
    %c0_i32_0 = arith.constant 0 : i32
    %c0_i32_1 = arith.constant 0 : i32
    %c0_i32_2 = arith.constant 0 : i32
    return %c0_i32, %c0_i32_0, %c0_i32_1 : i32, i32, i32
  }
  func.func @transform_21(%arg0: i32) -> (i32, i32, i32) {
    %c0_i32 = arith.constant 0 : i32
    %c0_i32_0 = arith.constant 0 : i32
    %c0_i32_1 = arith.constant 0 : i32
    %c0_i32_2 = arith.constant 0 : i32
    return %c0_i32, %c0_i32_0, %c0_i32_1 : i32, i32, i32
  }
  func.func @transform_22(%arg0: i32) -> (i32, i32, i32) {
    %c0_i32 = arith.constant 0 : i32
    %c0_i32_0 = arith.constant 0 : i32
    %c0_i32_1 = arith.constant 0 : i32
    %c0_i32_2 = arith.constant 0 : i32
    return %c0_i32, %c0_i32_0, %c0_i32_1 : i32, i32, i32
  }
  func.func @transform_23(%arg0: i32) -> (i32, i32, i32) {
    %c0_i32 = arith.constant 0 : i32
    %c0_i32_0 = arith.constant 0 : i32
    %c0_i32_1 = arith.constant 0 : i32
    %c0_i32_2 = arith.constant 0 : i32
    return %c0_i32, %c0_i32_0, %c0_i32_1 : i32, i32, i32
  }
  func.func @transform_24(%arg0: i32) -> (i32, i32, i32) {
    %c0_i32 = arith.constant 0 : i32
    %c0_i32_0 = arith.constant 0 : i32
    %c0_i32_1 = arith.constant 0 : i32
    %c0_i32_2 = arith.constant 0 : i32
    return %c0_i32, %c0_i32_0, %c0_i32_1 : i32, i32, i32
  }
  func.func @transform_25(%arg0: i32) -> (i32, i32) {
    %c0_i32 = arith.constant 0 : i32
    %c0_i32_0 = arith.constant 0 : i32
    %c0_i32_1 = arith.constant 0 : i32
    return %c0_i32, %c0_i32_0 : i32, i32
  }
  func.func @transform_26(%arg0: i32) -> (i32, i32) {
    %c0_i32 = arith.constant 0 : i32
    %c0_i32_0 = arith.constant 0 : i32
    %c0_i32_1 = arith.constant 0 : i32
    return %c0_i32, %c0_i32_0 : i32, i32
  }
  func.func @transform_27(%arg0: i32) -> (i32, i32, i32) {
    %c0_i32 = arith.constant 0 : i32
    %c0_i32_0 = arith.constant 0 : i32
    %c0_i32_1 = arith.constant 0 : i32
    return %arg0, %c0_i32, %c0_i32_0 : i32, i32, i32
  }
}

</mosaic_0001>

<bundles_post_ra>
// kernel: encoder_forward.1
= control target key start
LH: loop header
LB: loop body
LE: loop exit
PB: predicated region body
PF: predicated region fallthrough
CT: control target
= control target key end

     0   :  { %s15616_s0 = inlined_call_operand.vmem [shape: f32[2,4,588], index: 0, kind: input, shape index: {}]   ;;  %s15617_s1 = inlined_call_operand.vmem [shape: f32[588,64], index: 1, kind: input, shape index: {}]   ;;  %s15618_s2 = inlined_call_operand.vmem [shape: f32[1,64], index: 2, kind: input, shape index: {}]   ;;  %s15619_s3 = inlined_call_operand.vmem [shape: f32[4,64], index: 3, kind: input, shape index: {}]   ;;  %s15620_s4 = inlined_call_operand.vmem [shape: f32[9,4], index: 4, kind: input, shape index: {}]   ;;  %s15621_s5 = inlined_call_operand.vmem [shape: f32[9,64], index: 5, kind: input, shape index: {}]   ;;  %s15622_s6 = inlined_call_operand.vmem [shape: f32[4,9], index: 6, kind: input, shape index: {}]   ;;  %s15623_s7 = inlined_call_operand.vmem [shape: f32[3,1,64], index: 7, kind: input, shape index: {}]   ;;  %s15624_s8 = inlined_call_operand.vmem [shape: f32[3,1,64], index: 8, kind: input, shape index: {}]   ;;  %s15625_s9 = inlined_call_operand.vmem [shape: f32[12,64,16], index: 9, kind: input, shape index: {}]   ;;  %s15626_s10 = inlined_call_operand.vmem [shape: f32[12,1,16], index: 10, kind: input, shape index: {}]   ;;  %s15627_s11 = inlined_call_operand.vmem [shape: f32[12,64,16], index: 11, kind: input, shape index: {}]   ;;  %s15628_s12 = inlined_call_operand.vmem [shape: f32[12,1,16], index: 12, kind: input, shape index: {}]   ;;  %s15629_s13 = inlined_call_operand.vmem [shape: f32[12,64,16], index: 13, kind: input, shape index: {}]   ;;  %s15630_s14 = inlined_call_operand.vmem [shape: f32[12,1,16], index: 14, kind: input, shape index: {}]   ;;  %s15631_s15 = inlined_call_operand.vmem [shape: f32[12,16,64], index: 15, kind: input, shape index: {}]   ;;  %s15632_s16 = inlined_call_operand.vmem [shape: f32[3,1,64], index: 16, kind: input, shape index: {}]   ;;  %s15633_s17 = inlined_call_operand.vmem [shape: f32[3,1,64], index: 17, kind: input, shape index: {}]   ;;  %s15634_s18 = inlined_call_operand.vmem [shape: f32[3,1,64], index: 18, kind: input, shape index: {}]   ;;  %s15635_s19 = inlined_call_operand.vmem [shape: f32[3,1,64], index: 19, kind: input, shape index: {}]   ;;  %s15636_s20 = inlined_call_operand.vmem [shape: f32[3,64,256], index: 20, kind: input, shape index: {}]   ;;  %s15637_s21 = inlined_call_operand.vmem [shape: f32[3,1,256], index: 21, kind: input, shape index: {}]   ;;  %s15638_s22 = inlined_call_operand.vmem [shape: f32[3,256,64], index: 22, kind: input, shape index: {}]   ;;  %s15639_s23 = inlined_call_operand.vmem [shape: f32[3,1,64], index: 23, kind: input, shape index: {}]   ;;  %s15640_s24 = inlined_call_operand.vmem [shape: f32[3,1,64], index: 24, kind: input, shape index: {}]   ;;  %s15641_s25 = inlined_call_operand.vmem [shape: f32[1,64], index: 25, kind: input, shape index: {}]   ;;  %s15642_s26 = inlined_call_operand.vmem [shape: f32[1,64], index: 26, kind: input, shape index: {}]   ;;  %s15643_s27 = inlined_call_operand.hbm [shape: f32[2,4,64], index: 27, kind: output, shape index: {}]  }
   0x1   :  { %15667 = sst [smem:[#allocation12_spill]] %s15616_s0 }
   0x2   :  { %15668 = sst [smem:[#allocation13_spill]] %s15617_s1 }
   0x3   :  { %15669 = sst [smem:[#allocation14_spill]] %s15618_s2 }
   0x4   :  { %15670 = sst [smem:[#allocation15_spill]] %s15619_s3 }
   0x5   :  { %15671 = sst [smem:[#allocation16_spill]] %s15620_s4 }
   0x6   :  { %15672 = sst [smem:[#allocation17_spill]] %s15621_s5 }
   0x7   :  { %15673 = sst [smem:[#allocation18_spill]] %s15622_s6 }
   0x8   :  { %15674 = sst [smem:[#allocation19_spill]] %s15623_s7 }
   0x9   :  { %15675 = sst [smem:[#allocation20_spill]] %s15624_s8 }
   0xa   :  { %15676 = sst [smem:[#allocation21_spill]] %s15625_s9 }
   0xb   :  { %15677 = sst [smem:[#allocation22_spill]] %s15626_s10 }
   0xc   :  { %15678 = sst [smem:[#allocation23_spill]] %s15627_s11 }
   0xd   :  { %15679 = sst [smem:[#allocation24_spill]] %s15642_s26 }
   0xe   :  { %15680 = sst [smem:[#allocation25_spill]] %s15643_s27 }
   0xf   :  { %32 = vsyncpa [#allocation3], 0 }
  0x10   :  { %34 = vsyncpa [#allocation3 + $0x1], 0  ;;  %s13034_s7 = smov 0   ;;  %s13036_s4 = smov 0  }
  0x11   :  { %s13038_s8 = smov 0   ;;  %s13040_s30 = smov 0  }
  0x12 LB: > { %15681 = sst [smem:[#allocation5_spill]] %s12875_s7  ;;  %s13055_s9 = sadd.s32 4294967295, %s12887_s30   ;;  %s12887_s30 = sphi %s13040_s30, %s15714_s30   ;;  %s12883_s8 = sphi %s13038_s8, %s15716_s8   ;;  %s12879_s4 = sphi %s13036_s4, %s15718_s4   ;;  %s12875_s7 = sphi %s13034_s7, %s15717_s7  }
  0x13   : > { %15682 = sst [smem:[#allocation6_spill]] %s12883_s8  ;;  %s9242_s5 = sadd.s32 4294967294, %s12887_s30  }
  0x14   : > { %15683 = sst [smem:[#allocation7_spill]] %s12887_s30  ;;  %s13059_s28 = sadd.s32 1, %s12887_s30  }
  0x15   : > { %15684 = sst [smem:[#allocation8_spill]] %s13059_s28  ;;  %s619_s0 = sadd.s32 1, %s12883_s8 }
  0x16   : > { %s616_s10 = ssub.s32 %s12887_s30, %s13059_s28  ;;  %p629_p0 = scmp.ne.s32.totalorder %s12883_s8, %s12879_s4 }
  0x17   : > { %p617_p1 = scmp.eq.s32.totalorder %s616_s10, 0  ;;  %p630_p2 = scmp.eq.s32.totalorder %s13055_s9, 1 }
  0x18   : > { %p635_p3 = scmp.ne.s32.totalorder %s12879_s4, %s12875_s7  ;;  %p636_p4 = scmp.eq.s32.totalorder %s9242_s5, 1 }
  0x19   : > { %s13070_s29 = scalar_select %p617_p1, %s12883_s8, %s619_s0  }
  0x1a   : > { %p13072_p5 = por %p630_p2, %p629_p0  ;;  %p13076_p6 = por %p636_p4, %p635_p3 }
  0x1b   : > { %15685 = sst [smem:[#allocation9_spill]] %s13070_s29  ;;  %p9245_p7 = scmp.ge.s32.totalorder %s12887_s30, 1 }
  0x1c   : > { %s15686_s1 = scalar_select %p13072_p5, 1, 0 }
  0x1d   : > { %s15688_s6 = scalar_select %p13076_p6, 1, 0 }
  0x1e   : > { %15687 = sst [smem:[#allocation10_spill]] %s15686_s1  ;;  %p740_p8 = scmp.lt.s32.totalorder %s12887_s30, 3 }
  0x1f   : > { %15689 = sst [smem:[#allocation11_spill]] %s15688_s6 }
  0x20   : > { %p741_p9 = pnand %p9245_p7, %p740_p8 }
  0x21   : > { %s15690_s3 = sld [smem:[#allocation13_spill]] (!%p741_p9)  ;;  %p812_p10 = scmp.lt.s32.totalorder (!%p741_p9), %s13055_s9, 1  ;;  %vm12890_vm0 = vmmov (!%p741_p9), 0   ;;  %vm911_vm1 = vcmask (!%p741_p9), 1043456   ;;  %vm12892_vm2 = vmmov (!%p741_p9), 1   ;;  %vm908_vm4 = vcmask (!%p741_p9), 621568  }
  0x22   : > { %744 = sbr.rel (%p741_p9) target bundleno = 16161 (0x3f21), region = 128  ;;  %s15691_s11 = sld [smem:[#allocation12_spill]] (!%p741_p9)  ;;  %vm11695_vm3 = vmpackc.low (!%p741_p9), %vm911_vm1, %vm12892_vm2  ;;  %vm1131_vm5 = vcmask (!%p741_p9), 31744   ;;  %vm1220_vm6 = vcmask (!%p741_p9), 523264   ;;  %vm1224_vm7 = vcmask (!%p741_p9), 516096   ;;  %vm1541_vm8 = vcmask (!%p741_p9), 130048  }
  0x23   : > { %s15693_s0 = sld [smem:[#allocation14_spill]] (!%p741_p9)  ;;  %s15695_s7 = sld [smem:[#allocation17_spill]] (!%p741_p9)  ;;  %vm13502_vm9 = vmpackc.low (!%p741_p9), %vm1541_vm8, %vm1541_vm8  ;;  %vm1659_vm10 = vcmask (!%p741_p9), 1040384   ;;  %vm1633_vm12 = vcmask (!%p741_p9), 65536   ;;  %vm1629_vm13 = vcmask (!%p741_p9), 72704   ;;  %vm9167_vm14 = vcmask (!%p741_p9), 519168  }
  0x24   : > { %s15698_s28 = sld [smem:[#allocation23_spill]] (!%p741_p9)  ;;  %vm13519_vm11 = vmpackc.low (!%p741_p9), %vm1659_vm10, %vm12892_vm2  ;;  %s15708_s27 = sld [smem:[#allocation18_spill]] (!%p741_p9) }
  0x25   : > { %s809_s5 = sand.u32 (!%p741_p9), 1, %s12879_s4  }
  0x26   : > { %s9246_s26 = sshll.u32 (!%p741_p9), %s809_s5, 2 }
  0x27   : > { %v836_v0 = vld [vmem:[%s15690_s3 + $0x80] sm:$0xff] (!%p741_p9)  ;;  %v837_v1 = vld [vmem:[%s15690_s3 + $0x88] sm:$0xff] (!%p741_p9)  ;;  %v838_v11 = vld [vmem:[%s15690_s3 + $0x90] sm:$0xff] (!%p741_p9) }
  0x28   : > { %v820_v2 = vld [vmem:[%s15690_s3] sm:$0xff] (!%p741_p9)  ;;  %v11617_v3 = vpack.c.bf16 (!%p741_p9), %v837_v1, %v836_v0  ;;  %v821_v4 = vld [vmem:[%s15690_s3 + $0x8] sm:$0xff] (!%p741_p9)  ;;  %v839_v13 = vld [vmem:[%s15690_s3 + $0x98] sm:$0xff] (!%p741_p9) }
  0x29   : > { %v868_v5 = vld [vmem:[%s15690_s3 + $0x180] sm:$0xff]  ;;  %v869_v6 = vld [vmem:[%s15690_s3 + $0x188] sm:$0xff]  ;;  %v11619_v7 = vpack.c.bf16 %v821_v4, %v820_v2  ;;  %v822_v14 = vld [vmem:[%s15690_s3 + $0x10] sm:$0xff]  ;;  %v11621_v16 = vpack.c.bf16 %v839_v13, %v838_v11  ;;  %s13176_s8 = scalar_select %p812_p10, %s13055_s9, 1 }
  0x2a   : > { %v11649_v8 = vpack.c.bf16 %v869_v6, %v868_v5  ;;  %v852_v9 = vld [vmem:[%s15690_s3 + $0x100] sm:$0xff]  ;;  %v853_v10 = vld [vmem:[%s15690_s3 + $0x108] sm:$0xff]  ;;  %11618 = vmatprep.subr.bf16.mxu0 %v11617_v3  ;;  %v823_v15 = vld [vmem:[%s15690_s3 + $0x18] sm:$0xff]  ;;  %s15696_s6 = smov %s15695_s7 }
  0x2b   : > { %v11651_v12 = vpack.c.bf16 %v853_v10, %v852_v9  ;;  %11620 = vmatpush3.bf16.msra.mxu0 %v11619_v7  ;;  %v11623_v17 = vpack.c.bf16 %v823_v15, %v822_v14  ;;  %v870_v18 = vld [vmem:[%s15690_s3 + $0x190] sm:$0xff]  ;;  %v871_v19 = vld [vmem:[%s15690_s3 + $0x198] sm:$0xff]  ;;  %v840_v23 = vld [vmem:[%s15690_s3 + $0xa0] sm:$0xff]  ;;  %s12631_s29 = smul.u32 20, %s13176_s8  ;;  %s15694_s8 = sld [smem:[#allocation15_spill]] }
  0x2c   : > { %11650 = vmatprep.subr.bf16.mxu1 %v11649_v8  ;;  %v854_v20 = vld [vmem:[%s15690_s3 + $0x110] sm:$0xff]  ;;  %v11653_v21 = vpack.c.bf16 %v871_v19, %v870_v18  ;;  %v855_v22 = vld [vmem:[%s15690_s3 + $0x118] sm:$0xff]  ;;  %v841_v24 = vld [vmem:[%s15690_s3 + $0xa8] sm:$0xff]  ;;  %11622 = vmatprep.subr.bf16.mxu0 %v11621_v16 }
  0x2d   : > { %11652 = vmatpush3.bf16.msra.mxu1 %v11651_v12  ;;  %v11655_v25 = vpack.c.bf16 %v855_v22, %v854_v20  ;;  %v11625_v26 = vpack.c.bf16 %v841_v24, %v840_v23  ;;  %v824_v27 = vld [vmem:[%s15690_s3 + $0x20] sm:$0xff]  ;;  %v825_v28 = vld [vmem:[%s15690_s3 + $0x28] sm:$0xff]  ;;  %v842_v35 = vld [vmem:[%s15690_s3 + $0xb0] sm:$0xff]  ;;  %s13233_s2 = scalar_lea.vmem %s15691_s11, %s12631_s29  ;;  %s15692_s29 = sld [smem:[#allocation16_spill]] }
  0x2e   : > { %v872_v29 = vld [vmem:[%s15690_s3 + $0x1a0] sm:$0xff]  ;;  %11654 = vmatprep.subr.bf16.mxu1 %v11653_v21  ;;  %v873_v30 = vld [vmem:[%s15690_s3 + $0x1a8] sm:$0xff]  ;;  %v11627_v33 = vpack.c.bf16 %v825_v28, %v824_v27  ;;  %v843_v36 = vld [vmem:[%s15690_s3 + $0xb8] sm:$0xff]  ;;  %s15697_s11 = sld [smem:[#allocation21_spill]] }
  0x2f   : > { %v856_v31 = vld [vmem:[%s15690_s3 + $0x120] sm:$0xff]  ;;  %v857_v32 = vld [vmem:[%s15690_s3 + $0x128] sm:$0xff]  ;;  %11624 = vmatpush3.bf16.msra.mxu0 %v11623_v17  ;;  %v11657_v34 = vpack.c.bf16 %v873_v30, %v872_v29  ;;  %v826_v37 = vld [vmem:[%s15690_s3 + $0x30] sm:$0xff]  ;;  %v11629_v39 = vpack.c.bf16 %v843_v36, %v842_v35 }
  0x30   : > { %11626 = vmatprep.subr.bf16.mxu0 %v11625_v26  ;;  %v11659_v38 = vpack.c.bf16 %v857_v32, %v856_v31  ;;  %v827_v40 = vld [vmem:[%s15690_s3 + $0x38] sm:$0xff]  ;;  %v874_v41 = vld [vmem:[%s15690_s3 + $0x1b0] sm:$0xff]  ;;  %v844_v46 = vld [vmem:[%s15690_s3 + $0xc0] sm:$0xff] }
  0x31   : > { %11656 = vmatpush3.bf16.msra.mxu1 %v11655_v25  ;;  %v875_v42 = vld [vmem:[%s15690_s3 + $0x1b8] sm:$0xff]  ;;  %v858_v44 = vld [vmem:[%s15690_s3 + $0x130] sm:$0xff]  ;;  %v845_v47 = vld [vmem:[%s15690_s3 + $0xc8] sm:$0xff]  ;;  %v11631_v48 = vpack.c.bf16 %v827_v40, %v826_v37 }
  0x32   : > { %11658 = vmatprep.subr.bf16.mxu1 %v11657_v34  ;;  %v11661_v43 = vpack.c.bf16 %v875_v42, %v874_v41  ;;  %v859_v45 = vld [vmem:[%s15690_s3 + $0x138] sm:$0xff]  ;;  %v876_v49 = vld [vmem:[%s15690_s3 + $0x1c0] sm:$0xff]  ;;  %v877_v50 = vld [vmem:[%s15690_s3 + $0x1c8] sm:$0xff]  ;;  %v11633_v52 = vpack.c.bf16 %v845_v47, %v844_v46 }
  0x33   : > { %11628 = vmatpush3.bf16.msra.mxu0 %v11627_v33  ;;  %v11663_v51 = vpack.c.bf16 %v859_v45, %v858_v44  ;;  %v828_v53 = vld [vmem:[%s15690_s3 + $0x40] sm:$0xff]  ;;  %v829_v54 = vld [vmem:[%s15690_s3 + $0x48] sm:$0xff]  ;;  %v11665_v56 = vpack.c.bf16 %v877_v50, %v876_v49  ;;  %v846_v58 = vld [vmem:[%s15690_s3 + $0xd0] sm:$0xff]  ;;  %v12891_v45 = vmov 0.0  }
  0x34   : > { %11630 = vmatprep.subr.bf16.mxu0 %v11629_v39  ;;  %v860_v55 = vld [vmem:[%s15690_s3 + $0x140] sm:$0xff]  ;;  %v861_v57 = vld [vmem:[%s15690_s3 + $0x148] sm:$0xff]  ;;  %v847_v59 = vld [vmem:[%s15690_s3 + $0xd8] sm:$0xff]  ;;  %v11635_v62 = vpack.c.bf16 %v829_v54, %v828_v53  ;;  %v12889_v39 = vmov 0.0|0.0  }
  0x35   : > { %11660 = vmatpush3.bf16.msra.mxu1 %v11659_v38  ;;  %v878_v60 = vld [vmem:[%s15690_s3 + $0x1d0] sm:$0xff]  ;;  %v879_v61 = vld [vmem:[%s15690_s3 + $0x1d8] sm:$0xff]  ;;  %v11667_v63 = vpack.c.bf16 %v861_v57, %v860_v55  ;;  %v11637_v0 = vpack.c.bf16 %v847_v59, %v846_v58  ;;  %v848_v6 = vld [vmem:[%s15690_s3 + $0xe0] sm:$0xff] }
  0x36   : > { %11662 = vmatprep.subr.bf16.mxu1 %v11661_v43  ;;  %v830_v1 = vld [vmem:[%s15690_s3 + $0x50] sm:$0xff]  ;;  %v831_v2 = vld [vmem:[%s15690_s3 + $0x58] sm:$0xff]  ;;  %v11669_v4 = vpack.c.bf16 %v879_v61, %v878_v60  ;;  %v849_v7 = vld [vmem:[%s15690_s3 + $0xe8] sm:$0xff] }
  0x37   : > { %11632 = vmatpush3.bf16.msra.mxu0 %v11631_v48  ;;  %v862_v3 = vld [vmem:[%s15690_s3 + $0x150] sm:$0xff]  ;;  %v863_v5 = vld [vmem:[%s15690_s3 + $0x158] sm:$0xff]  ;;  %v880_v8 = vld [vmem:[%s15690_s3 + $0x1e0] sm:$0xff]  ;;  %v11639_v10 = vpack.c.bf16 %v831_v2, %v830_v1  ;;  %v11641_v14 = vpack.c.bf16 %v849_v7, %v848_v6 }
  0x38   : > { %11634 = vmatprep.subr.bf16.mxu0 %v11633_v52  ;;  %v881_v9 = vld [vmem:[%s15690_s3 + $0x1e8] sm:$0xff]  ;;  %v832_v11 = vld [vmem:[%s15690_s3 + $0x60] sm:$0xff]  ;;  %v11671_v13 = vpack.c.bf16 %v863_v5, %v862_v3  ;;  %v850_v20 = vld [vmem:[%s15690_s3 + $0xf0] sm:$0xff] }
  0x39   : > { %11664 = vmatpush3.bf16.msra.mxu1 %v11663_v51  ;;  %v817_v12 = vld [vmem:[%s13233_s2] sm:$0xff]  ;;  %v833_v15 = vld [vmem:[%s15690_s3 + $0x68] sm:$0xff]  ;;  %v11673_v19 = vpack.c.bf16 %v881_v9, %v880_v8  ;;  %v851_v21 = vld [vmem:[%s15690_s3 + $0xf8] sm:$0xff] }
  0x3a   : > { %11666 = vmatprep.subr.bf16.mxu1 %v11665_v56  ;;  %v864_v16 = vld [vmem:[%s15690_s3 + $0x160] sm:$0xff]  ;;  %v865_v17 = vld [vmem:[%s15690_s3 + $0x168] sm:$0xff]  ;;  %v904_v18 = vcombine.high %v817_v12, %v817_v12  ;;  %v882_v23 = vld [vmem:[%s15690_s3 + $0x1f0] sm:$0xff]  ;;  %v11643_v26 = vpack.c.bf16 %v833_v15, %v832_v11  ;;  %v11645_v28 = vpack.c.bf16 %v851_v21, %v850_v20 }
  0x3b   : > { %11636 = vmatpush3.bf16.msra.mxu0 %v11635_v62  ;;  %v818_v22 = vld [vmem:[%s13233_s2 + $0x8] sm:$0xff]  ;;  %v883_v24 = vld [vmem:[%s15690_s3 + $0x1f8] sm:$0xff]  ;;  %v11675_v27 = vpack.c.bf16 %v865_v17, %v864_v16  ;;  %v834_v29 = vld [vmem:[%s15690_s3 + $0x70] sm:$0xff] }
  0x3c   : > { %11638 = vmatprep.subr.bf16.mxu0 %v11637_v0  ;;  %979 = vmatprep.mubr.f32.mxu0 %v904_v18  ;;  %v905_v25 = vcombine.high %v818_v22, %v818_v22  ;;  %v835_v30 = vld [vmem:[%s15690_s3 + $0x78] sm:$0xff]  ;;  %v11677_v31 = vpack.c.bf16 %v883_v24, %v882_v23  ;;  %v866_v32 = vld [vmem:[%s15690_s3 + $0x170] sm:$0xff]  ;;  %v884_v36 = vld [vmem:[%s15690_s3 + $0x200] sm:$0xff] }
  0x3d   : > { %11668 = vmatpush3.bf16.msra.mxu1 %v11667_v63  ;;  %v867_v33 = vld [vmem:[%s15690_s3 + $0x178] sm:$0xff]  ;;  %v11647_v34 = vpack.c.bf16 %v835_v30, %v834_v29  ;;  %v885_v37 = vld [vmem:[%s15690_s3 + $0x208] sm:$0xff]  ;;  %v886_v40 = vld [vmem:[%s15690_s3 + $0x210] sm:$0xff] }
  0x3e   : > { %11670 = vmatprep.subr.bf16.mxu1 %v11669_v4  ;;  %1049 = vmatprep.mubr.f32.mxu1 %v905_v25  ;;  %v11679_v35 = vpack.c.bf16 %v867_v33, %v866_v32  ;;  %v11682_v38 = vpack.c.bf16 %v885_v37, %v884_v36  ;;  %v887_v41 = vld [vmem:[%s15690_s3 + $0x218] sm:$0xff]  ;;  %v888_v43 = vld [vmem:[%s15690_s3 + $0x220] sm:$0xff]  ;;  %v889_v44 = vld [vmem:[%s15690_s3 + $0x228] sm:$0xff] }
  0x3f   : > { %11640 = vmatpush3.bf16.msra.mxu0 %v11639_v10  ;;  %v11685_v42 = vpack.c.bf16 %v887_v41, %v886_v40  ;;  %v11688_v46 = vpack.c.bf16 %v889_v44, %v888_v43  ;;  %v890_v47 = vld [vmem:[%s15690_s3 + $0x230] sm:$0xff]  ;;  %v891_v48 = vld [vmem:[%s15690_s3 + $0x238] sm:$0xff]  ;;  %v892_v50 = vld [vmem:[%s15690_s3 + $0x240] sm:$0xff] }
  0x40   : > { %11642 = vmatprep.subr.bf16.mxu0 %v11641_v14  ;;  %v11691_v49 = vpack.c.bf16 %v891_v48, %v890_v47  ;;  %v893_v51 = vld [vmem:[%s15690_s3 + $0x248] sm:$0xf]  ;;  %v819_v53 = vld [vmem:[%s13233_s2 + $0x10] sm:$0xf]  ;;  %v1129_v54 = vld [vmem:[%s15692_s29] sm:$0xff]  ;;  %s15701_s2 = sld [smem:[#allocation20_spill]] }
  0x41   : > { %11672 = vmatpush3.bf16.msra.mxu1 %v11671_v13  ;;  %v11694_v52 = vpack.c.bf16 %v893_v51, %v892_v50  ;;  %v9248_v56 = vld [vmem:[%s15693_s0] ss:$0 sm:$0xff]  ;;  %v1130_v5 = vld [vmem:[%s15692_s29 + $0x8] sm:$0x1]  ;;  %v1267_v30 = vld [vmem:[%s15697_s11 + $0x10] sm:$0xff]  ;;  %s15707_s29 = sld [smem:[#allocation24_spill]] }
  0x42   : > { %11674 = vmatprep.subr.bf16.mxu1 %v11673_v19  ;;  %v1125_v1 = vld [vmem:[%s15694_s8] sm:$0xf]  ;;  %v1128_v8 = vld [vmem:[%s15696_s6 + $0x8] sm:$0x1]  ;;  %v1363_v32 = vld [vmem:[%s15698_s28 + $0x10] sm:$0xff]  ;;  %s15702_s6 = sld [smem:[#allocation22_spill]] }
  0x43   : > { %11644 = vmatpush3.bf16.msra.mxu0 %v11643_v26  ;;  %v1127_v6 = vld [vmem:[%s15695_s7] sm:$0xff]  ;;  %v1266_v25 = vld [vmem:[%s15697_s11 + $0x8] sm:$0xff]  ;;  %v1271_v43 = vld [vmem:[%s15697_s11 + $0x30] sm:$0xff]  ;;  %s15699_s7 = sld [smem:[#allocation19_spill]]  ;;  %s9170_s0 = scalar_lea.sflag [#allocation3], %s809_s5 }
  0x44   : > { %11646 = vmatprep.subr.bf16.mxu0 %v11645_v28  ;;  %v1265_v24 = vld [vmem:[%s15697_s11] sm:$0xff]  ;;  %v1362_v28 = vld [vmem:[%s15698_s28 + $0x8] sm:$0xff]  ;;  %v1272_v44 = vld [vmem:[%s15697_s11 + $0x38] sm:$0xff] }
  0x45   : > { %11676 = vmatpush3.bf16.msra.mxu1 %v11675_v27  ;;  %v1361_v26 = vld [vmem:[%s15698_s28] sm:$0xff]  ;;  %v11697_v27 = vpack.c.bf16 %v1266_v25, %v1265_v24  ;;  %v1270_v37 = vld [vmem:[%s15697_s11 + $0x28] sm:$0xff]  ;;  %v11709_v47 = vpack.c.bf16 %v1272_v44, %v1271_v43  ;;  %v1368_v48 = vld [vmem:[%s15698_s28 + $0x38] sm:$0xff] }
  0x46   : > { %11678 = vmatprep.subr.bf16.mxu1 %v11677_v31  ;;  %v11713_v29 = vpack.c.bf16 %v1362_v28, %v1361_v26  ;;  %v1268_v31 = vld [vmem:[%s15697_s11 + $0x18] sm:$0xff]  ;;  %v1269_v36 = vld [vmem:[%s15697_s11 + $0x20] sm:$0xff]  ;;  %v1366_v41 = vld [vmem:[%s15698_s28 + $0x28] sm:$0xff] }
  0x47   : > { %11648 = vmatpush3.bf16.msra.mxu0 %v11647_v34  ;;  %v11701_v33 = vpack.c.bf16 %v1268_v31, %v1267_v30  ;;  %v1364_v34 = vld [vmem:[%s15698_s28 + $0x18] sm:$0xff]  ;;  %v11705_v40 = vpack.c.bf16 %v1270_v37, %v1269_v36  ;;  %v1451_v50 = vld [vmem:[%s15629_s13] sm:$0xff]  ;;  %v1452_v51 = vld [vmem:[%s15629_s13 + $0x8] sm:$0xff] }
  0x48   : > { %11681 = vmatprep.subr.bf16.mxu0 %v12889_v39  ;;  %v9290_v24 = vld [vmem:[%s15698_s28 + $0x70] sm:$0xff]  ;;  %v9291_v25 = vld [vmem:[%s15698_s28 + $0x78] sm:$0xff]  ;;  %v9259_v28 = vld [vmem:[%s15628_s12] ss:$0 sm:$0xff] }
  0x49   : > { %11680 = vmatpush3.bf16.msra.mxu1 %v11679_v35  ;;  %v11717_v35 = vpack.c.bf16 %v1364_v34, %v1363_v32  ;;  %s15700_s1 = smov %s15699_s7 }
  0x4a   : > { %980 = vmatmul.mubr.f32.vlgmr.msra.gmra.mrb[0].mxu0 %v817_v12 }
  0x4b   : > { %11683 = vmatpush3.bf16.msra.mxu0 %v11682_v38  ;;  %10666 = vmatprep.mubr.msk.f32.mxu0 %vm12890_vm0, %v12891_v45  ;;  %v1365_v38 = vld [vmem:[%s15698_s28 + $0x20] sm:$0xff] }
  0x4c   : > { %1050 = vmatmul.mubr.f32.vlgmr.msra.gmra.mrb[0].mxu1 %v818_v22  ;;  %11684 = vmatprep.subr.bf16.mxu0 %v12889_v39 }
  0x4d   : > { %10671 = vmatprep.mubr.msk.f32.mxu1 %vm1131_vm5, %v1129_v54  ;;  %v9285_v54 = vld [vmem:[%s15698_s28 + $0x48] sm:$0xff] }
  0x4f   : > { %11686 = vmatpush3.bf16.msra.mxu0 %v11685_v42  ;;  %v11721_v42 = vpack.c.bf16 %v1366_v41, %v1365_v38  ;;  %v9262_v41 = vld [vmem:[%s15630_s14] ss:$0 sm:$0xff] }
  0x50   : > { %11687 = vmatprep.subr.bf16.mxu0 %v12889_v39 }
  0x53   : > { %11689 = vmatpush3.bf16.msra.mxu0 %v11688_v46  ;;  %v1367_v46 = vld [vmem:[%s15698_s28 + $0x30] sm:$0xff] }
  0x54   : > { %11690 = vmatprep.subr.bf16.mxu0 %v12889_v39 }
  0x57   : > { %11692 = vmatpush3.bf16.msra.mxu0 %v11691_v49  ;;  %v11725_v49 = vpack.c.bf16 %v1368_v48, %v1367_v46 }
  0x58   : > { %11693 = vmatprep.subr.bf16.mxu0 %v12889_v39 }
  0x5b   : > { %11696 = vmatpush3.bf16.msk.msra.mxu0 %vm11695_vm3, %v11694_v52  ;;  %v9284_v52 = vld [vmem:[%s15698_s28 + $0x40] sm:$0xff] }
  0x5c   : > { %11714 = vmatprep.subr.bf16.mxu0 %v11713_v29 }
  0x5e   : > { %10667 = vmatmul.mubr.msk.f32.vlgmr.msra.gmra.mrb[2].mxu0 %vm908_vm4, %v819_v53  ;;  %v11729_v53 = vpack.c.bf16 %v1452_v51, %v1451_v50 }
  0x5f   : > { %11716 = vmatpush3.bf16.msra.mxu0 %v11713_v29  ;;  %v9256_v29 = vld [vmem:[%s15702_s6] ss:$0 sm:$0xff] }
  0x60   : > { %11718 = vmatprep.subr.bf16.mxu0 %v11717_v35 }
  0x63   : > { %11720 = vmatpush3.bf16.msra.mxu0 %v11717_v35 }
  0x64   : > { %11722 = vmatprep.subr.bf16.mxu0 %v11721_v42 }
  0x67   : > { %11724 = vmatpush3.bf16.msra.mxu0 %v11721_v42  ;;  %v9293_v42 = vld [vmem:[%s15628_s12 + $0x1] ss:$0 sm:$0xff] }
  0x68   : > { %11726 = vmatprep.subr.bf16.mxu0 %v11725_v49 }
  0x6b   : > { %11728 = vmatpush3.bf16.msra.mxu0 %v11725_v49 }
 0x11d   : > { %v9973_v55 = vpop.f32.mrb[0].mxu0 }
 0x11e   : > { %v9974_v57 = vpop.f32.mrb[1].mxu0 }
 0x11f   : > { %v10008_v58 = vpop.f32.mrb[0].mxu1  ;;  %v9975_v59 = vadd.f32 %v9974_v57, %v9973_v55  ;;  %v11773_v55 = vpack.c.bf16 %v9285_v54, %v9284_v52 }
 0x120   : > { %v10009_v60 = vpop.f32.mrb[1].mxu1 }
 0x121   : > { %v10010_v61 = vadd.f32 %v10009_v60, %v10008_v58  ;;  %v982_v62 = vadd.f32 %v9975_v59, %v9248_v56  ;;  %11774 = vmatprep.subr.bf16.mxu0 %v11773_v55 }
 0x123   : > { %v1052_v63 = vadd.f32 %v10010_v61, %v982_v62 }
 0x131   : > { %v1121_v0 = vpop.f32.mrb[2].mxu0 }
 0x132   : > { %v1122_v2 = vadd.f32 %v1121_v0, %v1052_v63  ;;  %v10668_v3 = vpop.f32.mrb[3].mxu0  ;;  %v9254_v63 = vld [vmem:[%s15699_s7] ss:$0 sm:$0xff]  ;;  %s9938_s7 = sshll.u32 %s13055_s9, 6  ;;  %s12893_s9 = smov [#allocation2]  }
 0x134   : > { %v1126_v4 = vadd.f32 %v1125_v1, %v1122_v2  ;;  %v9255_v1 = vld [vmem:[%s15701_s2] ss:$0 sm:$0xff] }
 0x136   : > { %10669 = vmatprep.subr.msk.mxu1 %vm911_vm1, %v1126_v4 }
 0x137   : > { %10670 = vmatpush3.msk.msra.mxu1 %vm911_vm1, %v1126_v4 }
 0x138   : > { %10672 = vmatmul.mubr.msk.f32.vlgmr.msra.gmra.mrb[2].mxu1 %vm1131_vm5, %v1130_v5  ;;  %11698 = vmatprep.subr.bf16.mxu1 %v11697_v27 }
 0x139   : > { %11700 = vmatpush3.bf16.msra.mxu1 %v11697_v27  ;;  %v11785_v27 = vpack.c.bf16 %v9291_v25, %v9290_v24  ;;  %v9278_v24 = vld [vmem:[%s15697_s11 + $0x70] sm:$0xff]  ;;  %v9279_v25 = vld [vmem:[%s15697_s11 + $0x78] sm:$0xff] }
 0x13a   : > { %11702 = vmatprep.subr.bf16.mxu1 %v11701_v33 }
 0x13d   : > { %11704 = vmatpush3.bf16.msra.mxu1 %v11701_v33 }
 0x13e   : > { %11706 = vmatprep.subr.bf16.mxu1 %v11705_v40 }
 0x141   : > { %11708 = vmatpush3.bf16.msra.mxu1 %v11705_v40 }
 0x142   : > { %11710 = vmatprep.subr.bf16.mxu1 %v11709_v47 }
 0x145   : > { %11712 = vmatpush3.bf16.msra.mxu1 %v11709_v47 }
 0x146   : > { %11730 = vmatprep.subr.bf16.mxu1 %v11729_v53 }
 0x20b   : > { %v10673_v7 = vpop.f32.mrb[2].mxu1 }
 0x20c   : > { %v1207_v9 = vpop.f32.mrb[3].mxu1  ;;  %v13352_v11 = vadd.f32 %v10673_v7, %v1128_v8  ;;  %v1454_v8 = vld [vmem:[%s15629_s13 + $0x18] sm:$0xff] }
 0x20d   : > { %v13350_v10 = vadd.f32 %v1207_v9, %v1127_v6  ;;  %v1453_v6 = vld [vmem:[%s15629_s13 + $0x10] sm:$0xff] }
 0x20e   : > { %v1225_v13 = vsel %vm1224_vm7, %v13352_v11, 0.0  ;;  %v9286_v9 = vld [vmem:[%s15698_s28 + $0x50] sm:$0xff] }
 0x20f   : > { %v1221_v12 = vsel %vm1220_vm6, %v13350_v10, 0.0 }
 0x210   : > { %1222 = vadd.xlane.f32.xlu0 %v1221_v12  ;;  %v9287_v12 = vld [vmem:[%s15698_s28 + $0x58] sm:$0xff] }
 0x214   : > { %1226 = vadd.xlane.f32.xlu0 %v1225_v13 }
 0x29d   : > { %v1223_v14 = vpop.xlane.xlu0 %1222 }
 0x29e   : > { %v1229_v15 = vmul.f32 0.015625, %v1223_v14  ;;  %v1455_v14 = vld [vmem:[%s15629_s13 + $0x20] sm:$0xff] }
 0x2a0   : > { %v13359_v16 = vsub.f32 %v13350_v10, %v1229_v15  ;;  %v11733_v15 = vpack.c.bf16 %v1454_v8, %v1453_v6  ;;  %v9272_v6 = vld [vmem:[%s15697_s11 + $0x40] sm:$0xff] }
 0x2a1   : > { %v1227_v17 = vpop.xlane.xlu0 %1226 }
 0x2a2   : > { %v1230_v18 = vmul.f32 0.015625, %v1227_v17  ;;  %v1233_v19 = vmul.f32 %v13359_v16, %v13359_v16  ;;  %v1456_v17 = vld [vmem:[%s15629_s13 + $0x28] sm:$0xff] }
 0x2a4   : > { %v13364_v20 = vsub.f32 %v13352_v11, %v1230_v18  ;;  %v1235_v21 = vsel %vm1220_vm6, %v1233_v19, 0.0  ;;  %v9288_v18 = vld [vmem:[%s15698_s28 + $0x60] sm:$0xff]  ;;  %v9289_v19 = vld [vmem:[%s15698_s28 + $0x68] sm:$0xff] }
 0x2a5   : > { %1236 = vadd.xlane.f32.xlu1 %v1235_v21  ;;  %v11781_v21 = vpack.c.bf16 %v9289_v19, %v9288_v18 }
 0x2a6   : > { %v1234_v22 = vmul.f32 %v13364_v20, %v13364_v20 }
 0x2a8   : > { %v1238_v23 = vsel %vm1224_vm7, %v1234_v22, 0.0  ;;  %v1457_v22 = vld [vmem:[%s15629_s13 + $0x30] sm:$0xff] }
 0x2a9   : > { %1239 = vadd.xlane.f32.xlu1 %v1238_v23  ;;  %v1458_v23 = vld [vmem:[%s15629_s13 + $0x38] sm:$0xff] }
 0x2aa   : > { %v11741_v26 = vpack.c.bf16 %v1458_v23, %v1457_v22  ;;  %v9277_v22 = vld [vmem:[%s15697_s11 + $0x68] sm:$0xff] }
 0x332   : > { %v1237_v56 = vpop.xlane.xlu1 %1236 }
 0x333   : > { %v1241_v57 = vmul.f32 0.015625, %v1237_v56 }
 0x335   : > { %v1243_v58 = vadd.f32 1e-06, %v1241_v57 }
 0x336   : > { %v1240_v59 = vpop.xlane.xlu1 %1239 }
 0x337   : > { %12677 = vrsqrt.f32 %v1243_v58  ;;  %v1242_v60 = vmul.f32 0.015625, %v1240_v59 }
 0x339   : > { %v1244_v61 = vadd.f32 1e-06, %v1242_v60 }
 0x33b   : > { %12679 = vrsqrt.f32 %v1244_v61 }
 0x341   : > { %v12678_v62 = vpop.eup %12677 }
 0x342   : > { %v1247_v0 = vmul.f32 %v12678_v62, %v13359_v16  ;;  %v11777_v16 = vpack.c.bf16 %v9287_v12, %v9286_v9 }
 0x344   : > { %v1255_v2 = vmul.f32 %v9254_v63, %v1247_v0 }
 0x345   : > { %v12680_v3 = vpop.eup %12679 }
 0x346   : > { %v13437_v4 = vadd.f32 %v9255_v1, %v1255_v2  ;;  %v1248_v5 = vmul.f32 %v12680_v3, %v13364_v20  ;;  %v11737_v20 = vpack.c.bf16 %v1456_v17, %v1455_v14 }
 0x348   : > { %v1256_v7 = vmul.f32 %v9254_v63, %v1248_v5  ;;  %10690 = vmatprep.mubr.msk.f32.mxu1 %vm1220_vm6, %v13437_v4  ;;  %10709 = vmatprep.mubr.msk.f32.mxu0 %vm1220_vm6, %v13437_v4 }
 0x34a   : > { %v13456_v13 = vadd.f32 %v9255_v1, %v1256_v7  ;;  %v9273_v7 = vld [vmem:[%s15697_s11 + $0x48] sm:$0xff] }
 0x34b   : > { %v11757_v8 = vpack.c.bf16 %v9273_v7, %v9272_v6  ;;  %v9370_v7 = vld [vmem:[%s15697_s11 + $0xd0] sm:$0xff] }
 0x34c   : > { %10691 = vmatmul.mubr.msk.f32.vlgmr.msra.gmra.mrb[4].mxu1 %vm1220_vm6, %v13456_v13  ;;  %10710 = vmatmul.mubr.msk.f32.vlgmr.msra.gmra.mrb[4].mxu0 %vm1220_vm6, %v13456_v13 }
 0x34d   : > { %11732 = vmatpush3.bf16.msra.mxu1 %v11729_v53  ;;  %11776 = vmatpush3.bf16.msra.mxu0 %v11773_v55 }
 0x34e   : > { %10728 = vmatprep.mubr.msk.f32.mxu1 %vm1220_vm6, %v13437_v4  ;;  %10780 = vmatprep.mubr.msk.f32.mxu0 %vm1220_vm6, %v13437_v4 }
 0x34f   : > { %11734 = vmatprep.subr.bf16.mxu1 %v11733_v15  ;;  %11778 = vmatprep.subr.bf16.mxu0 %v11777_v16 }
 0x351   : > { %11736 = vmatpush3.bf16.msra.mxu1 %v11733_v15  ;;  %11780 = vmatpush3.bf16.msra.mxu0 %v11777_v16  ;;  %v9274_v15 = vld [vmem:[%s15697_s11 + $0x50] sm:$0xff]  ;;  %v9275_v16 = vld [vmem:[%s15697_s11 + $0x58] sm:$0xff] }
 0x352   : > { %11738 = vmatprep.subr.bf16.mxu1 %v11737_v20  ;;  %11782 = vmatprep.subr.bf16.mxu0 %v11781_v21 }
 0x355   : > { %11740 = vmatpush3.bf16.msra.mxu1 %v11737_v20  ;;  %11784 = vmatpush3.bf16.msra.mxu0 %v11781_v21  ;;  %v11761_v20 = vpack.c.bf16 %v9275_v16, %v9274_v15  ;;  %v9276_v21 = vld [vmem:[%s15697_s11 + $0x60] sm:$0xff]  ;;  %v9374_v16 = vld [vmem:[%s15697_s11 + $0xf0] sm:$0xff] }
 0x356   : > { %11742 = vmatprep.subr.bf16.mxu1 %v11741_v26  ;;  %11786 = vmatprep.subr.bf16.mxu0 %v11785_v27  ;;  %v11765_v23 = vpack.c.bf16 %v9277_v22, %v9276_v21  ;;  %v9394_v22 = vld [vmem:[%s15629_s13 + $0xd0] sm:$0xff] }
 0x359   : > { %11744 = vmatpush3.bf16.msra.mxu1 %v11741_v26  ;;  %11788 = vmatpush3.bf16.msra.mxu0 %v11785_v27  ;;  %v11769_v26 = vpack.c.bf16 %v9279_v25, %v9278_v24  ;;  %v9296_v27 = vld [vmem:[%s15629_s13 + $0x40] sm:$0xff] }
 0x35a   : > { %v9396_v25 = vld [vmem:[%s15629_s13 + $0xe0] sm:$0xff] }
 0x35c   : > { %10729 = vmatmul.mubr.msk.f32.vlgmr.msra.gmra.mrb[6].mxu1 %vm1220_vm6, %v13456_v13  ;;  %10781 = vmatmul.mubr.msk.f32.vlgmr.msra.gmra.mrb[6].mxu0 %vm1220_vm6, %v13456_v13 }
 0x41f   : > { %v10692_v30 = vpop.f32.mrb[4].mxu1  ;;  %v10711_v31 = vpop.f32.mrb[4].mxu0 }
 0x420   : > { %v1448_v32 = vadd.f32 %v10711_v31, %v9259_v28  ;;  %v1352_v33 = vpop.f32.mrb[5].mxu1  ;;  %v1442_v34 = vpop.f32.mrb[5].mxu0  ;;  %v1358_v40 = vadd.f32 %v10692_v30, %v9256_v29  ;;  %v9298_v30 = vld [vmem:[%s15629_s13 + $0x50] sm:$0xff]  ;;  %v9299_v31 = vld [vmem:[%s15629_s13 + $0x58] sm:$0xff] }
 0x421   : > { %v1353_v35 = vadd.f32 %v9256_v29, %v1352_v33  ;;  %v1443_v36 = vadd.f32 %v9259_v28, %v1442_v34  ;;  %v9297_v28 = vld [vmem:[%s15629_s13 + $0x48] sm:$0xff]  ;;  %v9300_v33 = vld [vmem:[%s15629_s13 + $0x60] sm:$0xff] }
 0x422   : > { %v11789_v29 = vpack.c.bf16 %v9297_v28, %v9296_v27  ;;  %v9301_v34 = vld [vmem:[%s15629_s13 + $0x68] sm:$0xff]  ;;  %v9398_v28 = vld [vmem:[%s15629_s13 + $0xf0] sm:$0xff] }
 0x423   : > { %v11745_v38 = vpack.c.bf16 %v1448_v32, %v1443_v36  ;;  %10735 = vmatprep.mubr.msk.f32.mxu1 %vm1541_vm8, %v1353_v35  ;;  %v11793_v32 = vpack.c.bf16 %v9299_v31, %v9298_v30  ;;  %v11797_v35 = vpack.c.bf16 %v9301_v34, %v9300_v33  ;;  %v9302_v36 = vld [vmem:[%s15629_s13 + $0x70] sm:$0xff]  ;;  %v9281_v33 = vld [vmem:[%s15702_s6 + $0x1] ss:$0 sm:$0xff] }
 0x425   : > { %11747 = vmatprep.subr.msk.bf16.mxu1 %vm13502_vm9, %v11745_v38 }
 0x426   : > { %11750 = vmatpush3.bf16.xpose.msk.msra.mxu1 %vm13502_vm9, %v11745_v38  ;;  %v9303_v38 = vld [vmem:[%s15629_s13 + $0x78] sm:$0xff] }
 0x42d   : > { %10736 = vmatmul.mubr.msk.f32.vlgmr.msra.gmra.mrb[8].mxu1 %vm1541_vm8, %v1358_v40  ;;  %v11801_v40 = vpack.c.bf16 %v9303_v38, %v9302_v36 }
 0x42f   : > { %v10730_v43 = vpop.f32.mrb[6].mxu1  ;;  %v10782_v44 = vpop.f32.mrb[6].mxu0 }
 0x430   : > { %v1538_v46 = vadd.f32 %v10730_v43, %v9262_v41  ;;  %v1921_v47 = vadd.f32 %v10782_v44, %v9293_v42  ;;  %v1532_v48 = vpop.f32.mrb[7].mxu1  ;;  %v1915_v49 = vpop.f32.mrb[7].mxu0  ;;  %v9323_v44 = vld [vmem:[%s15697_s11 + $0x90] sm:$0xff] }
 0x431   : > { %v1533_v50 = vadd.f32 %v9262_v41, %v1532_v48  ;;  %v1916_v51 = vadd.f32 %v9293_v42, %v1915_v49  ;;  %v9321_v41 = vld [vmem:[%s15697_s11 + $0x80] sm:$0xff]  ;;  %v9322_v42 = vld [vmem:[%s15697_s11 + $0x88] sm:$0xff] }
 0x432   : > { %v11825_v43 = vpack.c.bf16 %v9322_v42, %v9321_v41  ;;  %v9325_v48 = vld [vmem:[%s15697_s11 + $0xa0] sm:$0xff]  ;;  %v9326_v49 = vld [vmem:[%s15697_s11 + $0xa8] sm:$0xff] }
 0x433   : > { %v11751_v53 = vpack.c.bf16 %v1538_v46, %v1533_v50  ;;  %v11805_v54 = vpack.c.bf16 %v1921_v47, %v1916_v51  ;;  %v9324_v46 = vld [vmem:[%s15697_s11 + $0x98] sm:$0xff]  ;;  %v11833_v50 = vpack.c.bf16 %v9326_v49, %v9325_v48  ;;  %v9327_v51 = vld [vmem:[%s15697_s11 + $0xb0] sm:$0xff] }
 0x434   : > { %v11829_v47 = vpack.c.bf16 %v9324_v46, %v9323_v44 }
 0x435   : > { %11753 = vmatprep.subr.msk.bf16.mxu1 %vm13519_vm11, %v11751_v53  ;;  %11807 = vmatprep.subr.msk.bf16.mxu0 %vm13502_vm9, %v11805_v54 }
 0x436   : > { %11756 = vmatpush3.bf16.msk.msra.mxu1 %vm13519_vm11, %v11751_v53  ;;  %11810 = vmatpush3.bf16.xpose.msk.msra.mxu0 %vm13502_vm9, %v11805_v54  ;;  %v9328_v53 = vld [vmem:[%s15697_s11 + $0xb8] sm:$0xff] }
 0x437   : > { %11758 = vmatprep.subr.bf16.mxu1 %v11757_v8  ;;  %v11837_v54 = vpack.c.bf16 %v9328_v53, %v9327_v51  ;;  %v9354_v51 = vld [vmem:[%s15630_s14 + $0x2] ss:$0 sm:$0xff] }
 0x500   : > { %v10737_v55 = vpop.f32.mrb[8].mxu1 }
 0x501   : > { %v1620_v56 = vpop.f32.mrb[9].mxu1  ;;  %v1634_v57 = vsel %vm1633_vm12, %v10737_v55, -inf }
 0x502   : > { %1635 = vmax.xlane.f32.xlu1 %v1634_v57  ;;  %v1630_v58 = vsel %vm1629_vm13, %v1620_v56, -inf }
 0x503   : > { %1631 = vmax.xlane.f32.xlu0 %v1630_v58  ;;  %v9347_v58 = vld [vmem:[%s15629_s13 + $0x90] sm:$0xff] }
 0x58f   : > { %v1636_v59 = vpop.xlane.xlu1 %1635 }
 0x590   : > { %v1638_v60 = vsub.f32 %v10737_v55, %v1636_v59  ;;  %v1632_v61 = vpop.xlane.xlu0 %1631  ;;  %v9345_v55 = vld [vmem:[%s15629_s13 + $0x80] sm:$0xff]  ;;  %v9348_v59 = vld [vmem:[%s15629_s13 + $0x98] sm:$0xff] }
 0x591   : > { %v1637_v62 = vsub.f32 %v1620_v56, %v1632_v61  ;;  %v9346_v56 = vld [vmem:[%s15629_s13 + $0x88] sm:$0xff]  ;;  %v9349_v61 = vld [vmem:[%s15629_s13 + $0xa0] sm:$0xff] }
 0x592   : > { %v1641_v63 = vmul.f32 1.442695, %v1638_v60  ;;  %v11857_v57 = vpack.c.bf16 %v9346_v56, %v9345_v55  ;;  %v11861_v60 = vpack.c.bf16 %v9348_v59, %v9347_v58  ;;  %v13740_v58 = vld [vmem:[%s15702_s6 + $0x3] ss:$0 sm:$0xff] }
 0x593   : > { %v1639_v0 = vmul.f32 1.442695, %v1637_v62  ;;  %v9350_v62 = vld [vmem:[%s15629_s13 + $0xa8] sm:$0xff] }
 0x594   : > { %12681 = vpow2.f32 %v1641_v63  ;;  %v11865_v63 = vpack.c.bf16 %v9350_v62, %v9349_v61  ;;  %v9401_v62 = vld [vmem:[%s15630_s14 + $0x3] ss:$0 sm:$0xff] }
 0x595   : > { %12683 = vpow2.f32 %v1639_v0  ;;  %v9351_v0 = vld [vmem:[%s15629_s13 + $0xb0] sm:$0xff] }
 0x59e   : > { %v12682_v1 = vpop.eup %12681 }
 0x59f   : > { %v12684_v2 = vpop.eup %12683  ;;  %v1646_v3 = vsel %vm1633_vm12, %v12682_v1, 0.0 }
 0x5a0   : > { %1647 = vadd.xlane.f32.xlu1 %v1646_v3  ;;  %v1643_v5 = vsel %vm1629_vm13, %v12684_v2, 0.0  ;;  %v9368_v3 = vld [vmem:[%s15697_s11 + $0xc0] sm:$0xff] }
 0x5a1   : > { %1644 = vadd.xlane.f32.xlu0 %v1643_v5  ;;  %v9369_v5 = vld [vmem:[%s15697_s11 + $0xc8] sm:$0xff] }
 0x5a2   : > { %v11889_v6 = vpack.c.bf16 %v9369_v5, %v9368_v3 }
 0x62d   : > { %v1648_v9 = vpop.xlane.xlu1 %1647 }
 0x62e   : > { %12685 = vrcp.f32 %v1648_v9  ;;  %v1645_v12 = vpop.xlane.xlu0 %1644 }
 0x62f   : > { %12687 = vrcp.f32 %v1645_v12  ;;  %v9372_v12 = vld [vmem:[%s15697_s11 + $0xe0] sm:$0xff] }
 0x638   : > { %v12686_v14 = vpop.eup %12685 }
 0x639   : > { %v12688_v17 = vpop.eup %12687  ;;  %v1652_v19 = vmul.f32 %v12686_v14, %v12682_v1  ;;  %v9352_v1 = vld [vmem:[%s15629_s13 + $0xb8] sm:$0xff]  ;;  %v9373_v14 = vld [vmem:[%s15697_s11 + $0xe8] sm:$0xff] }
 0x63a   : > { %v1651_v18 = vmul.f32 %v12688_v17, %v12684_v2  ;;  %v11869_v2 = vpack.c.bf16 %v9352_v1, %v9351_v0  ;;  %v11897_v15 = vpack.c.bf16 %v9373_v14, %v9372_v12  ;;  %v9375_v17 = vld [vmem:[%s15697_s11 + $0xf8] sm:$0xff] }
 0x63c   : > { %10742 = vmatprep.mubr.msk.f32.mxu1 %vm1629_vm13, %v1651_v18  ;;  %v11901_v18 = vpack.c.bf16 %v9375_v17, %v9374_v16 }
 0x63d   : > { %10743 = vmatmul.mubr.msk.f32.vlgmr.msra.gmra.mrb[10].mxu1 %vm1629_vm13, %v1652_v19  ;;  %v9392_v19 = vld [vmem:[%s15629_s13 + $0xc0] sm:$0xff] }
 0x63e   : > { %11760 = vmatpush3.bf16.msra.mxu1 %v11757_v8  ;;  %10761 = vmatprep.mubr.msk.f32.mxu1 %vm1220_vm6, %v13437_v4  ;;  %v9371_v8 = vld [vmem:[%s15697_s11 + $0xd8] sm:$0xff] }
 0x63f   : > { %11762 = vmatprep.subr.bf16.mxu1 %v11761_v20  ;;  %v11893_v9 = vpack.c.bf16 %v9371_v8, %v9370_v7 }
 0x642   : > { %11764 = vmatpush3.bf16.msra.mxu1 %v11761_v20  ;;  %v9393_v20 = vld [vmem:[%s15629_s13 + $0xc8] sm:$0xff] }
 0x643   : > { %11766 = vmatprep.subr.bf16.mxu1 %v11765_v23  ;;  %v11921_v21 = vpack.c.bf16 %v9393_v20, %v9392_v19 }
 0x646   : > { %11768 = vmatpush3.bf16.msra.mxu1 %v11765_v23  ;;  %v9395_v23 = vld [vmem:[%s15629_s13 + $0xd8] sm:$0xff] }
 0x647   : > { %11770 = vmatprep.subr.bf16.mxu1 %v11769_v26  ;;  %v11925_v24 = vpack.c.bf16 %v9395_v23, %v9394_v22  ;;  %v9315_v22 = vld [vmem:[%s15631_s15 + $0x10] sm:$0xff]  ;;  %v9316_v23 = vld [vmem:[%s15631_s15 + $0x18] sm:$0xff] }
 0x64a   : > { %11772 = vmatpush3.bf16.msra.mxu1 %v11769_v26  ;;  %v9397_v26 = vld [vmem:[%s15629_s13 + $0xe8] sm:$0xff] }
 0x64b   : > { %11790 = vmatprep.subr.bf16.mxu1 %v11789_v29  ;;  %v11929_v27 = vpack.c.bf16 %v9397_v26, %v9396_v25 }
 0x64d   : > { %10762 = vmatmul.mubr.msk.f32.vlgmr.msra.gmra.mrb[12].mxu1 %vm1220_vm6, %v13456_v13 }
 0x64e   : > { %11792 = vmatpush3.bf16.msra.mxu1 %v11789_v29  ;;  %10799 = vmatprep.mubr.msk.f32.mxu1 %vm1220_vm6, %v13437_v4  ;;  %v9399_v29 = vld [vmem:[%s15629_s13 + $0xf8] sm:$0xff] }
 0x64f   : > { %11794 = vmatprep.subr.bf16.mxu1 %v11793_v32  ;;  %v11933_v30 = vpack.c.bf16 %v9399_v29, %v9398_v28 }
 0x652   : > { %11796 = vmatpush3.bf16.msra.mxu1 %v11793_v32 }
 0x653   : > { %11798 = vmatprep.subr.bf16.mxu1 %v11797_v35 }
 0x656   : > { %11800 = vmatpush3.bf16.msra.mxu1 %v11797_v35 }
 0x657   : > { %11802 = vmatprep.subr.bf16.mxu1 %v11801_v40 }
 0x65a   : > { %11804 = vmatpush3.bf16.msra.mxu1 %v11801_v40  ;;  %v9305_v40 = vld [vmem:[%s15630_s14 + $0x1] ss:$0 sm:$0xff] }
 0x65b   : > { %11826 = vmatprep.subr.bf16.mxu1 %v11825_v43 }
 0x65d   : > { %10800 = vmatmul.mubr.msk.f32.vlgmr.msra.gmra.mrb[14].mxu1 %vm1220_vm6, %v13456_v13 }
 0x65e   : > { %11828 = vmatpush3.bf16.msra.mxu1 %v11825_v43  ;;  %10846 = vmatprep.mubr.msk.f32.mxu1 %vm1220_vm6, %v13437_v4 }
 0x65f   : > { %11830 = vmatprep.subr.bf16.mxu1 %v11829_v47 }
 0x662   : > { %11832 = vmatpush3.bf16.msra.mxu1 %v11829_v47  ;;  %v13725_v47 = vld [vmem:[%s15702_s6 + $0x2] ss:$0 sm:$0xff] }
 0x663   : > { %11834 = vmatprep.subr.bf16.mxu1 %v11833_v50 }
 0x666   : > { %11836 = vmatpush3.bf16.msra.mxu1 %v11833_v50 }
 0x667   : > { %11838 = vmatprep.subr.bf16.mxu1 %v11837_v54 }
 0x66a   : > { %11840 = vmatpush3.bf16.msra.mxu1 %v11837_v54 }
 0x66b   : > { %11858 = vmatprep.subr.bf16.mxu1 %v11857_v57 }
 0x66d   : > { %10847 = vmatmul.mubr.msk.f32.vlgmr.msra.gmra.mrb[16].mxu1 %vm1220_vm6, %v13456_v13 }
 0x66e   : > { %11860 = vmatpush3.bf16.msra.mxu1 %v11857_v57  ;;  %10884 = vmatprep.mubr.msk.f32.mxu1 %vm1220_vm6, %v13437_v4 }
 0x66f   : > { %11862 = vmatprep.subr.bf16.mxu1 %v11861_v60 }
 0x672   : > { %11864 = vmatpush3.bf16.msra.mxu1 %v11861_v60 }
 0x673   : > { %11866 = vmatprep.subr.bf16.mxu1 %v11865_v63 }
 0x676   : > { %11868 = vmatpush3.bf16.msra.mxu1 %v11865_v63 }
 0x677   : > { %11870 = vmatprep.subr.bf16.mxu1 %v11869_v2 }
 0x67a   : > { %11872 = vmatpush3.bf16.msra.mxu1 %v11869_v2 }
 0x67b   : > { %11890 = vmatprep.subr.bf16.mxu1 %v11889_v6 }
 0x67d   : > { %10885 = vmatmul.mubr.msk.f32.vlgmr.msra.gmra.mrb[18].mxu1 %vm1220_vm6, %v13456_v13 }
 0x67e   : > { %11892 = vmatpush3.bf16.msra.mxu1 %v11889_v6  ;;  %10924 = vmatprep.mubr.msk.f32.mxu1 %vm1220_vm6, %v13437_v4 }
 0x67f   : > { %11894 = vmatprep.subr.bf16.mxu1 %v11893_v9 }
 0x682   : > { %11896 = vmatpush3.bf16.msra.mxu1 %v11893_v9 }
 0x683   : > { %11898 = vmatprep.subr.bf16.mxu1 %v11897_v15 }
 0x686   : > { %11900 = vmatpush3.bf16.msra.mxu1 %v11897_v15 }
 0x687   : > { %11902 = vmatprep.subr.bf16.mxu1 %v11901_v18 }
 0x68a   : > { %11904 = vmatpush3.bf16.msra.mxu1 %v11901_v18 }
 0x68b   : > { %11922 = vmatprep.subr.bf16.mxu1 %v11921_v21 }
 0x68d   : > { %10925 = vmatmul.mubr.msk.f32.vlgmr.msra.gmra.mrb[20].mxu1 %vm1220_vm6, %v13456_v13 }
 0x68e   : > { %11924 = vmatpush3.bf16.msra.mxu1 %v11921_v21  ;;  %10962 = vmatprep.mubr.msk.f32.mxu1 %vm1220_vm6, %v13437_v4 }
 0x68f   : > { %11926 = vmatprep.subr.bf16.mxu1 %v11925_v24 }
 0x692   : > { %11928 = vmatpush3.bf16.msra.mxu1 %v11925_v24  ;;  %v11817_v24 = vpack.c.bf16 %v9316_v23, %v9315_v22 }
 0x693   : > { %11930 = vmatprep.subr.bf16.mxu1 %v11929_v27 }
 0x696   : > { %11932 = vmatpush3.bf16.msra.mxu1 %v11929_v27 }
 0x697   : > { %11934 = vmatprep.subr.bf16.mxu1 %v11933_v30 }
 0x69a   : > { %11936 = vmatpush3.bf16.msra.mxu1 %v11933_v30 }
 0x69d   : > { %10963 = vmatmul.mubr.msk.f32.vlgmr.msra.gmra.mrb[22].mxu1 %vm1220_vm6, %v13456_v13 }
 0x69e   : > { %3646 = vmatprep.mubr.f32.mxu1 %v12891_v45 }
 0x710   : > { %v13706_v31 = vpop.f32.mrb[10].mxu1 }
 0x711   : > { %v13708_v32 = vpop.f32.mrb[11].mxu1 }
 0x720   : > { %v10763_v34 = vpop.f32.mrb[12].mxu1 }
 0x721   : > { %v1823_v35 = vpop.f32.mrb[13].mxu1  ;;  %v1829_v38 = vadd.f32 %v10763_v34, %v9281_v33  ;;  %v1739_v34 = vld [vmem:[%s15631_s15 + $0x8] sm:$0xff] }
 0x722   : > { %v1824_v36 = vadd.f32 %v9281_v33, %v1823_v35  ;;  %v1738_v33 = vld [vmem:[%s15631_s15] sm:$0xff] }
 0x723   : > { %v11821_v35 = vpack.c.bf16 %v1739_v34, %v1738_v33 }
 0x724   : > { %10806 = vmatprep.mubr.msk.f32.mxu0 %vm1541_vm8, %v1824_v36  ;;  %v9333_v36 = vld [vmem:[%s15698_s28 + $0x80] sm:$0xff] }
 0x725   : > { %10807 = vmatmul.mubr.msk.f32.vlgmr.msra.gmra.mrb[8].mxu0 %vm1541_vm8, %v1829_v38  ;;  %v9334_v38 = vld [vmem:[%s15698_s28 + $0x88] sm:$0xff] }
 0x730   : > { %v10801_v41 = vpop.f32.mrb[14].mxu1 }
 0x731   : > { %v2013_v42 = vadd.f32 %v10801_v41, %v9305_v40  ;;  %v2007_v43 = vpop.f32.mrb[15].mxu1 }
 0x732   : > { %v2008_v44 = vadd.f32 %v9305_v40, %v2007_v43  ;;  %v9335_v43 = vld [vmem:[%s15698_s28 + $0x90] sm:$0xff] }
 0x734   : > { %v11811_v46 = vpack.c.bf16 %v2013_v42, %v2008_v44  ;;  %v11841_v42 = vpack.c.bf16 %v9334_v38, %v9333_v36  ;;  %v9336_v44 = vld [vmem:[%s15698_s28 + $0x98] sm:$0xff]  ;;  %v9384_v36 = vld [vmem:[%s15698_s28 + $0xe0] sm:$0xff]  ;;  %v9385_v38 = vld [vmem:[%s15698_s28 + $0xe8] sm:$0xff] }
 0x736   : > { %11813 = vmatprep.subr.msk.bf16.mxu0 %vm13519_vm11, %v11811_v46 }
 0x737   : > { %11816 = vmatpush3.bf16.msk.msra.mxu0 %vm13519_vm11, %v11811_v46  ;;  %v11845_v46 = vpack.c.bf16 %v9336_v44, %v9335_v43 }
 0x738   : > { %11818 = vmatprep.subr.bf16.mxu0 %v11817_v24 }
 0x740   : > { %v10848_v48 = vpop.f32.mrb[16].mxu1 }
 0x741   : > { %v13728_v49 = vadd.f32 %v10848_v48, %v13725_v47  ;;  %v13730_v50 = vpop.f32.mrb[17].mxu1  ;;  %v9337_v48 = vld [vmem:[%s15698_s28 + $0xa0] sm:$0xff] }
 0x750   : > { %v10886_v53 = vpop.f32.mrb[18].mxu1 }
 0x751   : > { %v2647_v54 = vadd.f32 %v10886_v53, %v9354_v51  ;;  %v2641_v55 = vpop.f32.mrb[19].mxu1  ;;  %v9339_v53 = vld [vmem:[%s15698_s28 + $0xb0] sm:$0xff] }
 0x752   : > { %v2642_v56 = vadd.f32 %v9354_v51, %v2641_v55  ;;  %v9338_v51 = vld [vmem:[%s15698_s28 + $0xa8] sm:$0xff] }
 0x754   : > { %v13735_v57 = vpack.c.bf16 %v2647_v54, %v2642_v56  ;;  %v9340_v54 = vld [vmem:[%s15698_s28 + $0xb8] sm:$0xff]  ;;  %v9342_v56 = vld [vmem:[%s15628_s12 + $0x2] ss:$0 sm:$0xff] }
 0x755   : > { %v11853_v55 = vpack.c.bf16 %v9340_v54, %v9339_v53 }
 0x760   : > { %v10926_v59 = vpop.f32.mrb[20].mxu1 }
 0x761   : > { %v13743_v60 = vadd.f32 %v10926_v59, %v13740_v58  ;;  %v13745_v61 = vpop.f32.mrb[21].mxu1 }
 0x762   : > { %v3013_v44 = vadd.f32 %v13740_v58, %v13745_v61 }
 0x770   : > { %v10964_v63 = vpop.f32.mrb[22].mxu1 }
 0x771   : > { %v3202_v0 = vadd.f32 %v10964_v63, %v9401_v62  ;;  %v3196_v1 = vpop.f32.mrb[23].mxu1 }
 0x772   : > { %v3197_v2 = vadd.f32 %v9401_v62, %v3196_v1 }
 0x774   : > { %v13750_v3 = vpack.c.bf16 %v3202_v0, %v3197_v2 }
 0x7f8   : > { %v10808_v5 = vpop.f32.mrb[8].mxu0 }
 0x7f9   : > { %v2094_v6 = vpop.f32.mrb[9].mxu0  ;;  %v2106_v7 = vsel %vm1633_vm12, %v10808_v5, -inf }
 0x7fa   : > { %2107 = vmax.xlane.f32.xlu1 %v2106_v7  ;;  %v2103_v8 = vsel %vm1629_vm13, %v2094_v6, -inf }
 0x7fb   : > { %2104 = vmax.xlane.f32.xlu0 %v2103_v8 }
 0x887   : > { %v2108_v9 = vpop.xlane.xlu1 %2107 }
 0x888   : > { %v2110_v12 = vsub.f32 %v10808_v5, %v2108_v9  ;;  %v2105_v14 = vpop.xlane.xlu0 %2104 }
 0x889   : > { %v2109_v15 = vsub.f32 %v2094_v6, %v2105_v14 }
 0x88a   : > { %v2113_v16 = vmul.f32 1.442695, %v2110_v12 }
 0x88b   : > { %v2111_v17 = vmul.f32 1.442695, %v2109_v15 }
 0x88c   : > { %12689 = vpow2.f32 %v2113_v16 }
 0x88d   : > { %12691 = vpow2.f32 %v2111_v17  ;;  %v9364_v17 = vld [vmem:[%s15631_s15 + $0x20] sm:$0xff] }
 0x896   : > { %v12690_v18 = vpop.eup %12689 }
 0x897   : > { %v12692_v19 = vpop.eup %12691  ;;  %v2118_v20 = vsel %vm1633_vm12, %v12690_v18, 0.0 }
 0x898   : > { %2119 = vadd.xlane.f32.xlu1 %v2118_v20  ;;  %v2115_v21 = vsel %vm1629_vm13, %v12692_v19, 0.0 }
 0x899   : > { %2116 = vadd.xlane.f32.xlu0 %v2115_v21 }
 0x925   : > { %v2120_v25 = vpop.xlane.xlu1 %2119 }
 0x926   : > { %12693 = vrcp.f32 %v2120_v25  ;;  %v2117_v26 = vpop.xlane.xlu0 %2116 }
 0x927   : > { %12695 = vrcp.f32 %v2117_v26  ;;  %v9380_v26 = vld [vmem:[%s15698_s28 + $0xc0] sm:$0xff] }
 0x930   : > { %v12694_v27 = vpop.eup %12693 }
 0x931   : > { %v12696_v28 = vpop.eup %12695  ;;  %v2124_v30 = vmul.f32 %v12694_v27, %v12690_v18  ;;  %v9365_v18 = vld [vmem:[%s15631_s15 + $0x28] sm:$0xff] }
 0x932   : > { %v2123_v29 = vmul.f32 %v12696_v28, %v12692_v19  ;;  %v11885_v19 = vpack.c.bf16 %v9365_v18, %v9364_v17  ;;  %v9381_v27 = vld [vmem:[%s15698_s28 + $0xc8] sm:$0xff] }
 0x933   : > { %v11905_v28 = vpack.c.bf16 %v9381_v27, %v9380_v26 }
 0x934   : > { %10813 = vmatprep.mubr.msk.f32.mxu0 %vm1629_vm13, %v2123_v29  ;;  %v9382_v29 = vld [vmem:[%s15698_s28 + $0xd0] sm:$0xff] }
 0x935   : > { %10814 = vmatmul.mubr.msk.f32.vlgmr.msra.gmra.mrb[10].mxu0 %vm1629_vm13, %v2124_v30  ;;  %v9383_v30 = vld [vmem:[%s15698_s28 + $0xd8] sm:$0xff] }
 0x936   : > { %11820 = vmatpush3.bf16.msra.mxu0 %v11817_v24 }
 0x937   : > { %11822 = vmatprep.subr.bf16.mxu0 %v11821_v35 }
 0xa08   : > { %v10815_v40 = vpop.f32.mrb[10].mxu0 }
 0xa09   : > { %v2200_v41 = vpop.f32.mrb[11].mxu0 }
 0xa0a   : > { %10820 = vmatprep.mubr.msk.f32.mxu0 %vm1541_vm8, %v2200_v41  ;;  %v9386_v41 = vld [vmem:[%s15698_s28 + $0xf0] sm:$0xff] }
 0xa0b   : > { %10821 = vmatmul.mubr.msk.f32.vlgmr.msra.gmra.mrb[12].mxu0 %vm1541_vm8, %v10815_v40  ;;  %v11913_v40 = vpack.c.bf16 %v9385_v38, %v9384_v36  ;;  %v3549_v36 = vld [vmem:[%s15636_s20 + $0x8] sm:$0xff]  ;;  %v3551_v38 = vld [vmem:[%s15636_s20 + $0x18] sm:$0xff] }
 0xa0c   : > { %10827 = vmatprep.mubr.msk.f32.mxu0 %vm1541_vm8, %v13708_v32  ;;  %11824 = vmatpush3.bf16.msra.mxu0 %v11821_v35  ;;  %v11849_v32 = vpack.c.bf16 %v9338_v51, %v9337_v48  ;;  %v11909_v35 = vpack.c.bf16 %v9383_v30, %v9382_v29 }
 0xa0d   : > { %11842 = vmatprep.subr.bf16.mxu0 %v11841_v42 }
 0xa13   : > { %10828 = vmatmul.mubr.msk.f32.vlgmr.msra.gmra.mrb[12].mxu0 %vm1541_vm8, %v13706_v31  ;;  %v2458_v31 = vadd.f32 %v13725_v47, %v13730_v50 }
 0xa14   : > { %11844 = vmatpush3.bf16.msra.mxu0 %v11841_v42  ;;  %10865 = vmatprep.mubr.msk.f32.mxu0 %vm1220_vm6, %v13437_v4  ;;  %v9387_v42 = vld [vmem:[%s15698_s28 + $0xf8] sm:$0xff] }
 0xa15   : > { %11846 = vmatprep.subr.bf16.mxu0 %v11845_v46  ;;  %v11917_v43 = vpack.c.bf16 %v9387_v42, %v9386_v41  ;;  %v3548_v41 = vld [vmem:[%s15636_s20] sm:$0xff]  ;;  %v3550_v42 = vld [vmem:[%s15636_s20 + $0x10] sm:$0xff] }
 0xa18   : > { %11848 = vmatpush3.bf16.msra.mxu0 %v11845_v46 }
 0xa19   : > { %11850 = vmatprep.subr.bf16.mxu0 %v11849_v32 }
 0xa1c   : > { %11852 = vmatpush3.bf16.msra.mxu0 %v11849_v32 }
 0xa1d   : > { %11854 = vmatprep.subr.bf16.mxu0 %v11853_v55 }
 0xa20   : > { %11856 = vmatpush3.bf16.msra.mxu0 %v11853_v55 }
 0xa23   : > { %10866 = vmatmul.mubr.msk.f32.vlgmr.msra.gmra.mrb[14].mxu0 %vm1220_vm6, %v13456_v13 }
 0xa24   : > { %10891 = vmatprep.mubr.msk.f32.mxu0 %vm1541_vm8, %v2458_v31 }
 0xaf6   : > { %v10867_v59 = vpop.f32.mrb[14].mxu0 }
 0xaf7   : > { %v2555_v62 = vadd.f32 %v10867_v59, %v9342_v56  ;;  %v2549_v63 = vpop.f32.mrb[15].mxu0 }
 0xaf8   : > { %v2550_v0 = vadd.f32 %v9342_v56, %v2549_v63 }
 0xafa   : > { %v11873_v1 = vpack.c.bf16 %v2555_v62, %v2550_v0 }
 0xafc   : > { %11875 = vmatprep.subr.msk.bf16.mxu0 %vm13502_vm9, %v11873_v1 }
 0xafd   : > { %11878 = vmatpush3.bf16.xpose.msk.msra.mxu0 %vm13502_vm9, %v11873_v1 }
 0xafe   : > { %11881 = vmatprep.subr.msk.bf16.mxu0 %vm13519_vm11, %v13735_v57 }
 0xb04   : > { %10892 = vmatmul.mubr.msk.f32.vlgmr.msra.gmra.mrb[16].mxu0 %vm1541_vm8, %v13728_v49 }
 0xb05   : > { %11884 = vmatpush3.bf16.msk.msra.mxu0 %vm13519_vm11, %v13735_v57 }
 0xb06   : > { %11886 = vmatprep.subr.bf16.mxu0 %v11885_v19 }
 0xbd7   : > { %v10893_v47 = vpop.f32.mrb[16].mxu0 }
 0xbd8   : > { %v2728_v50 = vpop.f32.mrb[17].mxu0  ;;  %v2740_v2 = vsel %vm1633_vm12, %v10893_v47, -inf }
 0xbd9   : > { %2741 = vmax.xlane.f32.xlu1 %v2740_v2  ;;  %v2737_v5 = vsel %vm1629_vm13, %v2728_v50, -inf }
 0xbda   : > { %2738 = vmax.xlane.f32.xlu0 %v2737_v5 }
 0xc66   : > { %v2742_v6 = vpop.xlane.xlu1 %2741 }
 0xc67   : > { %v2744_v7 = vsub.f32 %v10893_v47, %v2742_v6  ;;  %v2739_v8 = vpop.xlane.xlu0 %2738  ;;  %v9411_v47 = vld [vmem:[%s15631_s15 + $0x30] sm:$0xff] }
 0xc68   : > { %v2743_v9 = vsub.f32 %v2728_v50, %v2739_v8  ;;  %v9412_v50 = vld [vmem:[%s15631_s15 + $0x38] sm:$0xff] }
 0xc69   : > { %v2747_v12 = vmul.f32 1.442695, %v2744_v7  ;;  %v11949_v2 = vpack.c.bf16 %v9412_v50, %v9411_v47  ;;  %v3696_v50 = vld [vmem:[%s15638_s22 + $0x8] sm:$0xff] }
 0xc6a   : > { %v2745_v14 = vmul.f32 1.442695, %v2743_v9 }
 0xc6b   : > { %12697 = vpow2.f32 %v2747_v12 }
 0xc6c   : > { %12699 = vpow2.f32 %v2745_v14 }
 0xc75   : > { %v12698_v49 = vpop.eup %12697 }
 0xc76   : > { %v12700_v15 = vpop.eup %12699  ;;  %v2752_v57 = vsel %vm1633_vm12, %v12698_v49, 0.0 }
 0xc77   : > { %2753 = vadd.xlane.f32.xlu1 %v2752_v57  ;;  %v2749_v16 = vsel %vm1629_vm13, %v12700_v15, 0.0 }
 0xc78   : > { %2750 = vadd.xlane.f32.xlu0 %v2749_v16  ;;  %v9416_v16 = vld [vmem:[%s15633_s17] ss:$0 sm:$0xff] }
 0xd04   : > { %v2754_v20 = vpop.xlane.xlu1 %2753 }
 0xd05   : > { %12701 = vrcp.f32 %v2754_v20  ;;  %v2751_v21 = vpop.xlane.xlu0 %2750 }
 0xd06   : > { %12703 = vrcp.f32 %v2751_v21 }
 0xd0f   : > { %v12702_v22 = vpop.eup %12701 }
 0xd10   : > { %v12704_v23 = vpop.eup %12703  ;;  %v2758_v25 = vmul.f32 %v12702_v22, %v12698_v49 }
 0xd11   : > { %v2757_v24 = vmul.f32 %v12704_v23, %v12700_v15  ;;  %v9415_v15 = vld [vmem:[%s15632_s16] ss:$0 sm:$0xff] }
 0xd13   : > { %10898 = vmatprep.mubr.msk.f32.mxu0 %vm1629_vm13, %v2757_v24 }
 0xd14   : > { %10899 = vmatmul.mubr.msk.f32.vlgmr.msra.gmra.mrb[18].mxu0 %vm1629_vm13, %v2758_v25 }
 0xd15   : > { %11888 = vmatpush3.bf16.msra.mxu0 %v11885_v19 }
 0xd16   : > { %11906 = vmatprep.subr.bf16.mxu0 %v11905_v28 }
 0xde7   : > { %v10900_v33 = vpop.f32.mrb[18].mxu0 }
 0xde8   : > { %v2834_v34 = vpop.f32.mrb[19].mxu0 }
 0xde9   : > { %10905 = vmatprep.mubr.msk.f32.mxu0 %vm1541_vm8, %v2834_v34 }
 0xdea   : > { %10906 = vmatmul.mubr.msk.f32.vlgmr.msra.gmra.mrb[12].mxu0 %vm1541_vm8, %v10900_v33 }
 0xdeb   : > { %11908 = vmatpush3.bf16.msra.mxu0 %v11905_v28  ;;  %10943 = vmatprep.mubr.msk.f32.mxu0 %vm1220_vm6, %v13437_v4  ;;  %v9389_v4 = vld [vmem:[%s15628_s12 + $0x3] ss:$0 sm:$0xff] }
 0xdec   : > { %11910 = vmatprep.subr.bf16.mxu0 %v11909_v35 }
 0xdef   : > { %11912 = vmatpush3.bf16.msra.mxu0 %v11909_v35 }
 0xdf0   : > { %11914 = vmatprep.subr.bf16.mxu0 %v11913_v40 }
 0xdf3   : > { %11916 = vmatpush3.bf16.msra.mxu0 %v11913_v40  ;;  %v11953_v40 = vpack.c.bf16 %v3551_v38, %v3549_v36  ;;  %v3717_v36 = vld [vmem:[%s15638_s22 + $0xb0] sm:$0xff]  ;;  %v3718_v38 = vld [vmem:[%s15638_s22 + $0xb8] sm:$0xff] }
 0xdf4   : > { %11918 = vmatprep.subr.bf16.mxu0 %v11917_v43 }
 0xdf5   : > { %11954 = vmatprep.subr.bf16.mxu1 %v11953_v40  ;;  %v11981_v40 = vpack.c.bf16 %v3718_v38, %v3717_v36 }
 0xdf7   : > { %11920 = vmatpush3.bf16.msra.mxu0 %v11917_v43  ;;  %v11955_v43 = vpack.c.bf16 %v3550_v42, %v3548_v41  ;;  %v3701_v41 = vld [vmem:[%s15638_s22 + $0x30] sm:$0xff]  ;;  %v3702_v42 = vld [vmem:[%s15638_s22 + $0x38] sm:$0xff] }
 0xdf9   : > { %11956 = vmatpush1.bf16.msra.mxu1 %v11955_v43  ;;  %v11983_v43 = vpack.c.bf16 %v3702_v42, %v3701_v41 }
 0xdfa   : > { %10944 = vmatmul.mubr.msk.f32.vlgmr.msra.gmra.mrb[20].mxu0 %vm1220_vm6, %v13456_v13 }
 0xdfb   : > { %10969 = vmatprep.mubr.msk.f32.mxu0 %vm1541_vm8, %v3013_v44  ;;  %v3553_v44 = vld [vmem:[%s15636_s20 + $0x28] sm:$0xff] }
 0xecd   : > { %v10945_v46 = vpop.f32.mrb[20].mxu0 }
 0xece   : > { %v3110_v48 = vadd.f32 %v10945_v46, %v9389_v4  ;;  %v3104_v51 = vpop.f32.mrb[21].mxu0 }
 0xecf   : > { %v3105_v32 = vadd.f32 %v9389_v4, %v3104_v51  ;;  %v3555_v4 = vld [vmem:[%s15636_s20 + $0x38] sm:$0xff]  ;;  %v3554_v51 = vld [vmem:[%s15636_s20 + $0x30] sm:$0xff] }
 0xed0   : > { %v11957_v46 = vpack.c.bf16 %v3555_v4, %v3553_v44  ;;  %v3719_v44 = vld [vmem:[%s15638_s22 + $0xc0] sm:$0xff]  ;;  %v3720_v4 = vld [vmem:[%s15638_s22 + $0xc8] sm:$0xff] }
 0xed1   : > { %v11937_v53 = vpack.c.bf16 %v3110_v48, %v3105_v32  ;;  %v3552_v48 = vld [vmem:[%s15636_s20 + $0x20] sm:$0xff] }
 0xed2   : > { %v11959_v32 = vpack.c.bf16 %v3554_v51, %v3552_v48  ;;  %11958 = vmatprep.subr.bf16.mxu1 %v11957_v46  ;;  %v3703_v46 = vld [vmem:[%s15638_s22 + $0x40] sm:$0xff]  ;;  %v11985_v48 = vpack.c.bf16 %v3720_v4, %v3719_v44  ;;  %v3704_v51 = vld [vmem:[%s15638_s22 + $0x48] sm:$0xff] }
 0xed3   : > { %11939 = vmatprep.subr.msk.bf16.mxu0 %vm13502_vm9, %v11937_v53 }
 0xed4   : > { %11942 = vmatpush3.bf16.xpose.msk.msra.mxu0 %vm13502_vm9, %v11937_v53  ;;  %11960 = vmatpush1.bf16.msra.mxu1 %v11959_v32  ;;  %v3557_v53 = vld [vmem:[%s15636_s20 + $0x48] sm:$0xff]  ;;  %v3721_v32 = vld [vmem:[%s15638_s22 + $0xd0] sm:$0xff] }
 0xed5   : > { %11945 = vmatprep.subr.msk.bf16.mxu0 %vm13519_vm11, %v13750_v3 }
 0xedb   : > { %10970 = vmatmul.mubr.msk.f32.vlgmr.msra.gmra.mrb[22].mxu0 %vm1541_vm8, %v13743_v60 }
 0xedc   : > { %11948 = vmatpush3.bf16.msk.msra.mxu0 %vm13519_vm11, %v13750_v3 }
 0xedd   : > { %11950 = vmatprep.subr.bf16.mxu0 %v11949_v2 }
 0xfae   : > { %v10971_v13 = vpop.f32.mrb[22].mxu0 }
 0xfaf   : > { %v3283_v58 = vpop.f32.mrb[23].mxu0  ;;  %v3295_v61 = vsel %vm1633_vm12, %v10971_v13, -inf }
 0xfb0   : > { %3296 = vmax.xlane.f32.xlu1 %v3295_v61  ;;  %v3292_v54 = vsel %vm1629_vm13, %v3283_v58, -inf  ;;  %v3556_v61 = vld [vmem:[%s15636_s20 + $0x40] sm:$0xff] }
 0xfb1   : > { %3293 = vmax.xlane.f32.xlu0 %v3292_v54  ;;  %v3558_v54 = vld [vmem:[%s15636_s20 + $0x50] sm:$0xff] }
0x103d   : > { %v3297_v55 = vpop.xlane.xlu1 %3296 }
0x103e   : > { %v3299_v31 = vsub.f32 %v10971_v13, %v3297_v55  ;;  %v3294_v56 = vpop.xlane.xlu0 %3293  ;;  %v3559_v13 = vld [vmem:[%s15636_s20 + $0x58] sm:$0xff]  ;;  %v11963_v55 = vpack.c.bf16 %v3558_v54, %v3556_v61  ;;  %v3705_v61 = vld [vmem:[%s15638_s22 + $0x50] sm:$0xff] }
0x103f   : > { %v3298_v59 = vsub.f32 %v3283_v58, %v3294_v56  ;;  %v11961_v58 = vpack.c.bf16 %v3559_v13, %v3557_v53  ;;  %v3563_v56 = vld [vmem:[%s15636_s20 + $0x78] sm:$0xff]  ;;  %v11987_v13 = vpack.c.bf16 %v3704_v51, %v3703_v46 }
0x1040   : > { %v3302_v62 = vmul.f32 1.442695, %v3299_v31  ;;  %v3561_v31 = vld [vmem:[%s15636_s20 + $0x68] sm:$0xff]  ;;  %v3722_v53 = vld [vmem:[%s15638_s22 + $0xd8] sm:$0xff] }
0x1041   : > { %v3300_v63 = vmul.f32 1.442695, %v3298_v59  ;;  %11962 = vmatprep.subr.bf16.mxu1 %v11961_v58  ;;  %v11965_v59 = vpack.c.bf16 %v3563_v56, %v3561_v31  ;;  %v11989_v58 = vpack.c.bf16 %v3722_v53, %v3721_v32  ;;  %v3706_v54 = vld [vmem:[%s15638_s22 + $0x58] sm:$0xff]  ;;  %v3724_v31 = vld [vmem:[%s15638_s22 + $0xe8] sm:$0xff] }
0x1042   : > { %12705 = vpow2.f32 %v3302_v62  ;;  %11964 = vmatpush1.bf16.msra.mxu1 %v11963_v55  ;;  %v3560_v62 = vld [vmem:[%s15636_s20 + $0x60] sm:$0xff]  ;;  %v11991_v56 = vpack.c.bf16 %v3706_v54, %v3705_v61 }
0x1043   : > { %12707 = vpow2.f32 %v3300_v63  ;;  %v3562_v63 = vld [vmem:[%s15636_s20 + $0x70] sm:$0xff]  ;;  %11966 = vmatprep.subr.bf16.mxu1 %v11965_v59  ;;  %v3723_v55 = vld [vmem:[%s15638_s22 + $0xe0] sm:$0xff] }
0x1044   : > { %v11993_v59 = vpack.c.bf16 %v3724_v31, %v3723_v55 }
0x104c   : > { %v12706_v60 = vpop.eup %12705 }
0x104d   : > { %v12708_v0 = vpop.eup %12707  ;;  %v3307_v3 = vsel %vm1633_vm12, %v12706_v60, 0.0 }
0x104e   : > { %3308 = vadd.xlane.f32.xlu1 %v3307_v3  ;;  %v3304_v1 = vsel %vm1629_vm13, %v12708_v0, 0.0  ;;  %v3712_v3 = vld [vmem:[%s15638_s22 + $0x88] sm:$0xff] }
0x104f   : > { %3305 = vadd.xlane.f32.xlu0 %v3304_v1  ;;  %v3695_v1 = vld [vmem:[%s15638_s22] sm:$0xff] }
0x10db   : > { %v3309_v5 = vpop.xlane.xlu1 %3308 }
0x10dc   : > { %12709 = vrcp.f32 %v3309_v5  ;;  %v3306_v6 = vpop.xlane.xlu0 %3305 }
0x10dd   : > { %12711 = vrcp.f32 %v3306_v6 }
0x10e6   : > { %v12710_v7 = vpop.eup %12709 }
0x10e7   : > { %v12712_v8 = vpop.eup %12711  ;;  %v3313_v12 = vmul.f32 %v12710_v7, %v12706_v60  ;;  %v11967_v60 = vpack.c.bf16 %v3562_v63, %v3560_v62  ;;  %v3707_v62 = vld [vmem:[%s15638_s22 + $0x60] sm:$0xff]  ;;  %v3708_v63 = vld [vmem:[%s15638_s22 + $0x68] sm:$0xff] }
0x10e8   : > { %v3312_v9 = vmul.f32 %v12712_v8, %v12708_v0  ;;  %v3711_v0 = vld [vmem:[%s15638_s22 + $0x80] sm:$0xff] }
0x10e9   : > { %11968 = vmatpush1.bf16.msra.mxu1 %v11967_v60  ;;  %v11969_v47 = vpack.c.bf16 %v3712_v3, %v3711_v0  ;;  %v3725_v60 = vld [vmem:[%s15638_s22 + $0xf0] sm:$0xff]  ;;  %v3726_v0 = vld [vmem:[%s15638_s22 + $0xf8] sm:$0xff]  ;;  %v11995_v3 = vpack.c.bf16 %v3708_v63, %v3707_v62 }
0x10ea   : > { %10976 = vmatprep.mubr.msk.f32.mxu0 %vm1629_vm13, %v3312_v9 }
0x10eb   : > { %10977 = vmatmul.mubr.msk.f32.vlgmr.msra.gmra.mrb[24].mxu0 %vm1629_vm13, %v3313_v12 }
0x10ec   : > { %11952 = vmatpush3.bf16.msra.mxu0 %v11949_v2  ;;  %v11971_v2 = vpack.c.bf16 %v3696_v50, %v3695_v1  ;;  %v11997_v1 = vpack.c.bf16 %v3726_v0, %v3725_v60  ;;  %v3710_v50 = vld [vmem:[%s15638_s22 + $0x78] sm:$0xff]  ;;  %v9421_v0 = vld [vmem:[%s15639_s23] ss:$0 sm:$0xff] }
0x10ed   : > { %11970 = vmatprep.subr.bf16.mxu0 %v11969_v47  ;;  %v3709_v47 = vld [vmem:[%s15638_s22 + $0x70] sm:$0xff] }
0x11be   : > { %v10978_v14 = vpop.f32.mrb[24].mxu0 }
0x11bf   : > { %v3389_v49 = vpop.f32.mrb[25].mxu0 }
0x11c0   : > { %10983 = vmatprep.mubr.msk.f32.mxu0 %vm1541_vm8, %v3389_v49 }
0x11c1   : > { %10984 = vmatmul.mubr.msk.f32.vlgmr.msra.gmra.mrb[12].mxu0 %vm1541_vm8, %v10978_v14 }
0x11c2   : > { %11972 = vmatpush3.bf16.msra.mxu0 %v11971_v2  ;;  %v11999_v2 = vpack.c.bf16 %v3710_v50, %v3709_v47  ;;  %v9422_v47 = vld [vmem:[%s15640_s24] ss:$0 sm:$0xff] }
0x1294   : > { %v10985_v57 = vpop.f32.mrb[12].mxu0 }
0x1295   : > { %v3493_v17 = vadd.f32 %v10985_v57, %v9415_v15  ;;  %v3473_v18 = vpop.f32.mrb[13].mxu0 }
0x1296   : > { %v3492_v19 = vadd.f32 %v9415_v15, %v3473_v18  ;;  %v9417_v15 = vld [vmem:[%s15634_s18] ss:$0 sm:$0xff] }
0x1297   : > { %v3501_v20 = vmul.f32 %v9416_v16, %v3493_v17  ;;  %v9418_v17 = vld [vmem:[%s15635_s19] ss:$0 sm:$0xff] }
0x1298   : > { %v3500_v21 = vmul.f32 %v9416_v16, %v3492_v19 }
0x1299   : > { %v13903_v22 = vadd.f32 %v3501_v20, %v13352_v11 }
0x129a   : > { %v13906_v23 = vadd.f32 %v3500_v21, %v13350_v10 }
0x129b   : > { %v3509_v24 = vsel %vm1224_vm7, %v13903_v22, 0.0 }
0x129c   : > { %3510 = vadd.xlane.f32.xlu1 %v3509_v24  ;;  %v3506_v25 = vsel %vm1220_vm6, %v13906_v23, 0.0  ;;  %v3713_v24 = vld [vmem:[%s15638_s22 + $0x90] sm:$0xff] }
0x129d   : > { %3507 = vadd.xlane.f32.xlu0 %v3506_v25  ;;  %v3714_v25 = vld [vmem:[%s15638_s22 + $0x98] sm:$0xff] }
0x1329   : > { %v3511_v26 = vpop.xlane.xlu1 %3510 }
0x132a   : > { %v3513_v27 = vmul.f32 0.015625, %v3511_v26  ;;  %v3508_v28 = vpop.xlane.xlu0 %3507  ;;  %v11973_v26 = vpack.c.bf16 %v3714_v25, %v3713_v24 }
0x132b   : > { %v3512_v29 = vmul.f32 0.015625, %v3508_v28  ;;  %v3698_v28 = vld [vmem:[%s15638_s22 + $0x18] sm:$0xff] }
0x132c   : > { %v3515_v30 = vsub.f32 %v13903_v22, %v3513_v27  ;;  %v3697_v27 = vld [vmem:[%s15638_s22 + $0x10] sm:$0xff]  ;;  %11974 = vmatprep.subr.bf16.mxu0 %v11973_v26 }
0x132d   : > { %v3514_v11 = vsub.f32 %v13906_v23, %v3512_v29  ;;  %v11975_v29 = vpack.c.bf16 %v3698_v28, %v3697_v27 }
0x132e   : > { %v3517_v33 = vmul.f32 %v3515_v30, %v3515_v30 }
0x132f   : > { %v3516_v34 = vmul.f32 %v3514_v11, %v3514_v11  ;;  %11976 = vmatpush3.bf16.msra.mxu0 %v11975_v29 }
0x1330   : > { %v3521_v10 = vsel %vm1224_vm7, %v3517_v33, 0.0 }
0x1331   : > { %3522 = vadd.xlane.f32.xlu1 %v3521_v10  ;;  %v3518_v35 = vsel %vm1220_vm6, %v3516_v34, 0.0  ;;  %v3699_v34 = vld [vmem:[%s15638_s22 + $0x20] sm:$0xff]  ;;  %v3700_v10 = vld [vmem:[%s15638_s22 + $0x28] sm:$0xff] }
0x1332   : > { %3519 = vadd.xlane.f32.xlu0 %v3518_v35  ;;  %v11979_v35 = vpack.c.bf16 %v3700_v10, %v3699_v34 }
0x13be   : > { %v3523_v5 = vpop.xlane.xlu1 %3522 }
0x13bf   : > { %v3525_v6 = vmul.f32 0.015625, %v3523_v5  ;;  %v3520_v7 = vpop.xlane.xlu0 %3519  ;;  %v3566_v5 = vlaneseq }
0x13c0   : > { %v3524_v8 = vmul.f32 0.015625, %v3520_v7 }
0x13c1   : > { %v3527_v9 = vadd.f32 1e-06, %v3525_v6  ;;  %v3567_v6 = vshrl.u32 %v3566_v5, 7 }
0x13c2   : > { %v3526_v12 = vadd.f32 1e-06, %v3524_v8  ;;  %v3564_v8 = vld [vmem:[%s15637_s21] sm:$0x3] }
0x13c3   : > { %12713 = vrsqrt.f32 %v3527_v9  ;;  %v14069_v7 = vsub.s32 0, %v3567_v6  ;;  %v14074_v9 = vsub.s32 1, %v3567_v6 }
0x13c4   : > { %12715 = vrsqrt.f32 %v3526_v12 }
0x13c5   : > { %v3569_v12 = vrot.slane %v3564_v8, %v14069_v7 }
0x13cd   : > { %v12714_v14 = vpop.eup %12713 }
0x13ce   : > { %v12716_v49 = vpop.eup %12715  ;;  %v3531_v16 = vmul.f32 %v12714_v14, %v3515_v30  ;;  %v3715_v30 = vld [vmem:[%s15638_s22 + $0xa0] sm:$0xff]  ;;  %v3573_v14 = vrot.slane %v3564_v8, %v14074_v9 }
0x13cf   : > { %v3530_v57 = vmul.f32 %v12716_v49, %v3514_v11  ;;  %v3716_v11 = vld [vmem:[%s15638_s22 + $0xa8] sm:$0xff] }
0x13d0   : > { %v3539_v20 = vmul.f32 %v9417_v15, %v3531_v16  ;;  %v11977_v33 = vpack.c.bf16 %v3716_v11, %v3715_v30 }
0x13d1   : > { %v3538_v18 = vmul.f32 %v9417_v15, %v3530_v57 }
0x13d2   : > { %v3547_v21 = vadd.f32 %v9418_v17, %v3539_v20  ;;  %11978 = vmatprep.subr.bf16.mxu0 %v11977_v33 }
0x13d3   : > { %v3546_v19 = vadd.f32 %v9418_v17, %v3538_v18  ;;  %11980 = vmatpush3.bf16.msra.mxu0 %v11979_v35 }
0x13d4   : > { %11982 = vmatprep.subr.bf16.mxu0 %v11981_v40 }
0x13d5   : > { %9419 = vmatmul.mubr.msk.f32.vlgmr.msra.gmra.mrb[24].mxu1 %vm1220_vm6, %v3546_v19 }
0x13d6   : > { %3652 = vmatprep.mubr.f32.mxu1 %v12891_v45 }
0x13d7   : > { %11984 = vmatpush3.bf16.msra.mxu0 %v11983_v43 }
0x13d8   : > { %11986 = vmatprep.subr.bf16.mxu0 %v11985_v48 }
0x13d9   : > { %9420 = vmatmul.mubr.msk.f32.gmra.mrb[26].mxu1 %vm1220_vm6, %v3547_v21 }
0x13db   : > { %11988 = vmatpush3.bf16.msra.mxu0 %v11987_v13 }
0x13dc   : > { %11990 = vmatprep.subr.bf16.mxu0 %v11989_v58 }
0x13df   : > { %11992 = vmatpush3.bf16.msra.mxu0 %v11991_v56 }
0x13e0   : > { %11994 = vmatprep.subr.bf16.mxu0 %v11993_v59 }
0x13e3   : > { %11996 = vmatpush3.bf16.msra.mxu0 %v11995_v3 }
0x13e4   : > { %11998 = vmatprep.subr.bf16.mxu0 %v11997_v1 }
0x13e7   : > { %12000 = vmatpush3.bf16.msra.mxu0 %v11999_v2 }
0x14a8   : > { %v3648_v49 = vpop.f32.mrb[24].mxu1 }
0x14a9   : > { %v3649_v15 = vadd.f32 %v3648_v49, %v3569_v12  ;;  %v3650_v57 = vpop.f32.mrb[25].mxu1 }
0x14aa   : > { %v3651_v16 = vadd.f32 %v3650_v57, %v3573_v14 }
0x14ab   : > { %v3663_v17 = vmul.f32 0.044715, %v3649_v15  ;;  %v3659_v53 = vmul.f32 0.5, %v3649_v15 }
0x14ac   : > { %v3664_v18 = vmul.f32 0.044715, %v3651_v16  ;;  %v3654_v19 = vpop.f32.mrb[26].mxu1  ;;  %v3660_v51 = vmul.f32 0.5, %v3651_v16 }
0x14ad   : > { %v3667_v20 = vmul.f32 %v3663_v17, %v3649_v15  ;;  %v3655_v21 = vadd.f32 %v3654_v19, %v3569_v12  ;;  %v3656_v24 = vpop.f32.mrb[27].mxu1 }
0x14ae   : > { %v3668_v25 = vmul.f32 %v3664_v18, %v3651_v16  ;;  %v3657_v26 = vadd.f32 %v3656_v24, %v3573_v14 }
0x14af   : > { %v3671_v27 = vmul.f32 %v3667_v20, %v3649_v15  ;;  %v3665_v28 = vmul.f32 0.044715, %v3655_v21  ;;  %v3661_v59 = vmul.f32 0.5, %v3655_v21 }
0x14b0   : > { %v3666_v29 = vmul.f32 0.044715, %v3657_v26  ;;  %v3672_v30 = vmul.f32 %v3668_v25, %v3651_v16  ;;  %v3662_v31 = vmul.f32 0.5, %v3657_v26 }
0x14b1   : > { %v3675_v11 = vadd.f32 %v3671_v27, %v3649_v15  ;;  %v3669_v33 = vmul.f32 %v3665_v28, %v3655_v21  ;;  %v9427_v27 = vld [vmem:[%s15697_s11 + $0x100] sm:$0xff]  ;;  %v9428_v28 = vld [vmem:[%s15697_s11 + $0x108] sm:$0xff] }
0x14b2   : > { %v3670_v34 = vmul.f32 %v3666_v29, %v3657_v26  ;;  %v3676_v10 = vadd.f32 %v3672_v30, %v3651_v16  ;;  %v12001_v29 = vpack.c.bf16 %v9428_v28, %v9427_v27  ;;  %v9451_v30 = vld [vmem:[%s15629_s13 + $0x100] sm:$0xff] }
0x14b3   : > { %v3679_v35 = vmul.f32 0.7978846, %v3675_v11  ;;  %v3673_v36 = vmul.f32 %v3669_v33, %v3655_v21  ;;  %v9452_v11 = vld [vmem:[%s15629_s13 + $0x108] sm:$0xff] }
0x14b4   : > { %v3680_v38 = vmul.f32 0.7978846, %v3676_v10  ;;  %v3674_v40 = vmul.f32 %v3670_v34, %v3657_v26  ;;  %v12033_v33 = vpack.c.bf16 %v9452_v11, %v9451_v30  ;;  %12002 = vmatprep.subr.bf16.mxu1 %v12001_v29  ;;  %v9429_v34 = vld [vmem:[%s15697_s11 + $0x110] sm:$0xff]  ;;  %v9430_v10 = vld [vmem:[%s15697_s11 + $0x118] sm:$0xff] }
0x14b5   : > { %12717 = vtanh.f32 %v3679_v35  ;;  %v3677_v41 = vadd.f32 %v3673_v36, %v3655_v21  ;;  %12004 = vmatpush3.bf16.msra.mxu1 %v12001_v29  ;;  %v12005_v35 = vpack.c.bf16 %v9430_v10, %v9429_v34  ;;  %v9453_v36 = vld [vmem:[%s15629_s13 + $0x110] sm:$0xff]  ;;  %v9448_v34 = vld [vmem:[%s15628_s12 + $0x4] ss:$0 sm:$0xff] }
0x14b6   : > { %12719 = vtanh.f32 %v3680_v38  ;;  %v3678_v42 = vadd.f32 %v3674_v40, %v3657_v26  ;;  %12034 = vmatprep.subr.bf16.mxu0 %v12033_v33  ;;  %v9454_v38 = vld [vmem:[%s15629_s13 + $0x118] sm:$0xff] }
0x14b7   : > { %v3681_v43 = vmul.f32 0.7978846, %v3677_v41  ;;  %v12037_v40 = vpack.c.bf16 %v9454_v38, %v9453_v36  ;;  %12006 = vmatprep.subr.bf16.mxu1 %v12005_v35  ;;  %v9431_v41 = vld [vmem:[%s15697_s11 + $0x120] sm:$0xff] }
0x14b8   : > { %v3682_v44 = vmul.f32 0.7978846, %v3678_v42  ;;  %v9432_v42 = vld [vmem:[%s15697_s11 + $0x128] sm:$0xff]  ;;  %v9472_v38 = vld [vmem:[%s15697_s11 + $0x140] sm:$0xff] }
0x14b9   : > { %12721 = vtanh.f32 %v3681_v43  ;;  %12008 = vmatpush3.bf16.msra.mxu1 %v12005_v35  ;;  %v12009_v43 = vpack.c.bf16 %v9432_v42, %v9431_v41 }
0x14ba   : > { %12723 = vtanh.f32 %v3682_v44  ;;  %v9455_v44 = vld [vmem:[%s15629_s13 + $0x120] sm:$0xff] }
0x14bb   : > { %12010 = vmatprep.subr.bf16.mxu1 %v12009_v43 }
0x14bd   : > { %12012 = vmatpush3.bf16.msra.mxu1 %v12009_v43 }
0x14bf   : > { %v12718_v4 = vpop.eup %12717 }
0x14c0   : > { %v12720_v46 = vpop.eup %12719  ;;  %v3687_v48 = vadd.f32 1.0, %v12718_v4  ;;  %v9456_v4 = vld [vmem:[%s15629_s13 + $0x128] sm:$0xff] }
0x14c1   : > { %v3688_v32 = vadd.f32 1.0, %v12720_v46  ;;  %v12041_v46 = vpack.c.bf16 %v9456_v4, %v9455_v44  ;;  %v9474_v44 = vld [vmem:[%s15697_s11 + $0x150] sm:$0xff]  ;;  %v9475_v4 = vld [vmem:[%s15697_s11 + $0x158] sm:$0xff] }
0x14c2   : > { %v3691_v54 = vmul.f32 %v3687_v48, %v3659_v53  ;;  %v9433_v48 = vld [vmem:[%s15697_s11 + $0x130] sm:$0xff] }
0x14c3   : > { %v12722_v13 = vpop.eup %12721  ;;  %v3692_v58 = vmul.f32 %v3688_v32, %v3660_v51  ;;  %v9434_v51 = vld [vmem:[%s15697_s11 + $0x138] sm:$0xff]  ;;  %v9457_v53 = vld [vmem:[%s15629_s13 + $0x130] sm:$0xff] }
0x14c4   : > { %v12724_v61 = vpop.eup %12723  ;;  %v3689_v55 = vadd.f32 1.0, %v12722_v13  ;;  %v12013_v32 = vpack.c.bf16 %v9434_v51, %v9433_v48  ;;  %v9458_v13 = vld [vmem:[%s15629_s13 + $0x138] sm:$0xff]  ;;  %v12065_v48 = vpack.c.bf16 %v9475_v4, %v9474_v44  ;;  %v9476_v51 = vld [vmem:[%s15697_s11 + $0x160] sm:$0xff]  ;;  %v9574_v4 = vld [vmem:[%s15697_s11 + $0x1f0] sm:$0xff] }
0x14c5   : > { %3798 = vmatprep.mubr.f32.mxu0 %v3692_v58  ;;  %v3690_v56 = vadd.f32 1.0, %v12724_v61  ;;  %v12045_v58 = vpack.c.bf16 %v9458_v13, %v9457_v53  ;;  %v9439_v61 = vld [vmem:[%s15698_s28 + $0x100] sm:$0xff]  ;;  %v9478_v13 = vld [vmem:[%s15697_s11 + $0x170] sm:$0xff] }
0x14c6   : > { %3799 = vmatmul.mubr.f32.vlgmr.msra.gmra.mrb[26].mxu0 %v3691_v54  ;;  %v3693_v63 = vmul.f32 %v3689_v55, %v3661_v59  ;;  %12014 = vmatprep.subr.bf16.mxu1 %v12013_v32  ;;  %v9440_v54 = vld [vmem:[%s15698_s28 + $0x108] sm:$0xff] }
0x14c7   : > { %v3694_v62 = vmul.f32 %v3690_v56, %v3662_v31  ;;  %12036 = vmatpush3.bf16.msra.mxu0 %v12033_v33  ;;  %12016 = vmatpush3.bf16.msra.mxu1 %v12013_v32  ;;  %v12017_v55 = vpack.c.bf16 %v9440_v54, %v9439_v61  ;;  %v9477_v32 = vld [vmem:[%s15697_s11 + $0x168] sm:$0xff]  ;;  %v9496_v54 = vld [vmem:[%s15629_s13 + $0x140] sm:$0xff] }
0x14c8   : > { %12038 = vmatprep.subr.bf16.mxu0 %v12037_v40  ;;  %v12069_v53 = vpack.c.bf16 %v9477_v32, %v9476_v51  ;;  %v9592_v51 = vld [vmem:[%s15629_s13 + $0x1c0] sm:$0xff]  ;;  %v9593_v32 = vld [vmem:[%s15629_s13 + $0x1c8] sm:$0xff] }
0x14c9   : > { %3803 = vmatprep.mubr.f32.mxu0 %v3694_v62  ;;  %12018 = vmatprep.subr.bf16.mxu1 %v12017_v55 }
0x14ca   : > { %3804 = vmatmul.mubr.f32.gmra.mrb[28].mxu0 %v3693_v63 }
0x14cb   : > { %12040 = vmatpush3.bf16.msra.mxu0 %v12037_v40  ;;  %v9473_v40 = vld [vmem:[%s15697_s11 + $0x148] sm:$0xff] }
0x14cc   : > { %12042 = vmatprep.subr.bf16.mxu0 %v12041_v46  ;;  %v12061_v43 = vpack.c.bf16 %v9473_v40, %v9472_v38  ;;  %v9570_v38 = vld [vmem:[%s15697_s11 + $0x1d0] sm:$0xff]  ;;  %v9571_v40 = vld [vmem:[%s15697_s11 + $0x1d8] sm:$0xff] }
0x14cf   : > { %12044 = vmatpush3.bf16.msra.mxu0 %v12041_v46 }
0x14d0   : > { %12046 = vmatprep.subr.bf16.mxu0 %v12045_v58 }
0x14d3   : > { %12048 = vmatpush3.bf16.msra.mxu0 %v12045_v58  ;;  %v9479_v58 = vld [vmem:[%s15697_s11 + $0x178] sm:$0xff] }
0x14d4   : > { %v12073_v61 = vpack.c.bf16 %v9479_v58, %v9478_v13  ;;  %v9594_v13 = vld [vmem:[%s15629_s13 + $0x1d0] sm:$0xff]  ;;  %v9595_v58 = vld [vmem:[%s15629_s13 + $0x1d8] sm:$0xff] }
0x1599   : > { %v10225_v60 = vpop.f32.mrb[26].mxu0 }
0x159a   : > { %v10226_v3 = vpop.f32.mrb[27].mxu0 }
0x159b   : > { %v10227_v1 = vadd.f32 %v10226_v3, %v10225_v60  ;;  %v9425_v3 = vld [vmem:[%s15700_s1 + $0x1] ss:$0 sm:$0xff] }
0x159d   : > { %v3801_v50 = vadd.f32 %v10227_v1, %v9421_v0  ;;  %v10228_v2 = vpop.f32.mrb[28].mxu0 }
0x159e   : > { %v10229_v5 = vpop.f32.mrb[29].mxu0 }
0x159f   : > { %v3816_v6 = vmul.f32 %v9422_v47, %v3801_v50  ;;  %v10230_v8 = vadd.f32 %v10229_v5, %v10228_v2 }
0x15a1   : > { %v3806_v12 = vadd.f32 %v10230_v8, %v9421_v0  ;;  %v14085_v14 = vadd.f32 %v3816_v6, %v13906_v23  ;;  %v9441_v8 = vld [vmem:[%s15698_s28 + $0x110] sm:$0xff] }
0x15a3   : > { %v3817_v49 = vmul.f32 %v9422_v47, %v3806_v12  ;;  %v3824_v15 = vsel %vm1220_vm6, %v14085_v14, 0.0  ;;  %v9426_v47 = vld [vmem:[%s15701_s2 + $0x1] ss:$0 sm:$0xff]  ;;  %v9442_v12 = vld [vmem:[%s15698_s28 + $0x118] sm:$0xff] }
0x15a4   : > { %3825 = vadd.xlane.f32.xlu0 %v3824_v15 }
0x15a5   : > { %v14090_v57 = vadd.f32 %v3817_v49, %v13903_v22 }
0x15a7   : > { %v3827_v16 = vsel %vm1224_vm7, %v14090_v57, 0.0 }
0x15a8   : > { %3828 = vadd.xlane.f32.xlu1 %v3827_v16  ;;  %v12021_v16 = vpack.c.bf16 %v9442_v12, %v9441_v8  ;;  %v9523_v8 = vld [vmem:[%s15697_s11 + $0x190] sm:$0xff]  ;;  %v9524_v12 = vld [vmem:[%s15697_s11 + $0x198] sm:$0xff] }
0x1631   : > { %v3826_v17 = vpop.xlane.xlu0 %3825 }
0x1632   : > { %v3830_v18 = vmul.f32 0.015625, %v3826_v17  ;;  %v9443_v17 = vld [vmem:[%s15698_s28 + $0x120] sm:$0xff] }
0x1634   : > { %v14095_v19 = vsub.f32 %v14085_v14, %v3830_v18  ;;  %v9444_v18 = vld [vmem:[%s15698_s28 + $0x128] sm:$0xff] }
0x1635   : > { %v3829_v20 = vpop.xlane.xlu1 %3828 }
0x1636   : > { %v3831_v23 = vmul.f32 0.015625, %v3829_v20  ;;  %v3834_v21 = vmul.f32 %v14095_v19, %v14095_v19  ;;  %v9445_v20 = vld [vmem:[%s15698_s28 + $0x130] sm:$0xff] }
0x1638   : > { %v14100_v24 = vsub.f32 %v14090_v57, %v3831_v23  ;;  %v3836_v22 = vsel %vm1220_vm6, %v3834_v21, 0.0  ;;  %v9446_v23 = vld [vmem:[%s15698_s28 + $0x138] sm:$0xff] }
0x1639   : > { %3837 = vadd.xlane.f32.xlu0 %v3836_v22  ;;  %v12029_v21 = vpack.c.bf16 %v9446_v23, %v9445_v20  ;;  %v9436_v22 = vld [vmem:[%s15702_s6 + $0x4] ss:$0 sm:$0xff]  ;;  %v9528_v20 = vld [vmem:[%s15697_s11 + $0x1b8] sm:$0xff] }
0x163a   : > { %v3835_v25 = vmul.f32 %v14100_v24, %v14100_v24 }
0x163c   : > { %v3839_v26 = vsel %vm1224_vm7, %v3835_v25, 0.0 }
0x163d   : > { %3840 = vadd.xlane.f32.xlu1 %v3839_v26 }
0x16c6   : > { %v3838_v31 = vpop.xlane.xlu0 %3837 }
0x16c7   : > { %v3842_v56 = vmul.f32 0.015625, %v3838_v31 }
0x16c9   : > { %v3844_v59 = vadd.f32 1e-06, %v3842_v56  ;;  %v9498_v56 = vld [vmem:[%s15629_s13 + $0x150] sm:$0xff] }
0x16ca   : > { %v3841_v62 = vpop.xlane.xlu1 %3840 }
0x16cb   : > { %12725 = vrsqrt.f32 %v3844_v59  ;;  %v3843_v63 = vmul.f32 0.015625, %v3841_v62  ;;  %v9499_v59 = vld [vmem:[%s15629_s13 + $0x158] sm:$0xff] }
0x16cc   : > { %v12097_v62 = vpack.c.bf16 %v9499_v59, %v9498_v56  ;;  %v9598_v56 = vld [vmem:[%s15629_s13 + $0x1f0] sm:$0xff]  ;;  %v9599_v59 = vld [vmem:[%s15629_s13 + $0x1f8] sm:$0xff] }
0x16cd   : > { %v3845_v60 = vadd.f32 1e-06, %v3843_v63  ;;  %v9500_v63 = vld [vmem:[%s15629_s13 + $0x160] sm:$0xff] }
0x16cf   : > { %12727 = vrsqrt.f32 %v3845_v60  ;;  %v9501_v60 = vld [vmem:[%s15629_s13 + $0x168] sm:$0xff] }
0x16d5   : > { %v12726_v0 = vpop.eup %12725 }
0x16d6   : > { %v3848_v1 = vmul.f32 %v12726_v0, %v14095_v19  ;;  %v12025_v19 = vpack.c.bf16 %v9444_v18, %v9443_v17  ;;  %v12101_v0 = vpack.c.bf16 %v9501_v60, %v9500_v63  ;;  %v9526_v17 = vld [vmem:[%s15697_s11 + $0x1a8] sm:$0xff] }
0x16d8   : > { %v3856_v50 = vmul.f32 %v9425_v3, %v3848_v1  ;;  %v9503_v1 = vld [vmem:[%s15629_s13 + $0x178] sm:$0xff] }
0x16d9   : > { %v12728_v2 = vpop.eup %12727 }
0x16da   : > { %v14167_v5 = vadd.f32 %v9426_v47, %v3856_v50  ;;  %v3849_v6 = vmul.f32 %v12728_v2, %v14100_v24  ;;  %v9460_v24 = vld [vmem:[%s15630_s14 + $0x4] ss:$0 sm:$0xff]  ;;  %v9522_v2 = vld [vmem:[%s15697_s11 + $0x188] sm:$0xff] }
0x16db   : > { %v9521_v50 = vld [vmem:[%s15697_s11 + $0x180] sm:$0xff] }
0x16dc   : > { %v3857_v49 = vmul.f32 %v9425_v3, %v3849_v6  ;;  %11002 = vmatprep.mubr.msk.f32.mxu1 %vm1220_vm6, %v14167_v5  ;;  %11040 = vmatprep.mubr.msk.f32.mxu0 %vm1220_vm6, %v14167_v5  ;;  %v9502_v3 = vld [vmem:[%s15629_s13 + $0x170] sm:$0xff]  ;;  %v12129_v6 = vpack.c.bf16 %v9522_v2, %v9521_v50 }
0x16de   : > { %v14180_v15 = vadd.f32 %v9426_v47, %v3857_v49  ;;  %v12105_v47 = vpack.c.bf16 %v9503_v1, %v9502_v3  ;;  %v12133_v49 = vpack.c.bf16 %v9524_v12, %v9523_v8  ;;  %v14395_v1 = vld [vmem:[%s15702_s6 + $0x5] ss:$0 sm:$0xff] }
0x16e0   : > { %11003 = vmatmul.mubr.msk.f32.vlgmr.msra.gmra.mrb[28].mxu1 %vm1220_vm6, %v14180_v15  ;;  %11041 = vmatmul.mubr.msk.f32.vlgmr.msra.gmra.mrb[30].mxu0 %vm1220_vm6, %v14180_v15 }
0x16e1   : > { %12020 = vmatpush3.bf16.msra.mxu1 %v12017_v55  ;;  %11021 = vmatprep.mubr.msk.f32.mxu1 %vm1220_vm6, %v14167_v5  ;;  %v9497_v55 = vld [vmem:[%s15629_s13 + $0x148] sm:$0xff] }
0x16e2   : > { %12022 = vmatprep.subr.bf16.mxu1 %v12021_v16  ;;  %v12093_v31 = vpack.c.bf16 %v9497_v55, %v9496_v54  ;;  %v9596_v54 = vld [vmem:[%s15629_s13 + $0x1e0] sm:$0xff]  ;;  %v9597_v55 = vld [vmem:[%s15629_s13 + $0x1e8] sm:$0xff] }
0x16e5   : > { %12024 = vmatpush3.bf16.msra.mxu1 %v12021_v16  ;;  %v9525_v16 = vld [vmem:[%s15697_s11 + $0x1a0] sm:$0xff] }
0x16e6   : > { %12026 = vmatprep.subr.bf16.mxu1 %v12025_v19  ;;  %v12137_v18 = vpack.c.bf16 %v9526_v17, %v9525_v16 }
0x16e9   : > { %12028 = vmatpush3.bf16.msra.mxu1 %v12025_v19  ;;  %v9527_v19 = vld [vmem:[%s15697_s11 + $0x1b0] sm:$0xff] }
0x16ea   : > { %12030 = vmatprep.subr.bf16.mxu1 %v12029_v21  ;;  %v12141_v23 = vpack.c.bf16 %v9528_v20, %v9527_v19 }
0x16ed   : > { %12032 = vmatpush3.bf16.msra.mxu1 %v12029_v21  ;;  %v9545_v21 = vld [vmem:[%s15629_s13 + $0x180] sm:$0xff] }
0x16f0   : > { %11022 = vmatmul.mubr.msk.f32.vlgmr.msra.gmra.mrb[30].mxu1 %vm1220_vm6, %v14180_v15 }
0x17b3   : > { %v11004_v25 = vpop.f32.mrb[28].mxu1  ;;  %v11042_v26 = vpop.f32.mrb[30].mxu0 }
0x17b4   : > { %v4145_v27 = vadd.f32 %v11042_v26, %v9460_v24  ;;  %v3955_v28 = vpop.f32.mrb[29].mxu1  ;;  %v4139_v29 = vpop.f32.mrb[31].mxu0  ;;  %v3961_v46 = vadd.f32 %v11004_v25, %v9436_v22  ;;  %v9547_v25 = vld [vmem:[%s15629_s13 + $0x190] sm:$0xff]  ;;  %v9548_v26 = vld [vmem:[%s15629_s13 + $0x198] sm:$0xff] }
0x17b5   : > { %v3956_v30 = vadd.f32 %v9436_v22, %v3955_v28  ;;  %v4140_v11 = vadd.f32 %v9460_v24, %v4139_v29  ;;  %v9546_v24 = vld [vmem:[%s15629_s13 + $0x188] sm:$0xff]  ;;  %v9549_v28 = vld [vmem:[%s15629_s13 + $0x1a0] sm:$0xff] }
0x17b6   : > { %v12161_v22 = vpack.c.bf16 %v9546_v24, %v9545_v21  ;;  %v9550_v29 = vld [vmem:[%s15629_s13 + $0x1a8] sm:$0xff]  ;;  %v9554_v21 = vld [vmem:[%s15630_s14 + $0x6] ss:$0 sm:$0xff] }
0x17b7   : > { %v12055_v33 = vpack.c.bf16 %v4145_v27, %v4140_v11  ;;  %11047 = vmatprep.mubr.msk.f32.mxu1 %vm1541_vm8, %v3956_v30  ;;  %v12165_v27 = vpack.c.bf16 %v9548_v26, %v9547_v25  ;;  %v12169_v30 = vpack.c.bf16 %v9550_v29, %v9549_v28  ;;  %v9551_v11 = vld [vmem:[%s15629_s13 + $0x1b0] sm:$0xff]  ;;  %v14425_v28 = vld [vmem:[%s15702_s6 + $0x7] ss:$0 sm:$0xff] }
0x17b9   : > { %12057 = vmatprep.subr.msk.bf16.mxu0 %vm13519_vm11, %v12055_v33 }
0x17ba   : > { %12060 = vmatpush3.bf16.msk.msra.mxu0 %vm13519_vm11, %v12055_v33  ;;  %v9552_v33 = vld [vmem:[%s15629_s13 + $0x1b8] sm:$0xff] }
0x17c3   : > { %v11023_v10 = vpop.f32.mrb[30].mxu1 }
0x17c4   : > { %v4053_v35 = vadd.f32 %v11023_v10, %v9448_v34  ;;  %v4047_v36 = vpop.f32.mrb[31].mxu1  ;;  %v9568_v10 = vld [vmem:[%s15697_s11 + $0x1c0] sm:$0xff] }
0x17c5   : > { %v4048_v41 = vadd.f32 %v9448_v34, %v4047_v36  ;;  %v12173_v34 = vpack.c.bf16 %v9552_v33, %v9551_v11  ;;  %v9601_v33 = vld [vmem:[%s15630_s14 + $0x7] ss:$0 sm:$0xff] }
0x17c7   : > { %v12049_v42 = vpack.c.bf16 %v4053_v35, %v4048_v41  ;;  %v9569_v35 = vld [vmem:[%s15697_s11 + $0x1c8] sm:$0xff]  ;;  %v12197_v41 = vpack.c.bf16 %v9571_v40, %v9570_v38 }
0x17c8   : > { %v12193_v36 = vpack.c.bf16 %v9569_v35, %v9568_v10 }
0x17c9   : > { %12051 = vmatprep.subr.msk.bf16.mxu1 %vm13502_vm9, %v12049_v42 }
0x17ca   : > { %12054 = vmatpush3.bf16.xpose.msk.msra.mxu1 %vm13502_vm9, %v12049_v42  ;;  %v9572_v42 = vld [vmem:[%s15697_s11 + $0x1e0] sm:$0xff] }
0x17cb   : > { %12062 = vmatprep.subr.bf16.mxu1 %v12061_v43 }
0x17d1   : > { %11048 = vmatmul.mubr.msk.f32.vlgmr.msra.gmra.mrb[32].mxu1 %vm1541_vm8, %v3961_v46  ;;  %v9575_v46 = vld [vmem:[%s15697_s11 + $0x1f8] sm:$0xff] }
0x17d2   : > { %12064 = vmatpush3.bf16.msra.mxu1 %v12061_v43  ;;  %11073 = vmatprep.mubr.msk.f32.mxu1 %vm1220_vm6, %v14167_v5  ;;  %v9573_v43 = vld [vmem:[%s15697_s11 + $0x1e8] sm:$0xff] }
0x17d3   : > { %12066 = vmatprep.subr.bf16.mxu1 %v12065_v48  ;;  %v12201_v44 = vpack.c.bf16 %v9573_v43, %v9572_v42 }
0x17d6   : > { %12068 = vmatpush3.bf16.msra.mxu1 %v12065_v48  ;;  %v12205_v48 = vpack.c.bf16 %v9575_v46, %v9574_v4 }
0x17d7   : > { %12070 = vmatprep.subr.bf16.mxu1 %v12069_v53 }
0x17da   : > { %12072 = vmatpush3.bf16.msra.mxu1 %v12069_v53  ;;  %v12225_v53 = vpack.c.bf16 %v9593_v32, %v9592_v51 }
0x17db   : > { %12074 = vmatprep.subr.bf16.mxu1 %v12073_v61 }
0x17de   : > { %12076 = vmatpush3.bf16.msra.mxu1 %v12073_v61  ;;  %v12229_v61 = vpack.c.bf16 %v9595_v58, %v9594_v13  ;;  %v9485_v13 = vld [vmem:[%s15698_s28 + $0x148] sm:$0xff] }
0x17df   : > { %12094 = vmatprep.subr.bf16.mxu1 %v12093_v31 }
0x17e1   : > { %11074 = vmatmul.mubr.msk.f32.vlgmr.msra.gmra.mrb[34].mxu1 %vm1220_vm6, %v14180_v15 }
0x17e2   : > { %12096 = vmatpush3.bf16.msra.mxu1 %v12093_v31  ;;  %11111 = vmatprep.mubr.msk.f32.mxu1 %vm1220_vm6, %v14167_v5  ;;  %v12233_v31 = vpack.c.bf16 %v9597_v55, %v9596_v54 }
0x17e3   : > { %12098 = vmatprep.subr.bf16.mxu1 %v12097_v62 }
0x17e6   : > { %12100 = vmatpush3.bf16.msra.mxu1 %v12097_v62  ;;  %v12237_v62 = vpack.c.bf16 %v9599_v59, %v9598_v56  ;;  %v9487_v56 = vld [vmem:[%s15698_s28 + $0x158] sm:$0xff] }
0x17e7   : > { %12102 = vmatprep.subr.bf16.mxu1 %v12101_v0 }
0x17ea   : > { %12104 = vmatpush3.bf16.msra.mxu1 %v12101_v0 }
0x17eb   : > { %12106 = vmatprep.subr.bf16.mxu1 %v12105_v47 }
0x17ee   : > { %12108 = vmatpush3.bf16.msra.mxu1 %v12105_v47 }
0x17ef   : > { %12130 = vmatprep.subr.bf16.mxu1 %v12129_v6 }
0x17f1   : > { %11112 = vmatmul.mubr.msk.f32.vlgmr.msra.gmra.mrb[36].mxu1 %vm1220_vm6, %v14180_v15 }
0x17f2   : > { %12132 = vmatpush3.bf16.msra.mxu1 %v12129_v6  ;;  %11158 = vmatprep.mubr.msk.f32.mxu1 %vm1220_vm6, %v14167_v5  ;;  %v9505_v6 = vld [vmem:[%s15630_s14 + $0x5] ss:$0 sm:$0xff] }
0x17f3   : > { %12134 = vmatprep.subr.bf16.mxu1 %v12133_v49 }
0x17f6   : > { %12136 = vmatpush3.bf16.msra.mxu1 %v12133_v49 }
0x17f7   : > { %12138 = vmatprep.subr.bf16.mxu1 %v12137_v18 }
0x17fa   : > { %12140 = vmatpush3.bf16.msra.mxu1 %v12137_v18  ;;  %v14410_v18 = vld [vmem:[%s15702_s6 + $0x6] ss:$0 sm:$0xff] }
0x17fb   : > { %12142 = vmatprep.subr.bf16.mxu1 %v12141_v23 }
0x17fe   : > { %12144 = vmatpush3.bf16.msra.mxu1 %v12141_v23 }
0x17ff   : > { %12162 = vmatprep.subr.bf16.mxu1 %v12161_v22 }
0x1801   : > { %11159 = vmatmul.mubr.msk.f32.vlgmr.msra.gmra.mrb[38].mxu1 %vm1220_vm6, %v14180_v15 }
0x1802   : > { %12164 = vmatpush3.bf16.msra.mxu1 %v12161_v22  ;;  %11196 = vmatprep.mubr.msk.f32.mxu1 %vm1220_vm6, %v14167_v5 }
0x1803   : > { %12166 = vmatprep.subr.bf16.mxu1 %v12165_v27 }
0x1806   : > { %12168 = vmatpush3.bf16.msra.mxu1 %v12165_v27 }
0x1807   : > { %12170 = vmatprep.subr.bf16.mxu1 %v12169_v30 }
0x180a   : > { %12172 = vmatpush3.bf16.msra.mxu1 %v12169_v30 }
0x180b   : > { %12174 = vmatprep.subr.bf16.mxu1 %v12173_v34 }
0x180e   : > { %12176 = vmatpush3.bf16.msra.mxu1 %v12173_v34 }
0x180f   : > { %12194 = vmatprep.subr.bf16.mxu1 %v12193_v36 }
0x1811   : > { %11197 = vmatmul.mubr.msk.f32.vlgmr.msra.gmra.mrb[40].mxu1 %vm1220_vm6, %v14180_v15 }
0x1812   : > { %12196 = vmatpush3.bf16.msra.mxu1 %v12193_v36  ;;  %11236 = vmatprep.mubr.msk.f32.mxu1 %vm1220_vm6, %v14167_v5 }
0x1813   : > { %12198 = vmatprep.subr.bf16.mxu1 %v12197_v41 }
0x1816   : > { %12200 = vmatpush3.bf16.msra.mxu1 %v12197_v41 }
0x1817   : > { %12202 = vmatprep.subr.bf16.mxu1 %v12201_v44 }
0x181a   : > { %12204 = vmatpush3.bf16.msra.mxu1 %v12201_v44 }
0x181b   : > { %12206 = vmatprep.subr.bf16.mxu1 %v12205_v48 }
0x181e   : > { %12208 = vmatpush3.bf16.msra.mxu1 %v12205_v48 }
0x181f   : > { %12226 = vmatprep.subr.bf16.mxu1 %v12225_v53 }
0x1821   : > { %11237 = vmatmul.mubr.msk.f32.vlgmr.msra.gmra.mrb[42].mxu1 %vm1220_vm6, %v14180_v15 }
0x1822   : > { %12228 = vmatpush3.bf16.msra.mxu1 %v12225_v53  ;;  %11274 = vmatprep.mubr.msk.f32.mxu1 %vm1220_vm6, %v14167_v5  ;;  %v9484_v53 = vld [vmem:[%s15698_s28 + $0x140] sm:$0xff] }
0x1823   : > { %12230 = vmatprep.subr.bf16.mxu1 %v12229_v61  ;;  %v12077_v58 = vpack.c.bf16 %v9485_v13, %v9484_v53 }
0x1825   : > { %12078 = vmatprep.subr.bf16.mxu0 %v12077_v58 }
0x1826   : > { %12232 = vmatpush3.bf16.msra.mxu1 %v12229_v61 }
0x1827   : > { %12234 = vmatprep.subr.bf16.mxu1 %v12233_v31 }
0x182a   : > { %12236 = vmatpush3.bf16.msra.mxu1 %v12233_v31  ;;  %v9486_v31 = vld [vmem:[%s15698_s28 + $0x150] sm:$0xff] }
0x182b   : > { %12238 = vmatprep.subr.bf16.mxu1 %v12237_v62 }
0x182e   : > { %12240 = vmatpush3.bf16.msra.mxu1 %v12237_v62 }
0x1831   : > { %11275 = vmatmul.mubr.msk.f32.vlgmr.msra.gmra.mrb[44].mxu1 %vm1220_vm6, %v14180_v15 }
0x1832   : > { %6256 = vmatprep.mubr.f32.mxu1 %v12891_v45 }
0x18a4   : > { %v11049_v63 = vpop.f32.mrb[32].mxu1 }
0x18a5   : > { %v4226_v60 = vpop.f32.mrb[33].mxu1  ;;  %v4238_v0 = vsel %vm1633_vm12, %v11049_v63, -inf }
0x18a6   : > { %4239 = vmax.xlane.f32.xlu1 %v4238_v0  ;;  %v4235_v3 = vsel %vm1629_vm13, %v4226_v60, -inf  ;;  %v9488_v0 = vld [vmem:[%s15698_s28 + $0x160] sm:$0xff] }
0x18a7   : > { %4236 = vmax.xlane.f32.xlu0 %v4235_v3  ;;  %v9489_v3 = vld [vmem:[%s15698_s28 + $0x168] sm:$0xff] }
0x18b4   : > { %v11075_v47 = vpop.f32.mrb[34].mxu1 }
0x18b5   : > { %v14398_v50 = vadd.f32 %v11075_v47, %v14395_v1  ;;  %v14400_v2 = vpop.f32.mrb[35].mxu1  ;;  %v12085_v47 = vpack.c.bf16 %v9489_v3, %v9488_v0  ;;  %v9535_v0 = vld [vmem:[%s15698_s28 + $0x190] sm:$0xff]  ;;  %v9536_v3 = vld [vmem:[%s15698_s28 + $0x198] sm:$0xff] }
0x18c4   : > { %v11113_v8 = vpop.f32.mrb[36].mxu1 }
0x18c5   : > { %v4617_v12 = vadd.f32 %v11113_v8, %v9505_v6  ;;  %v4611_v49 = vpop.f32.mrb[37].mxu1  ;;  %v9491_v8 = vld [vmem:[%s15698_s28 + $0x178] sm:$0xff] }
0x18c6   : > { %v4612_v16 = vadd.f32 %v9505_v6, %v4611_v49  ;;  %v9490_v6 = vld [vmem:[%s15698_s28 + $0x170] sm:$0xff]  ;;  %v4428_v49 = vadd.f32 %v14395_v1, %v14400_v2 }
0x18c8   : > { %v14405_v17 = vpack.c.bf16 %v4617_v12, %v4612_v16  ;;  %v12089_v12 = vpack.c.bf16 %v9491_v8, %v9490_v6  ;;  %v9537_v6 = vld [vmem:[%s15698_s28 + $0x1a0] sm:$0xff]  ;;  %v9538_v8 = vld [vmem:[%s15698_s28 + $0x1a8] sm:$0xff] }
0x18d4   : > { %v11160_v19 = vpop.f32.mrb[38].mxu1 }
0x18d5   : > { %v14413_v20 = vadd.f32 %v11160_v19, %v14410_v18  ;;  %v14415_v23 = vpop.f32.mrb[39].mxu1 }
0x18e4   : > { %v11198_v24 = vpop.f32.mrb[40].mxu1 }
0x18e5   : > { %v5251_v22 = vadd.f32 %v11198_v24, %v9554_v21  ;;  %v5245_v25 = vpop.f32.mrb[41].mxu1 }
0x18e6   : > { %v5246_v26 = vadd.f32 %v9554_v21, %v5245_v25  ;;  %v9493_v21 = vld [vmem:[%s15628_s12 + $0x5] ss:$0 sm:$0xff] }
0x18e8   : > { %v14420_v27 = vpack.c.bf16 %v5251_v22, %v5246_v26 }
0x18f4   : > { %v11238_v29 = vpop.f32.mrb[42].mxu1 }
0x18f5   : > { %v14428_v30 = vadd.f32 %v11238_v29, %v14425_v28  ;;  %v14430_v11 = vpop.f32.mrb[43].mxu1 }
0x1904   : > { %v11276_v34 = vpop.f32.mrb[44].mxu1 }
0x1905   : > { %v5806_v10 = vadd.f32 %v11276_v34, %v9601_v33  ;;  %v5800_v35 = vpop.f32.mrb[45].mxu1 }
0x1906   : > { %v5801_v36 = vadd.f32 %v9601_v33, %v5800_v35 }
0x1908   : > { %v14435_v38 = vpack.c.bf16 %v5806_v10, %v5801_v36 }
0x1933   : > { %v4240_v40 = vpop.xlane.xlu1 %4239 }
0x1934   : > { %v4242_v41 = vsub.f32 %v11049_v63, %v4240_v40  ;;  %v4237_v42 = vpop.xlane.xlu0 %4236 }
0x1935   : > { %v4241_v43 = vsub.f32 %v4226_v60, %v4237_v42  ;;  %v12081_v60 = vpack.c.bf16 %v9487_v56, %v9486_v31  ;;  %v9533_v56 = vld [vmem:[%s15698_s28 + $0x180] sm:$0xff] }
0x1936   : > { %v4245_v44 = vmul.f32 1.442695, %v4242_v41 }
0x1937   : > { %v4243_v4 = vmul.f32 1.442695, %v4241_v43 }
0x1938   : > { %12729 = vpow2.f32 %v4245_v44 }
0x1939   : > { %12731 = vpow2.f32 %v4243_v4  ;;  %v9515_v4 = vld [vmem:[%s15631_s15 + $0x50] sm:$0xff] }
0x1942   : > { %v12730_v46 = vpop.eup %12729 }
0x1943   : > { %v12732_v48 = vpop.eup %12731  ;;  %v4250_v51 = vsel %vm1633_vm12, %v12730_v46, 0.0 }
0x1944   : > { %4251 = vadd.xlane.f32.xlu1 %v4250_v51  ;;  %v4247_v32 = vsel %vm1629_vm13, %v12732_v48, 0.0 }
0x1945   : > { %4248 = vadd.xlane.f32.xlu0 %v4247_v32 }
0x19d1   : > { %v4252_v61 = vpop.xlane.xlu1 %4251 }
0x19d2   : > { %12733 = vrcp.f32 %v4252_v61  ;;  %v4249_v54 = vpop.xlane.xlu0 %4248 }
0x19d3   : > { %12735 = vrcp.f32 %v4249_v54  ;;  %v9470_v54 = vld [vmem:[%s15631_s15 + $0x40] sm:$0xff] }
0x19dc   : > { %v12734_v55 = vpop.eup %12733 }
0x19dd   : > { %v12736_v59 = vpop.eup %12735  ;;  %v4256_v63 = vmul.f32 %v12734_v55, %v12730_v46  ;;  %v9516_v46 = vld [vmem:[%s15631_s15 + $0x58] sm:$0xff]  ;;  %v9471_v55 = vld [vmem:[%s15631_s15 + $0x48] sm:$0xff] }
0x19de   : > { %v4255_v62 = vmul.f32 %v12736_v59, %v12732_v48  ;;  %v12121_v48 = vpack.c.bf16 %v9516_v46, %v9515_v4  ;;  %v12125_v31 = vpack.c.bf16 %v9471_v55, %v9470_v54  ;;  %v9534_v59 = vld [vmem:[%s15698_s28 + $0x188] sm:$0xff]  ;;  %v9582_v54 = vld [vmem:[%s15698_s28 + $0x1d0] sm:$0xff]  ;;  %v9583_v55 = vld [vmem:[%s15698_s28 + $0x1d8] sm:$0xff] }
0x19e0   : > { %11054 = vmatprep.mubr.msk.f32.mxu0 %vm1629_vm13, %v4255_v62 }
0x19e1   : > { %11055 = vmatmul.mubr.msk.f32.vlgmr.msra.gmra.mrb[32].mxu0 %vm1629_vm13, %v4256_v63 }
0x19e2   : > { %12080 = vmatpush3.bf16.msra.mxu0 %v12077_v58  ;;  %11092 = vmatprep.mubr.msk.f32.mxu0 %vm1220_vm6, %v14167_v5 }
0x19e3   : > { %12082 = vmatprep.subr.bf16.mxu0 %v12081_v60 }
0x19e6   : > { %12084 = vmatpush3.bf16.msra.mxu0 %v12081_v60  ;;  %v12145_v60 = vpack.c.bf16 %v9534_v59, %v9533_v56  ;;  %v12213_v59 = vpack.c.bf16 %v9583_v55, %v9582_v54 }
0x19e7   : > { %12086 = vmatprep.subr.bf16.mxu0 %v12085_v47 }
0x19ea   : > { %12088 = vmatpush3.bf16.msra.mxu0 %v12085_v47  ;;  %v12149_v47 = vpack.c.bf16 %v9536_v3, %v9535_v0  ;;  %v9586_v0 = vld [vmem:[%s15698_s28 + $0x1f0] sm:$0xff]  ;;  %v9587_v3 = vld [vmem:[%s15698_s28 + $0x1f8] sm:$0xff] }
0x19eb   : > { %12090 = vmatprep.subr.bf16.mxu0 %v12089_v12 }
0x19ee   : > { %12092 = vmatpush3.bf16.msra.mxu0 %v12089_v12  ;;  %v12153_v12 = vpack.c.bf16 %v9538_v8, %v9537_v6  ;;  %v5617_v6 = vadd.f32 %v14425_v28, %v14430_v11 }
0x19f1   : > { %11093 = vmatmul.mubr.msk.f32.vlgmr.msra.gmra.mrb[34].mxu0 %vm1220_vm6, %v14180_v15 }
0x19f2   : > { %11118 = vmatprep.mubr.msk.f32.mxu0 %vm1541_vm8, %v4428_v49  ;;  %v9539_v49 = vld [vmem:[%s15698_s28 + $0x1b0] sm:$0xff] }
0x1ab4   : > { %v14472_v16 = vpop.f32.mrb[32].mxu0 }
0x1ab5   : > { %v4332_v19 = vpop.f32.mrb[33].mxu0 }
0x1ac4   : > { %v11094_v24 = vpop.f32.mrb[34].mxu0 }
0x1ac5   : > { %v4525_v22 = vadd.f32 %v11094_v24, %v9493_v21  ;;  %v4519_v25 = vpop.f32.mrb[35].mxu0  ;;  %v9542_v24 = vld [vmem:[%s15628_s12 + $0x6] ss:$0 sm:$0xff] }
0x1ac6   : > { %v4520_v26 = vadd.f32 %v9493_v21, %v4519_v25 }
0x1ac8   : > { %v12109_v29 = vpack.c.bf16 %v4525_v22, %v4520_v26 }
0x1aca   : > { %12111 = vmatprep.subr.msk.bf16.mxu0 %vm13502_vm9, %v12109_v29 }
0x1acb   : > { %12114 = vmatpush3.bf16.xpose.msk.msra.mxu0 %vm13502_vm9, %v12109_v29 }
0x1acc   : > { %12117 = vmatprep.subr.msk.bf16.mxu0 %vm13519_vm11, %v14405_v17 }
0x1ad2   : > { %11119 = vmatmul.mubr.msk.f32.vlgmr.msra.gmra.mrb[36].mxu0 %vm1541_vm8, %v14398_v50 }
0x1ad3   : > { %12120 = vmatpush3.bf16.msk.msra.mxu0 %vm13519_vm11, %v14405_v17 }
0x1ad4   : > { %12122 = vmatprep.subr.bf16.mxu0 %v12121_v48 }
0x1ba5   : > { %v11120_v1 = vpop.f32.mrb[36].mxu0 }
0x1ba6   : > { %v4698_v2 = vpop.f32.mrb[37].mxu0  ;;  %v4710_v33 = vsel %vm1633_vm12, %v11120_v1, -inf }
0x1ba7   : > { %4711 = vmax.xlane.f32.xlu1 %v4710_v33  ;;  %v4707_v34 = vsel %vm1629_vm13, %v4698_v2, -inf }
0x1ba8   : > { %4708 = vmax.xlane.f32.xlu0 %v4707_v34 }
0x1c34   : > { %v4712_v10 = vpop.xlane.xlu1 %4711 }
0x1c35   : > { %v4714_v35 = vsub.f32 %v11120_v1, %v4712_v10  ;;  %v4709_v36 = vpop.xlane.xlu0 %4708 }
0x1c36   : > { %v4713_v40 = vsub.f32 %v4698_v2, %v4709_v36 }
0x1c37   : > { %v4717_v41 = vmul.f32 1.442695, %v4714_v35 }
0x1c38   : > { %v4715_v42 = vmul.f32 1.442695, %v4713_v40 }
0x1c39   : > { %12737 = vpow2.f32 %v4717_v41 }
0x1c3a   : > { %12739 = vpow2.f32 %v4715_v42 }
0x1c43   : > { %v12738_v50 = vpop.eup %12737 }
0x1c44   : > { %v12740_v43 = vpop.eup %12739  ;;  %v4722_v17 = vsel %vm1633_vm12, %v12738_v50, 0.0 }
0x1c45   : > { %4723 = vadd.xlane.f32.xlu1 %v4722_v17  ;;  %v4719_v44 = vsel %vm1629_vm13, %v12740_v43, 0.0  ;;  %v9565_v17 = vld [vmem:[%s15631_s15 + $0x68] sm:$0xff] }
0x1c46   : > { %4720 = vadd.xlane.f32.xlu0 %v4719_v44 }
0x1cd2   : > { %v4724_v51 = vpop.xlane.xlu1 %4723 }
0x1cd3   : > { %12741 = vrcp.f32 %v4724_v51  ;;  %v4721_v32 = vpop.xlane.xlu0 %4720 }
0x1cd4   : > { %12743 = vrcp.f32 %v4721_v32 }
0x1cdd   : > { %v12742_v53 = vpop.eup %12741 }
0x1cde   : > { %v12744_v13 = vpop.eup %12743  ;;  %v4728_v61 = vmul.f32 %v12742_v53, %v12738_v50 }
0x1cdf   : > { %v4727_v58 = vmul.f32 %v12744_v13, %v12740_v43  ;;  %v9564_v43 = vld [vmem:[%s15631_s15 + $0x60] sm:$0xff] }
0x1ce0   : > { %v12189_v44 = vpack.c.bf16 %v9565_v17, %v9564_v43  ;;  %v9580_v13 = vld [vmem:[%s15698_s28 + $0x1c0] sm:$0xff] }
0x1ce1   : > { %11125 = vmatprep.mubr.msk.f32.mxu0 %vm1629_vm13, %v4727_v58  ;;  %v9581_v58 = vld [vmem:[%s15698_s28 + $0x1c8] sm:$0xff]  ;;  %v9618_v17 = vld [vmem:[%s15633_s17 + $0x1] ss:$0 sm:$0xff] }
0x1ce2   : > { %11126 = vmatmul.mubr.msk.f32.vlgmr.msra.gmra.mrb[38].mxu0 %vm1629_vm13, %v4728_v61  ;;  %v12209_v61 = vpack.c.bf16 %v9581_v58, %v9580_v13 }
0x1ce3   : > { %12124 = vmatpush3.bf16.msra.mxu0 %v12121_v48 }
0x1ce4   : > { %12126 = vmatprep.subr.bf16.mxu0 %v12125_v31 }
0x1db5   : > { %v11127_v62 = vpop.f32.mrb[38].mxu0 }
0x1db6   : > { %v4804_v63 = vpop.f32.mrb[39].mxu0 }
0x1db7   : > { %11132 = vmatprep.mubr.msk.f32.mxu0 %vm1541_vm8, %v4804_v63  ;;  %v9585_v63 = vld [vmem:[%s15698_s28 + $0x1e8] sm:$0xff] }
0x1db8   : > { %11133 = vmatmul.mubr.msk.f32.vlgmr.msra.gmra.mrb[40].mxu0 %vm1541_vm8, %v11127_v62  ;;  %v9584_v62 = vld [vmem:[%s15698_s28 + $0x1e0] sm:$0xff] }
0x1db9   : > { %11139 = vmatprep.mubr.msk.f32.mxu0 %vm1541_vm8, %v4332_v19  ;;  %12128 = vmatpush3.bf16.msra.mxu0 %v12125_v31  ;;  %v9540_v19 = vld [vmem:[%s15698_s28 + $0x1b8] sm:$0xff] }
0x1dba   : > { %12146 = vmatprep.subr.bf16.mxu0 %v12145_v60  ;;  %v12157_v21 = vpack.c.bf16 %v9540_v19, %v9539_v49 }
0x1dc0   : > { %11140 = vmatmul.mubr.msk.f32.vlgmr.msra.gmra.mrb[40].mxu0 %vm1541_vm8, %v14472_v16  ;;  %v5062_v16 = vadd.f32 %v14410_v18, %v14415_v23 }
0x1dc1   : > { %12148 = vmatpush3.bf16.msra.mxu0 %v12145_v60  ;;  %11177 = vmatprep.mubr.msk.f32.mxu0 %vm1220_vm6, %v14167_v5  ;;  %v12217_v60 = vpack.c.bf16 %v9585_v63, %v9584_v62 }
0x1dc2   : > { %12150 = vmatprep.subr.bf16.mxu0 %v12149_v47 }
0x1dc5   : > { %12152 = vmatpush3.bf16.msra.mxu0 %v12149_v47  ;;  %v12221_v47 = vpack.c.bf16 %v9587_v3, %v9586_v0  ;;  %v9626_v0 = vld [vmem:[%s15636_s20 + $0x98] sm:$0xff] }
0x1dc6   : > { %12154 = vmatprep.subr.bf16.mxu0 %v12153_v12 }
0x1dc9   : > { %12156 = vmatpush3.bf16.msra.mxu0 %v12153_v12 }
0x1dca   : > { %12158 = vmatprep.subr.bf16.mxu0 %v12157_v21 }
0x1dcd   : > { %12160 = vmatpush3.bf16.msra.mxu0 %v12157_v21 }
0x1dd0   : > { %11178 = vmatmul.mubr.msk.f32.vlgmr.msra.gmra.mrb[42].mxu0 %vm1220_vm6, %v14180_v15 }
0x1dd1   : > { %11203 = vmatprep.mubr.msk.f32.mxu0 %vm1541_vm8, %v5062_v16 }
0x1ea3   : > { %v11179_v22 = vpop.f32.mrb[42].mxu0 }
0x1ea4   : > { %v5159_v25 = vadd.f32 %v11179_v22, %v9542_v24  ;;  %v5153_v26 = vpop.f32.mrb[43].mxu0 }
0x1ea5   : > { %v5154_v29 = vadd.f32 %v9542_v24, %v5153_v26 }
0x1ea7   : > { %v12177_v1 = vpack.c.bf16 %v5159_v25, %v5154_v29 }
0x1ea9   : > { %12179 = vmatprep.subr.msk.bf16.mxu0 %vm13502_vm9, %v12177_v1 }
0x1eaa   : > { %12182 = vmatpush3.bf16.xpose.msk.msra.mxu0 %vm13502_vm9, %v12177_v1 }
0x1eab   : > { %12185 = vmatprep.subr.msk.bf16.mxu0 %vm13519_vm11, %v14420_v27 }
0x1eb1   : > { %11204 = vmatmul.mubr.msk.f32.vlgmr.msra.gmra.mrb[44].mxu0 %vm1541_vm8, %v14413_v20 }
0x1eb2   : > { %12188 = vmatpush3.bf16.msk.msra.mxu0 %vm13519_vm11, %v14420_v27 }
0x1eb3   : > { %12190 = vmatprep.subr.bf16.mxu0 %v12189_v44 }
0x1f84   : > { %v11205_v18 = vpop.f32.mrb[44].mxu0 }
0x1f85   : > { %v5332_v23 = vpop.f32.mrb[45].mxu0  ;;  %v5344_v2 = vsel %vm1633_vm12, %v11205_v18, -inf }
0x1f86   : > { %5345 = vmax.xlane.f32.xlu1 %v5344_v2  ;;  %v5341_v33 = vsel %vm1629_vm13, %v5332_v23, -inf  ;;  %v9611_v2 = vld [vmem:[%s15631_s15 + $0x70] sm:$0xff] }
0x1f87   : > { %5342 = vmax.xlane.f32.xlu0 %v5341_v33  ;;  %v9612_v33 = vld [vmem:[%s15631_s15 + $0x78] sm:$0xff] }
0x2013   : > { %v5346_v34 = vpop.xlane.xlu1 %5345 }
0x2014   : > { %v5348_v10 = vsub.f32 %v11205_v18, %v5346_v34  ;;  %v5343_v35 = vpop.xlane.xlu0 %5342  ;;  %v12253_v34 = vpack.c.bf16 %v9612_v33, %v9611_v2  ;;  %v9659_v2 = vld [vmem:[%s15638_s22 + $0x188] sm:$0xff]  ;;  %v9642_v33 = vld [vmem:[%s15638_s22 + $0x100] sm:$0xff] }
0x2015   : > { %v5347_v36 = vsub.f32 %v5332_v23, %v5343_v35 }
0x2016   : > { %v5351_v40 = vmul.f32 1.442695, %v5348_v10 }
0x2017   : > { %v5349_v41 = vmul.f32 1.442695, %v5347_v36 }
0x2018   : > { %12745 = vpow2.f32 %v5351_v40 }
0x2019   : > { %12747 = vpow2.f32 %v5349_v41 }
0x2022   : > { %v12746_v20 = vpop.eup %12745 }
0x2023   : > { %v12748_v42 = vpop.eup %12747  ;;  %v5356_v27 = vsel %vm1633_vm12, %v12746_v20, 0.0 }
0x2024   : > { %5357 = vadd.xlane.f32.xlu1 %v5356_v27  ;;  %v5353_v50 = vsel %vm1629_vm13, %v12748_v42, 0.0 }
0x2025   : > { %5354 = vadd.xlane.f32.xlu0 %v5353_v50  ;;  %v9617_v50 = vld [vmem:[%s15632_s16 + $0x1] ss:$0 sm:$0xff] }
0x20b1   : > { %v5358_v4 = vpop.xlane.xlu1 %5357 }
0x20b2   : > { %12749 = vrcp.f32 %v5358_v4  ;;  %v5355_v46 = vpop.xlane.xlu0 %5354 }
0x20b3   : > { %12751 = vrcp.f32 %v5355_v46 }
0x20bc   : > { %v12750_v48 = vpop.eup %12749 }
0x20bd   : > { %v12752_v51 = vpop.eup %12751  ;;  %v5362_v53 = vmul.f32 %v12750_v48, %v12746_v20 }
0x20be   : > { %v5361_v32 = vmul.f32 %v12752_v51, %v12748_v42 }
0x20c0   : > { %11210 = vmatprep.mubr.msk.f32.mxu0 %vm1629_vm13, %v5361_v32 }
0x20c1   : > { %11211 = vmatmul.mubr.msk.f32.vlgmr.msra.gmra.mrb[46].mxu0 %vm1629_vm13, %v5362_v53 }
0x20c2   : > { %12192 = vmatpush3.bf16.msra.mxu0 %v12189_v44 }
0x20c3   : > { %12210 = vmatprep.subr.bf16.mxu0 %v12209_v61 }
0x2194   : > { %v11212_v31 = vpop.f32.mrb[46].mxu0 }
0x2195   : > { %v5438_v56 = vpop.f32.mrb[47].mxu0 }
0x2196   : > { %11217 = vmatprep.mubr.msk.f32.mxu0 %vm1541_vm8, %v5438_v56 }
0x2197   : > { %11218 = vmatmul.mubr.msk.f32.vlgmr.msra.gmra.mrb[40].mxu0 %vm1541_vm8, %v11212_v31 }
0x2198   : > { %12212 = vmatpush3.bf16.msra.mxu0 %v12209_v61  ;;  %11255 = vmatprep.mubr.msk.f32.mxu0 %vm1220_vm6, %v14167_v5  ;;  %v9589_v5 = vld [vmem:[%s15628_s12 + $0x7] ss:$0 sm:$0xff] }
0x2199   : > { %12214 = vmatprep.subr.bf16.mxu0 %v12213_v59 }
0x219c   : > { %12216 = vmatpush3.bf16.msra.mxu0 %v12213_v59 }
0x219d   : > { %12218 = vmatprep.subr.bf16.mxu0 %v12217_v60 }
0x21a0   : > { %12220 = vmatpush3.bf16.msra.mxu0 %v12217_v60  ;;  %v9624_v60 = vld [vmem:[%s15636_s20 + $0x88] sm:$0xff] }
0x21a1   : > { %12222 = vmatprep.subr.bf16.mxu0 %v12221_v47  ;;  %v12257_v3 = vpack.c.bf16 %v9626_v0, %v9624_v60  ;;  %v9647_v60 = vld [vmem:[%s15638_s22 + $0x128] sm:$0xff] }
0x21a3   : > { %12258 = vmatprep.subr.bf16.mxu1 %v12257_v3  ;;  %v9664_v3 = vld [vmem:[%s15638_s22 + $0x1b0] sm:$0xff] }
0x21a4   : > { %12224 = vmatpush3.bf16.msra.mxu0 %v12221_v47  ;;  %v9623_v47 = vld [vmem:[%s15636_s20 + $0x80] sm:$0xff] }
0x21a7   : > { %11256 = vmatmul.mubr.msk.f32.vlgmr.msra.gmra.mrb[48].mxu0 %vm1220_vm6, %v14180_v15 }
0x21a8   : > { %11281 = vmatprep.mubr.msk.f32.mxu0 %vm1541_vm8, %v5617_v6  ;;  %v9625_v6 = vld [vmem:[%s15636_s20 + $0x90] sm:$0xff] }
0x227a   : > { %v11257_v8 = vpop.f32.mrb[48].mxu0 }
0x227b   : > { %v5714_v12 = vadd.f32 %v11257_v8, %v9589_v5  ;;  %v5708_v49 = vpop.f32.mrb[49].mxu0  ;;  %v9628_v8 = vld [vmem:[%s15636_s20 + $0xa8] sm:$0xff] }
0x227c   : > { %v5709_v19 = vadd.f32 %v9589_v5, %v5708_v49  ;;  %v12259_v5 = vpack.c.bf16 %v9625_v6, %v9623_v47  ;;  %v9665_v47 = vld [vmem:[%s15638_s22 + $0x1b8] sm:$0xff] }
0x227d   : > { %v12285_v6 = vpack.c.bf16 %v9665_v47, %v9664_v3 }
0x227e   : > { %v12241_v21 = vpack.c.bf16 %v5714_v12, %v5709_v19  ;;  %12260 = vmatpush1.bf16.msra.mxu1 %v12259_v5  ;;  %v9630_v12 = vld [vmem:[%s15636_s20 + $0xb8] sm:$0xff]  ;;  %v9627_v19 = vld [vmem:[%s15636_s20 + $0xa0] sm:$0xff]  ;;  %v9648_v5 = vld [vmem:[%s15638_s22 + $0x130] sm:$0xff] }
0x227f   : > { %v12261_v49 = vpack.c.bf16 %v9630_v12, %v9628_v8  ;;  %v9649_v8 = vld [vmem:[%s15638_s22 + $0x138] sm:$0xff] }
0x2280   : > { %12243 = vmatprep.subr.msk.bf16.mxu0 %vm13502_vm9, %v12241_v21  ;;  %v12287_v12 = vpack.c.bf16 %v9649_v8, %v9648_v5 }
0x2281   : > { %12246 = vmatpush3.bf16.xpose.msk.msra.mxu0 %vm13502_vm9, %v12241_v21  ;;  %v9629_v21 = vld [vmem:[%s15636_s20 + $0xb0] sm:$0xff]  ;;  %12262 = vmatprep.subr.bf16.mxu1 %v12261_v49  ;;  %v9666_v49 = vld [vmem:[%s15638_s22 + $0x1c0] sm:$0xff] }
0x2282   : > { %12249 = vmatprep.subr.msk.bf16.mxu0 %vm13519_vm11, %v14435_v38 }
0x2288   : > { %11282 = vmatmul.mubr.msk.f32.vlgmr.msra.gmra.mrb[50].mxu0 %vm1541_vm8, %v14428_v30 }
0x2289   : > { %12252 = vmatpush3.bf16.msk.msra.mxu0 %vm13519_vm11, %v14435_v38 }
0x228a   : > { %12254 = vmatprep.subr.bf16.mxu0 %v12253_v34 }
0x235b   : > { %v11283_v15 = vpop.f32.mrb[50].mxu0 }
0x235c   : > { %v5887_v28 = vpop.f32.mrb[51].mxu0  ;;  %v5899_v11 = vsel %vm1633_vm12, %v11283_v15, -inf }
0x235d   : > { %5900 = vmax.xlane.f32.xlu1 %v5899_v11  ;;  %v5896_v16 = vsel %vm1629_vm13, %v5887_v28, -inf  ;;  %v9634_v11 = vld [vmem:[%s15636_s20 + $0xd8] sm:$0xff] }
0x235e   : > { %5897 = vmax.xlane.f32.xlu0 %v5896_v16 }
0x23ea   : > { %v5901_v24 = vpop.xlane.xlu1 %5900 }
0x23eb   : > { %v5903_v22 = vsub.f32 %v11283_v15, %v5901_v24  ;;  %v5898_v25 = vpop.xlane.xlu0 %5897  ;;  %v12263_v15 = vpack.c.bf16 %v9629_v21, %v9627_v19  ;;  %v9631_v24 = vld [vmem:[%s15636_s20 + $0xc0] sm:$0xff]  ;;  %v9667_v19 = vld [vmem:[%s15638_s22 + $0x1c8] sm:$0xff] }
0x23ec   : > { %v5902_v26 = vsub.f32 %v5887_v28, %v5898_v25  ;;  %v9632_v28 = vld [vmem:[%s15636_s20 + $0xc8] sm:$0xff]  ;;  %v9650_v21 = vld [vmem:[%s15638_s22 + $0x140] sm:$0xff] }
0x23ed   : > { %v5906_v29 = vmul.f32 1.442695, %v5903_v22  ;;  %12264 = vmatpush1.bf16.msra.mxu1 %v12263_v15  ;;  %v12265_v16 = vpack.c.bf16 %v9634_v11, %v9632_v28  ;;  %v9633_v22 = vld [vmem:[%s15636_s20 + $0xd0] sm:$0xff]  ;;  %v12289_v15 = vpack.c.bf16 %v9667_v19, %v9666_v49  ;;  %v9651_v28 = vld [vmem:[%s15638_s22 + $0x148] sm:$0xff] }
0x23ee   : > { %v5904_v1 = vmul.f32 1.442695, %v5902_v26  ;;  %v12267_v25 = vpack.c.bf16 %v9633_v22, %v9631_v24  ;;  %v9636_v26 = vld [vmem:[%s15636_s20 + $0xe8] sm:$0xff]  ;;  %v9668_v11 = vld [vmem:[%s15638_s22 + $0x1d0] sm:$0xff]  ;;  %v12291_v24 = vpack.c.bf16 %v9651_v28, %v9650_v21 }
0x23ef   : > { %12753 = vpow2.f32 %v5906_v29  ;;  %12266 = vmatprep.subr.bf16.mxu1 %v12265_v16  ;;  %v9638_v29 = vld [vmem:[%s15636_s20 + $0xf8] sm:$0xff] }
0x23f0   : > { %12755 = vpow2.f32 %v5904_v1  ;;  %v12269_v1 = vpack.c.bf16 %v9638_v29, %v9636_v26  ;;  %v9669_v16 = vld [vmem:[%s15638_s22 + $0x1d8] sm:$0xff]  ;;  %v9670_v29 = vld [vmem:[%s15638_s22 + $0x1e0] sm:$0xff] }
0x23f1   : > { %12268 = vmatpush1.bf16.msra.mxu1 %v12267_v25  ;;  %v12293_v22 = vpack.c.bf16 %v9669_v16, %v9668_v11  ;;  %v9652_v25 = vld [vmem:[%s15638_s22 + $0x150] sm:$0xff]  ;;  %v9653_v26 = vld [vmem:[%s15638_s22 + $0x158] sm:$0xff] }
0x23f2   : > { %12270 = vmatprep.subr.bf16.mxu1 %v12269_v1  ;;  %v9671_v1 = vld [vmem:[%s15638_s22 + $0x1e8] sm:$0xff] }
0x23f9   : > { %v12754_v30 = vpop.eup %12753 }
0x23fa   : > { %v12756_v18 = vpop.eup %12755  ;;  %v5911_v38 = vsel %vm1633_vm12, %v12754_v30, 0.0 }
0x23fb   : > { %5912 = vadd.xlane.f32.xlu1 %v5911_v38  ;;  %v5908_v23 = vsel %vm1629_vm13, %v12756_v18, 0.0 }
0x23fc   : > { %5909 = vadd.xlane.f32.xlu0 %v5908_v23  ;;  %v9658_v23 = vld [vmem:[%s15638_s22 + $0x180] sm:$0xff] }
0x2488   : > { %v5913_v10 = vpop.xlane.xlu1 %5912 }
0x2489   : > { %12757 = vrcp.f32 %v5913_v10  ;;  %v5910_v35 = vpop.xlane.xlu0 %5909  ;;  %v9643_v10 = vld [vmem:[%s15638_s22 + $0x108] sm:$0xff] }
0x248a   : > { %12759 = vrcp.f32 %v5910_v35  ;;  %v12275_v35 = vpack.c.bf16 %v9643_v10, %v9642_v33  ;;  %v9673_v33 = vld [vmem:[%s15638_s22 + $0x1f8] sm:$0xff] }
0x2493   : > { %v12758_v36 = vpop.eup %12757 }
0x2494   : > { %v12760_v40 = vpop.eup %12759  ;;  %v5917_v20 = vmul.f32 %v12758_v36, %v12754_v30  ;;  %v9635_v30 = vld [vmem:[%s15636_s20 + $0xe0] sm:$0xff] }
0x2495   : > { %v5916_v41 = vmul.f32 %v12760_v40, %v12756_v18  ;;  %v9637_v18 = vld [vmem:[%s15636_s20 + $0xf0] sm:$0xff] }
0x2496   : > { %v12271_v38 = vpack.c.bf16 %v9637_v18, %v9635_v30  ;;  %v12295_v30 = vpack.c.bf16 %v9653_v26, %v9652_v25  ;;  %v12297_v18 = vpack.c.bf16 %v9671_v1, %v9670_v29 }
0x2497   : > { %11288 = vmatprep.mubr.msk.f32.mxu0 %vm1629_vm13, %v5916_v41 }
0x2498   : > { %11289 = vmatmul.mubr.msk.f32.vlgmr.msra.gmra.mrb[52].mxu0 %vm1629_vm13, %v5917_v20  ;;  %12272 = vmatpush1.bf16.msra.mxu1 %v12271_v38  ;;  %v9654_v38 = vld [vmem:[%s15638_s22 + $0x160] sm:$0xff] }
0x2499   : > { %12256 = vmatpush3.bf16.msra.mxu0 %v12253_v34  ;;  %v12273_v34 = vpack.c.bf16 %v9659_v2, %v9658_v23  ;;  %v9655_v23 = vld [vmem:[%s15638_s22 + $0x168] sm:$0xff]  ;;  %v9672_v2 = vld [vmem:[%s15638_s22 + $0x1f0] sm:$0xff] }
0x249a   : > { %v12301_v10 = vpack.c.bf16 %v9673_v33, %v9672_v2 }
0x249b   : > { %12274 = vmatprep.subr.bf16.mxu0 %v12273_v34  ;;  %v12299_v34 = vpack.c.bf16 %v9655_v23, %v9654_v38  ;;  %v9675_v23 = vld [vmem:[%s15639_s23 + $0x1] ss:$0 sm:$0xff] }
0x256b   : > { %v11290_v42 = vpop.f32.mrb[52].mxu0 }
0x256c   : > { %v5993_v27 = vpop.f32.mrb[53].mxu0 }
0x256d   : > { %11295 = vmatprep.mubr.msk.f32.mxu0 %vm1541_vm8, %v5993_v27 }
0x256e   : > { %11296 = vmatmul.mubr.msk.f32.vlgmr.msra.gmra.mrb[40].mxu0 %vm1541_vm8, %v11290_v42 }
0x256f   : > { %12276 = vmatpush3.bf16.msra.mxu0 %v12275_v35  ;;  %v9656_v35 = vld [vmem:[%s15638_s22 + $0x170] sm:$0xff] }
0x2641   : > { %v11297_v43 = vpop.f32.mrb[40].mxu0 }
0x2642   : > { %v6099_v44 = vadd.f32 %v11297_v43, %v9617_v50  ;;  %v6077_v4 = vpop.f32.mrb[41].mxu0 }
0x2643   : > { %v6098_v46 = vadd.f32 %v9617_v50, %v6077_v4 }
0x2644   : > { %v6107_v48 = vmul.f32 %v9618_v17, %v6099_v44 }
0x2645   : > { %v6106_v51 = vmul.f32 %v9618_v17, %v6098_v46  ;;  %v9621_v17 = vld [vmem:[%s15634_s18 + $0x1] ss:$0 sm:$0xff] }
0x2646   : > { %v14639_v32 = vadd.f32 %v6107_v48, %v14090_v57  ;;  %v9622_v46 = vld [vmem:[%s15635_s19 + $0x1] ss:$0 sm:$0xff] }
0x2647   : > { %v14642_v53 = vadd.f32 %v6106_v51, %v14085_v14 }
0x2648   : > { %v6117_v13 = vsel %vm1224_vm7, %v14639_v32, 0.0 }
0x2649   : > { %6118 = vadd.xlane.f32.xlu1 %v6117_v13  ;;  %v6114_v58 = vsel %vm1220_vm6, %v14642_v53, 0.0 }
0x264a   : > { %6115 = vadd.xlane.f32.xlu0 %v6114_v58 }
0x26d6   : > { %v6119_v61 = vpop.xlane.xlu1 %6118 }
0x26d7   : > { %v6121_v54 = vmul.f32 0.015625, %v6119_v61  ;;  %v6116_v55 = vpop.xlane.xlu0 %6115  ;;  %v9660_v61 = vld [vmem:[%s15638_s22 + $0x190] sm:$0xff] }
0x26d8   : > { %v6120_v31 = vmul.f32 0.015625, %v6116_v55 }
0x26d9   : > { %v6123_v56 = vsub.f32 %v14639_v32, %v6121_v54  ;;  %v9661_v54 = vld [vmem:[%s15638_s22 + $0x198] sm:$0xff] }
0x26da   : > { %v6122_v57 = vsub.f32 %v14642_v53, %v6120_v31  ;;  %v12277_v55 = vpack.c.bf16 %v9661_v54, %v9660_v61  ;;  %v9644_v31 = vld [vmem:[%s15638_s22 + $0x110] sm:$0xff] }
0x26db   : > { %v6125_v59 = vmul.f32 %v6123_v56, %v6123_v56 }
0x26dc   : > { %v6124_v62 = vmul.f32 %v6122_v57, %v6122_v57  ;;  %12278 = vmatprep.subr.bf16.mxu0 %v12277_v55 }
0x26dd   : > { %v6129_v14 = vsel %vm1224_vm7, %v6125_v59, 0.0  ;;  %v9662_v59 = vld [vmem:[%s15638_s22 + $0x1a0] sm:$0xff] }
0x26de   : > { %6130 = vadd.xlane.f32.xlu1 %v6129_v14  ;;  %v6126_v63 = vsel %vm1220_vm6, %v6124_v62, 0.0  ;;  %v9663_v62 = vld [vmem:[%s15638_s22 + $0x1a8] sm:$0xff] }
0x26df   : > { %6127 = vadd.xlane.f32.xlu0 %v6126_v63  ;;  %v12281_v14 = vpack.c.bf16 %v9663_v62, %v9662_v59  ;;  %v9646_v63 = vld [vmem:[%s15638_s22 + $0x120] sm:$0xff] }
0x26e0   : > { %v12283_v0 = vpack.c.bf16 %v9647_v60, %v9646_v63 }
0x276b   : > { %v6131_v36 = vpop.xlane.xlu1 %6130 }
0x276c   : > { %v6133_v40 = vmul.f32 0.015625, %v6131_v36  ;;  %v6128_v41 = vpop.xlane.xlu0 %6127  ;;  %v9657_v36 = vld [vmem:[%s15638_s22 + $0x178] sm:$0xff] }
0x276d   : > { %v6132_v20 = vmul.f32 0.015625, %v6128_v41  ;;  %v9639_v41 = vld [vmem:[%s15637_s21 + $0x2] sm:$0x3] }
0x276e   : > { %v6135_v42 = vadd.f32 1e-06, %v6133_v40  ;;  %v12303_v40 = vpack.c.bf16 %v9657_v36, %v9656_v35 }
0x276f   : > { %v6134_v27 = vadd.f32 1e-06, %v6132_v20  ;;  %v6179_v20 = vrot.slane %v9639_v41, %v14069_v7 }
0x2770   : > { %12761 = vrsqrt.f32 %v6135_v42  ;;  %v6183_v42 = vrot.slane %v9639_v41, %v14074_v9 }
0x2771   : > { %12763 = vrsqrt.f32 %v6134_v27 }
0x277a   : > { %v12762_v50 = vpop.eup %12761 }
0x277b   : > { %v12764_v43 = vpop.eup %12763  ;;  %v6139_v4 = vmul.f32 %v12762_v50, %v6123_v56  ;;  %v9645_v56 = vld [vmem:[%s15638_s22 + $0x118] sm:$0xff] }
0x277c   : > { %v6138_v44 = vmul.f32 %v12764_v43, %v6122_v57  ;;  %v12279_v57 = vpack.c.bf16 %v9645_v56, %v9644_v31 }
0x277d   : > { %v6147_v13 = vmul.f32 %v9621_v17, %v6139_v4 }
0x277e   : > { %v6146_v48 = vmul.f32 %v9621_v17, %v6138_v44  ;;  %12280 = vmatpush3.bf16.msra.mxu0 %v12279_v57 }
0x277f   : > { %v6155_v58 = vadd.f32 %v9622_v46, %v6147_v13  ;;  %12282 = vmatprep.subr.bf16.mxu0 %v12281_v14 }
0x2780   : > { %v6154_v51 = vadd.f32 %v9622_v46, %v6146_v48 }
0x2782   : > { %9640 = vmatmul.mubr.msk.f32.vlgmr.msra.gmra.mrb[46].mxu1 %vm1220_vm6, %v6154_v51  ;;  %12284 = vmatpush3.bf16.msra.mxu0 %v12283_v0 }
0x2783   : > { %6262 = vmatprep.mubr.f32.mxu1 %v12891_v45  ;;  %12286 = vmatprep.subr.bf16.mxu0 %v12285_v6 }
0x2786   : > { %9641 = vmatmul.mubr.msk.f32.gmra.mrb[48].mxu1 %vm1220_vm6, %v6155_v58  ;;  %12288 = vmatpush3.bf16.msra.mxu0 %v12287_v12 }
0x2787   : > { %12290 = vmatprep.subr.bf16.mxu0 %v12289_v15 }
0x278a   : > { %12292 = vmatpush3.bf16.msra.mxu0 %v12291_v24 }
0x278b   : > { %12294 = vmatprep.subr.bf16.mxu0 %v12293_v22 }
0x278e   : > { %12296 = vmatpush3.bf16.msra.mxu0 %v12295_v30 }
0x278f   : > { %12298 = vmatprep.subr.bf16.mxu0 %v12297_v18 }
0x2792   : > { %12300 = vmatpush3.bf16.msra.mxu0 %v12299_v34  ;;  %v9677_v34 = vld [vmem:[%s15640_s24 + $0x1] ss:$0 sm:$0xff] }
0x2793   : > { %12302 = vmatprep.subr.bf16.mxu0 %v12301_v10 }
0x2796   : > { %12304 = vmatpush3.bf16.msra.mxu0 %v12303_v40 }
0x2855   : > { %v6258_v27 = vpop.f32.mrb[46].mxu1 }
0x2856   : > { %v6259_v50 = vadd.f32 %v6258_v27, %v6179_v20  ;;  %v6260_v43 = vpop.f32.mrb[47].mxu1 }
0x2857   : > { %v6261_v17 = vadd.f32 %v6260_v43, %v6183_v42 }
0x2858   : > { %v6273_v44 = vmul.f32 0.044715, %v6259_v50  ;;  %v6269_v28 = vmul.f32 0.5, %v6259_v50 }
0x2859   : > { %v6274_v4 = vmul.f32 0.044715, %v6261_v17  ;;  %v6264_v46 = vpop.f32.mrb[48].mxu1  ;;  %v6270_v21 = vmul.f32 0.5, %v6261_v17 }
0x285a   : > { %v6277_v48 = vmul.f32 %v6273_v44, %v6259_v50  ;;  %v6265_v51 = vadd.f32 %v6264_v46, %v6179_v20  ;;  %v6266_v13 = vpop.f32.mrb[49].mxu1 }
0x285b   : > { %v6278_v58 = vmul.f32 %v6274_v4, %v6261_v17  ;;  %v6267_v61 = vadd.f32 %v6266_v13, %v6183_v42 }
0x285c   : > { %v6281_v54 = vmul.f32 %v6277_v48, %v6259_v50  ;;  %v6275_v55 = vmul.f32 0.044715, %v6265_v51  ;;  %v6271_v1 = vmul.f32 0.5, %v6265_v51 }
0x285d   : > { %v6276_v31 = vmul.f32 0.044715, %v6267_v61  ;;  %v6282_v56 = vmul.f32 %v6278_v58, %v6261_v17  ;;  %v6272_v26 = vmul.f32 0.5, %v6267_v61 }
0x285e   : > { %v6285_v57 = vadd.f32 %v6281_v54, %v6259_v50  ;;  %v6279_v59 = vmul.f32 %v6275_v55, %v6265_v51  ;;  %v9682_v54 = vld [vmem:[%s15697_s11 + $0x200] sm:$0xff]  ;;  %v9683_v55 = vld [vmem:[%s15697_s11 + $0x208] sm:$0xff] }
0x285f   : > { %v6280_v62 = vmul.f32 %v6276_v31, %v6267_v61  ;;  %v6286_v14 = vadd.f32 %v6282_v56, %v6261_v17  ;;  %v12305_v31 = vpack.c.bf16 %v9683_v55, %v9682_v54  ;;  %v9706_v56 = vld [vmem:[%s15629_s13 + $0x200] sm:$0xff] }
0x2860   : > { %v6289_v63 = vmul.f32 0.7978846, %v6285_v57  ;;  %v6283_v60 = vmul.f32 %v6279_v59, %v6265_v51  ;;  %v9707_v57 = vld [vmem:[%s15629_s13 + $0x208] sm:$0xff] }
0x2861   : > { %v6290_v0 = vmul.f32 0.7978846, %v6286_v14  ;;  %v6284_v3 = vmul.f32 %v6280_v62, %v6267_v61  ;;  %v12337_v59 = vpack.c.bf16 %v9707_v57, %v9706_v56  ;;  %12306 = vmatprep.subr.bf16.mxu1 %v12305_v31  ;;  %v9684_v62 = vld [vmem:[%s15697_s11 + $0x210] sm:$0xff]  ;;  %v9685_v14 = vld [vmem:[%s15697_s11 + $0x218] sm:$0xff] }
0x2862   : > { %12765 = vtanh.f32 %v6289_v63  ;;  %v6287_v47 = vadd.f32 %v6283_v60, %v6265_v51  ;;  %12308 = vmatpush3.bf16.msra.mxu1 %v12305_v31  ;;  %v12309_v63 = vpack.c.bf16 %v9685_v14, %v9684_v62  ;;  %v9708_v60 = vld [vmem:[%s15629_s13 + $0x210] sm:$0xff]  ;;  %v9703_v62 = vld [vmem:[%s15628_s12 + $0x8] ss:$0 sm:$0xff] }
0x2863   : > { %12767 = vtanh.f32 %v6290_v0  ;;  %v6288_v6 = vadd.f32 %v6284_v3, %v6267_v61  ;;  %12338 = vmatprep.subr.bf16.mxu0 %v12337_v59  ;;  %v9709_v0 = vld [vmem:[%s15629_s13 + $0x218] sm:$0xff] }
0x2864   : > { %v6291_v5 = vmul.f32 0.7978846, %v6287_v47  ;;  %v12341_v3 = vpack.c.bf16 %v9709_v0, %v9708_v60  ;;  %12310 = vmatprep.subr.bf16.mxu1 %v12309_v63  ;;  %v9686_v47 = vld [vmem:[%s15697_s11 + $0x220] sm:$0xff] }
0x2865   : > { %v6292_v8 = vmul.f32 0.7978846, %v6288_v6  ;;  %v9687_v6 = vld [vmem:[%s15697_s11 + $0x228] sm:$0xff]  ;;  %v9727_v0 = vld [vmem:[%s15697_s11 + $0x240] sm:$0xff] }
0x2866   : > { %12769 = vtanh.f32 %v6291_v5  ;;  %12312 = vmatpush3.bf16.msra.mxu1 %v12309_v63  ;;  %v12313_v5 = vpack.c.bf16 %v9687_v6, %v9686_v47 }
0x2867   : > { %12771 = vtanh.f32 %v6292_v8  ;;  %v9710_v8 = vld [vmem:[%s15629_s13 + $0x220] sm:$0xff] }
0x2868   : > { %12314 = vmatprep.subr.bf16.mxu1 %v12313_v5 }
0x286a   : > { %12316 = vmatpush3.bf16.msra.mxu1 %v12313_v5 }
0x286c   : > { %v12766_v12 = vpop.eup %12765 }
0x286d   : > { %v12768_v49 = vpop.eup %12767  ;;  %v6297_v19 = vadd.f32 1.0, %v12766_v12  ;;  %v9711_v12 = vld [vmem:[%s15629_s13 + $0x228] sm:$0xff] }
0x286e   : > { %v6298_v15 = vadd.f32 1.0, %v12768_v49  ;;  %v12345_v49 = vpack.c.bf16 %v9711_v12, %v9710_v8  ;;  %v9729_v8 = vld [vmem:[%s15697_s11 + $0x250] sm:$0xff]  ;;  %v9730_v12 = vld [vmem:[%s15697_s11 + $0x258] sm:$0xff] }
0x286f   : > { %v6301_v22 = vmul.f32 %v6297_v19, %v6269_v28  ;;  %v9688_v19 = vld [vmem:[%s15697_s11 + $0x230] sm:$0xff] }
0x2870   : > { %v12770_v11 = vpop.eup %12769  ;;  %v6302_v16 = vmul.f32 %v6298_v15, %v6270_v21  ;;  %v9689_v21 = vld [vmem:[%s15697_s11 + $0x238] sm:$0xff]  ;;  %v9712_v28 = vld [vmem:[%s15629_s13 + $0x230] sm:$0xff] }
0x2871   : > { %v12772_v24 = vpop.eup %12771  ;;  %v6299_v25 = vadd.f32 1.0, %v12770_v11  ;;  %v12317_v15 = vpack.c.bf16 %v9689_v21, %v9688_v19  ;;  %v9713_v11 = vld [vmem:[%s15629_s13 + $0x238] sm:$0xff]  ;;  %v12369_v19 = vpack.c.bf16 %v9730_v12, %v9729_v8  ;;  %v9731_v21 = vld [vmem:[%s15697_s11 + $0x260] sm:$0xff]  ;;  %v9829_v12 = vld [vmem:[%s15697_s11 + $0x2f0] sm:$0xff] }
0x2872   : > { %6410 = vmatprep.mubr.f32.mxu0 %v6302_v16  ;;  %v6300_v29 = vadd.f32 1.0, %v12772_v24  ;;  %v12349_v16 = vpack.c.bf16 %v9713_v11, %v9712_v28  ;;  %v9694_v24 = vld [vmem:[%s15698_s28 + $0x200] sm:$0xff]  ;;  %v9733_v11 = vld [vmem:[%s15697_s11 + $0x270] sm:$0xff] }
0x2873   : > { %6411 = vmatmul.mubr.f32.vlgmr.msra.gmra.mrb[54].mxu0 %v6301_v22  ;;  %v6303_v18 = vmul.f32 %v6299_v25, %v6271_v1  ;;  %12318 = vmatprep.subr.bf16.mxu1 %v12317_v15  ;;  %v9695_v22 = vld [vmem:[%s15698_s28 + $0x208] sm:$0xff] }
0x2874   : > { %v6304_v30 = vmul.f32 %v6300_v29, %v6272_v26  ;;  %12340 = vmatpush3.bf16.msra.mxu0 %v12337_v59  ;;  %12320 = vmatpush3.bf16.msra.mxu1 %v12317_v15  ;;  %v12321_v25 = vpack.c.bf16 %v9695_v22, %v9694_v24  ;;  %v9732_v15 = vld [vmem:[%s15697_s11 + $0x268] sm:$0xff]  ;;  %v9751_v22 = vld [vmem:[%s15629_s13 + $0x240] sm:$0xff] }
0x2875   : > { %12342 = vmatprep.subr.bf16.mxu0 %v12341_v3  ;;  %v12373_v28 = vpack.c.bf16 %v9732_v15, %v9731_v21  ;;  %v9847_v21 = vld [vmem:[%s15629_s13 + $0x2c0] sm:$0xff]  ;;  %v9848_v15 = vld [vmem:[%s15629_s13 + $0x2c8] sm:$0xff] }
0x2876   : > { %6415 = vmatprep.mubr.f32.mxu0 %v6304_v30  ;;  %12322 = vmatprep.subr.bf16.mxu1 %v12321_v25 }
0x2877   : > { %6416 = vmatmul.mubr.f32.gmra.mrb[56].mxu0 %v6303_v18 }
0x2878   : > { %12344 = vmatpush3.bf16.msra.mxu0 %v12341_v3  ;;  %v9728_v3 = vld [vmem:[%s15697_s11 + $0x248] sm:$0xff] }
0x2879   : > { %12346 = vmatprep.subr.bf16.mxu0 %v12345_v49  ;;  %v12365_v5 = vpack.c.bf16 %v9728_v3, %v9727_v0  ;;  %v9825_v0 = vld [vmem:[%s15697_s11 + $0x2d0] sm:$0xff]  ;;  %v9826_v3 = vld [vmem:[%s15697_s11 + $0x2d8] sm:$0xff] }
0x287c   : > { %12348 = vmatpush3.bf16.msra.mxu0 %v12345_v49 }
0x287d   : > { %12350 = vmatprep.subr.bf16.mxu0 %v12349_v16 }
0x2880   : > { %12352 = vmatpush3.bf16.msra.mxu0 %v12349_v16  ;;  %v9734_v16 = vld [vmem:[%s15697_s11 + $0x278] sm:$0xff] }
0x2881   : > { %v12377_v24 = vpack.c.bf16 %v9734_v16, %v9733_v11  ;;  %v9849_v11 = vld [vmem:[%s15629_s13 + $0x2d0] sm:$0xff]  ;;  %v9850_v16 = vld [vmem:[%s15629_s13 + $0x2d8] sm:$0xff] }
0x2946   : > { %v10431_v38 = vpop.f32.mrb[54].mxu0 }
0x2947   : > { %v10432_v2 = vpop.f32.mrb[55].mxu0 }
0x2948   : > { %v10433_v33 = vadd.f32 %v10432_v2, %v10431_v38  ;;  %v9680_v2 = vld [vmem:[%s15700_s1 + $0x2] ss:$0 sm:$0xff]  ;;  %s811_s1 = scalar_lea.vmem [#allocation2], %s9246_s26 }
0x2949   : > { %s9183_s30 = sshll.u32 %s811_s1, 4  ;;  %s15576_s30 = int_to_ptr.vmem [resolvable:$true] %s9183_s30 }
0x294a   : > { %v6413_v10 = vadd.f32 %v10433_v33, %v9675_v23  ;;  %v10434_v35 = vpop.f32.mrb[56].mxu0  ;;  %s12825_s8 = scalar_lea.vmem %s15576_s30, 64 }
0x294b   : > { %v10435_v36 = vpop.f32.mrb[57].mxu0  ;;  %p12826_p11 = scmp.ne.s32.totalorder %s15576_s30, %s12825_s8 }
0x294c   : > { %v6429_v40 = vmul.f32 %v9677_v34, %v6413_v10  ;;  %v10436_v41 = vadd.f32 %v10435_v36, %v10434_v35 }
0x294d   : > { %p12827_p12 = pnand %p12826_p11, %p13072_p5 }
0x294e   : > { %v6418_v20 = vadd.f32 %v10436_v41, %v9675_v23  ;;  %v14817_v42 = vadd.f32 %v6429_v40, %v14642_v53  ;;  %v9696_v41 = vld [vmem:[%s15698_s28 + $0x210] sm:$0xff] }
0x294f   : > { %p12828_p13 = pneg %p12827_p12 }
0x2950   : > { %v6430_v27 = vmul.f32 %v9677_v34, %v6418_v20  ;;  %v6437_v50 = vsel %vm1220_vm6, %v14817_v42, 0.0  ;;  %v9681_v34 = vld [vmem:[%s15701_s2 + $0x2] ss:$0 sm:$0xff]  ;;  %v9697_v20 = vld [vmem:[%s15698_s28 + $0x218] sm:$0xff]  ;;  %s15710_s2 = sld [smem:[#allocation25_spill]] }
0x2951   : > { %6438 = vadd.xlane.f32.xlu0 %v6437_v50 }
0x2952   : > { %v14822_v43 = vadd.f32 %v6430_v27, %v14639_v32 }
0x2954   : > { %v6440_v17 = vsel %vm1224_vm7, %v14822_v43, 0.0 }
0x2955   : > { %6441 = vadd.xlane.f32.xlu1 %v6440_v17  ;;  %v12325_v17 = vpack.c.bf16 %v9697_v20, %v9696_v41  ;;  %v9778_v41 = vld [vmem:[%s15697_s11 + $0x290] sm:$0xff]  ;;  %v9779_v20 = vld [vmem:[%s15697_s11 + $0x298] sm:$0xff] }
0x29de   : > { %v6439_v44 = vpop.xlane.xlu0 %6438 }
0x29df   : > { %v6443_v4 = vmul.f32 0.015625, %v6439_v44  ;;  %v9698_v44 = vld [vmem:[%s15698_s28 + $0x220] sm:$0xff] }
0x29e1   : > { %v14827_v46 = vsub.f32 %v14817_v42, %v6443_v4  ;;  %v9699_v4 = vld [vmem:[%s15698_s28 + $0x228] sm:$0xff] }
0x29e2   : > { %v6442_v48 = vpop.xlane.xlu1 %6441 }
0x29e3   : > { %v6444_v53 = vmul.f32 0.015625, %v6442_v48  ;;  %v6447_v51 = vmul.f32 %v14827_v46, %v14827_v46  ;;  %v9700_v48 = vld [vmem:[%s15698_s28 + $0x230] sm:$0xff] }
0x29e5   : > { %v14832_v13 = vsub.f32 %v14822_v43, %v6444_v53  ;;  %v6449_v32 = vsel %vm1220_vm6, %v6447_v51, 0.0  ;;  %v9701_v53 = vld [vmem:[%s15698_s28 + $0x238] sm:$0xff] }
0x29e6   : > { %6450 = vadd.xlane.f32.xlu0 %v6449_v32  ;;  %v12333_v51 = vpack.c.bf16 %v9701_v53, %v9700_v48  ;;  %v9691_v32 = vld [vmem:[%s15702_s6 + $0x8] ss:$0 sm:$0xff]  ;;  %v9783_v48 = vld [vmem:[%s15697_s11 + $0x2b8] sm:$0xff] }
0x29e7   : > { %v6448_v58 = vmul.f32 %v14832_v13, %v14832_v13 }
0x29e9   : > { %v6452_v61 = vsel %vm1224_vm7, %v6448_v58, 0.0 }
0x29ea   : > { %6453 = vadd.xlane.f32.xlu1 %v6452_v61 }
0x2a73   : > { %v6451_v26 = vpop.xlane.xlu0 %6450 }
0x2a74   : > { %v6455_v29 = vmul.f32 0.015625, %v6451_v26 }
0x2a76   : > { %v6457_v1 = vadd.f32 1e-06, %v6455_v29  ;;  %v9753_v29 = vld [vmem:[%s15629_s13 + $0x250] sm:$0xff] }
0x2a77   : > { %v6454_v30 = vpop.xlane.xlu1 %6453 }
0x2a78   : > { %12773 = vrsqrt.f32 %v6457_v1  ;;  %v6456_v18 = vmul.f32 0.015625, %v6454_v30  ;;  %v9754_v1 = vld [vmem:[%s15629_s13 + $0x258] sm:$0xff] }
0x2a79   : > { %v12401_v30 = vpack.c.bf16 %v9754_v1, %v9753_v29  ;;  %v9853_v29 = vld [vmem:[%s15629_s13 + $0x2f0] sm:$0xff]  ;;  %v9854_v1 = vld [vmem:[%s15629_s13 + $0x2f8] sm:$0xff] }
0x2a7a   : > { %v6458_v38 = vadd.f32 1e-06, %v6456_v18  ;;  %v9755_v18 = vld [vmem:[%s15629_s13 + $0x260] sm:$0xff] }
0x2a7c   : > { %12775 = vrsqrt.f32 %v6458_v38  ;;  %v9756_v38 = vld [vmem:[%s15629_s13 + $0x268] sm:$0xff] }
0x2a82   : > { %v12774_v23 = vpop.eup %12773 }
0x2a83   : > { %v6461_v33 = vmul.f32 %v12774_v23, %v14827_v46  ;;  %v12329_v46 = vpack.c.bf16 %v9699_v4, %v9698_v44  ;;  %v12405_v23 = vpack.c.bf16 %v9756_v38, %v9755_v18  ;;  %v9781_v44 = vld [vmem:[%s15697_s11 + $0x2a8] sm:$0xff] }
0x2a85   : > { %v6469_v10 = vmul.f32 %v9680_v2, %v6461_v33  ;;  %v9758_v33 = vld [vmem:[%s15629_s13 + $0x278] sm:$0xff] }
0x2a86   : > { %v12776_v35 = vpop.eup %12775 }
0x2a87   : > { %v14899_v36 = vadd.f32 %v9681_v34, %v6469_v10  ;;  %v6462_v40 = vmul.f32 %v12776_v35, %v14832_v13  ;;  %v9715_v13 = vld [vmem:[%s15630_s14 + $0x8] ss:$0 sm:$0xff]  ;;  %v9776_v10 = vld [vmem:[%s15697_s11 + $0x280] sm:$0xff] }
0x2a88   : > { %v9777_v35 = vld [vmem:[%s15697_s11 + $0x288] sm:$0xff] }
0x2a89   : > { %v6470_v27 = vmul.f32 %v9680_v2, %v6462_v40  ;;  %11314 = vmatprep.mubr.msk.f32.mxu1 %vm1220_vm6, %v14899_v36  ;;  %11352 = vmatprep.mubr.msk.f32.mxu0 %vm1220_vm6, %v14899_v36  ;;  %v9757_v2 = vld [vmem:[%s15629_s13 + $0x270] sm:$0xff]  ;;  %v12433_v40 = vpack.c.bf16 %v9777_v35, %v9776_v10 }
0x2a8b   : > { %v14912_v50 = vadd.f32 %v9681_v34, %v6470_v27  ;;  %v12409_v34 = vpack.c.bf16 %v9758_v33, %v9757_v2  ;;  %v12437_v27 = vpack.c.bf16 %v9779_v20, %v9778_v41  ;;  %v15127_v33 = vld [vmem:[%s15702_s6 + $0x9] ss:$0 sm:$0xff] }
0x2a8d   : > { %11315 = vmatmul.mubr.msk.f32.vlgmr.msra.gmra.mrb[50].mxu1 %vm1220_vm6, %v14912_v50  ;;  %11353 = vmatmul.mubr.msk.f32.vlgmr.msra.gmra.mrb[58].mxu0 %vm1220_vm6, %v14912_v50 }
0x2a8e   : > { %12324 = vmatpush3.bf16.msra.mxu1 %v12321_v25  ;;  %11333 = vmatprep.mubr.msk.f32.mxu1 %vm1220_vm6, %v14899_v36  ;;  %v9752_v25 = vld [vmem:[%s15629_s13 + $0x248] sm:$0xff] }
0x2a8f   : > { %12326 = vmatprep.subr.bf16.mxu1 %v12325_v17  ;;  %v12397_v26 = vpack.c.bf16 %v9752_v25, %v9751_v22  ;;  %v9851_v22 = vld [vmem:[%s15629_s13 + $0x2e0] sm:$0xff]  ;;  %v9852_v25 = vld [vmem:[%s15629_s13 + $0x2e8] sm:$0xff] }
0x2a92   : > { %12328 = vmatpush3.bf16.msra.mxu1 %v12325_v17  ;;  %v9780_v17 = vld [vmem:[%s15697_s11 + $0x2a0] sm:$0xff] }
0x2a93   : > { %12330 = vmatprep.subr.bf16.mxu1 %v12329_v46  ;;  %v12441_v4 = vpack.c.bf16 %v9781_v44, %v9780_v17 }
0x2a96   : > { %12332 = vmatpush3.bf16.msra.mxu1 %v12329_v46  ;;  %v9782_v46 = vld [vmem:[%s15697_s11 + $0x2b0] sm:$0xff] }
0x2a97   : > { %12334 = vmatprep.subr.bf16.mxu1 %v12333_v51  ;;  %v12445_v53 = vpack.c.bf16 %v9783_v48, %v9782_v46 }
0x2a9a   : > { %12336 = vmatpush3.bf16.msra.mxu1 %v12333_v51  ;;  %v9800_v51 = vld [vmem:[%s15629_s13 + $0x280] sm:$0xff] }
0x2a9d   : > { %11334 = vmatmul.mubr.msk.f32.vlgmr.msra.gmra.mrb[52].mxu1 %vm1220_vm6, %v14912_v50 }
0x2b60   : > { %v11316_v58 = vpop.f32.mrb[50].mxu1  ;;  %v11354_v61 = vpop.f32.mrb[58].mxu0 }
0x2b61   : > { %v6758_v54 = vadd.f32 %v11354_v61, %v9715_v13  ;;  %v6568_v55 = vpop.f32.mrb[51].mxu1  ;;  %v6752_v31 = vpop.f32.mrb[59].mxu0  ;;  %v6574_v49 = vadd.f32 %v11316_v58, %v9691_v32  ;;  %v9802_v58 = vld [vmem:[%s15629_s13 + $0x290] sm:$0xff]  ;;  %v9803_v61 = vld [vmem:[%s15629_s13 + $0x298] sm:$0xff] }
0x2b62   : > { %v6569_v56 = vadd.f32 %v9691_v32, %v6568_v55  ;;  %v6753_v57 = vadd.f32 %v9715_v13, %v6752_v31  ;;  %v9801_v13 = vld [vmem:[%s15629_s13 + $0x288] sm:$0xff]  ;;  %v9804_v55 = vld [vmem:[%s15629_s13 + $0x2a0] sm:$0xff] }
0x2b63   : > { %v12465_v32 = vpack.c.bf16 %v9801_v13, %v9800_v51  ;;  %v9805_v31 = vld [vmem:[%s15629_s13 + $0x2a8] sm:$0xff] }
0x2b64   : > { %v12359_v59 = vpack.c.bf16 %v6758_v54, %v6753_v57  ;;  %11359 = vmatprep.mubr.msk.f32.mxu1 %vm1541_vm8, %v6569_v56  ;;  %v12469_v54 = vpack.c.bf16 %v9803_v61, %v9802_v58  ;;  %v12473_v56 = vpack.c.bf16 %v9805_v31, %v9804_v55  ;;  %v9806_v57 = vld [vmem:[%s15629_s13 + $0x2b0] sm:$0xff]  ;;  %v9809_v51 = vld [vmem:[%s15630_s14 + $0xa] ss:$0 sm:$0xff]  ;;  %v15157_v55 = vld [vmem:[%s15702_s6 + $0xb] ss:$0 sm:$0xff] }
0x2b66   : > { %12361 = vmatprep.subr.msk.bf16.mxu0 %vm13519_vm11, %v12359_v59 }
0x2b67   : > { %12364 = vmatpush3.bf16.msk.msra.mxu0 %vm13519_vm11, %v12359_v59  ;;  %v9807_v59 = vld [vmem:[%s15629_s13 + $0x2b8] sm:$0xff] }
0x2b70   : > { %v11335_v14 = vpop.f32.mrb[52].mxu1 }
0x2b71   : > { %v6666_v63 = vadd.f32 %v11335_v14, %v9703_v62  ;;  %v6660_v60 = vpop.f32.mrb[53].mxu1  ;;  %v9823_v14 = vld [vmem:[%s15697_s11 + $0x2c0] sm:$0xff] }
0x2b72   : > { %v6661_v47 = vadd.f32 %v9703_v62, %v6660_v60  ;;  %v12477_v62 = vpack.c.bf16 %v9807_v59, %v9806_v57  ;;  %v9856_v59 = vld [vmem:[%s15630_s14 + $0xb] ss:$0 sm:$0xff] }
0x2b74   : > { %v12353_v6 = vpack.c.bf16 %v6666_v63, %v6661_v47  ;;  %v9824_v63 = vld [vmem:[%s15697_s11 + $0x2c8] sm:$0xff]  ;;  %v12501_v47 = vpack.c.bf16 %v9826_v3, %v9825_v0 }
0x2b75   : > { %v12497_v60 = vpack.c.bf16 %v9824_v63, %v9823_v14 }
0x2b76   : > { %12355 = vmatprep.subr.msk.bf16.mxu1 %vm13502_vm9, %v12353_v6 }
0x2b77   : > { %12358 = vmatpush3.bf16.xpose.msk.msra.mxu1 %vm13502_vm9, %v12353_v6  ;;  %v9827_v6 = vld [vmem:[%s15697_s11 + $0x2e0] sm:$0xff] }
0x2b78   : > { %12366 = vmatprep.subr.bf16.mxu1 %v12365_v5 }
0x2b7e   : > { %11360 = vmatmul.mubr.msk.f32.vlgmr.msra.gmra.mrb[54].mxu1 %vm1541_vm8, %v6574_v49  ;;  %v9830_v49 = vld [vmem:[%s15697_s11 + $0x2f8] sm:$0xff] }
0x2b7f   : > { %12368 = vmatpush3.bf16.msra.mxu1 %v12365_v5  ;;  %11385 = vmatprep.mubr.msk.f32.mxu1 %vm1220_vm6, %v14899_v36  ;;  %v9828_v5 = vld [vmem:[%s15697_s11 + $0x2e8] sm:$0xff] }
0x2b80   : > { %12370 = vmatprep.subr.bf16.mxu1 %v12369_v19  ;;  %v12505_v8 = vpack.c.bf16 %v9828_v5, %v9827_v6 }
0x2b83   : > { %12372 = vmatpush3.bf16.msra.mxu1 %v12369_v19  ;;  %v12509_v19 = vpack.c.bf16 %v9830_v49, %v9829_v12 }
0x2b84   : > { %12374 = vmatprep.subr.bf16.mxu1 %v12373_v28 }
0x2b87   : > { %12376 = vmatpush3.bf16.msra.mxu1 %v12373_v28  ;;  %v12529_v28 = vpack.c.bf16 %v9848_v15, %v9847_v21 }
0x2b88   : > { %12378 = vmatprep.subr.bf16.mxu1 %v12377_v24 }
0x2b8b   : > { %12380 = vmatpush3.bf16.msra.mxu1 %v12377_v24  ;;  %v12533_v24 = vpack.c.bf16 %v9850_v16, %v9849_v11  ;;  %v9740_v11 = vld [vmem:[%s15698_s28 + $0x248] sm:$0xff] }
0x2b8c   : > { %12398 = vmatprep.subr.bf16.mxu1 %v12397_v26 }
0x2b8e   : > { %11386 = vmatmul.mubr.msk.f32.vlgmr.msra.gmra.mrb[56].mxu1 %vm1220_vm6, %v14912_v50 }
0x2b8f   : > { %12400 = vmatpush3.bf16.msra.mxu1 %v12397_v26  ;;  %11423 = vmatprep.mubr.msk.f32.mxu1 %vm1220_vm6, %v14899_v36  ;;  %v12537_v26 = vpack.c.bf16 %v9852_v25, %v9851_v22 }
0x2b90   : > { %12402 = vmatprep.subr.bf16.mxu1 %v12401_v30 }
0x2b93   : > { %12404 = vmatpush3.bf16.msra.mxu1 %v12401_v30  ;;  %v12541_v30 = vpack.c.bf16 %v9854_v1, %v9853_v29  ;;  %v9742_v29 = vld [vmem:[%s15698_s28 + $0x258] sm:$0xff] }
0x2b94   : > { %12406 = vmatprep.subr.bf16.mxu1 %v12405_v23 }
0x2b97   : > { %12408 = vmatpush3.bf16.msra.mxu1 %v12405_v23 }
0x2b98   : > { %12410 = vmatprep.subr.bf16.mxu1 %v12409_v34 }
0x2b9b   : > { %12412 = vmatpush3.bf16.msra.mxu1 %v12409_v34 }
0x2b9c   : > { %12434 = vmatprep.subr.bf16.mxu1 %v12433_v40 }
0x2b9e   : > { %11424 = vmatmul.mubr.msk.f32.vlgmr.msra.gmra.mrb[58].mxu1 %vm1220_vm6, %v14912_v50 }
0x2b9f   : > { %12436 = vmatpush3.bf16.msra.mxu1 %v12433_v40  ;;  %11470 = vmatprep.mubr.msk.f32.mxu1 %vm1220_vm6, %v14899_v36  ;;  %v9760_v40 = vld [vmem:[%s15630_s14 + $0x9] ss:$0 sm:$0xff] }
0x2ba0   : > { %12438 = vmatprep.subr.bf16.mxu1 %v12437_v27 }
0x2ba3   : > { %12440 = vmatpush3.bf16.msra.mxu1 %v12437_v27 }
0x2ba4   : > { %12442 = vmatprep.subr.bf16.mxu1 %v12441_v4 }
0x2ba7   : > { %12444 = vmatpush3.bf16.msra.mxu1 %v12441_v4  ;;  %v15142_v4 = vld [vmem:[%s15702_s6 + $0xa] ss:$0 sm:$0xff]  ;;  %s15574_s6 = scalar_lea.hbm %s15710_s2, %s9938_s7 }
0x2ba8   : > { %12446 = vmatprep.subr.bf16.mxu1 %v12445_v53 }
0x2bab   : > { %12448 = vmatpush3.bf16.msra.mxu1 %v12445_v53 }
0x2bac   : > { %12466 = vmatprep.subr.bf16.mxu1 %v12465_v32 }
0x2bae   : > { %11471 = vmatmul.mubr.msk.f32.vlgmr.msra.gmra.mrb[60].mxu1 %vm1220_vm6, %v14912_v50 }
0x2baf   : > { %12468 = vmatpush3.bf16.msra.mxu1 %v12465_v32  ;;  %11508 = vmatprep.mubr.msk.f32.mxu1 %vm1220_vm6, %v14899_v36 }
0x2bb0   : > { %12470 = vmatprep.subr.bf16.mxu1 %v12469_v54 }
0x2bb3   : > { %12472 = vmatpush3.bf16.msra.mxu1 %v12469_v54 }
0x2bb4   : > { %12474 = vmatprep.subr.bf16.mxu1 %v12473_v56 }
0x2bb7   : > { %12476 = vmatpush3.bf16.msra.mxu1 %v12473_v56 }
0x2bb8   : > { %12478 = vmatprep.subr.bf16.mxu1 %v12477_v62 }
0x2bbb   : > { %12480 = vmatpush3.bf16.msra.mxu1 %v12477_v62 }
0x2bbc   : > { %12498 = vmatprep.subr.bf16.mxu1 %v12497_v60 }
0x2bbe   : > { %11509 = vmatmul.mubr.msk.f32.vlgmr.msra.gmra.mrb[62].mxu1 %vm1220_vm6, %v14912_v50 }
0x2bbf   : > { %12500 = vmatpush3.bf16.msra.mxu1 %v12497_v60  ;;  %11548 = vmatprep.mubr.msk.f32.mxu1 %vm1220_vm6, %v14899_v36 }
0x2bc0   : > { %12502 = vmatprep.subr.bf16.mxu1 %v12501_v47 }
0x2bc3   : > { %12504 = vmatpush3.bf16.msra.mxu1 %v12501_v47 }
0x2bc4   : > { %12506 = vmatprep.subr.bf16.mxu1 %v12505_v8 }
0x2bc7   : > { %12508 = vmatpush3.bf16.msra.mxu1 %v12505_v8 }
0x2bc8   : > { %12510 = vmatprep.subr.bf16.mxu1 %v12509_v19 }
0x2bcb   : > { %12512 = vmatpush3.bf16.msra.mxu1 %v12509_v19 }
0x2bcc   : > { %12530 = vmatprep.subr.bf16.mxu1 %v12529_v28 }
0x2bce   : > { %11549 = vmatmul.mubr.msk.f32.vlgmr.msra.gmra.mrb[64].mxu1 %vm1220_vm6, %v14912_v50 }
0x2bcf   : > { %12532 = vmatpush3.bf16.msra.mxu1 %v12529_v28  ;;  %11586 = vmatprep.mubr.msk.f32.mxu1 %vm1220_vm6, %v14899_v36  ;;  %v9739_v28 = vld [vmem:[%s15698_s28 + $0x240] sm:$0xff] }
0x2bd0   : > { %12534 = vmatprep.subr.bf16.mxu1 %v12533_v24  ;;  %v12381_v16 = vpack.c.bf16 %v9740_v11, %v9739_v28 }
0x2bd2   : > { %12382 = vmatprep.subr.bf16.mxu0 %v12381_v16 }
0x2bd3   : > { %12536 = vmatpush3.bf16.msra.mxu1 %v12533_v24 }
0x2bd4   : > { %12538 = vmatprep.subr.bf16.mxu1 %v12537_v26 }
0x2bd7   : > { %12540 = vmatpush3.bf16.msra.mxu1 %v12537_v26  ;;  %v9741_v26 = vld [vmem:[%s15698_s28 + $0x250] sm:$0xff] }
0x2bd8   : > { %12542 = vmatprep.subr.bf16.mxu1 %v12541_v30 }
0x2bdb   : > { %12544 = vmatpush3.bf16.msra.mxu1 %v12541_v30 }
0x2bde   : > { %11587 = vmatmul.mubr.msk.f32.vlgmr.msra.gmra.mrb[66].mxu1 %vm1220_vm6, %v14912_v50 }
0x2bdf   : > { %8869 = vmatprep.mubr.f32.mxu1 %v12891_v45 }
0x2c51   : > { %v11361_v18 = vpop.f32.mrb[54].mxu1 }
0x2c52   : > { %v6839_v38 = vpop.f32.mrb[55].mxu1  ;;  %v6851_v23 = vsel %vm1633_vm12, %v11361_v18, -inf }
0x2c53   : > { %6852 = vmax.xlane.f32.xlu1 %v6851_v23  ;;  %v6848_v2 = vsel %vm1629_vm13, %v6839_v38, -inf  ;;  %v9743_v23 = vld [vmem:[%s15698_s28 + $0x260] sm:$0xff] }
0x2c54   : > { %6849 = vmax.xlane.f32.xlu0 %v6848_v2  ;;  %v9744_v2 = vld [vmem:[%s15698_s28 + $0x268] sm:$0xff] }
0x2c61   : > { %v11387_v34 = vpop.f32.mrb[56].mxu1 }
0x2c62   : > { %v15130_v10 = vadd.f32 %v11387_v34, %v15127_v33  ;;  %v15132_v35 = vpop.f32.mrb[57].mxu1  ;;  %v12389_v34 = vpack.c.bf16 %v9744_v2, %v9743_v23  ;;  %v9790_v23 = vld [vmem:[%s15698_s28 + $0x290] sm:$0xff]  ;;  %v9791_v2 = vld [vmem:[%s15698_s28 + $0x298] sm:$0xff] }
0x2c71   : > { %v11425_v41 = vpop.f32.mrb[58].mxu1 }
0x2c72   : > { %v7230_v20 = vadd.f32 %v11425_v41, %v9760_v40  ;;  %v7224_v27 = vpop.f32.mrb[59].mxu1  ;;  %v9746_v41 = vld [vmem:[%s15698_s28 + $0x278] sm:$0xff] }
0x2c73   : > { %v7225_v17 = vadd.f32 %v9760_v40, %v7224_v27  ;;  %v9745_v40 = vld [vmem:[%s15698_s28 + $0x270] sm:$0xff]  ;;  %v7041_v27 = vadd.f32 %v15127_v33, %v15132_v35 }
0x2c75   : > { %v15137_v44 = vpack.c.bf16 %v7230_v20, %v7225_v17  ;;  %v12393_v20 = vpack.c.bf16 %v9746_v41, %v9745_v40  ;;  %v9792_v40 = vld [vmem:[%s15698_s28 + $0x2a0] sm:$0xff]  ;;  %v9793_v41 = vld [vmem:[%s15698_s28 + $0x2a8] sm:$0xff] }
0x2c81   : > { %v11472_v46 = vpop.f32.mrb[60].mxu1 }
0x2c82   : > { %v15145_v48 = vadd.f32 %v11472_v46, %v15142_v4  ;;  %v15147_v53 = vpop.f32.mrb[61].mxu1 }
0x2c91   : > { %v11510_v13 = vpop.f32.mrb[62].mxu1 }
0x2c92   : > { %v7864_v32 = vadd.f32 %v11510_v13, %v9809_v51  ;;  %v7858_v58 = vpop.f32.mrb[63].mxu1 }
0x2c93   : > { %v7859_v61 = vadd.f32 %v9809_v51, %v7858_v58  ;;  %v9748_v51 = vld [vmem:[%s15628_s12 + $0x9] ss:$0 sm:$0xff] }
0x2c95   : > { %v15152_v54 = vpack.c.bf16 %v7864_v32, %v7859_v61 }
0x2ca1   : > { %v11550_v31 = vpop.f32.mrb[64].mxu1 }
0x2ca2   : > { %v15160_v56 = vadd.f32 %v11550_v31, %v15157_v55  ;;  %v15162_v57 = vpop.f32.mrb[65].mxu1 }
0x2cb1   : > { %v11588_v62 = vpop.f32.mrb[66].mxu1 }
0x2cb2   : > { %v8419_v14 = vadd.f32 %v11588_v62, %v9856_v59  ;;  %v8413_v63 = vpop.f32.mrb[67].mxu1 }
0x2cb3   : > { %v8414_v60 = vadd.f32 %v9856_v59, %v8413_v63 }
0x2cb5   : > { %v15167_v0 = vpack.c.bf16 %v8419_v14, %v8414_v60 }
0x2ce0   : > { %v6853_v3 = vpop.xlane.xlu1 %6852 }
0x2ce1   : > { %v6855_v47 = vsub.f32 %v11361_v18, %v6853_v3  ;;  %v6850_v6 = vpop.xlane.xlu0 %6849 }
0x2ce2   : > { %v6854_v5 = vsub.f32 %v6839_v38, %v6850_v6  ;;  %v12385_v38 = vpack.c.bf16 %v9742_v29, %v9741_v26  ;;  %v9788_v29 = vld [vmem:[%s15698_s28 + $0x280] sm:$0xff] }
0x2ce3   : > { %v6858_v8 = vmul.f32 1.442695, %v6855_v47 }
0x2ce4   : > { %v6856_v12 = vmul.f32 1.442695, %v6854_v5 }
0x2ce5   : > { %12777 = vpow2.f32 %v6858_v8 }
0x2ce6   : > { %12779 = vpow2.f32 %v6856_v12  ;;  %v9770_v12 = vld [vmem:[%s15631_s15 + $0x90] sm:$0xff] }
0x2cef   : > { %v12778_v49 = vpop.eup %12777 }
0x2cf0   : > { %v12780_v19 = vpop.eup %12779  ;;  %v6863_v21 = vsel %vm1633_vm12, %v12778_v49, 0.0 }
0x2cf1   : > { %6864 = vadd.xlane.f32.xlu1 %v6863_v21  ;;  %v6860_v15 = vsel %vm1629_vm13, %v12780_v19, 0.0 }
0x2cf2   : > { %6861 = vadd.xlane.f32.xlu0 %v6860_v15 }
0x2d7e   : > { %v6865_v24 = vpop.xlane.xlu1 %6864 }
0x2d7f   : > { %12781 = vrcp.f32 %v6865_v24  ;;  %v6862_v22 = vpop.xlane.xlu0 %6861 }
0x2d80   : > { %12783 = vrcp.f32 %v6862_v22  ;;  %v9725_v22 = vld [vmem:[%s15631_s15 + $0x80] sm:$0xff] }
0x2d89   : > { %v12782_v25 = vpop.eup %12781 }
0x2d8a   : > { %v12784_v1 = vpop.eup %12783  ;;  %v6869_v18 = vmul.f32 %v12782_v25, %v12778_v49  ;;  %v9771_v49 = vld [vmem:[%s15631_s15 + $0x98] sm:$0xff]  ;;  %v9726_v25 = vld [vmem:[%s15631_s15 + $0x88] sm:$0xff] }
0x2d8b   : > { %v6868_v30 = vmul.f32 %v12784_v1, %v12780_v19  ;;  %v12425_v19 = vpack.c.bf16 %v9771_v49, %v9770_v12  ;;  %v12429_v26 = vpack.c.bf16 %v9726_v25, %v9725_v22  ;;  %v9789_v1 = vld [vmem:[%s15698_s28 + $0x288] sm:$0xff]  ;;  %v9837_v22 = vld [vmem:[%s15698_s28 + $0x2d0] sm:$0xff]  ;;  %v9838_v25 = vld [vmem:[%s15698_s28 + $0x2d8] sm:$0xff] }
0x2d8d   : > { %11366 = vmatprep.mubr.msk.f32.mxu0 %vm1629_vm13, %v6868_v30 }
0x2d8e   : > { %11367 = vmatmul.mubr.msk.f32.vlgmr.msra.gmra.mrb[60].mxu0 %vm1629_vm13, %v6869_v18 }
0x2d8f   : > { %12384 = vmatpush3.bf16.msra.mxu0 %v12381_v16  ;;  %11404 = vmatprep.mubr.msk.f32.mxu0 %vm1220_vm6, %v14899_v36 }
0x2d90   : > { %12386 = vmatprep.subr.bf16.mxu0 %v12385_v38 }
0x2d93   : > { %12388 = vmatpush3.bf16.msra.mxu0 %v12385_v38  ;;  %v12449_v38 = vpack.c.bf16 %v9789_v1, %v9788_v29  ;;  %v12517_v1 = vpack.c.bf16 %v9838_v25, %v9837_v22 }
0x2d94   : > { %12390 = vmatprep.subr.bf16.mxu0 %v12389_v34 }
0x2d97   : > { %12392 = vmatpush3.bf16.msra.mxu0 %v12389_v34  ;;  %v12453_v34 = vpack.c.bf16 %v9791_v2, %v9790_v23  ;;  %v9841_v23 = vld [vmem:[%s15698_s28 + $0x2f0] sm:$0xff]  ;;  %v9842_v2 = vld [vmem:[%s15698_s28 + $0x2f8] sm:$0xff] }
0x2d98   : > { %12394 = vmatprep.subr.bf16.mxu0 %v12393_v20 }
0x2d9b   : > { %12396 = vmatpush3.bf16.msra.mxu0 %v12393_v20  ;;  %v12457_v20 = vpack.c.bf16 %v9793_v41, %v9792_v40  ;;  %v8230_v40 = vadd.f32 %v15157_v55, %v15162_v57 }
0x2d9e   : > { %11405 = vmatmul.mubr.msk.f32.vlgmr.msra.gmra.mrb[62].mxu0 %vm1220_vm6, %v14912_v50 }
0x2d9f   : > { %11430 = vmatprep.mubr.msk.f32.mxu0 %vm1541_vm8, %v7041_v27  ;;  %v9794_v27 = vld [vmem:[%s15698_s28 + $0x2b0] sm:$0xff] }
0x2e61   : > { %v15204_v17 = vpop.f32.mrb[60].mxu0 }
0x2e62   : > { %v6945_v46 = vpop.f32.mrb[61].mxu0 }
0x2e71   : > { %v11406_v13 = vpop.f32.mrb[62].mxu0 }
0x2e72   : > { %v7138_v32 = vadd.f32 %v11406_v13, %v9748_v51  ;;  %v7132_v58 = vpop.f32.mrb[63].mxu0  ;;  %v9797_v13 = vld [vmem:[%s15628_s12 + $0xa] ss:$0 sm:$0xff] }
0x2e73   : > { %v7133_v61 = vadd.f32 %v9748_v51, %v7132_v58 }
0x2e75   : > { %v12413_v31 = vpack.c.bf16 %v7138_v32, %v7133_v61 }
0x2e77   : > { %12415 = vmatprep.subr.msk.bf16.mxu0 %vm13502_vm9, %v12413_v31 }
0x2e78   : > { %12418 = vmatpush3.bf16.xpose.msk.msra.mxu0 %vm13502_vm9, %v12413_v31 }
0x2e79   : > { %12421 = vmatprep.subr.msk.bf16.mxu0 %vm13519_vm11, %v15137_v44 }
0x2e7f   : > { %11431 = vmatmul.mubr.msk.f32.vlgmr.msra.gmra.mrb[64].mxu0 %vm1541_vm8, %v15130_v10 }
0x2e80   : > { %12424 = vmatpush3.bf16.msk.msra.mxu0 %vm13519_vm11, %v15137_v44 }
0x2e81   : > { %12426 = vmatprep.subr.bf16.mxu0 %v12425_v19 }
0x2f52   : > { %v11432_v33 = vpop.f32.mrb[64].mxu0 }
0x2f53   : > { %v7311_v35 = vpop.f32.mrb[65].mxu0  ;;  %v7323_v59 = vsel %vm1633_vm12, %v11432_v33, -inf }
0x2f54   : > { %7324 = vmax.xlane.f32.xlu1 %v7323_v59  ;;  %v7320_v62 = vsel %vm1629_vm13, %v7311_v35, -inf }
0x2f55   : > { %7321 = vmax.xlane.f32.xlu0 %v7320_v62 }
0x2fe1   : > { %v7325_v14 = vpop.xlane.xlu1 %7324 }
0x2fe2   : > { %v7327_v63 = vsub.f32 %v11432_v33, %v7325_v14  ;;  %v7322_v60 = vpop.xlane.xlu0 %7321 }
0x2fe3   : > { %v7326_v3 = vsub.f32 %v7311_v35, %v7322_v60 }
0x2fe4   : > { %v7330_v47 = vmul.f32 1.442695, %v7327_v63 }
0x2fe5   : > { %v7328_v6 = vmul.f32 1.442695, %v7326_v3 }
0x2fe6   : > { %12785 = vpow2.f32 %v7330_v47 }
0x2fe7   : > { %12787 = vpow2.f32 %v7328_v6 }
0x2ff0   : > { %v12786_v10 = vpop.eup %12785 }
0x2ff1   : > { %v12788_v5 = vpop.eup %12787  ;;  %v7335_v44 = vsel %vm1633_vm12, %v12786_v10, 0.0 }
0x2ff2   : > { %7336 = vadd.xlane.f32.xlu1 %v7335_v44  ;;  %v7332_v8 = vsel %vm1629_vm13, %v12788_v5, 0.0  ;;  %v9820_v44 = vld [vmem:[%s15631_s15 + $0xa8] sm:$0xff] }
0x2ff3   : > { %7333 = vadd.xlane.f32.xlu0 %v7332_v8 }
0x307f   : > { %v7337_v21 = vpop.xlane.xlu1 %7336 }
0x3080   : > { %12789 = vrcp.f32 %v7337_v21  ;;  %v7334_v15 = vpop.xlane.xlu0 %7333 }
0x3081   : > { %12791 = vrcp.f32 %v7334_v15 }
0x308a   : > { %v12790_v28 = vpop.eup %12789 }
0x308b   : > { %v12792_v11 = vpop.eup %12791  ;;  %v7341_v24 = vmul.f32 %v12790_v28, %v12786_v10 }
0x308c   : > { %v7340_v16 = vmul.f32 %v12792_v11, %v12788_v5  ;;  %v9819_v5 = vld [vmem:[%s15631_s15 + $0xa0] sm:$0xff] }
0x308d   : > { %v12493_v8 = vpack.c.bf16 %v9820_v44, %v9819_v5  ;;  %v9835_v11 = vld [vmem:[%s15698_s28 + $0x2c0] sm:$0xff] }
0x308e   : > { %11437 = vmatprep.mubr.msk.f32.mxu0 %vm1629_vm13, %v7340_v16  ;;  %v9836_v16 = vld [vmem:[%s15698_s28 + $0x2c8] sm:$0xff]  ;;  %v9873_v5 = vld [vmem:[%s15633_s17 + $0x2] ss:$0 sm:$0xff] }
0x308f   : > { %11438 = vmatmul.mubr.msk.f32.vlgmr.msra.gmra.mrb[66].mxu0 %vm1629_vm13, %v7341_v24  ;;  %v12513_v24 = vpack.c.bf16 %v9836_v16, %v9835_v11 }
0x3090   : > { %12428 = vmatpush3.bf16.msra.mxu0 %v12425_v19 }
0x3091   : > { %12430 = vmatprep.subr.bf16.mxu0 %v12429_v26 }
0x3162   : > { %v11439_v30 = vpop.f32.mrb[66].mxu0 }
0x3163   : > { %v7417_v18 = vpop.f32.mrb[67].mxu0 }
0x3164   : > { %11444 = vmatprep.mubr.msk.f32.mxu0 %vm1541_vm8, %v7417_v18  ;;  %v9840_v18 = vld [vmem:[%s15698_s28 + $0x2e8] sm:$0xff] }
0x3165   : > { %11445 = vmatmul.mubr.msk.f32.vlgmr.msra.gmra.mrb[68].mxu0 %vm1541_vm8, %v11439_v30  ;;  %v9839_v30 = vld [vmem:[%s15698_s28 + $0x2e0] sm:$0xff] }
0x3166   : > { %11451 = vmatprep.mubr.msk.f32.mxu0 %vm1541_vm8, %v6945_v46  ;;  %12432 = vmatpush3.bf16.msra.mxu0 %v12429_v26  ;;  %v9795_v46 = vld [vmem:[%s15698_s28 + $0x2b8] sm:$0xff] }
0x3167   : > { %12450 = vmatprep.subr.bf16.mxu0 %v12449_v38  ;;  %v12461_v51 = vpack.c.bf16 %v9795_v46, %v9794_v27 }
0x316d   : > { %11452 = vmatmul.mubr.msk.f32.vlgmr.msra.gmra.mrb[68].mxu0 %vm1541_vm8, %v15204_v17  ;;  %v7675_v17 = vadd.f32 %v15142_v4, %v15147_v53 }
0x316e   : > { %12452 = vmatpush3.bf16.msra.mxu0 %v12449_v38  ;;  %11489 = vmatprep.mubr.msk.f32.mxu0 %vm1220_vm6, %v14899_v36  ;;  %v12521_v38 = vpack.c.bf16 %v9840_v18, %v9839_v30  ;;  %v9879_v18 = vld [vmem:[%s15636_s20 + $0x108] sm:$0xff] }
0x316f   : > { %12454 = vmatprep.subr.bf16.mxu0 %v12453_v34 }
0x3172   : > { %12456 = vmatpush3.bf16.msra.mxu0 %v12453_v34  ;;  %v12525_v34 = vpack.c.bf16 %v9842_v2, %v9841_v23  ;;  %v9878_v2 = vld [vmem:[%s15636_s20 + $0x100] sm:$0xff] }
0x3173   : > { %12458 = vmatprep.subr.bf16.mxu0 %v12457_v20 }
0x3176   : > { %12460 = vmatpush3.bf16.msra.mxu0 %v12457_v20 }
0x3177   : > { %12462 = vmatprep.subr.bf16.mxu0 %v12461_v51 }
0x317a   : > { %12464 = vmatpush3.bf16.msra.mxu0 %v12461_v51 }
0x317d   : > { %11490 = vmatmul.mubr.msk.f32.vlgmr.msra.gmra.mrb[70].mxu0 %vm1220_vm6, %v14912_v50 }
0x317e   : > { %11515 = vmatprep.mubr.msk.f32.mxu0 %vm1541_vm8, %v7675_v17 }
0x3250   : > { %v11491_v32 = vpop.f32.mrb[70].mxu0 }
0x3251   : > { %v7772_v58 = vadd.f32 %v11491_v32, %v9797_v13  ;;  %v7766_v61 = vpop.f32.mrb[71].mxu0 }
0x3252   : > { %v7767_v31 = vadd.f32 %v9797_v13, %v7766_v61 }
0x3254   : > { %v12481_v33 = vpack.c.bf16 %v7772_v58, %v7767_v31 }
0x3256   : > { %12483 = vmatprep.subr.msk.bf16.mxu0 %vm13502_vm9, %v12481_v33 }
0x3257   : > { %12486 = vmatpush3.bf16.xpose.msk.msra.mxu0 %vm13502_vm9, %v12481_v33 }
0x3258   : > { %12489 = vmatprep.subr.msk.bf16.mxu0 %vm13519_vm11, %v15152_v54 }
0x325e   : > { %11516 = vmatmul.mubr.msk.f32.vlgmr.msra.gmra.mrb[72].mxu0 %vm1541_vm8, %v15145_v48 }
0x325f   : > { %12492 = vmatpush3.bf16.msk.msra.mxu0 %vm13519_vm11, %v15152_v54 }
0x3260   : > { %12494 = vmatprep.subr.bf16.mxu0 %v12493_v8 }
0x3331   : > { %v11517_v4 = vpop.f32.mrb[72].mxu0 }
0x3332   : > { %v7945_v53 = vpop.f32.mrb[73].mxu0  ;;  %v7957_v35 = vsel %vm1633_vm12, %v11517_v4, -inf }
0x3333   : > { %7958 = vmax.xlane.f32.xlu1 %v7957_v35  ;;  %v7954_v59 = vsel %vm1629_vm13, %v7945_v53, -inf  ;;  %v9867_v35 = vld [vmem:[%s15631_s15 + $0xb8] sm:$0xff] }
0x3334   : > { %7955 = vmax.xlane.f32.xlu0 %v7954_v59 }
0x33c0   : > { %v7959_v62 = vpop.xlane.xlu1 %7958 }
0x33c1   : > { %v7961_v14 = vsub.f32 %v11517_v4, %v7959_v62  ;;  %v7956_v63 = vpop.xlane.xlu0 %7955 }
0x33c2   : > { %v7960_v60 = vsub.f32 %v7945_v53, %v7956_v63  ;;  %v9866_v53 = vld [vmem:[%s15631_s15 + $0xb0] sm:$0xff] }
0x33c3   : > { %v7964_v3 = vmul.f32 1.442695, %v7961_v14  ;;  %v12557_v59 = vpack.c.bf16 %v9867_v35, %v9866_v53  ;;  %v9897_v53 = vld [vmem:[%s15638_s22 + $0x200] sm:$0xff] }
0x33c4   : > { %v7962_v47 = vmul.f32 1.442695, %v7960_v60 }
0x33c5   : > { %12793 = vpow2.f32 %v7964_v3 }
0x33c6   : > { %12795 = vpow2.f32 %v7962_v47 }
0x33cf   : > { %v12794_v48 = vpop.eup %12793 }
0x33d0   : > { %v12796_v6 = vpop.eup %12795  ;;  %v7969_v54 = vsel %vm1633_vm12, %v12794_v48, 0.0 }
0x33d1   : > { %7970 = vadd.xlane.f32.xlu1 %v7969_v54  ;;  %v7966_v10 = vsel %vm1629_vm13, %v12796_v6, 0.0  ;;  %v9872_v54 = vld [vmem:[%s15632_s16 + $0x2] ss:$0 sm:$0xff] }
0x33d2   : > { %7967 = vadd.xlane.f32.xlu0 %v7966_v10 }
0x345e   : > { %v7971_v12 = vpop.xlane.xlu1 %7970 }
0x345f   : > { %12797 = vrcp.f32 %v7971_v12  ;;  %v7968_v49 = vpop.xlane.xlu0 %7967 }
0x3460   : > { %12799 = vrcp.f32 %v7968_v49 }
0x3469   : > { %v12798_v19 = vpop.eup %12797 }
0x346a   : > { %v12800_v21 = vpop.eup %12799  ;;  %v7975_v28 = vmul.f32 %v12798_v19, %v12794_v48 }
0x346b   : > { %v7974_v15 = vmul.f32 %v12800_v21, %v12796_v6 }
0x346d   : > { %11522 = vmatprep.mubr.msk.f32.mxu0 %vm1629_vm13, %v7974_v15 }
0x346e   : > { %11523 = vmatmul.mubr.msk.f32.vlgmr.msra.gmra.mrb[74].mxu0 %vm1629_vm13, %v7975_v28 }
0x346f   : > { %12496 = vmatpush3.bf16.msra.mxu0 %v12493_v8 }
0x3470   : > { %12514 = vmatprep.subr.bf16.mxu0 %v12513_v24 }
0x3541   : > { %v11524_v26 = vpop.f32.mrb[74].mxu0 }
0x3542   : > { %v8051_v29 = vpop.f32.mrb[75].mxu0 }
0x3543   : > { %11529 = vmatprep.mubr.msk.f32.mxu0 %vm1541_vm8, %v8051_v29 }
0x3544   : > { %11530 = vmatmul.mubr.msk.f32.vlgmr.msra.gmra.mrb[68].mxu0 %vm1541_vm8, %v11524_v26 }
0x3545   : > { %12516 = vmatpush3.bf16.msra.mxu0 %v12513_v24  ;;  %11567 = vmatprep.mubr.msk.f32.mxu0 %vm1220_vm6, %v14899_v36  ;;  %v9844_v36 = vld [vmem:[%s15628_s12 + $0xb] ss:$0 sm:$0xff] }
0x3546   : > { %12518 = vmatprep.subr.bf16.mxu0 %v12517_v1 }
0x3549   : > { %12520 = vmatpush3.bf16.msra.mxu0 %v12517_v1 }
0x354a   : > { %12522 = vmatprep.subr.bf16.mxu0 %v12521_v38 }
0x354d   : > { %12524 = vmatpush3.bf16.msra.mxu0 %v12521_v38  ;;  %v9881_v38 = vld [vmem:[%s15636_s20 + $0x118] sm:$0xff] }
0x354e   : > { %12526 = vmatprep.subr.bf16.mxu0 %v12525_v34  ;;  %v12561_v23 = vpack.c.bf16 %v9881_v38, %v9879_v18  ;;  %v9920_v18 = vld [vmem:[%s15638_s22 + $0x2b8] sm:$0xff] }
0x3550   : > { %12562 = vmatprep.subr.bf16.mxu1 %v12561_v23  ;;  %v9903_v23 = vld [vmem:[%s15638_s22 + $0x230] sm:$0xff] }
0x3551   : > { %12528 = vmatpush3.bf16.msra.mxu0 %v12525_v34  ;;  %v9880_v34 = vld [vmem:[%s15636_s20 + $0x110] sm:$0xff] }
0x3554   : > { %11568 = vmatmul.mubr.msk.f32.vlgmr.msra.gmra.mrb[76].mxu0 %vm1220_vm6, %v14912_v50 }
0x3555   : > { %11593 = vmatprep.mubr.msk.f32.mxu0 %vm1541_vm8, %v8230_v40  ;;  %v12563_v40 = vpack.c.bf16 %v9880_v34, %v9878_v2  ;;  %v9904_v2 = vld [vmem:[%s15638_s22 + $0x238] sm:$0xff] }
0x3556   : > { %v12591_v34 = vpack.c.bf16 %v9904_v2, %v9903_v23 }
0x3557   : > { %12564 = vmatpush1.bf16.msra.mxu1 %v12563_v40  ;;  %v9921_v40 = vld [vmem:[%s15638_s22 + $0x2c0] sm:$0xff] }
0x3627   : > { %v11569_v41 = vpop.f32.mrb[76].mxu0 }
0x3628   : > { %v8327_v20 = vadd.f32 %v11569_v41, %v9844_v36  ;;  %v8321_v27 = vpop.f32.mrb[77].mxu0  ;;  %v9885_v41 = vld [vmem:[%s15636_s20 + $0x138] sm:$0xff] }
0x3629   : > { %v8322_v46 = vadd.f32 %v9844_v36, %v8321_v27  ;;  %v9883_v36 = vld [vmem:[%s15636_s20 + $0x128] sm:$0xff]  ;;  %v9882_v27 = vld [vmem:[%s15636_s20 + $0x120] sm:$0xff] }
0x362b   : > { %v12545_v51 = vpack.c.bf16 %v8327_v20, %v8322_v46  ;;  %v12565_v20 = vpack.c.bf16 %v9885_v41, %v9883_v36  ;;  %v9884_v46 = vld [vmem:[%s15636_s20 + $0x130] sm:$0xff]  ;;  %v9922_v36 = vld [vmem:[%s15638_s22 + $0x2c8] sm:$0xff]  ;;  %v9905_v41 = vld [vmem:[%s15638_s22 + $0x240] sm:$0xff] }
0x362d   : > { %12547 = vmatprep.subr.msk.bf16.mxu0 %vm13502_vm9, %v12545_v51  ;;  %12566 = vmatprep.subr.bf16.mxu1 %v12565_v20  ;;  %v12593_v20 = vpack.c.bf16 %v9922_v36, %v9921_v40 }
0x362e   : > { %12550 = vmatpush3.bf16.xpose.msk.msra.mxu0 %vm13502_vm9, %v12545_v51  ;;  %v12567_v51 = vpack.c.bf16 %v9884_v46, %v9882_v27  ;;  %v9906_v27 = vld [vmem:[%s15638_s22 + $0x248] sm:$0xff]  ;;  %v9923_v46 = vld [vmem:[%s15638_s22 + $0x2d0] sm:$0xff] }
0x362f   : > { %12553 = vmatprep.subr.msk.bf16.mxu0 %vm13519_vm11, %v15167_v0 }
0x3630   : > { %12568 = vmatpush1.bf16.msra.mxu1 %v12567_v51  ;;  %v9924_v51 = vld [vmem:[%s15638_s22 + $0x2d8] sm:$0xff] }
0x3635   : > { %11594 = vmatmul.mubr.msk.f32.vlgmr.msra.gmra.mrb[78].mxu0 %vm1541_vm8, %v15160_v56 }
0x3636   : > { %12556 = vmatpush3.bf16.msk.msra.mxu0 %vm13519_vm11, %v15167_v0 }
0x3637   : > { %12558 = vmatprep.subr.bf16.mxu0 %v12557_v59 }
0x3708   : > { %v11595_v50 = vpop.f32.mrb[78].mxu0 }
0x3709   : > { %v8500_v55 = vpop.f32.mrb[79].mxu0  ;;  %v8512_v57 = vsel %vm1633_vm12, %v11595_v50, -inf }
0x370a   : > { %8513 = vmax.xlane.f32.xlu1 %v8512_v57  ;;  %v8509_v17 = vsel %vm1629_vm13, %v8500_v55, -inf }
0x370b   : > { %8510 = vmax.xlane.f32.xlu0 %v8509_v17  ;;  %v9886_v17 = vld [vmem:[%s15636_s20 + $0x140] sm:$0xff] }
0x3797   : > { %v8514_v37 = vpop.xlane.xlu1 %8513 }
0x3798   : > { %v8516_v13 = vsub.f32 %v11595_v50, %v8514_v37  ;;  %v8511_v32 = vpop.xlane.xlu0 %8510  ;;  %v9887_v50 = vld [vmem:[%s15636_s20 + $0x148] sm:$0xff]  ;;  %v9888_v37 = vld [vmem:[%s15636_s20 + $0x150] sm:$0xff] }
0x3799   : > { %v8515_v58 = vsub.f32 %v8500_v55, %v8511_v32  ;;  %v9889_v55 = vld [vmem:[%s15636_s20 + $0x158] sm:$0xff]  ;;  %v9891_v32 = vld [vmem:[%s15636_s20 + $0x168] sm:$0xff] }
0x379a   : > { %v8519_v61 = vmul.f32 1.442695, %v8516_v13  ;;  %v12569_v57 = vpack.c.bf16 %v9889_v55, %v9887_v50  ;;  %v12571_v13 = vpack.c.bf16 %v9888_v37, %v9886_v17  ;;  %v12595_v50 = vpack.c.bf16 %v9906_v27, %v9905_v41  ;;  %v9908_v17 = vld [vmem:[%s15638_s22 + $0x258] sm:$0xff]  ;;  %v9925_v37 = vld [vmem:[%s15638_s22 + $0x2e0] sm:$0xff] }
0x379b   : > { %v8517_v31 = vmul.f32 1.442695, %v8515_v58  ;;  %v9893_v58 = vld [vmem:[%s15636_s20 + $0x178] sm:$0xff]  ;;  %v12597_v55 = vpack.c.bf16 %v9924_v51, %v9923_v46 }
0x379c   : > { %12801 = vpow2.f32 %v8519_v61  ;;  %12570 = vmatprep.subr.bf16.mxu1 %v12569_v57  ;;  %v12573_v61 = vpack.c.bf16 %v9893_v58, %v9891_v32  ;;  %v9907_v57 = vld [vmem:[%s15638_s22 + $0x250] sm:$0xff] }
0x379d   : > { %12803 = vpow2.f32 %v8517_v31  ;;  %12572 = vmatpush1.bf16.msra.mxu1 %v12571_v13  ;;  %v9890_v31 = vld [vmem:[%s15636_s20 + $0x160] sm:$0xff]  ;;  %v9926_v13 = vld [vmem:[%s15638_s22 + $0x2e8] sm:$0xff]  ;;  %v12599_v32 = vpack.c.bf16 %v9908_v17, %v9907_v57 }
0x379e   : > { %12574 = vmatprep.subr.bf16.mxu1 %v12573_v61  ;;  %v12601_v58 = vpack.c.bf16 %v9926_v13, %v9925_v37  ;;  %v9909_v61 = vld [vmem:[%s15638_s22 + $0x260] sm:$0xff] }
0x379f   : > { %v9930_v37 = vld [vmem:[%s15639_s23 + $0x2] ss:$0 sm:$0xff] }
0x37a6   : > { %v12802_v56 = vpop.eup %12801 }
0x37a7   : > { %v12804_v33 = vpop.eup %12803  ;;  %v8524_v0 = vsel %vm1633_vm12, %v12802_v56, 0.0 }
0x37a8   : > { %8525 = vadd.xlane.f32.xlu1 %v8524_v0  ;;  %v8521_v4 = vsel %vm1629_vm13, %v12804_v33, 0.0  ;;  %v9913_v0 = vld [vmem:[%s15638_s22 + $0x280] sm:$0xff] }
0x37a9   : > { %8522 = vadd.xlane.f32.xlu0 %v8521_v4  ;;  %v9914_v4 = vld [vmem:[%s15638_s22 + $0x288] sm:$0xff] }
0x37aa   : > { %v12577_v35 = vpack.c.bf16 %v9914_v4, %v9913_v0 }
0x3835   : > { %v8526_v62 = vpop.xlane.xlu1 %8525 }
0x3836   : > { %12805 = vrcp.f32 %v8526_v62  ;;  %v8523_v14 = vpop.xlane.xlu0 %8522 }
0x3837   : > { %12807 = vrcp.f32 %v8523_v14 }
0x3840   : > { %v12806_v63 = vpop.eup %12805 }
0x3841   : > { %v12808_v60 = vpop.eup %12807  ;;  %v8530_v47 = vmul.f32 %v12806_v63, %v12802_v56  ;;  %v9892_v56 = vld [vmem:[%s15636_s20 + $0x170] sm:$0xff] }
0x3842   : > { %v8529_v3 = vmul.f32 %v12808_v60, %v12804_v33  ;;  %v12575_v33 = vpack.c.bf16 %v9892_v56, %v9890_v31  ;;  %v9910_v31 = vld [vmem:[%s15638_s22 + $0x268] sm:$0xff]  ;;  %v9927_v56 = vld [vmem:[%s15638_s22 + $0x2f0] sm:$0xff] }
0x3843   : > { %v12603_v0 = vpack.c.bf16 %v9910_v31, %v9909_v61 }
0x3844   : > { %11600 = vmatprep.mubr.msk.f32.mxu0 %vm1629_vm13, %v8529_v3  ;;  %12576 = vmatpush1.bf16.msra.mxu1 %v12575_v33  ;;  %v9928_v33 = vld [vmem:[%s15638_s22 + $0x2f8] sm:$0xff] }
0x3845   : > { %11601 = vmatmul.mubr.msk.f32.vlgmr.msra.gmra.mrb[80].mxu0 %vm1629_vm13, %v8530_v47  ;;  %12609 = vmatprep.subr.bf16.mxu1 %v12889_v39  ;;  %v12605_v4 = vpack.c.bf16 %v9928_v33, %v9927_v56 }
0x3846   : > { %12560 = vmatpush3.bf16.msra.mxu0 %v12557_v59  ;;  %v9898_v59 = vld [vmem:[%s15638_s22 + $0x208] sm:$0xff] }
0x3847   : > { %v12579_v62 = vpack.c.bf16 %v9898_v59, %v9897_v53  ;;  %12578 = vmatprep.subr.bf16.mxu0 %v12577_v35  ;;  %v9911_v53 = vld [vmem:[%s15638_s22 + $0x270] sm:$0xff]  ;;  %v9912_v35 = vld [vmem:[%s15638_s22 + $0x278] sm:$0xff] }
0x3848   : > { %v12607_v59 = vpack.c.bf16 %v9912_v35, %v9911_v53 }
0x3918   : > { %v11602_v48 = vpop.f32.mrb[80].mxu0 }
0x3919   : > { %v8606_v6 = vpop.f32.mrb[81].mxu0 }
0x391a   : > { %11607 = vmatprep.mubr.msk.f32.mxu0 %vm1541_vm8, %v8606_v6 }
0x391b   : > { %11608 = vmatmul.mubr.msk.f32.vlgmr.msra.gmra.mrb[68].mxu0 %vm1541_vm8, %v11602_v48 }
0x391c   : > { %12580 = vmatpush3.bf16.msra.mxu0 %v12579_v62  ;;  %v9894_v62 = vld [vmem:[%s15637_s21 + $0x4] sm:$0x3] }
0x39ee   : > { %v11609_v10 = vpop.f32.mrb[68].mxu0 }
0x39ef   : > { %v8712_v44 = vadd.f32 %v11609_v10, %v9872_v54  ;;  %v8690_v8 = vpop.f32.mrb[69].mxu0 }
0x39f0   : > { %v8711_v12 = vadd.f32 %v9872_v54, %v8690_v8  ;;  %v9876_v54 = vld [vmem:[%s15634_s18 + $0x2] ss:$0 sm:$0xff] }
0x39f1   : > { %v8720_v49 = vmul.f32 %v9873_v5, %v8712_v44  ;;  %v9877_v44 = vld [vmem:[%s15635_s19 + $0x2] ss:$0 sm:$0xff] }
0x39f2   : > { %v8719_v19 = vmul.f32 %v9873_v5, %v8711_v12 }
0x39f3   : > { %v15371_v21 = vadd.f32 %v8720_v49, %v14822_v43 }
0x39f4   : > { %v15374_v15 = vadd.f32 %v8719_v19, %v14817_v42 }
0x39f5   : > { %v8730_v28 = vsel %vm1224_vm7, %v15371_v21, 0.0 }
0x39f6   : > { %8731 = vadd.xlane.f32.xlu1 %v8730_v28  ;;  %v8727_v11 = vsel %vm1220_vm6, %v15374_v15, 0.0  ;;  %v9915_v28 = vld [vmem:[%s15638_s22 + $0x290] sm:$0xff] }
0x39f7   : > { %8728 = vadd.xlane.f32.xlu0 %v8727_v11  ;;  %v9916_v11 = vld [vmem:[%s15638_s22 + $0x298] sm:$0xff] }
0x3a83   : > { %v8732_v16 = vpop.xlane.xlu1 %8731 }
0x3a84   : > { %v8734_v24 = vmul.f32 0.015625, %v8732_v16  ;;  %v8729_v22 = vpop.xlane.xlu0 %8728  ;;  %v12581_v16 = vpack.c.bf16 %v9916_v11, %v9915_v28 }
0x3a85   : > { %v8733_v25 = vmul.f32 0.015625, %v8729_v22  ;;  %v9900_v22 = vld [vmem:[%s15638_s22 + $0x218] sm:$0xff] }
0x3a86   : > { %v8736_v26 = vsub.f32 %v15371_v21, %v8734_v24  ;;  %v9899_v24 = vld [vmem:[%s15638_s22 + $0x210] sm:$0xff]  ;;  %12582 = vmatprep.subr.bf16.mxu0 %v12581_v16 }
0x3a87   : > { %v8735_v43 = vsub.f32 %v15374_v15, %v8733_v25  ;;  %v12583_v25 = vpack.c.bf16 %v9900_v22, %v9899_v24 }
0x3a88   : > { %v8738_v29 = vmul.f32 %v8736_v26, %v8736_v26 }
0x3a89   : > { %v8737_v1 = vmul.f32 %v8735_v43, %v8735_v43  ;;  %12584 = vmatpush3.bf16.msra.mxu0 %v12583_v25 }
0x3a8a   : > { %v8742_v42 = vsel %vm1224_vm7, %v8738_v29, 0.0  ;;  %v9901_v29 = vld [vmem:[%s15638_s22 + $0x220] sm:$0xff] }
0x3a8b   : > { %8743 = vadd.xlane.f32.xlu1 %v8742_v42  ;;  %v8739_v30 = vsel %vm1220_vm6, %v8737_v1, 0.0  ;;  %v9902_v1 = vld [vmem:[%s15638_s22 + $0x228] sm:$0xff] }
0x3a8c   : > { %8740 = vadd.xlane.f32.xlu0 %v8739_v30  ;;  %v12587_v42 = vpack.c.bf16 %v9902_v1, %v9901_v29  ;;  %v9919_v30 = vld [vmem:[%s15638_s22 + $0x2b0] sm:$0xff] }
0x3a8d   : > { %v12589_v38 = vpack.c.bf16 %v9920_v18, %v9919_v30 }
0x3b18   : > { %v8744_v39 = vpop.xlane.xlu1 %8743 }
0x3b19   : > { %v8746_v14 = vmul.f32 0.015625, %v8744_v39  ;;  %v8741_v63 = vpop.xlane.xlu0 %8740  ;;  %v8792_v39 = vrot.slane %v9894_v62, %v14069_v7 }
0x3b1a   : > { %v8745_v60 = vmul.f32 0.015625, %v8741_v63 }
0x3b1b   : > { %v8748_v3 = vadd.f32 1e-06, %v8746_v14  ;;  %v8796_v14 = vrot.slane %v9894_v62, %v14074_v9 }
0x3b1c   : > { %v8747_v47 = vadd.f32 1e-06, %v8745_v60 }
0x3b1d   : > { %12809 = vrsqrt.f32 %v8748_v3 }
0x3b1e   : > { %12811 = vrsqrt.f32 %v8747_v47 }
0x3b27   : > { %v12810_v48 = vpop.eup %12809 }
0x3b28   : > { %v12812_v6 = vpop.eup %12811  ;;  %v8752_v5 = vmul.f32 %v12810_v48, %v8736_v26  ;;  %v9918_v26 = vld [vmem:[%s15638_s22 + $0x2a8] sm:$0xff] }
0x3b29   : > { %v8751_v10 = vmul.f32 %v12812_v6, %v8735_v43 }
0x3b2a   : > { %v8760_v49 = vmul.f32 %v9876_v54, %v8752_v5 }
0x3b2b   : > { %v8759_v8 = vmul.f32 %v9876_v54, %v8751_v10 }
0x3b2c   : > { %v8768_v19 = vadd.f32 %v9877_v44, %v8760_v49 }
0x3b2d   : > { %v8767_v12 = vadd.f32 %v9877_v44, %v8759_v8 }
0x3b2f   : > { %9895 = vmatmul.mubr.msk.f32.vlgmr.msra.gmra.mrb[68].mxu1 %vm1220_vm6, %v8767_v12 }
0x3b30   : > { %8875 = vmatprep.mubr.f32.mxu1 %v12891_v45 }
0x3b33   : > { %9896 = vmatmul.mubr.msk.f32.gmra.mrb[70].mxu1 %vm1220_vm6, %v8768_v19 }
0x3b34   : > { %11614 = vmatprep.mubr.msk.f32.mxu1 %vm12890_vm0, %v12891_v45  ;;  %v9917_v45 = vld [vmem:[%s15638_s22 + $0x2a0] sm:$0xff] }
0x3b35   : > { %v12585_v43 = vpack.c.bf16 %v9918_v26, %v9917_v45 }
0x3b37   : > { %12586 = vmatprep.subr.bf16.mxu0 %v12585_v43 }
0x3b38   : > { %12588 = vmatpush3.bf16.msra.mxu0 %v12587_v42 }
0x3b39   : > { %12590 = vmatprep.subr.bf16.mxu0 %v12589_v38 }
0x3b3c   : > { %12592 = vmatpush3.bf16.msra.mxu0 %v12591_v34 }
0x3b3d   : > { %12594 = vmatprep.subr.bf16.mxu0 %v12593_v20 }
0x3b40   : > { %12596 = vmatpush3.bf16.msra.mxu0 %v12595_v50 }
0x3b41   : > { %12598 = vmatprep.subr.bf16.mxu0 %v12597_v55 }
0x3b44   : > { %12600 = vmatpush3.bf16.msra.mxu0 %v12599_v32 }
0x3b45   : > { %12602 = vmatprep.subr.bf16.mxu0 %v12601_v58  ;;  %v9932_v58 = vld [vmem:[%s15640_s24 + $0x2] ss:$0 sm:$0xff] }
0x3b48   : > { %12604 = vmatpush3.bf16.msra.mxu0 %v12603_v0 }
0x3b49   : > { %12606 = vmatprep.subr.bf16.mxu0 %v12605_v4 }
0x3b4c   : > { %12608 = vmatpush3.bf16.msra.mxu0 %v12607_v59 }
0x3c02   : > { %v8871_v63 = vpop.f32.mrb[68].mxu1 }
0x3c03   : > { %v8872_v60 = vadd.f32 %v8871_v63, %v8792_v39  ;;  %v8873_v3 = vpop.f32.mrb[69].mxu1 }
0x3c04   : > { %v8874_v47 = vadd.f32 %v8873_v3, %v8796_v14 }
0x3c05   : > { %v8886_v48 = vmul.f32 0.044715, %v8872_v60  ;;  %v8882_v34 = vmul.f32 0.5, %v8872_v60 }
0x3c06   : > { %v8887_v6 = vmul.f32 0.044715, %v8874_v47  ;;  %v8877_v54 = vpop.f32.mrb[70].mxu1  ;;  %v8883_v23 = vmul.f32 0.5, %v8874_v47 }
0x3c07   : > { %v8890_v10 = vmul.f32 %v8886_v48, %v8872_v60  ;;  %v8878_v5 = vadd.f32 %v8877_v54, %v8792_v39  ;;  %v8879_v44 = vpop.f32.mrb[71].mxu1 }
0x3c08   : > { %v8891_v8 = vmul.f32 %v8887_v6, %v8874_v47  ;;  %v8880_v12 = vadd.f32 %v8879_v44, %v8796_v14 }
0x3c09   : > { %v8894_v49 = vmul.f32 %v8890_v10, %v8872_v60  ;;  %v8888_v19 = vmul.f32 0.044715, %v8878_v5  ;;  %v8884_v50 = vmul.f32 0.5, %v8878_v5 }
0x3c0a   : > { %v8889_v28 = vmul.f32 0.044715, %v8880_v12  ;;  %v8895_v11 = vmul.f32 %v8891_v8, %v8874_v47  ;;  %v8885_v46 = vmul.f32 0.5, %v8880_v12 }
0x3c0b   : > { %v8898_v16 = vadd.f32 %v8894_v49, %v8872_v60  ;;  %v8892_v7 = vmul.f32 %v8888_v19, %v8878_v5 }
0x3c0c   : > { %v8893_v24 = vmul.f32 %v8889_v28, %v8880_v12  ;;  %v8899_v9 = vadd.f32 %v8895_v11, %v8874_v47  ;;  %v9933_v11 = vld [vmem:[%s15641_s25] ss:$0 sm:$0xff] }
0x3c0d   : > { %v8902_v22 = vmul.f32 0.7978846, %v8898_v16  ;;  %v8896_v25 = vmul.f32 %v8892_v7, %v8878_v5 }
0x3c0e   : > { %v8903_v45 = vmul.f32 0.7978846, %v8899_v9  ;;  %v8897_v26 = vmul.f32 %v8893_v24, %v8880_v12  ;;  %v9934_v9 = vld [vmem:[%s15707_s29] ss:$0 sm:$0xff] }
0x3c0f   : > { %12813 = vtanh.f32 %v8902_v22  ;;  %v8900_v43 = vadd.f32 %v8896_v25, %v8878_v5 }
0x3c10   : > { %12815 = vtanh.f32 %v8903_v45  ;;  %v8901_v29 = vadd.f32 %v8897_v26, %v8880_v12 }
0x3c11   : > { %v8904_v1 = vmul.f32 0.7978846, %v8900_v43  ;;  %v9090_v43 = vld [vmem:[%s15708_s27] sm:$0xf]  ;;  %s12829_s27 = sshll.u32 %s12893_s9, 4  ;;  %s12830_s27 = int_to_ptr.vmem [resolvable:$false] %s12829_s27 }
0x3c12   : > { %v8905_v42 = vmul.f32 0.7978846, %v8901_v29  ;;  %s12831_s26 = scalar_lea.vmem %s12830_s27, 128  ;;  %p12832_p0 = scmp.lt.s32.totalorder %s15576_s30, %s12830_s27 }
0x3c13   : > { %12817 = vtanh.f32 %v8904_v1  ;;  %p12833_p1 = scmp.lt.s32.totalorder %s12831_s26, %s12825_s8 }
0x3c14   : > { %12819 = vtanh.f32 %v8905_v42 }
0x3c15   : > { %p12834_p2 = por %p12833_p1, %p12832_p0 }
0x3c17   : > { %p12835_p3 = pnand %p12834_p2, %p12828_p13 }
0x3c19   : > { %v12814_v30 = vpop.eup %12813 }
0x3c1a   : > { %v12816_v18 = vpop.eup %12815  ;;  %v8910_v38 = vadd.f32 1.0, %v12814_v30 }
0x3c1b   : > { %v8911_v2 = vadd.f32 1.0, %v12816_v18 }
0x3c1c   : > { %v8914_v20 = vmul.f32 %v8910_v38, %v8882_v34 }
0x3c1d   : > { %v12818_v40 = vpop.eup %12817  ;;  %v8915_v36 = vmul.f32 %v8911_v2, %v8883_v23 }
0x3c1e   : > { %v12820_v41 = vpop.eup %12819  ;;  %v8912_v27 = vadd.f32 1.0, %v12818_v40 }
0x3c1f   : > { %9023 = vmatprep.mubr.f32.mxu0 %v8915_v36  ;;  %v8913_v51 = vadd.f32 1.0, %v12820_v41 }
0x3c20   : > { %9024 = vmatmul.mubr.f32.vlgmr.msra.gmra.mrb[82].mxu0 %v8914_v20  ;;  %v8916_v57 = vmul.f32 %v8912_v27, %v8884_v50 }
0x3c21   : > { %v8917_v55 = vmul.f32 %v8913_v51, %v8885_v46 }
0x3c23   : > { %9028 = vmatprep.mubr.f32.mxu0 %v8917_v55 }
0x3c24   : > { %9029 = vmatmul.mubr.f32.gmra.mrb[84].mxu0 %v8916_v57 }
0x3cf3   : > { %v10637_v17 = vpop.f32.mrb[82].mxu0 }
0x3cf4   : > { %v10638_v13 = vpop.f32.mrb[83].mxu0 }
0x3cf5   : > { %v10639_v32 = vadd.f32 %v10638_v13, %v10637_v17 }
0x3cf7   : > { %v9026_v61 = vadd.f32 %v10639_v32, %v9930_v37  ;;  %v10640_v31 = vpop.f32.mrb[84].mxu0 }
0x3cf8   : > { %v10641_v56 = vpop.f32.mrb[85].mxu0 }
0x3cf9   : > { %v10642_v33 = vadd.f32 %v10641_v56, %v10640_v31  ;;  %v9042_v0 = vmul.f32 %v9932_v58, %v9026_v61 }
0x3cfb   : > { %v9031_v4 = vadd.f32 %v10642_v33, %v9930_v37  ;;  %v9044_v53 = vadd.f32 %v9042_v0, %v15374_v15 }
0x3cfd   : > { %v9048_v35 = vsel %vm1220_vm6, %v9044_v53, 0.0  ;;  %v9043_v59 = vmul.f32 %v9932_v58, %v9031_v4 }
0x3cfe   : > { %9049 = vadd.xlane.f32.xlu0 %v9048_v35 }
0x3cff   : > { %v9045_v62 = vadd.f32 %v9043_v59, %v15371_v21 }
0x3d01   : > { %v9051_v39 = vsel %vm1224_vm7, %v9045_v62, 0.0 }
0x3d02   : > { %9052 = vadd.xlane.f32.xlu1 %v9051_v39 }
0x3d8b   : > { %v9050_v14 = vpop.xlane.xlu0 %9049 }
0x3d8c   : > { %v9054_v63 = vmul.f32 0.015625, %v9050_v14 }
0x3d8e   : > { %v9056_v60 = vsub.f32 %v9044_v53, %v9054_v63 }
0x3d8f   : > { %v9053_v3 = vpop.xlane.xlu1 %9052 }
0x3d90   : > { %v9055_v47 = vmul.f32 0.015625, %v9053_v3  ;;  %v9058_v48 = vmul.f32 %v9056_v60, %v9056_v60 }
0x3d92   : > { %v9057_v6 = vsub.f32 %v9045_v62, %v9055_v47  ;;  %v9060_v54 = vsel %vm1220_vm6, %v9058_v48, 0.0 }
0x3d93   : > { %9061 = vadd.xlane.f32.xlu0 %v9060_v54 }
0x3d94   : > { %v9059_v15 = vmul.f32 %v9057_v6, %v9057_v6 }
0x3d96   : > { %v9063_v10 = vsel %vm1224_vm7, %v9059_v15, 0.0 }
0x3d97   : > { %9064 = vadd.xlane.f32.xlu1 %v9063_v10 }
0x3e20   : > { %v9062_v5 = vpop.xlane.xlu0 %9061 }
0x3e21   : > { %v9066_v44 = vmul.f32 0.015625, %v9062_v5 }
0x3e23   : > { %v9068_v21 = vadd.f32 1e-06, %v9066_v44 }
0x3e24   : > { %v9065_v8 = vpop.xlane.xlu1 %9064 }
0x3e25   : > { %12821 = vrsqrt.f32 %v9068_v21  ;;  %v9067_v12 = vmul.f32 0.015625, %v9065_v8 }
0x3e27   : > { %v9069_v49 = vadd.f32 1e-06, %v9067_v12 }
0x3e29   : > { %12823 = vrsqrt.f32 %v9069_v49 }
0x3e2f   : > { %v12822_v19 = vpop.eup %12821 }
0x3e30   : > { %v9072_v28 = vmul.f32 %v12822_v19, %v9056_v60 }
0x3e32   : > { %v9080_v7 = vmul.f32 %v9933_v11, %v9072_v28 }
0x3e33   : > { %v12824_v16 = vpop.eup %12823 }
0x3e34   : > { %v9073_v24 = vmul.f32 %v12824_v16, %v9057_v6  ;;  %v9088_v25 = vadd.f32 %v9934_v9, %v9080_v7 }
0x3e36   : > { %v9081_v22 = vmul.f32 %v9933_v11, %v9073_v24 }
0x3e38   : > { %v9089_v45 = vadd.f32 %v9934_v9, %v9081_v22 }
0x3e3a   : > { %v12610_v26 = vpack.c.bf16 %v9089_v45, %v9088_v25 }
0x3e3c   : > { %12612 = vmatpush3.bf16.msk.msra.mxu1 %vm13519_vm11, %v12610_v26 }
0x3e3f   : > { %11615 = vmatmul.mubr.msk.f32.vlgmr.msra.gmra.mrb[72].mxu1 %vm1629_vm13, %v9090_v43 }
0x3f12   : > { %v9163_v52 = vpop.f32.mrb[72].mxu1 }
0x3f13   : > { %9168 = vst.msk [vmem:[%s811_s1] sm:$0xf] %vm9167_vm14, %v9163_v52  ;;  %v11616_v29 = vpop.f32.mrb[73].mxu1 }
0x3f14   : > { %12838 = shalt.err (!%p12835_p3)
}
0x3f15   : > { %s12839_s1 = scalar_lea.hbm %s15574_s6, 64  ;;  %s12843_s3 = scalar_lea.hbm %s15710_s2, 128 }
0x3f16   : > { %p12840_p4 = scmp.ne.s32.totalorder %s15574_s6, %s12839_s1  ;;  %p12844_p9 = scmp.lt.u32.totalorder %s15574_s6, %s15710_s2 }
0x3f17   : > { %p12845_p10 = scmp.lt.u32.totalorder %s12843_s3, %s12839_s1  ;;  %p12847_p12 = scmp.lt.u32.totalorder %s12839_s1, %s15574_s6 }
0x3f18   : > { %p12841_p7 = pnand %p12840_p4, %p13072_p5 }
0x3f19   : > { %p12846_p11 = por %p12845_p10, %p12844_p9 }
0x3f1a   : > { %p12842_p8 = pneg %p12841_p7 }
0x3f1b   : > { %p12848_p13 = por %p12847_p12, %p12846_p11 }
0x3f1d   : > { %p12849_p0 = pnand %p12848_p13, %p12842_p8 }
0x3f1f   : > { %12852 = shalt.err (!%p12849_p0)
}
0x3f20   : > { %12632 = dma.vmem_to_hbm [thread:$0]  (%p13072_p5), %s15576_s30, 64, %s15574_s6, %s9170_s0  }
0x3f21 PF: > { %s15711_s8 = sld [smem:[#allocation7_spill]]  ;;  %s15712_s27 = sld [smem:[#allocation5_spill]] }
0x3f27   : > { %p12638_p1 = scmp.ge.s32.totalorder %s15711_s8, 2  ;;  %s9195_s5 = sand.u32 1, %s15712_s27  }
0x3f28   : > { %s9196_s7 = scalar_lea.sflag [#allocation3], %s9195_s5 }
0x3f29   : > { %p12635_p2 = pnand %p12638_p1, %p13076_p6 }
0x3f2b   : > { %12870 = dma.done.wait (!%p12635_p2), %s9196_s7, 64  }
0x3f2c   : > { %12872 = vsyncadd (!%p12635_p2), %s9196_s7, 4294967232  ;;  %s15714_s30 = sld [smem:[#allocation8_spill]]  ;;  %s15715_s1 = sld [smem:[#allocation6_spill]] }
0x3f2d   : > { %s15716_s8 = sld [smem:[#allocation9_spill]]  ;;  %s15717_s7 = smov %s12879_s4 }
0x3f32   : > { %p37_p3 = scmp.ge.s32.totalorder %s15714_s30, 4   ;;  %s15718_s4 = smov %s15715_s1 }
0x3f34   :  { %39 = sbr.rel (!%p37_p3) target bundleno = 18 (0x12), region = 262 }
0x3f3b   :  { %9201 = vsyncpa [#allocation3], 1 }
0x3f3c   :  { %9203 = vsyncpa [#allocation3 + $0x1], 1 }

</bundles_post_ra>
